<compile_context>
chip_gen: v6e
topology: v6e:2x2x1
jax: 0.10.0
libtpu: 0.0.40
codegen_flags: <defaults>
</compile_context>

<pallas_src>
import functools

import jax
import jax.numpy as jnp
from jax.experimental import pallas as pl
from jax.experimental.pallas import tpu as pltpu

EPS = 1e-6
HID_CHUNK = 512                  # MLP hidden-dim chunk inside the block kernel


# ----------------------------- hardware awareness ---------------------------

def _round_up(v, m):
    return ((v + m - 1) // m) * m


@functools.lru_cache(maxsize=None)
def _hw_config():
    """(vmem_limit_bytes, max token tile rows, tensorcores per chip)."""
    try:
        vmem = int(pltpu.get_tpu_info().vmem_capacity_bytes)
    except Exception:
        # Unknown backend: conservative defaults that are valid on every gen.
        return 56 * 1024 * 1024, 512, 1
    if vmem >= 100 * 1024 * 1024:          # v5e / v6e: 128 MiB VMEM, single TC
        return 100 * 1024 * 1024, 1024, 1
    return 56 * 1024 * 1024, 512, 2        # v7x: 64 MiB per-TC VMEM, 2 TCs


def _compiler_params(dim_semantics):
    vmem_limit, _, _ = _hw_config()
    return pltpu.CompilerParams(dimension_semantics=dim_semantics,
                                vmem_limit_bytes=vmem_limit)


def _choose_tile(m, max_tm, n_cores):
    """Token-tile rows: <= max_tm, multiple of 8.  Only force >= n_cores grid
    steps on multi-TensorCore chips (v7x); on single-TC chips take the single
    largest tile that fits."""
    m8 = _round_up(m, 8)
    if n_cores > 1 and m8 > 8 * n_cores:
        tm = min(max_tm, _round_up(-(-m // n_cores), 8))
    else:
        tm = min(max_tm, m8)
    return tm, _round_up(m, tm)


# ----------------------------- Pallas kernels ------------------------------

def _ln_f32(v, w, eps):
    # LayerNorm over last dim, scale only, in f32 (LayerNormWithoutBias).
    mu = jnp.mean(v, axis=-1, keepdims=True)
    c = v - mu
    var = jnp.mean(c * c, axis=-1, keepdims=True)
    return c * jax.lax.rsqrt(var + eps) * w


def _conv_kernel(p_ref, w_ref, b_ref, g_ref, o_ref, *, eps, post_ln):
    """Downsample conv as one wide matmul: patches(bf16) @ kernel(bf16) + bias.

    Stem (stage 0): post-LN (scale only) fused as the matmul epilogue.
    Stages 1-3: pre-LN was already applied by the previous stage's block kernel
    epilogue, so this is a plain matmul + bias (zero-padded taps stay zero,
    exactly matching 'LN then zero-padded conv')."""
    y = jnp.dot(p_ref[...], w_ref[...], preferred_element_type=jnp.float32) + b_ref[...]
    if post_ln:
        y = _ln_f32(y, g_ref[...], eps)
    o_ref[...] = y.astype(o_ref.dtype)


def _stage_blocks_kernel(x_ref, ln1_ref, ln2_ref, fc1_ref, fc2_ref,
                         rs1_ref, rs2_ref, sb_ref, outln_ref, o_ref, acc_ref,
                         *, eps, hid, hid_chunk, out_ln):
    """One MetaFormerBlock per grid step along axis 1 (depth); the (TM, C) token
    tile is carried across depth in a resident f32 VMEM scratch.

    token mixer = Identity, layer_scale = Identity, res_scale = per-channel vec.
    MXU matmuls take bf16 operands; LN / residual / StarReLU stay f32; the MLP
    hidden dim is processed in chunks of `hid_chunk` to bound live intermediates.
    If `out_ln`, the NEXT stage's downsample pre-LN (scale only) is applied as
    the epilogue on the final depth step."""
    d = pl.program_id(1)

    @pl.when(d == 0)
    def _():
        acc_ref[...] = x_ref[...].astype(jnp.float32)

    x = acc_ref[...]
    ln1 = ln1_ref[0]                       # (1, C) f32, loaded once per block
    ln2 = ln2_ref[0]
    rs1 = rs1_ref[0]
    rs2 = rs2_ref[0]
    s = sb_ref[d, 0]                       # StarReLU scale (SMEM scalar)
    b = sb_ref[d, 1]                       # StarReLU bias

    x = x * rs1 + _ln_f32(x, ln1, eps)     # token mixer = Identity

    z = _ln_f32(x, ln2, eps).astype(jnp.bfloat16)
    mlp = None
    for k0 in range(0, hid, hid_chunk):    # static unroll over hid chunks
        k1 = min(hid, k0 + hid_chunk)
        h = jnp.dot(z, fc1_ref[0, :, k0:k1], preferred_element_type=jnp.float32)
        h = s * jnp.square(jnp.maximum(h, 0.0)) + b          # StarReLU
        part = jnp.dot(h.astype(jnp.bfloat16), fc2_ref[0, k0:k1, :],
                       preferred_element_type=jnp.float32)
        mlp = part if mlp is None else mlp + part
    x = x * rs2 + mlp
    acc_ref[...] = x

    @pl.when(d == pl.num_programs(1) - 1)
    def _():
        y = _ln_f32(x, outln_ref[...], eps) if out_ln else x
        o_ref[...] = y.astype(o_ref.dtype)


def _head_kernel(x_ref, gw_ref, gb_ref, hw_ref, hb_ref, o_ref, *, eps):
    # x: (TB, HW, C) -> mean over HW -> LayerNorm(weight+bias) -> Linear(C, classes)
    x = x_ref[...].astype(jnp.float32)
    pooled = jnp.mean(x, axis=1)                      # == x.mean([1, 2]) in NHWC
    mu = jnp.mean(pooled, axis=-1, keepdims=True)
    c = pooled - mu
    var = jnp.mean(c * c, axis=-1, keepdims=True)
    y = c * jax.lax.rsqrt(var + eps) * gw_ref[...] + gb_ref[...]
    o_ref[...] = (jnp.dot(y, hw_ref[...], preferred_element_type=jnp.float32)
                  + hb_ref[...]).astype(o_ref.dtype)


# ------------------------------ wrappers ------------------------------------

def conv_downsample(patches, kernel, bias, post_w, tm, eps=EPS):
    mp, kf = patches.shape
    cout = kernel.shape[1]
    post_ln = post_w is not None
    if post_w is None:
        post_w = jnp.ones((1, cout), jnp.float32)    # dummy, unused when post_ln=False
    return pl.pallas_call(
        functools.partial(_conv_kernel, eps=eps, post_ln=post_ln),
        grid=(mp // tm,),
        in_specs=[
            pl.BlockSpec((tm, kf), lambda i: (i, 0)),        # patches (bf16)
            pl.BlockSpec((kf, cout), lambda i: (0, 0)),      # conv kernel (bf16)
            pl.BlockSpec((1, cout), lambda i: (0, 0)),       # conv bias (f32)
            pl.BlockSpec((1, cout), lambda i: (0, 0)),       # post-LN weight (f32)
        ],
        out_specs=pl.BlockSpec((tm, cout), lambda i: (i, 0)),
        out_shape=jax.ShapeDtypeStruct((mp, cout), jnp.bfloat16),
        compiler_params=_compiler_params(("parallel",)),
    )(patches, kernel, bias, post_w)


def stage_blocks(tokens, bp, tm, out_ln_w=None, eps=EPS):
    mp, c = tokens.shape
    depth = bp["ln1"].shape[0]
    hid = bp["fc1"].shape[2]
    hid_chunk = min(hid, HID_CHUNK)
    out_ln = out_ln_w is not None
    if out_ln_w is None:
        out_ln_w = jnp.ones((1, c), jnp.float32)     # dummy, unused when out_ln=False
    return pl.pallas_call(
        functools.partial(_stage_blocks_kernel, eps=eps, hid=hid,
                          hid_chunk=hid_chunk, out_ln=out_ln),
        grid=(mp // tm, depth),
        in_specs=[
            pl.BlockSpec((tm, c), lambda i, d: (i, 0)),           # token tile (bf16)
            pl.BlockSpec((1, 1, c), lambda i, d: (d, 0, 0)),      # ln1 weight
            pl.BlockSpec((1, 1, c), lambda i, d: (d, 0, 0)),      # ln2 weight
            pl.BlockSpec((1, c, hid), lambda i, d: (d, 0, 0)),    # fc1 (bf16)
            pl.BlockSpec((1, hid, c), lambda i, d: (d, 0, 0)),    # fc2 (bf16)
            pl.BlockSpec((1, 1, c), lambda i, d: (d, 0, 0)),      # res_scale1
            pl.BlockSpec((1, 1, c), lambda i, d: (d, 0, 0)),      # res_scale2
            pl.BlockSpec((depth, 2), lambda i, d: (0, 0),
                         memory_space=pltpu.MemorySpace.SMEM),    # StarReLU (s, b)
            pl.BlockSpec((1, c), lambda i, d: (0, 0)),            # fused next pre-LN w
        ],
        out_specs=pl.BlockSpec((tm, c), lambda i, d: (i, 0)),
        out_shape=jax.ShapeDtypeStruct((mp, c), jnp.bfloat16),
        scratch_shapes=[pltpu.VMEM((tm, c), jnp.float32)],        # resident token carry
        compiler_params=_compiler_params(("parallel", "arbitrary")),
    )(tokens, bp["ln1"], bp["ln2"], bp["fc1"], bp["fc2"],
      bp["rs1"], bp["rs2"], bp["star"], out_ln_w)


def head_forward(x_bhwc, gw, gb, hw, hb, eps=EPS):
    b, h, w, c = x_bhwc.shape
    n = hw.shape[1]
    x = x_bhwc.reshape(b, h * w, c)
    tb = min(_round_up(b, 8), 256)                 # block over batch (robust for big B)
    bp_ = _round_up(b, tb)
    if bp_ != b:
        x = jnp.pad(x, ((0, bp_ - b), (0, 0), (0, 0)))
    out = pl.pallas_call(
        functools.partial(_head_kernel, eps=eps),
        grid=(bp_ // tb,),
        in_specs=[
            pl.BlockSpec((tb, h * w, c), lambda i: (i, 0, 0)),
            pl.BlockSpec((1, c), lambda i: (0, 0)),
            pl.BlockSpec((1, c), lambda i: (0, 0)),
            pl.BlockSpec((c, n), lambda i: (0, 0)),
            pl.BlockSpec((1, n), lambda i: (0, 0)),
        ],
        out_specs=pl.BlockSpec((tb, n), lambda i: (i, 0)),
        out_shape=jax.ShapeDtypeStruct((bp_, n), jnp.float32),
        compiler_params=_compiler_params(("parallel",)),
    )(x, gw.reshape(1, c), gb.reshape(1, c), hw, hb.reshape(1, n))
    return out[:b]


# ------------------------------ glue (patch extraction) ----------------------

def _im2col(x, ksize, stride, pad):
    """NHWC -> flat (tokens, K*K*C) bf16 patches, tap-major / channel-minor.
    Plain-JAX glue; the conv itself runs in the Pallas kernel.
    TODO(synk): replace with in-kernel haloed DMA windows to avoid the K^2/stride^2
    HBM duplication on this bandwidth-bound step."""
    b, h, w, c = x.shape
    ho = (h + 2 * pad - ksize) // stride + 1
    wo = (w + 2 * pad - ksize) // stride + 1
    xp = jnp.pad(x, ((0, 0), (pad, pad), (pad, pad), (0, 0)))
    cols = []
    for dh in range(ksize):
        for dw in range(ksize):
            cols.append(xp[:, dh:dh + (ho - 1) * stride + 1:stride,
                              dw:dw + (wo - 1) * stride + 1:stride, :])
    patches = jnp.stack(cols, axis=3).reshape(b * ho * wo, ksize * ksize * c)
    return patches, ho, wo


# ------------------------------ parameters -----------------------------------

def init_params(key, in_chans, num_classes, depths, dims, mlp_ratio=4):
    res_scale_init = [None, None, 1.0, 1.0]
    keys = iter(jax.random.split(key, 4096))

    def tn(shape):  # trunc_normal_(std=0.02), deterministic
        return jax.random.truncated_normal(next(keys), -2.0, 2.0, shape,
                                           jnp.float32) * 0.02

    down_dims = [in_chans] + list(dims)
    stages = []
    for i in range(len(depths)):
        cin, cout = down_dims[i], down_dims[i + 1]
        ks = 7 if i == 0 else 3
        conv_w = tn((cout, cin, ks, ks))                   # torch (Cout, Cin, Kh, Kw)
        w_hwio = jnp.transpose(conv_w, (2, 3, 1, 0))       # (Kh, Kw, Cin, Cout)
        down = dict(
            kernel=w_hwio.reshape(ks * ks * cin, cout).astype(jnp.bfloat16),
            bias=jnp.zeros((1, cout), jnp.float32),
            pre_w=None if i == 0 else jnp.ones((1, cin), jnp.float32),
            post_w=jnp.ones((1, cout), jnp.float32) if i == 0 else None,
        )

        d = dims[i]
        hid = mlp_ratio * d
        depth = depths[i]
        rsv = res_scale_init[i] if i < len(res_scale_init) else 1.0
        rs_val = 1.0 if rsv is None else rsv               # None -> Identity == 1.0
        fc1 = jnp.stack([tn((hid, d)).T for _ in range(depth)]).astype(jnp.bfloat16)
        fc2 = jnp.stack([tn((d, hid)).T for _ in range(depth)]).astype(jnp.bfloat16)
        blocks = dict(
            ln1=jnp.ones((depth, 1, d), jnp.float32),
            ln2=jnp.ones((depth, 1, d), jnp.float32),
            fc1=fc1,                                       # (depth, d, hid) bf16
            fc2=fc2,                                       # (depth, hid, d) bf16
            rs1=jnp.full((depth, 1, d), rs_val, jnp.float32),
            rs2=jnp.full((depth, 1, d), rs_val, jnp.float32),
            star=jnp.tile(jnp.array([[1.0, 0.0]], jnp.float32), (depth, 1)),
        )
        stages.append(dict(down=down, blocks=blocks))

    head_w = tn((num_classes, dims[-1]))
    return dict(
        stages=stages,
        norm_w=jnp.ones((dims[-1],), jnp.float32),
        norm_b=jnp.zeros((dims[-1],), jnp.float32),
        head_w=head_w.T,                                   # (dims[-1], num_classes)
        head_b=jnp.zeros((num_classes,), jnp.float32),
    )


# ------------------------------ full forward ----------------------------------

def metaformer_forward(params, x_nchw):
    # NCHW (PyTorch) input -> NHWC internally; activations carried in bf16,
    # all reductions / MXU accumulations inside the kernels stay f32.
    # NOTE: channel widths < 128 (early stages of small configs) cause masked
    # lane stores; production dims >= 128 are lane-dense automatically.
    _, max_tm, n_cores = _hw_config()
    x = jnp.transpose(x_nchw, (0, 2, 3, 1)).astype(jnp.bfloat16)
    n_stage = len(params["stages"])
    for i, stage in enumerate(params["stages"]):
        ds = stage["down"]
        ks, st, pd = (7, 4, 2) if i == 0 else (3, 2, 1)
        b = x.shape[0]
        patches, ho, wo = _im2col(x, ks, st, pd)
        m = b * ho * wo
        tm, mp = _choose_tile(m, max_tm, n_cores)   # pad once, slice once per stage
        if mp != m:
            patches = jnp.pad(patches, ((0, mp - m), (0, 0)))
        tokens = conv_downsample(patches, ds["kernel"], ds["bias"], ds["post_w"], tm)
        # Fuse the NEXT stage's downsample pre-LN (scale only) into this stage's
        # block-kernel epilogue: LN of real tokens first, conv zero-padding after,
        # exactly matching the reference 'pre-norm then zero-padded conv'.
        next_pre_w = (params["stages"][i + 1]["down"]["pre_w"]
                      if i + 1 < n_stage else None)
        tokens = stage_blocks(tokens, stage["blocks"], tm, out_ln_w=next_pre_w)
        cout = tokens.shape[1]
        x = tokens[:m].reshape(b, ho, wo, cout)
    return head_forward(x, params["norm_w"], params["norm_b"],
                        params["head_w"], params["head_b"])


# ----------------------------------- main -------------------------------------

if __name__ == "__main__":
    key = jax.random.PRNGKey(0)
    kp, kx = jax.random.split(key)

    # Small-but-consistent configuration (4 stages, stride 4 then 2,2,2).
    depths = [1, 1, 2, 1]
    dims = [32, 64, 128, 256]
    num_classes = 10
    in_chans = 3

    params = init_params(kp, in_chans=in_chans, num_classes=num_classes,
                         depths=depths, dims=dims)

    x = jax.random.normal(kx, (2, in_chans, 32, 32), jnp.float32)  # NCHW

    fwd = jax.jit(metaformer_forward)
    out = jax.block_until_ready(fwd(params, x))
    assert out.shape == (2, num_classes), out.shape
    assert bool(jnp.all(jnp.isfinite(out)))
    print("KERNEL_OK")
</pallas_src>

<mosaic_0001>
module attributes {stable_mosaic.version = 11 : i64} {
  func.func @_conv_kernel(%arg0: i32, %arg1: memref<128x147xbf16, #tpu.memory_space<vmem>>, %arg2: memref<147x32xbf16, #tpu.memory_space<vmem>>, %arg3: memref<1x32xf32, #tpu.memory_space<vmem>>, %arg4: memref<1x32xf32, #tpu.memory_space<vmem>>, %arg5: memref<128x32xbf16, #tpu.memory_space<vmem>>) attributes {dimension_semantics = [#tpu.dimension_semantics<parallel>], iteration_bounds = array<i64: 1>, scalar_prefetch = 0 : i64, scratch_operands = 0 : i64, tpu.core_type = #tpu.core_type<tc>, window_params = [{transform_indices = @transform_0, window_bounds = array<i64: 128, 147>}, {pipeline_mode = #tpu.pipeline_mode<synchronous>, transform_indices = @transform_1, window_bounds = array<i64: 147, 32>}, {pipeline_mode = #tpu.pipeline_mode<synchronous>, transform_indices = @transform_2, window_bounds = array<i64: 1, 32>}, {pipeline_mode = #tpu.pipeline_mode<synchronous>, transform_indices = @transform_3, window_bounds = array<i64: 1, 32>}, {transform_indices = @transform_4, window_bounds = array<i64: 128, 32>}]} {
    %c0 = arith.constant 0 : index
    %c0_0 = arith.constant 0 : index
    %0 = vector.load %arg1[%c0, %c0_0] : memref<128x147xbf16, #tpu.memory_space<vmem>>, vector<128x147xbf16>
    %c0_1 = arith.constant 0 : index
    %c0_2 = arith.constant 0 : index
    %1 = vector.load %arg2[%c0_1, %c0_2] : memref<147x32xbf16, #tpu.memory_space<vmem>>, vector<147x32xbf16>
    %cst = arith.constant dense<0.000000e+00> : vector<128x32xf32>
    %2 = tpu.matmul %0, %1, %cst {dimension_numbers = #tpu.dot_dimension_numbers<[1], [0], [0], [1], [0, 0, 1, 1], [], []>} : vector<128x147xbf16>, vector<147x32xbf16>, vector<128x32xf32> -> vector<128x32xf32>
    %c0_3 = arith.constant 0 : index
    %c0_4 = arith.constant 0 : index
    %3 = vector.load %arg3[%c0_3, %c0_4] : memref<1x32xf32, #tpu.memory_space<vmem>>, vector<1x32xf32>
    %4 = vector.broadcast %3 : vector<1x32xf32> to vector<128x32xf32>
    %5 = arith.addf %2, %4 : vector<128x32xf32>
    %c0_5 = arith.constant 0 : index
    %c0_6 = arith.constant 0 : index
    %6 = vector.load %arg4[%c0_5, %c0_6] : memref<1x32xf32, #tpu.memory_space<vmem>>, vector<1x32xf32>
    %cst_7 = arith.constant dense<0.000000e+00> : vector<128xf32>
    %7 = vector.multi_reduction <add>, %5, %cst_7 [1] : vector<128x32xf32> to vector<128xf32>
    %8 = vector.shape_cast %7 : vector<128xf32> to vector<128x1xf32>
    %cst_8 = arith.constant 3.200000e+01 : f32
    %9 = vector.broadcast %cst_8 : f32 to vector<128x1xf32>
    %10 = arith.divf %8, %9 : vector<128x1xf32>
    %11 = vector.broadcast %10 : vector<128x1xf32> to vector<128x32xf32>
    %12 = arith.subf %5, %11 : vector<128x32xf32>
    %13 = arith.mulf %12, %12 : vector<128x32xf32>
    %cst_9 = arith.constant dense<0.000000e+00> : vector<128xf32>
    %14 = vector.multi_reduction <add>, %13, %cst_9 [1] : vector<128x32xf32> to vector<128xf32>
    %15 = vector.shape_cast %14 : vector<128xf32> to vector<128x1xf32>
    %cst_10 = arith.constant 3.200000e+01 : f32
    %16 = vector.broadcast %cst_10 : f32 to vector<128x1xf32>
    %17 = arith.divf %15, %16 : vector<128x1xf32>
    %cst_11 = arith.constant 9.99999997E-7 : f32
    %18 = vector.broadcast %cst_11 : f32 to vector<128x1xf32>
    %19 = arith.addf %17, %18 : vector<128x1xf32>
    %20 = math.rsqrt %19 : vector<128x1xf32>
    %21 = vector.broadcast %20 : vector<128x1xf32> to vector<128x32xf32>
    %22 = arith.mulf %12, %21 : vector<128x32xf32>
    %23 = vector.broadcast %6 : vector<1x32xf32> to vector<128x32xf32>
    %24 = arith.mulf %22, %23 : vector<128x32xf32>
    %25 = arith.truncf %24 : vector<128x32xf32> to vector<128x32xbf16>
    %c0_12 = arith.constant 0 : index
    %c0_13 = arith.constant 0 : index
    %26 = vector.load %arg5[%c0_12, %c0_13] : memref<128x32xbf16, #tpu.memory_space<vmem>>, vector<128x32xbf16>
    tpu.vector_store %arg5[%c0_12, %c0_13], %25 {strides = array<i32>} : memref<128x32xbf16, #tpu.memory_space<vmem>>, vector<128x32xbf16>,
    return
  }
  func.func @transform_0(%arg0: i32) -> (i32, i32) {
    %c0_i32 = arith.constant 0 : i32
    %c0_i32_0 = arith.constant 0 : i32
    return %arg0, %c0_i32 : i32, i32
  }
  func.func @transform_1(%arg0: i32) -> (i32, i32) {
    %c0_i32 = arith.constant 0 : i32
    %c0_i32_0 = arith.constant 0 : i32
    %c0_i32_1 = arith.constant 0 : i32
    return %c0_i32, %c0_i32_0 : i32, i32
  }
  func.func @transform_2(%arg0: i32) -> (i32, i32) {
    %c0_i32 = arith.constant 0 : i32
    %c0_i32_0 = arith.constant 0 : i32
    %c0_i32_1 = arith.constant 0 : i32
    return %c0_i32, %c0_i32_0 : i32, i32
  }
  func.func @transform_3(%arg0: i32) -> (i32, i32) {
    %c0_i32 = arith.constant 0 : i32
    %c0_i32_0 = arith.constant 0 : i32
    %c0_i32_1 = arith.constant 0 : i32
    return %c0_i32, %c0_i32_0 : i32, i32
  }
  func.func @transform_4(%arg0: i32) -> (i32, i32) {
    %c0_i32 = arith.constant 0 : i32
    %c0_i32_0 = arith.constant 0 : i32
    return %arg0, %c0_i32 : i32, i32
  }
}

module attributes {stable_mosaic.version = 11 : i64} {
  func.func @_stage_blocks_kernel(%arg0: i32, %arg1: i32, %arg2: memref<128x32xbf16, #tpu.memory_space<vmem>>, %arg3: memref<1x1x32xf32, #tpu.memory_space<vmem>>, %arg4: memref<1x1x32xf32, #tpu.memory_space<vmem>>, %arg5: memref<1x32x128xbf16, #tpu.memory_space<vmem>>, %arg6: memref<1x128x32xbf16, #tpu.memory_space<vmem>>, %arg7: memref<1x1x32xf32, #tpu.memory_space<vmem>>, %arg8: memref<1x1x32xf32, #tpu.memory_space<vmem>>, %arg9: memref<1x2xf32, #tpu.memory_space<smem>>, %arg10: memref<1x32xf32, #tpu.memory_space<vmem>>, %arg11: memref<128x32xbf16, #tpu.memory_space<vmem>>, %arg12: memref<128x32xf32, #tpu.memory_space<vmem>>) attributes {dimension_semantics = [#tpu.dimension_semantics<parallel>, #tpu.dimension_semantics<arbitrary>], iteration_bounds = array<i64: 1, 1>, scalar_prefetch = 0 : i64, scratch_operands = 1 : i64, tpu.core_type = #tpu.core_type<tc>, window_params = [{transform_indices = @transform_0, window_bounds = array<i64: 128, 32>}, {transform_indices = @transform_1, window_bounds = array<i64: 1, 1, 32>}, {transform_indices = @transform_2, window_bounds = array<i64: 1, 1, 32>}, {transform_indices = @transform_3, window_bounds = array<i64: 1, 32, 128>}, {transform_indices = @transform_4, window_bounds = array<i64: 1, 128, 32>}, {transform_indices = @transform_5, window_bounds = array<i64: 1, 1, 32>}, {transform_indices = @transform_6, window_bounds = array<i64: 1, 1, 32>}, {transform_indices = @transform_7, window_bounds = array<i64: 1, 2>}, {pipeline_mode = #tpu.pipeline_mode<synchronous>, transform_indices = @transform_8, window_bounds = array<i64: 1, 32>}, {transform_indices = @transform_9, window_bounds = array<i64: 128, 32>}]} {
    %c0_i32 = arith.constant 0 : i32
    %0 = arith.cmpi eq, %arg1, %c0_i32 : i32
    %1 = arith.extui %0 : i1 to i32
    %c0_i32_0 = arith.constant 0 : i32
    %2 = arith.cmpi ne, %1, %c0_i32_0 : i32
    scf.if %2 {
      %c0_37 = arith.constant 0 : index
      %c0_38 = arith.constant 0 : index
      %77 = vector.load %arg2[%c0_37, %c0_38] : memref<128x32xbf16, #tpu.memory_space<vmem>>, vector<128x32xbf16>
      %78 = arith.extf %77 : vector<128x32xbf16> to vector<128x32xf32>
      %c0_39 = arith.constant 0 : index
      %c0_40 = arith.constant 0 : index
      %79 = vector.load %arg12[%c0_39, %c0_40] : memref<128x32xf32, #tpu.memory_space<vmem>>, vector<128x32xf32>
      tpu.vector_store %arg12[%c0_39, %c0_40], %78 {strides = array<i32>} : memref<128x32xf32, #tpu.memory_space<vmem>>, vector<128x32xf32>,
    } else {
    }
    %c0 = arith.constant 0 : index
    %c0_1 = arith.constant 0 : index
    %3 = vector.load %arg12[%c0, %c0_1] : memref<128x32xf32, #tpu.memory_space<vmem>>, vector<128x32xf32>
    %c0_2 = arith.constant 0 : index
    %c0_3 = arith.constant 0 : index
    %c0_4 = arith.constant 0 : index
    %4 = vector.load %arg3[%c0_2, %c0_3, %c0_4] : memref<1x1x32xf32, #tpu.memory_space<vmem>>, vector<1x1x32xf32>
    %5 = vector.shape_cast %4 : vector<1x1x32xf32> to vector<1x32xf32>
    %c0_5 = arith.constant 0 : index
    %c0_6 = arith.constant 0 : index
    %c0_7 = arith.constant 0 : index
    %6 = vector.load %arg4[%c0_5, %c0_6, %c0_7] : memref<1x1x32xf32, #tpu.memory_space<vmem>>, vector<1x1x32xf32>
    %7 = vector.shape_cast %6 : vector<1x1x32xf32> to vector<1x32xf32>
    %c0_8 = arith.constant 0 : index
    %c0_9 = arith.constant 0 : index
    %c0_10 = arith.constant 0 : index
    %8 = vector.load %arg7[%c0_8, %c0_9, %c0_10] : memref<1x1x32xf32, #tpu.memory_space<vmem>>, vector<1x1x32xf32>
    %9 = vector.shape_cast %8 : vector<1x1x32xf32> to vector<1x32xf32>
    %c0_11 = arith.constant 0 : index
    %c0_12 = arith.constant 0 : index
    %c0_13 = arith.constant 0 : index
    %10 = vector.load %arg8[%c0_11, %c0_12, %c0_13] : memref<1x1x32xf32, #tpu.memory_space<vmem>>, vector<1x1x32xf32>
    %11 = vector.shape_cast %10 : vector<1x1x32xf32> to vector<1x32xf32>
    %12 = arith.index_cast %arg1 : i32 to index
    %c0_14 = arith.constant 0 : index
    %13 = memref.load %arg9[%12, %c0_14] : memref<1x2xf32, #tpu.memory_space<smem>>
    %14 = arith.index_cast %arg1 : i32 to index
    %c1 = arith.constant 1 : index
    %15 = memref.load %arg9[%14, %c1] : memref<1x2xf32, #tpu.memory_space<smem>>
    %16 = vector.broadcast %9 : vector<1x32xf32> to vector<128x32xf32>
    %17 = arith.mulf %3, %16 : vector<128x32xf32>
    %cst = arith.constant dense<0.000000e+00> : vector<128xf32>
    %18 = vector.multi_reduction <add>, %3, %cst [1] : vector<128x32xf32> to vector<128xf32>
    %19 = vector.shape_cast %18 : vector<128xf32> to vector<128x1xf32>
    %cst_15 = arith.constant 3.200000e+01 : f32
    %20 = vector.broadcast %cst_15 : f32 to vector<128x1xf32>
    %21 = arith.divf %19, %20 : vector<128x1xf32>
    %22 = vector.broadcast %21 : vector<128x1xf32> to vector<128x32xf32>
    %23 = arith.subf %3, %22 : vector<128x32xf32>
    %24 = arith.mulf %23, %23 : vector<128x32xf32>
    %cst_16 = arith.constant dense<0.000000e+00> : vector<128xf32>
    %25 = vector.multi_reduction <add>, %24, %cst_16 [1] : vector<128x32xf32> to vector<128xf32>
    %26 = vector.shape_cast %25 : vector<128xf32> to vector<128x1xf32>
    %cst_17 = arith.constant 3.200000e+01 : f32
    %27 = vector.broadcast %cst_17 : f32 to vector<128x1xf32>
    %28 = arith.divf %26, %27 : vector<128x1xf32>
    %cst_18 = arith.constant 9.99999997E-7 : f32
    %29 = vector.broadcast %cst_18 : f32 to vector<128x1xf32>
    %30 = arith.addf %28, %29 : vector<128x1xf32>
    %31 = math.rsqrt %30 : vector<128x1xf32>
    %32 = vector.broadcast %31 : vector<128x1xf32> to vector<128x32xf32>
    %33 = arith.mulf %23, %32 : vector<128x32xf32>
    %34 = vector.broadcast %5 : vector<1x32xf32> to vector<128x32xf32>
    %35 = arith.mulf %33, %34 : vector<128x32xf32>
    %36 = arith.addf %17, %35 : vector<128x32xf32>
    %cst_19 = arith.constant dense<0.000000e+00> : vector<128xf32>
    %37 = vector.multi_reduction <add>, %36, %cst_19 [1] : vector<128x32xf32> to vector<128xf32>
    %38 = vector.shape_cast %37 : vector<128xf32> to vector<128x1xf32>
    %cst_20 = arith.constant 3.200000e+01 : f32
    %39 = vector.broadcast %cst_20 : f32 to vector<128x1xf32>
    %40 = arith.divf %38, %39 : vector<128x1xf32>
    %41 = vector.broadcast %40 : vector<128x1xf32> to vector<128x32xf32>
    %42 = arith.subf %36, %41 : vector<128x32xf32>
    %43 = arith.mulf %42, %42 : vector<128x32xf32>
    %cst_21 = arith.constant dense<0.000000e+00> : vector<128xf32>
    %44 = vector.multi_reduction <add>, %43, %cst_21 [1] : vector<128x32xf32> to vector<128xf32>
    %45 = vector.shape_cast %44 : vector<128xf32> to vector<128x1xf32>
    %cst_22 = arith.constant 3.200000e+01 : f32
    %46 = vector.broadcast %cst_22 : f32 to vector<128x1xf32>
    %47 = arith.divf %45, %46 : vector<128x1xf32>
    %cst_23 = arith.constant 9.99999997E-7 : f32
    %48 = vector.broadcast %cst_23 : f32 to vector<128x1xf32>
    %49 = arith.addf %47, %48 : vector<128x1xf32>
    %50 = math.rsqrt %49 : vector<128x1xf32>
    %51 = vector.broadcast %50 : vector<128x1xf32> to vector<128x32xf32>
    %52 = arith.mulf %42, %51 : vector<128x32xf32>
    %53 = vector.broadcast %7 : vector<1x32xf32> to vector<128x32xf32>
    %54 = arith.mulf %52, %53 : vector<128x32xf32>
    %55 = arith.truncf %54 : vector<128x32xf32> to vector<128x32xbf16>
    %c0_24 = arith.constant 0 : index
    %c0_25 = arith.constant 0 : index
    %c0_26 = arith.constant 0 : index
    %56 = vector.load %arg5[%c0_24, %c0_25, %c0_26] : memref<1x32x128xbf16, #tpu.memory_space<vmem>>, vector<1x32x128xbf16>
    %57 = vector.shape_cast %56 : vector<1x32x128xbf16> to vector<32x128xbf16>
    %cst_27 = arith.constant dense<0.000000e+00> : vector<128x128xf32>
    %58 = tpu.matmul %55, %57, %cst_27 {dimension_numbers = #tpu.dot_dimension_numbers<[1], [0], [0], [1], [0, 0, 1, 1], [], []>} : vector<128x32xbf16>, vector<32x128xbf16>, vector<128x128xf32> -> vector<128x128xf32>
    %cst_28 = arith.constant 0.000000e+00 : f32
    %59 = vector.broadcast %cst_28 : f32 to vector<128x128xf32>
    %60 = arith.maximumf %58, %59 : vector<128x128xf32>
    %61 = arith.mulf %60, %60 : vector<128x128xf32>
    %62 = vector.broadcast %13 : f32 to vector<128x128xf32>
    %63 = arith.mulf %62, %61 : vector<128x128xf32>
    %64 = vector.broadcast %15 : f32 to vector<128x128xf32>
    %65 = arith.addf %63, %64 : vector<128x128xf32>
    %66 = arith.truncf %65 : vector<128x128xf32> to vector<128x128xbf16>
    %c0_29 = arith.constant 0 : index
    %c0_30 = arith.constant 0 : index
    %c0_31 = arith.constant 0 : index
    %67 = vector.load %arg6[%c0_29, %c0_30, %c0_31] : memref<1x128x32xbf16, #tpu.memory_space<vmem>>, vector<1x128x32xbf16>
    %68 = vector.shape_cast %67 : vector<1x128x32xbf16> to vector<128x32xbf16>
    %cst_32 = arith.constant dense<0.000000e+00> : vector<128x32xf32>
    %69 = tpu.matmul %66, %68, %cst_32 {dimension_numbers = #tpu.dot_dimension_numbers<[1], [0], [0], [1], [0, 0, 1, 1], [], []>} : vector<128x128xbf16>, vector<128x32xbf16>, vector<128x32xf32> -> vector<128x32xf32>
    %70 = vector.broadcast %11 : vector<1x32xf32> to vector<128x32xf32>
    %71 = arith.mulf %36, %70 : vector<128x32xf32>
    %72 = arith.addf %71, %69 : vector<128x32xf32>
    %c0_33 = arith.constant 0 : index
    %c0_34 = arith.constant 0 : index
    %73 = vector.load %arg12[%c0_33, %c0_34] : memref<128x32xf32, #tpu.memory_space<vmem>>, vector<128x32xf32>
    tpu.vector_store %arg12[%c0_33, %c0_34], %72 {strides = array<i32>} : memref<128x32xf32, #tpu.memory_space<vmem>>, vector<128x32xf32>,
    %c0_i32_35 = arith.constant 0 : i32
    %74 = arith.cmpi eq, %arg1, %c0_i32_35 : i32
    %75 = arith.extui %74 : i1 to i32
    %c0_i32_36 = arith.constant 0 : i32
    %76 = arith.cmpi ne, %75, %c0_i32_36 : i32
    scf.if %76 {
      %c0_37 = arith.constant 0 : index
      %c0_38 = arith.constant 0 : index
      %77 = vector.load %arg10[%c0_37, %c0_38] : memref<1x32xf32, #tpu.memory_space<vmem>>, vector<1x32xf32>
      %cst_39 = arith.constant dense<0.000000e+00> : vector<128xf32>
      %78 = vector.multi_reduction <add>, %72, %cst_39 [1] : vector<128x32xf32> to vector<128xf32>
      %79 = vector.shape_cast %78 : vector<128xf32> to vector<128x1xf32>
      %cst_40 = arith.constant 3.200000e+01 : f32
      %80 = vector.broadcast %cst_40 : f32 to vector<128x1xf32>
      %81 = arith.divf %79, %80 : vector<128x1xf32>
      %82 = vector.broadcast %81 : vector<128x1xf32> to vector<128x32xf32>
      %83 = arith.subf %72, %82 : vector<128x32xf32>
      %84 = arith.mulf %83, %83 : vector<128x32xf32>
      %cst_41 = arith.constant dense<0.000000e+00> : vector<128xf32>
      %85 = vector.multi_reduction <add>, %84, %cst_41 [1] : vector<128x32xf32> to vector<128xf32>
      %86 = vector.shape_cast %85 : vector<128xf32> to vector<128x1xf32>
      %cst_42 = arith.constant 3.200000e+01 : f32
      %87 = vector.broadcast %cst_42 : f32 to vector<128x1xf32>
      %88 = arith.divf %86, %87 : vector<128x1xf32>
      %cst_43 = arith.constant 9.99999997E-7 : f32
      %89 = vector.broadcast %cst_43 : f32 to vector<128x1xf32>
      %90 = arith.addf %88, %89 : vector<128x1xf32>
      %91 = math.rsqrt %90 : vector<128x1xf32>
      %92 = vector.broadcast %91 : vector<128x1xf32> to vector<128x32xf32>
      %93 = arith.mulf %83, %92 : vector<128x32xf32>
      %94 = vector.broadcast %77 : vector<1x32xf32> to vector<128x32xf32>
      %95 = arith.mulf %93, %94 : vector<128x32xf32>
      %96 = arith.truncf %95 : vector<128x32xf32> to vector<128x32xbf16>
      %c0_44 = arith.constant 0 : index
      %c0_45 = arith.constant 0 : index
      %97 = vector.load %arg11[%c0_44, %c0_45] : memref<128x32xbf16, #tpu.memory_space<vmem>>, vector<128x32xbf16>
      tpu.vector_store %arg11[%c0_44, %c0_45], %96 {strides = array<i32>} : memref<128x32xbf16, #tpu.memory_space<vmem>>, vector<128x32xbf16>,
    } else {
    }
    return
  }
  func.func @transform_0(%arg0: i32, %arg1: i32) -> (i32, i32) {
    %c0_i32 = arith.constant 0 : i32
    %c0_i32_0 = arith.constant 0 : i32
    return %arg0, %c0_i32 : i32, i32
  }
  func.func @transform_1(%arg0: i32, %arg1: i32) -> (i32, i32, i32) {
    %c0_i32 = arith.constant 0 : i32
    %c0_i32_0 = arith.constant 0 : i32
    %c0_i32_1 = arith.constant 0 : i32
    return %arg1, %c0_i32, %c0_i32_0 : i32, i32, i32
  }
  func.func @transform_2(%arg0: i32, %arg1: i32) -> (i32, i32, i32) {
    %c0_i32 = arith.constant 0 : i32
    %c0_i32_0 = arith.constant 0 : i32
    %c0_i32_1 = arith.constant 0 : i32
    return %arg1, %c0_i32, %c0_i32_0 : i32, i32, i32
  }
  func.func @transform_3(%arg0: i32, %arg1: i32) -> (i32, i32, i32) {
    %c0_i32 = arith.constant 0 : i32
    %c0_i32_0 = arith.constant 0 : i32
    %c0_i32_1 = arith.constant 0 : i32
    return %arg1, %c0_i32, %c0_i32_0 : i32, i32, i32
  }
  func.func @transform_4(%arg0: i32, %arg1: i32) -> (i32, i32, i32) {
    %c0_i32 = arith.constant 0 : i32
    %c0_i32_0 = arith.constant 0 : i32
    %c0_i32_1 = arith.constant 0 : i32
    return %arg1, %c0_i32, %c0_i32_0 : i32, i32, i32
  }
  func.func @transform_5(%arg0: i32, %arg1: i32) -> (i32, i32, i32) {
    %c0_i32 = arith.constant 0 : i32
    %c0_i32_0 = arith.constant 0 : i32
    %c0_i32_1 = arith.constant 0 : i32
    return %arg1, %c0_i32, %c0_i32_0 : i32, i32, i32
  }
  func.func @transform_6(%arg0: i32, %arg1: i32) -> (i32, i32, i32) {
    %c0_i32 = arith.constant 0 : i32
    %c0_i32_0 = arith.constant 0 : i32
    %c0_i32_1 = arith.constant 0 : i32
    return %arg1, %c0_i32, %c0_i32_0 : i32, i32, i32
  }
  func.func @transform_7(%arg0: i32, %arg1: i32) -> (i32, i32) {
    %c0_i32 = arith.constant 0 : i32
    %c0_i32_0 = arith.constant 0 : i32
    %c0_i32_1 = arith.constant 0 : i32
    return %c0_i32, %c0_i32_0 : i32, i32
  }
  func.func @transform_8(%arg0: i32, %arg1: i32) -> (i32, i32) {
    %c0_i32 = arith.constant 0 : i32
    %c0_i32_0 = arith.constant 0 : i32
    %c0_i32_1 = arith.constant 0 : i32
    return %c0_i32, %c0_i32_0 : i32, i32
  }
  func.func @transform_9(%arg0: i32, %arg1: i32) -> (i32, i32) {
    %c0_i32 = arith.constant 0 : i32
    %c0_i32_0 = arith.constant 0 : i32
    return %arg0, %c0_i32 : i32, i32
  }
}

module attributes {stable_mosaic.version = 11 : i64} {
  func.func @_conv_kernel(%arg0: i32, %arg1: memref<32x288xbf16, #tpu.memory_space<vmem>>, %arg2: memref<288x64xbf16, #tpu.memory_space<vmem>>, %arg3: memref<1x64xf32, #tpu.memory_space<vmem>>, %arg4: memref<1x64xf32, #tpu.memory_space<vmem>>, %arg5: memref<32x64xbf16, #tpu.memory_space<vmem>>) attributes {dimension_semantics = [#tpu.dimension_semantics<parallel>], iteration_bounds = array<i64: 1>, scalar_prefetch = 0 : i64, scratch_operands = 0 : i64, tpu.core_type = #tpu.core_type<tc>, window_params = [{transform_indices = @transform_0, window_bounds = array<i64: 32, 288>}, {pipeline_mode = #tpu.pipeline_mode<synchronous>, transform_indices = @transform_1, window_bounds = array<i64: 288, 64>}, {pipeline_mode = #tpu.pipeline_mode<synchronous>, transform_indices = @transform_2, window_bounds = array<i64: 1, 64>}, {pipeline_mode = #tpu.pipeline_mode<synchronous>, transform_indices = @transform_3, window_bounds = array<i64: 1, 64>}, {transform_indices = @transform_4, window_bounds = array<i64: 32, 64>}]} {
    %c0 = arith.constant 0 : index
    %c0_0 = arith.constant 0 : index
    %0 = vector.load %arg1[%c0, %c0_0] : memref<32x288xbf16, #tpu.memory_space<vmem>>, vector<32x288xbf16>
    %c0_1 = arith.constant 0 : index
    %c0_2 = arith.constant 0 : index
    %1 = vector.load %arg2[%c0_1, %c0_2] : memref<288x64xbf16, #tpu.memory_space<vmem>>, vector<288x64xbf16>
    %cst = arith.constant dense<0.000000e+00> : vector<32x64xf32>
    %2 = tpu.matmul %0, %1, %cst {dimension_numbers = #tpu.dot_dimension_numbers<[1], [0], [0], [1], [0, 0, 1, 1], [], []>} : vector<32x288xbf16>, vector<288x64xbf16>, vector<32x64xf32> -> vector<32x64xf32>
    %c0_3 = arith.constant 0 : index
    %c0_4 = arith.constant 0 : index
    %3 = vector.load %arg3[%c0_3, %c0_4] : memref<1x64xf32, #tpu.memory_space<vmem>>, vector<1x64xf32>
    %4 = vector.broadcast %3 : vector<1x64xf32> to vector<32x64xf32>
    %5 = arith.addf %2, %4 : vector<32x64xf32>
    %6 = arith.truncf %5 : vector<32x64xf32> to vector<32x64xbf16>
    %c0_5 = arith.constant 0 : index
    %c0_6 = arith.constant 0 : index
    %7 = vector.load %arg5[%c0_5, %c0_6] : memref<32x64xbf16, #tpu.memory_space<vmem>>, vector<32x64xbf16>
    tpu.vector_store %arg5[%c0_5, %c0_6], %6 {strides = array<i32>} : memref<32x64xbf16, #tpu.memory_space<vmem>>, vector<32x64xbf16>,
    return
  }
  func.func @transform_0(%arg0: i32) -> (i32, i32) {
    %c0_i32 = arith.constant 0 : i32
    %c0_i32_0 = arith.constant 0 : i32
    return %arg0, %c0_i32 : i32, i32
  }
  func.func @transform_1(%arg0: i32) -> (i32, i32) {
    %c0_i32 = arith.constant 0 : i32
    %c0_i32_0 = arith.constant 0 : i32
    %c0_i32_1 = arith.constant 0 : i32
    return %c0_i32, %c0_i32_0 : i32, i32
  }
  func.func @transform_2(%arg0: i32) -> (i32, i32) {
    %c0_i32 = arith.constant 0 : i32
    %c0_i32_0 = arith.constant 0 : i32
    %c0_i32_1 = arith.constant 0 : i32
    return %c0_i32, %c0_i32_0 : i32, i32
  }
  func.func @transform_3(%arg0: i32) -> (i32, i32) {
    %c0_i32 = arith.constant 0 : i32
    %c0_i32_0 = arith.constant 0 : i32
    %c0_i32_1 = arith.constant 0 : i32
    return %c0_i32, %c0_i32_0 : i32, i32
  }
  func.func @transform_4(%arg0: i32) -> (i32, i32) {
    %c0_i32 = arith.constant 0 : i32
    %c0_i32_0 = arith.constant 0 : i32
    return %arg0, %c0_i32 : i32, i32
  }
}

module attributes {stable_mosaic.version = 11 : i64} {
  func.func @_stage_blocks_kernel(%arg0: i32, %arg1: i32, %arg2: memref<32x64xbf16, #tpu.memory_space<vmem>>, %arg3: memref<1x1x64xf32, #tpu.memory_space<vmem>>, %arg4: memref<1x1x64xf32, #tpu.memory_space<vmem>>, %arg5: memref<1x64x256xbf16, #tpu.memory_space<vmem>>, %arg6: memref<1x256x64xbf16, #tpu.memory_space<vmem>>, %arg7: memref<1x1x64xf32, #tpu.memory_space<vmem>>, %arg8: memref<1x1x64xf32, #tpu.memory_space<vmem>>, %arg9: memref<1x2xf32, #tpu.memory_space<smem>>, %arg10: memref<1x64xf32, #tpu.memory_space<vmem>>, %arg11: memref<32x64xbf16, #tpu.memory_space<vmem>>, %arg12: memref<32x64xf32, #tpu.memory_space<vmem>>) attributes {dimension_semantics = [#tpu.dimension_semantics<parallel>, #tpu.dimension_semantics<arbitrary>], iteration_bounds = array<i64: 1, 1>, scalar_prefetch = 0 : i64, scratch_operands = 1 : i64, tpu.core_type = #tpu.core_type<tc>, window_params = [{transform_indices = @transform_0, window_bounds = array<i64: 32, 64>}, {transform_indices = @transform_1, window_bounds = array<i64: 1, 1, 64>}, {transform_indices = @transform_2, window_bounds = array<i64: 1, 1, 64>}, {transform_indices = @transform_3, window_bounds = array<i64: 1, 64, 256>}, {transform_indices = @transform_4, window_bounds = array<i64: 1, 256, 64>}, {transform_indices = @transform_5, window_bounds = array<i64: 1, 1, 64>}, {transform_indices = @transform_6, window_bounds = array<i64: 1, 1, 64>}, {transform_indices = @transform_7, window_bounds = array<i64: 1, 2>}, {pipeline_mode = #tpu.pipeline_mode<synchronous>, transform_indices = @transform_8, window_bounds = array<i64: 1, 64>}, {transform_indices = @transform_9, window_bounds = array<i64: 32, 64>}]} {
    %c0_i32 = arith.constant 0 : i32
    %0 = arith.cmpi eq, %arg1, %c0_i32 : i32
    %1 = arith.extui %0 : i1 to i32
    %c0_i32_0 = arith.constant 0 : i32
    %2 = arith.cmpi ne, %1, %c0_i32_0 : i32
    scf.if %2 {
      %c0_37 = arith.constant 0 : index
      %c0_38 = arith.constant 0 : index
      %77 = vector.load %arg2[%c0_37, %c0_38] : memref<32x64xbf16, #tpu.memory_space<vmem>>, vector<32x64xbf16>
      %78 = arith.extf %77 : vector<32x64xbf16> to vector<32x64xf32>
      %c0_39 = arith.constant 0 : index
      %c0_40 = arith.constant 0 : index
      %79 = vector.load %arg12[%c0_39, %c0_40] : memref<32x64xf32, #tpu.memory_space<vmem>>, vector<32x64xf32>
      tpu.vector_store %arg12[%c0_39, %c0_40], %78 {strides = array<i32>} : memref<32x64xf32, #tpu.memory_space<vmem>>, vector<32x64xf32>,
    } else {
    }
    %c0 = arith.constant 0 : index
    %c0_1 = arith.constant 0 : index
    %3 = vector.load %arg12[%c0, %c0_1] : memref<32x64xf32, #tpu.memory_space<vmem>>, vector<32x64xf32>
    %c0_2 = arith.constant 0 : index
    %c0_3 = arith.constant 0 : index
    %c0_4 = arith.constant 0 : index
    %4 = vector.load %arg3[%c0_2, %c0_3, %c0_4] : memref<1x1x64xf32, #tpu.memory_space<vmem>>, vector<1x1x64xf32>
    %5 = vector.shape_cast %4 : vector<1x1x64xf32> to vector<1x64xf32>
    %c0_5 = arith.constant 0 : index
    %c0_6 = arith.constant 0 : index
    %c0_7 = arith.constant 0 : index
    %6 = vector.load %arg4[%c0_5, %c0_6, %c0_7] : memref<1x1x64xf32, #tpu.memory_space<vmem>>, vector<1x1x64xf32>
    %7 = vector.shape_cast %6 : vector<1x1x64xf32> to vector<1x64xf32>
    %c0_8 = arith.constant 0 : index
    %c0_9 = arith.constant 0 : index
    %c0_10 = arith.constant 0 : index
    %8 = vector.load %arg7[%c0_8, %c0_9, %c0_10] : memref<1x1x64xf32, #tpu.memory_space<vmem>>, vector<1x1x64xf32>
    %9 = vector.shape_cast %8 : vector<1x1x64xf32> to vector<1x64xf32>
    %c0_11 = arith.constant 0 : index
    %c0_12 = arith.constant 0 : index
    %c0_13 = arith.constant 0 : index
    %10 = vector.load %arg8[%c0_11, %c0_12, %c0_13] : memref<1x1x64xf32, #tpu.memory_space<vmem>>, vector<1x1x64xf32>
    %11 = vector.shape_cast %10 : vector<1x1x64xf32> to vector<1x64xf32>
    %12 = arith.index_cast %arg1 : i32 to index
    %c0_14 = arith.constant 0 : index
    %13 = memref.load %arg9[%12, %c0_14] : memref<1x2xf32, #tpu.memory_space<smem>>
    %14 = arith.index_cast %arg1 : i32 to index
    %c1 = arith.constant 1 : index
    %15 = memref.load %arg9[%14, %c1] : memref<1x2xf32, #tpu.memory_space<smem>>
    %16 = vector.broadcast %9 : vector<1x64xf32> to vector<32x64xf32>
    %17 = arith.mulf %3, %16 : vector<32x64xf32>
    %cst = arith.constant dense<0.000000e+00> : vector<32xf32>
    %18 = vector.multi_reduction <add>, %3, %cst [1] : vector<32x64xf32> to vector<32xf32>
    %19 = vector.shape_cast %18 : vector<32xf32> to vector<32x1xf32>
    %cst_15 = arith.constant 6.400000e+01 : f32
    %20 = vector.broadcast %cst_15 : f32 to vector<32x1xf32>
    %21 = arith.divf %19, %20 : vector<32x1xf32>
    %22 = vector.broadcast %21 : vector<32x1xf32> to vector<32x64xf32>
    %23 = arith.subf %3, %22 : vector<32x64xf32>
    %24 = arith.mulf %23, %23 : vector<32x64xf32>
    %cst_16 = arith.constant dense<0.000000e+00> : vector<32xf32>
    %25 = vector.multi_reduction <add>, %24, %cst_16 [1] : vector<32x64xf32> to vector<32xf32>
    %26 = vector.shape_cast %25 : vector<32xf32> to vector<32x1xf32>
    %cst_17 = arith.constant 6.400000e+01 : f32
    %27 = vector.broadcast %cst_17 : f32 to vector<32x1xf32>
    %28 = arith.divf %26, %27 : vector<32x1xf32>
    %cst_18 = arith.constant 9.99999997E-7 : f32
    %29 = vector.broadcast %cst_18 : f32 to vector<32x1xf32>
    %30 = arith.addf %28, %29 : vector<32x1xf32>
    %31 = math.rsqrt %30 : vector<32x1xf32>
    %32 = vector.broadcast %31 : vector<32x1xf32> to vector<32x64xf32>
    %33 = arith.mulf %23, %32 : vector<32x64xf32>
    %34 = vector.broadcast %5 : vector<1x64xf32> to vector<32x64xf32>
    %35 = arith.mulf %33, %34 : vector<32x64xf32>
    %36 = arith.addf %17, %35 : vector<32x64xf32>
    %cst_19 = arith.constant dense<0.000000e+00> : vector<32xf32>
    %37 = vector.multi_reduction <add>, %36, %cst_19 [1] : vector<32x64xf32> to vector<32xf32>
    %38 = vector.shape_cast %37 : vector<32xf32> to vector<32x1xf32>
    %cst_20 = arith.constant 6.400000e+01 : f32
    %39 = vector.broadcast %cst_20 : f32 to vector<32x1xf32>
    %40 = arith.divf %38, %39 : vector<32x1xf32>
    %41 = vector.broadcast %40 : vector<32x1xf32> to vector<32x64xf32>
    %42 = arith.subf %36, %41 : vector<32x64xf32>
    %43 = arith.mulf %42, %42 : vector<32x64xf32>
    %cst_21 = arith.constant dense<0.000000e+00> : vector<32xf32>
    %44 = vector.multi_reduction <add>, %43, %cst_21 [1] : vector<32x64xf32> to vector<32xf32>
    %45 = vector.shape_cast %44 : vector<32xf32> to vector<32x1xf32>
    %cst_22 = arith.constant 6.400000e+01 : f32
    %46 = vector.broadcast %cst_22 : f32 to vector<32x1xf32>
    %47 = arith.divf %45, %46 : vector<32x1xf32>
    %cst_23 = arith.constant 9.99999997E-7 : f32
    %48 = vector.broadcast %cst_23 : f32 to vector<32x1xf32>
    %49 = arith.addf %47, %48 : vector<32x1xf32>
    %50 = math.rsqrt %49 : vector<32x1xf32>
    %51 = vector.broadcast %50 : vector<32x1xf32> to vector<32x64xf32>
    %52 = arith.mulf %42, %51 : vector<32x64xf32>
    %53 = vector.broadcast %7 : vector<1x64xf32> to vector<32x64xf32>
    %54 = arith.mulf %52, %53 : vector<32x64xf32>
    %55 = arith.truncf %54 : vector<32x64xf32> to vector<32x64xbf16>
    %c0_24 = arith.constant 0 : index
    %c0_25 = arith.constant 0 : index
    %c0_26 = arith.constant 0 : index
    %56 = vector.load %arg5[%c0_24, %c0_25, %c0_26] : memref<1x64x256xbf16, #tpu.memory_space<vmem>>, vector<1x64x256xbf16>
    %57 = vector.shape_cast %56 : vector<1x64x256xbf16> to vector<64x256xbf16>
    %cst_27 = arith.constant dense<0.000000e+00> : vector<32x256xf32>
    %58 = tpu.matmul %55, %57, %cst_27 {dimension_numbers = #tpu.dot_dimension_numbers<[1], [0], [0], [1], [0, 0, 1, 1], [], []>} : vector<32x64xbf16>, vector<64x256xbf16>, vector<32x256xf32> -> vector<32x256xf32>
    %cst_28 = arith.constant 0.000000e+00 : f32
    %59 = vector.broadcast %cst_28 : f32 to vector<32x256xf32>
    %60 = arith.maximumf %58, %59 : vector<32x256xf32>
    %61 = arith.mulf %60, %60 : vector<32x256xf32>
    %62 = vector.broadcast %13 : f32 to vector<32x256xf32>
    %63 = arith.mulf %62, %61 : vector<32x256xf32>
    %64 = vector.broadcast %15 : f32 to vector<32x256xf32>
    %65 = arith.addf %63, %64 : vector<32x256xf32>
    %66 = arith.truncf %65 : vector<32x256xf32> to vector<32x256xbf16>
    %c0_29 = arith.constant 0 : index
    %c0_30 = arith.constant 0 : index
    %c0_31 = arith.constant 0 : index
    %67 = vector.load %arg6[%c0_29, %c0_30, %c0_31] : memref<1x256x64xbf16, #tpu.memory_space<vmem>>, vector<1x256x64xbf16>
    %68 = vector.shape_cast %67 : vector<1x256x64xbf16> to vector<256x64xbf16>
    %cst_32 = arith.constant dense<0.000000e+00> : vector<32x64xf32>
    %69 = tpu.matmul %66, %68, %cst_32 {dimension_numbers = #tpu.dot_dimension_numbers<[1], [0], [0], [1], [0, 0, 1, 1], [], []>} : vector<32x256xbf16>, vector<256x64xbf16>, vector<32x64xf32> -> vector<32x64xf32>
    %70 = vector.broadcast %11 : vector<1x64xf32> to vector<32x64xf32>
    %71 = arith.mulf %36, %70 : vector<32x64xf32>
    %72 = arith.addf %71, %69 : vector<32x64xf32>
    %c0_33 = arith.constant 0 : index
    %c0_34 = arith.constant 0 : index
    %73 = vector.load %arg12[%c0_33, %c0_34] : memref<32x64xf32, #tpu.memory_space<vmem>>, vector<32x64xf32>
    tpu.vector_store %arg12[%c0_33, %c0_34], %72 {strides = array<i32>} : memref<32x64xf32, #tpu.memory_space<vmem>>, vector<32x64xf32>,
    %c0_i32_35 = arith.constant 0 : i32
    %74 = arith.cmpi eq, %arg1, %c0_i32_35 : i32
    %75 = arith.extui %74 : i1 to i32
    %c0_i32_36 = arith.constant 0 : i32
    %76 = arith.cmpi ne, %75, %c0_i32_36 : i32
    scf.if %76 {
      %c0_37 = arith.constant 0 : index
      %c0_38 = arith.constant 0 : index
      %77 = vector.load %arg10[%c0_37, %c0_38] : memref<1x64xf32, #tpu.memory_space<vmem>>, vector<1x64xf32>
      %cst_39 = arith.constant dense<0.000000e+00> : vector<32xf32>
      %78 = vector.multi_reduction <add>, %72, %cst_39 [1] : vector<32x64xf32> to vector<32xf32>
      %79 = vector.shape_cast %78 : vector<32xf32> to vector<32x1xf32>
      %cst_40 = arith.constant 6.400000e+01 : f32
      %80 = vector.broadcast %cst_40 : f32 to vector<32x1xf32>
      %81 = arith.divf %79, %80 : vector<32x1xf32>
      %82 = vector.broadcast %81 : vector<32x1xf32> to vector<32x64xf32>
      %83 = arith.subf %72, %82 : vector<32x64xf32>
      %84 = arith.mulf %83, %83 : vector<32x64xf32>
      %cst_41 = arith.constant dense<0.000000e+00> : vector<32xf32>
      %85 = vector.multi_reduction <add>, %84, %cst_41 [1] : vector<32x64xf32> to vector<32xf32>
      %86 = vector.shape_cast %85 : vector<32xf32> to vector<32x1xf32>
      %cst_42 = arith.constant 6.400000e+01 : f32
      %87 = vector.broadcast %cst_42 : f32 to vector<32x1xf32>
      %88 = arith.divf %86, %87 : vector<32x1xf32>
      %cst_43 = arith.constant 9.99999997E-7 : f32
      %89 = vector.broadcast %cst_43 : f32 to vector<32x1xf32>
      %90 = arith.addf %88, %89 : vector<32x1xf32>
      %91 = math.rsqrt %90 : vector<32x1xf32>
      %92 = vector.broadcast %91 : vector<32x1xf32> to vector<32x64xf32>
      %93 = arith.mulf %83, %92 : vector<32x64xf32>
      %94 = vector.broadcast %77 : vector<1x64xf32> to vector<32x64xf32>
      %95 = arith.mulf %93, %94 : vector<32x64xf32>
      %96 = arith.truncf %95 : vector<32x64xf32> to vector<32x64xbf16>
      %c0_44 = arith.constant 0 : index
      %c0_45 = arith.constant 0 : index
      %97 = vector.load %arg11[%c0_44, %c0_45] : memref<32x64xbf16, #tpu.memory_space<vmem>>, vector<32x64xbf16>
      tpu.vector_store %arg11[%c0_44, %c0_45], %96 {strides = array<i32>} : memref<32x64xbf16, #tpu.memory_space<vmem>>, vector<32x64xbf16>,
    } else {
    }
    return
  }
  func.func @transform_0(%arg0: i32, %arg1: i32) -> (i32, i32) {
    %c0_i32 = arith.constant 0 : i32
    %c0_i32_0 = arith.constant 0 : i32
    return %arg0, %c0_i32 : i32, i32
  }
  func.func @transform_1(%arg0: i32, %arg1: i32) -> (i32, i32, i32) {
    %c0_i32 = arith.constant 0 : i32
    %c0_i32_0 = arith.constant 0 : i32
    %c0_i32_1 = arith.constant 0 : i32
    return %arg1, %c0_i32, %c0_i32_0 : i32, i32, i32
  }
  func.func @transform_2(%arg0: i32, %arg1: i32) -> (i32, i32, i32) {
    %c0_i32 = arith.constant 0 : i32
    %c0_i32_0 = arith.constant 0 : i32
    %c0_i32_1 = arith.constant 0 : i32
    return %arg1, %c0_i32, %c0_i32_0 : i32, i32, i32
  }
  func.func @transform_3(%arg0: i32, %arg1: i32) -> (i32, i32, i32) {
    %c0_i32 = arith.constant 0 : i32
    %c0_i32_0 = arith.constant 0 : i32
    %c0_i32_1 = arith.constant 0 : i32
    return %arg1, %c0_i32, %c0_i32_0 : i32, i32, i32
  }
  func.func @transform_4(%arg0: i32, %arg1: i32) -> (i32, i32, i32) {
    %c0_i32 = arith.constant 0 : i32
    %c0_i32_0 = arith.constant 0 : i32
    %c0_i32_1 = arith.constant 0 : i32
    return %arg1, %c0_i32, %c0_i32_0 : i32, i32, i32
  }
  func.func @transform_5(%arg0: i32, %arg1: i32) -> (i32, i32, i32) {
    %c0_i32 = arith.constant 0 : i32
    %c0_i32_0 = arith.constant 0 : i32
    %c0_i32_1 = arith.constant 0 : i32
    return %arg1, %c0_i32, %c0_i32_0 : i32, i32, i32
  }
  func.func @transform_6(%arg0: i32, %arg1: i32) -> (i32, i32, i32) {
    %c0_i32 = arith.constant 0 : i32
    %c0_i32_0 = arith.constant 0 : i32
    %c0_i32_1 = arith.constant 0 : i32
    return %arg1, %c0_i32, %c0_i32_0 : i32, i32, i32
  }
  func.func @transform_7(%arg0: i32, %arg1: i32) -> (i32, i32) {
    %c0_i32 = arith.constant 0 : i32
    %c0_i32_0 = arith.constant 0 : i32
    %c0_i32_1 = arith.constant 0 : i32
    return %c0_i32, %c0_i32_0 : i32, i32
  }
  func.func @transform_8(%arg0: i32, %arg1: i32) -> (i32, i32) {
    %c0_i32 = arith.constant 0 : i32
    %c0_i32_0 = arith.constant 0 : i32
    %c0_i32_1 = arith.constant 0 : i32
    return %c0_i32, %c0_i32_0 : i32, i32
  }
  func.func @transform_9(%arg0: i32, %arg1: i32) -> (i32, i32) {
    %c0_i32 = arith.constant 0 : i32
    %c0_i32_0 = arith.constant 0 : i32
    return %arg0, %c0_i32 : i32, i32
  }
}

module attributes {stable_mosaic.version = 11 : i64} {
  func.func @_conv_kernel(%arg0: i32, %arg1: memref<8x576xbf16, #tpu.memory_space<vmem>>, %arg2: memref<576x128xbf16, #tpu.memory_space<vmem>>, %arg3: memref<1x128xf32, #tpu.memory_space<vmem>>, %arg4: memref<1x128xf32, #tpu.memory_space<vmem>>, %arg5: memref<8x128xbf16, #tpu.memory_space<vmem>>) attributes {dimension_semantics = [#tpu.dimension_semantics<parallel>], iteration_bounds = array<i64: 1>, scalar_prefetch = 0 : i64, scratch_operands = 0 : i64, tpu.core_type = #tpu.core_type<tc>, window_params = [{transform_indices = @transform_0, window_bounds = array<i64: 8, 576>}, {pipeline_mode = #tpu.pipeline_mode<synchronous>, transform_indices = @transform_1, window_bounds = array<i64: 576, 128>}, {pipeline_mode = #tpu.pipeline_mode<synchronous>, transform_indices = @transform_2, window_bounds = array<i64: 1, 128>}, {pipeline_mode = #tpu.pipeline_mode<synchronous>, transform_indices = @transform_3, window_bounds = array<i64: 1, 128>}, {transform_indices = @transform_4, window_bounds = array<i64: 8, 128>}]} {
    %c0 = arith.constant 0 : index
    %c0_0 = arith.constant 0 : index
    %0 = vector.load %arg1[%c0, %c0_0] : memref<8x576xbf16, #tpu.memory_space<vmem>>, vector<8x576xbf16>
    %c0_1 = arith.constant 0 : index
    %c0_2 = arith.constant 0 : index
    %1 = vector.load %arg2[%c0_1, %c0_2] : memref<576x128xbf16, #tpu.memory_space<vmem>>, vector<576x128xbf16>
    %cst = arith.constant dense<0.000000e+00> : vector<8x128xf32>
    %2 = tpu.matmul %0, %1, %cst {dimension_numbers = #tpu.dot_dimension_numbers<[1], [0], [0], [1], [0, 0, 1, 1], [], []>} : vector<8x576xbf16>, vector<576x128xbf16>, vector<8x128xf32> -> vector<8x128xf32>
    %c0_3 = arith.constant 0 : index
    %c0_4 = arith.constant 0 : index
    %3 = vector.load %arg3[%c0_3, %c0_4] : memref<1x128xf32, #tpu.memory_space<vmem>>, vector<1x128xf32>
    %4 = vector.broadcast %3 : vector<1x128xf32> to vector<8x128xf32>
    %5 = arith.addf %2, %4 : vector<8x128xf32>
    %6 = arith.truncf %5 : vector<8x128xf32> to vector<8x128xbf16>
    %c0_5 = arith.constant 0 : index
    %c0_6 = arith.constant 0 : index
    %7 = vector.load %arg5[%c0_5, %c0_6] : memref<8x128xbf16, #tpu.memory_space<vmem>>, vector<8x128xbf16>
    tpu.vector_store %arg5[%c0_5, %c0_6], %6 {strides = array<i32>} : memref<8x128xbf16, #tpu.memory_space<vmem>>, vector<8x128xbf16>,
    return
  }
  func.func @transform_0(%arg0: i32) -> (i32, i32) {
    %c0_i32 = arith.constant 0 : i32
    %c0_i32_0 = arith.constant 0 : i32
    return %arg0, %c0_i32 : i32, i32
  }
  func.func @transform_1(%arg0: i32) -> (i32, i32) {
    %c0_i32 = arith.constant 0 : i32
    %c0_i32_0 = arith.constant 0 : i32
    %c0_i32_1 = arith.constant 0 : i32
    return %c0_i32, %c0_i32_0 : i32, i32
  }
  func.func @transform_2(%arg0: i32) -> (i32, i32) {
    %c0_i32 = arith.constant 0 : i32
    %c0_i32_0 = arith.constant 0 : i32
    %c0_i32_1 = arith.constant 0 : i32
    return %c0_i32, %c0_i32_0 : i32, i32
  }
  func.func @transform_3(%arg0: i32) -> (i32, i32) {
    %c0_i32 = arith.constant 0 : i32
    %c0_i32_0 = arith.constant 0 : i32
    %c0_i32_1 = arith.constant 0 : i32
    return %c0_i32, %c0_i32_0 : i32, i32
  }
  func.func @transform_4(%arg0: i32) -> (i32, i32) {
    %c0_i32 = arith.constant 0 : i32
    %c0_i32_0 = arith.constant 0 : i32
    return %arg0, %c0_i32 : i32, i32
  }
}

module attributes {stable_mosaic.version = 11 : i64} {
  func.func @_stage_blocks_kernel(%arg0: i32, %arg1: i32, %arg2: memref<8x128xbf16, #tpu.memory_space<vmem>>, %arg3: memref<1x1x128xf32, #tpu.memory_space<vmem>>, %arg4: memref<1x1x128xf32, #tpu.memory_space<vmem>>, %arg5: memref<1x128x512xbf16, #tpu.memory_space<vmem>>, %arg6: memref<1x512x128xbf16, #tpu.memory_space<vmem>>, %arg7: memref<1x1x128xf32, #tpu.memory_space<vmem>>, %arg8: memref<1x1x128xf32, #tpu.memory_space<vmem>>, %arg9: memref<2x2xf32, #tpu.memory_space<smem>>, %arg10: memref<1x128xf32, #tpu.memory_space<vmem>>, %arg11: memref<8x128xbf16, #tpu.memory_space<vmem>>, %arg12: memref<8x128xf32, #tpu.memory_space<vmem>>) attributes {dimension_semantics = [#tpu.dimension_semantics<parallel>, #tpu.dimension_semantics<arbitrary>], iteration_bounds = array<i64: 1, 2>, scalar_prefetch = 0 : i64, scratch_operands = 1 : i64, tpu.core_type = #tpu.core_type<tc>, window_params = [{transform_indices = @transform_0, window_bounds = array<i64: 8, 128>}, {transform_indices = @transform_1, window_bounds = array<i64: 1, 1, 128>}, {transform_indices = @transform_2, window_bounds = array<i64: 1, 1, 128>}, {transform_indices = @transform_3, window_bounds = array<i64: 1, 128, 512>}, {transform_indices = @transform_4, window_bounds = array<i64: 1, 512, 128>}, {transform_indices = @transform_5, window_bounds = array<i64: 1, 1, 128>}, {transform_indices = @transform_6, window_bounds = array<i64: 1, 1, 128>}, {transform_indices = @transform_7, window_bounds = array<i64: 2, 2>}, {pipeline_mode = #tpu.pipeline_mode<synchronous>, transform_indices = @transform_8, window_bounds = array<i64: 1, 128>}, {transform_indices = @transform_9, window_bounds = array<i64: 8, 128>}]} {
    %c0_i32 = arith.constant 0 : i32
    %0 = arith.cmpi eq, %arg1, %c0_i32 : i32
    %1 = arith.extui %0 : i1 to i32
    %c0_i32_0 = arith.constant 0 : i32
    %2 = arith.cmpi ne, %1, %c0_i32_0 : i32
    scf.if %2 {
      %c0_36 = arith.constant 0 : index
      %c0_37 = arith.constant 0 : index
      %77 = vector.load %arg2[%c0_36, %c0_37] : memref<8x128xbf16, #tpu.memory_space<vmem>>, vector<8x128xbf16>
      %78 = arith.extf %77 : vector<8x128xbf16> to vector<8x128xf32>
      %c0_38 = arith.constant 0 : index
      %c0_39 = arith.constant 0 : index
      %79 = vector.load %arg12[%c0_38, %c0_39] : memref<8x128xf32, #tpu.memory_space<vmem>>, vector<8x128xf32>
      tpu.vector_store %arg12[%c0_38, %c0_39], %78 {strides = array<i32>} : memref<8x128xf32, #tpu.memory_space<vmem>>, vector<8x128xf32>,
    } else {
    }
    %c0 = arith.constant 0 : index
    %c0_1 = arith.constant 0 : index
    %3 = vector.load %arg12[%c0, %c0_1] : memref<8x128xf32, #tpu.memory_space<vmem>>, vector<8x128xf32>
    %c0_2 = arith.constant 0 : index
    %c0_3 = arith.constant 0 : index
    %c0_4 = arith.constant 0 : index
    %4 = vector.load %arg3[%c0_2, %c0_3, %c0_4] : memref<1x1x128xf32, #tpu.memory_space<vmem>>, vector<1x1x128xf32>
    %5 = vector.shape_cast %4 : vector<1x1x128xf32> to vector<1x128xf32>
    %c0_5 = arith.constant 0 : index
    %c0_6 = arith.constant 0 : index
    %c0_7 = arith.constant 0 : index
    %6 = vector.load %arg4[%c0_5, %c0_6, %c0_7] : memref<1x1x128xf32, #tpu.memory_space<vmem>>, vector<1x1x128xf32>
    %7 = vector.shape_cast %6 : vector<1x1x128xf32> to vector<1x128xf32>
    %c0_8 = arith.constant 0 : index
    %c0_9 = arith.constant 0 : index
    %c0_10 = arith.constant 0 : index
    %8 = vector.load %arg7[%c0_8, %c0_9, %c0_10] : memref<1x1x128xf32, #tpu.memory_space<vmem>>, vector<1x1x128xf32>
    %9 = vector.shape_cast %8 : vector<1x1x128xf32> to vector<1x128xf32>
    %c0_11 = arith.constant 0 : index
    %c0_12 = arith.constant 0 : index
    %c0_13 = arith.constant 0 : index
    %10 = vector.load %arg8[%c0_11, %c0_12, %c0_13] : memref<1x1x128xf32, #tpu.memory_space<vmem>>, vector<1x1x128xf32>
    %11 = vector.shape_cast %10 : vector<1x1x128xf32> to vector<1x128xf32>
    %12 = arith.index_cast %arg1 : i32 to index
    %c0_14 = arith.constant 0 : index
    %13 = memref.load %arg9[%12, %c0_14] : memref<2x2xf32, #tpu.memory_space<smem>>
    %14 = arith.index_cast %arg1 : i32 to index
    %c1 = arith.constant 1 : index
    %15 = memref.load %arg9[%14, %c1] : memref<2x2xf32, #tpu.memory_space<smem>>
    %16 = vector.broadcast %9 : vector<1x128xf32> to vector<8x128xf32>
    %17 = arith.mulf %3, %16 : vector<8x128xf32>
    %cst = arith.constant dense<0.000000e+00> : vector<8xf32>
    %18 = vector.multi_reduction <add>, %3, %cst [1] : vector<8x128xf32> to vector<8xf32>
    %19 = vector.shape_cast %18 : vector<8xf32> to vector<8x1xf32>
    %cst_15 = arith.constant 1.280000e+02 : f32
    %20 = vector.broadcast %cst_15 : f32 to vector<8x1xf32>
    %21 = arith.divf %19, %20 : vector<8x1xf32>
    %22 = vector.broadcast %21 : vector<8x1xf32> to vector<8x128xf32>
    %23 = arith.subf %3, %22 : vector<8x128xf32>
    %24 = arith.mulf %23, %23 : vector<8x128xf32>
    %cst_16 = arith.constant dense<0.000000e+00> : vector<8xf32>
    %25 = vector.multi_reduction <add>, %24, %cst_16 [1] : vector<8x128xf32> to vector<8xf32>
    %26 = vector.shape_cast %25 : vector<8xf32> to vector<8x1xf32>
    %cst_17 = arith.constant 1.280000e+02 : f32
    %27 = vector.broadcast %cst_17 : f32 to vector<8x1xf32>
    %28 = arith.divf %26, %27 : vector<8x1xf32>
    %cst_18 = arith.constant 9.99999997E-7 : f32
    %29 = vector.broadcast %cst_18 : f32 to vector<8x1xf32>
    %30 = arith.addf %28, %29 : vector<8x1xf32>
    %31 = math.rsqrt %30 : vector<8x1xf32>
    %32 = vector.broadcast %31 : vector<8x1xf32> to vector<8x128xf32>
    %33 = arith.mulf %23, %32 : vector<8x128xf32>
    %34 = vector.broadcast %5 : vector<1x128xf32> to vector<8x128xf32>
    %35 = arith.mulf %33, %34 : vector<8x128xf32>
    %36 = arith.addf %17, %35 : vector<8x128xf32>
    %cst_19 = arith.constant dense<0.000000e+00> : vector<8xf32>
    %37 = vector.multi_reduction <add>, %36, %cst_19 [1] : vector<8x128xf32> to vector<8xf32>
    %38 = vector.shape_cast %37 : vector<8xf32> to vector<8x1xf32>
    %cst_20 = arith.constant 1.280000e+02 : f32
    %39 = vector.broadcast %cst_20 : f32 to vector<8x1xf32>
    %40 = arith.divf %38, %39 : vector<8x1xf32>
    %41 = vector.broadcast %40 : vector<8x1xf32> to vector<8x128xf32>
    %42 = arith.subf %36, %41 : vector<8x128xf32>
    %43 = arith.mulf %42, %42 : vector<8x128xf32>
    %cst_21 = arith.constant dense<0.000000e+00> : vector<8xf32>
    %44 = vector.multi_reduction <add>, %43, %cst_21 [1] : vector<8x128xf32> to vector<8xf32>
    %45 = vector.shape_cast %44 : vector<8xf32> to vector<8x1xf32>
    %cst_22 = arith.constant 1.280000e+02 : f32
    %46 = vector.broadcast %cst_22 : f32 to vector<8x1xf32>
    %47 = arith.divf %45, %46 : vector<8x1xf32>
    %cst_23 = arith.constant 9.99999997E-7 : f32
    %48 = vector.broadcast %cst_23 : f32 to vector<8x1xf32>
    %49 = arith.addf %47, %48 : vector<8x1xf32>
    %50 = math.rsqrt %49 : vector<8x1xf32>
    %51 = vector.broadcast %50 : vector<8x1xf32> to vector<8x128xf32>
    %52 = arith.mulf %42, %51 : vector<8x128xf32>
    %53 = vector.broadcast %7 : vector<1x128xf32> to vector<8x128xf32>
    %54 = arith.mulf %52, %53 : vector<8x128xf32>
    %55 = arith.truncf %54 : vector<8x128xf32> to vector<8x128xbf16>
    %c0_24 = arith.constant 0 : index
    %c0_25 = arith.constant 0 : index
    %c0_26 = arith.constant 0 : index
    %56 = vector.load %arg5[%c0_24, %c0_25, %c0_26] : memref<1x128x512xbf16, #tpu.memory_space<vmem>>, vector<1x128x512xbf16>
    %57 = vector.shape_cast %56 : vector<1x128x512xbf16> to vector<128x512xbf16>
    %cst_27 = arith.constant dense<0.000000e+00> : vector<8x512xf32>
    %58 = tpu.matmul %55, %57, %cst_27 {dimension_numbers = #tpu.dot_dimension_numbers<[1], [0], [0], [1], [0, 0, 1, 1], [], []>} : vector<8x128xbf16>, vector<128x512xbf16>, vector<8x512xf32> -> vector<8x512xf32>
    %cst_28 = arith.constant 0.000000e+00 : f32
    %59 = vector.broadcast %cst_28 : f32 to vector<8x512xf32>
    %60 = arith.maximumf %58, %59 : vector<8x512xf32>
    %61 = arith.mulf %60, %60 : vector<8x512xf32>
    %62 = vector.broadcast %13 : f32 to vector<8x512xf32>
    %63 = arith.mulf %62, %61 : vector<8x512xf32>
    %64 = vector.broadcast %15 : f32 to vector<8x512xf32>
    %65 = arith.addf %63, %64 : vector<8x512xf32>
    %66 = arith.truncf %65 : vector<8x512xf32> to vector<8x512xbf16>
    %c0_29 = arith.constant 0 : index
    %c0_30 = arith.constant 0 : index
    %c0_31 = arith.constant 0 : index
    %67 = vector.load %arg6[%c0_29, %c0_30, %c0_31] : memref<1x512x128xbf16, #tpu.memory_space<vmem>>, vector<1x512x128xbf16>
    %68 = vector.shape_cast %67 : vector<1x512x128xbf16> to vector<512x128xbf16>
    %cst_32 = arith.constant dense<0.000000e+00> : vector<8x128xf32>
    %69 = tpu.matmul %66, %68, %cst_32 {dimension_numbers = #tpu.dot_dimension_numbers<[1], [0], [0], [1], [0, 0, 1, 1], [], []>} : vector<8x512xbf16>, vector<512x128xbf16>, vector<8x128xf32> -> vector<8x128xf32>
    %70 = vector.broadcast %11 : vector<1x128xf32> to vector<8x128xf32>
    %71 = arith.mulf %36, %70 : vector<8x128xf32>
    %72 = arith.addf %71, %69 : vector<8x128xf32>
    %c0_33 = arith.constant 0 : index
    %c0_34 = arith.constant 0 : index
    %73 = vector.load %arg12[%c0_33, %c0_34] : memref<8x128xf32, #tpu.memory_space<vmem>>, vector<8x128xf32>
    tpu.vector_store %arg12[%c0_33, %c0_34], %72 {strides = array<i32>} : memref<8x128xf32, #tpu.memory_space<vmem>>, vector<8x128xf32>,
    %c1_i32 = arith.constant 1 : i32
    %74 = arith.cmpi eq, %arg1, %c1_i32 : i32
    %75 = arith.extui %74 : i1 to i32
    %c0_i32_35 = arith.constant 0 : i32
    %76 = arith.cmpi ne, %75, %c0_i32_35 : i32
    scf.if %76 {
      %c0_36 = arith.constant 0 : index
      %c0_37 = arith.constant 0 : index
      %77 = vector.load %arg10[%c0_36, %c0_37] : memref<1x128xf32, #tpu.memory_space<vmem>>, vector<1x128xf32>
      %cst_38 = arith.constant dense<0.000000e+00> : vector<8xf32>
      %78 = vector.multi_reduction <add>, %72, %cst_38 [1] : vector<8x128xf32> to vector<8xf32>
      %79 = vector.shape_cast %78 : vector<8xf32> to vector<8x1xf32>
      %cst_39 = arith.constant 1.280000e+02 : f32
      %80 = vector.broadcast %cst_39 : f32 to vector<8x1xf32>
      %81 = arith.divf %79, %80 : vector<8x1xf32>
      %82 = vector.broadcast %81 : vector<8x1xf32> to vector<8x128xf32>
      %83 = arith.subf %72, %82 : vector<8x128xf32>
      %84 = arith.mulf %83, %83 : vector<8x128xf32>
      %cst_40 = arith.constant dense<0.000000e+00> : vector<8xf32>
      %85 = vector.multi_reduction <add>, %84, %cst_40 [1] : vector<8x128xf32> to vector<8xf32>
      %86 = vector.shape_cast %85 : vector<8xf32> to vector<8x1xf32>
      %cst_41 = arith.constant 1.280000e+02 : f32
      %87 = vector.broadcast %cst_41 : f32 to vector<8x1xf32>
      %88 = arith.divf %86, %87 : vector<8x1xf32>
      %cst_42 = arith.constant 9.99999997E-7 : f32
      %89 = vector.broadcast %cst_42 : f32 to vector<8x1xf32>
      %90 = arith.addf %88, %89 : vector<8x1xf32>
      %91 = math.rsqrt %90 : vector<8x1xf32>
      %92 = vector.broadcast %91 : vector<8x1xf32> to vector<8x128xf32>
      %93 = arith.mulf %83, %92 : vector<8x128xf32>
      %94 = vector.broadcast %77 : vector<1x128xf32> to vector<8x128xf32>
      %95 = arith.mulf %93, %94 : vector<8x128xf32>
      %96 = arith.truncf %95 : vector<8x128xf32> to vector<8x128xbf16>
      %c0_43 = arith.constant 0 : index
      %c0_44 = arith.constant 0 : index
      %97 = vector.load %arg11[%c0_43, %c0_44] : memref<8x128xbf16, #tpu.memory_space<vmem>>, vector<8x128xbf16>
      tpu.vector_store %arg11[%c0_43, %c0_44], %96 {strides = array<i32>} : memref<8x128xbf16, #tpu.memory_space<vmem>>, vector<8x128xbf16>,
    } else {
    }
    return
  }
  func.func @transform_0(%arg0: i32, %arg1: i32) -> (i32, i32) {
    %c0_i32 = arith.constant 0 : i32
    %c0_i32_0 = arith.constant 0 : i32
    return %arg0, %c0_i32 : i32, i32
  }
  func.func @transform_1(%arg0: i32, %arg1: i32) -> (i32, i32, i32) {
    %c0_i32 = arith.constant 0 : i32
    %c0_i32_0 = arith.constant 0 : i32
    %c0_i32_1 = arith.constant 0 : i32
    return %arg1, %c0_i32, %c0_i32_0 : i32, i32, i32
  }
  func.func @transform_2(%arg0: i32, %arg1: i32) -> (i32, i32, i32) {
    %c0_i32 = arith.constant 0 : i32
    %c0_i32_0 = arith.constant 0 : i32
    %c0_i32_1 = arith.constant 0 : i32
    return %arg1, %c0_i32, %c0_i32_0 : i32, i32, i32
  }
  func.func @transform_3(%arg0: i32, %arg1: i32) -> (i32, i32, i32) {
    %c0_i32 = arith.constant 0 : i32
    %c0_i32_0 = arith.constant 0 : i32
    %c0_i32_1 = arith.constant 0 : i32
    return %arg1, %c0_i32, %c0_i32_0 : i32, i32, i32
  }
  func.func @transform_4(%arg0: i32, %arg1: i32) -> (i32, i32, i32) {
    %c0_i32 = arith.constant 0 : i32
    %c0_i32_0 = arith.constant 0 : i32
    %c0_i32_1 = arith.constant 0 : i32
    return %arg1, %c0_i32, %c0_i32_0 : i32, i32, i32
  }
  func.func @transform_5(%arg0: i32, %arg1: i32) -> (i32, i32, i32) {
    %c0_i32 = arith.constant 0 : i32
    %c0_i32_0 = arith.constant 0 : i32
    %c0_i32_1 = arith.constant 0 : i32
    return %arg1, %c0_i32, %c0_i32_0 : i32, i32, i32
  }
  func.func @transform_6(%arg0: i32, %arg1: i32) -> (i32, i32, i32) {
    %c0_i32 = arith.constant 0 : i32
    %c0_i32_0 = arith.constant 0 : i32
    %c0_i32_1 = arith.constant 0 : i32
    return %arg1, %c0_i32, %c0_i32_0 : i32, i32, i32
  }
  func.func @transform_7(%arg0: i32, %arg1: i32) -> (i32, i32) {
    %c0_i32 = arith.constant 0 : i32
    %c0_i32_0 = arith.constant 0 : i32
    %c0_i32_1 = arith.constant 0 : i32
    return %c0_i32, %c0_i32_0 : i32, i32
  }
  func.func @transform_8(%arg0: i32, %arg1: i32) -> (i32, i32) {
    %c0_i32 = arith.constant 0 : i32
    %c0_i32_0 = arith.constant 0 : i32
    %c0_i32_1 = arith.constant 0 : i32
    return %c0_i32, %c0_i32_0 : i32, i32
  }
  func.func @transform_9(%arg0: i32, %arg1: i32) -> (i32, i32) {
    %c0_i32 = arith.constant 0 : i32
    %c0_i32_0 = arith.constant 0 : i32
    return %arg0, %c0_i32 : i32, i32
  }
}

module attributes {stable_mosaic.version = 11 : i64} {
  func.func @_conv_kernel(%arg0: i32, %arg1: memref<8x1152xbf16, #tpu.memory_space<vmem>>, %arg2: memref<1152x256xbf16, #tpu.memory_space<vmem>>, %arg3: memref<1x256xf32, #tpu.memory_space<vmem>>, %arg4: memref<1x256xf32, #tpu.memory_space<vmem>>, %arg5: memref<8x256xbf16, #tpu.memory_space<vmem>>) attributes {dimension_semantics = [#tpu.dimension_semantics<parallel>], iteration_bounds = array<i64: 1>, scalar_prefetch = 0 : i64, scratch_operands = 0 : i64, tpu.core_type = #tpu.core_type<tc>, window_params = [{transform_indices = @transform_0, window_bounds = array<i64: 8, 1152>}, {pipeline_mode = #tpu.pipeline_mode<synchronous>, transform_indices = @transform_1, window_bounds = array<i64: 1152, 256>}, {pipeline_mode = #tpu.pipeline_mode<synchronous>, transform_indices = @transform_2, window_bounds = array<i64: 1, 256>}, {pipeline_mode = #tpu.pipeline_mode<synchronous>, transform_indices = @transform_3, window_bounds = array<i64: 1, 256>}, {transform_indices = @transform_4, window_bounds = array<i64: 8, 256>}]} {
    %c0 = arith.constant 0 : index
    %c0_0 = arith.constant 0 : index
    %0 = vector.load %arg1[%c0, %c0_0] : memref<8x1152xbf16, #tpu.memory_space<vmem>>, vector<8x1152xbf16>
    %c0_1 = arith.constant 0 : index
    %c0_2 = arith.constant 0 : index
    %1 = vector.load %arg2[%c0_1, %c0_2] : memref<1152x256xbf16, #tpu.memory_space<vmem>>, vector<1152x256xbf16>
    %cst = arith.constant dense<0.000000e+00> : vector<8x256xf32>
    %2 = tpu.matmul %0, %1, %cst {dimension_numbers = #tpu.dot_dimension_numbers<[1], [0], [0], [1], [0, 0, 1, 1], [], []>} : vector<8x1152xbf16>, vector<1152x256xbf16>, vector<8x256xf32> -> vector<8x256xf32>
    %c0_3 = arith.constant 0 : index
    %c0_4 = arith.constant 0 : index
    %3 = vector.load %arg3[%c0_3, %c0_4] : memref<1x256xf32, #tpu.memory_space<vmem>>, vector<1x256xf32>
    %4 = vector.broadcast %3 : vector<1x256xf32> to vector<8x256xf32>
    %5 = arith.addf %2, %4 : vector<8x256xf32>
    %6 = arith.truncf %5 : vector<8x256xf32> to vector<8x256xbf16>
    %c0_5 = arith.constant 0 : index
    %c0_6 = arith.constant 0 : index
    %7 = vector.load %arg5[%c0_5, %c0_6] : memref<8x256xbf16, #tpu.memory_space<vmem>>, vector<8x256xbf16>
    tpu.vector_store %arg5[%c0_5, %c0_6], %6 {strides = array<i32>} : memref<8x256xbf16, #tpu.memory_space<vmem>>, vector<8x256xbf16>,
    return
  }
  func.func @transform_0(%arg0: i32) -> (i32, i32) {
    %c0_i32 = arith.constant 0 : i32
    %c0_i32_0 = arith.constant 0 : i32
    return %arg0, %c0_i32 : i32, i32
  }
  func.func @transform_1(%arg0: i32) -> (i32, i32) {
    %c0_i32 = arith.constant 0 : i32
    %c0_i32_0 = arith.constant 0 : i32
    %c0_i32_1 = arith.constant 0 : i32
    return %c0_i32, %c0_i32_0 : i32, i32
  }
  func.func @transform_2(%arg0: i32) -> (i32, i32) {
    %c0_i32 = arith.constant 0 : i32
    %c0_i32_0 = arith.constant 0 : i32
    %c0_i32_1 = arith.constant 0 : i32
    return %c0_i32, %c0_i32_0 : i32, i32
  }
  func.func @transform_3(%arg0: i32) -> (i32, i32) {
    %c0_i32 = arith.constant 0 : i32
    %c0_i32_0 = arith.constant 0 : i32
    %c0_i32_1 = arith.constant 0 : i32
    return %c0_i32, %c0_i32_0 : i32, i32
  }
  func.func @transform_4(%arg0: i32) -> (i32, i32) {
    %c0_i32 = arith.constant 0 : i32
    %c0_i32_0 = arith.constant 0 : i32
    return %arg0, %c0_i32 : i32, i32
  }
}

module attributes {stable_mosaic.version = 11 : i64} {
  func.func @_stage_blocks_kernel(%arg0: i32, %arg1: i32, %arg2: memref<8x256xbf16, #tpu.memory_space<vmem>>, %arg3: memref<1x1x256xf32, #tpu.memory_space<vmem>>, %arg4: memref<1x1x256xf32, #tpu.memory_space<vmem>>, %arg5: memref<1x256x1024xbf16, #tpu.memory_space<vmem>>, %arg6: memref<1x1024x256xbf16, #tpu.memory_space<vmem>>, %arg7: memref<1x1x256xf32, #tpu.memory_space<vmem>>, %arg8: memref<1x1x256xf32, #tpu.memory_space<vmem>>, %arg9: memref<1x2xf32, #tpu.memory_space<smem>>, %arg10: memref<1x256xf32, #tpu.memory_space<vmem>>, %arg11: memref<8x256xbf16, #tpu.memory_space<vmem>>, %arg12: memref<8x256xf32, #tpu.memory_space<vmem>>) attributes {dimension_semantics = [#tpu.dimension_semantics<parallel>, #tpu.dimension_semantics<arbitrary>], iteration_bounds = array<i64: 1, 1>, scalar_prefetch = 0 : i64, scratch_operands = 1 : i64, tpu.core_type = #tpu.core_type<tc>, window_params = [{transform_indices = @transform_0, window_bounds = array<i64: 8, 256>}, {transform_indices = @transform_1, window_bounds = array<i64: 1, 1, 256>}, {transform_indices = @transform_2, window_bounds = array<i64: 1, 1, 256>}, {transform_indices = @transform_3, window_bounds = array<i64: 1, 256, 1024>}, {transform_indices = @transform_4, window_bounds = array<i64: 1, 1024, 256>}, {transform_indices = @transform_5, window_bounds = array<i64: 1, 1, 256>}, {transform_indices = @transform_6, window_bounds = array<i64: 1, 1, 256>}, {transform_indices = @transform_7, window_bounds = array<i64: 1, 2>}, {pipeline_mode = #tpu.pipeline_mode<synchronous>, transform_indices = @transform_8, window_bounds = array<i64: 1, 256>}, {transform_indices = @transform_9, window_bounds = array<i64: 8, 256>}]} {
    %c0_i32 = arith.constant 0 : i32
    %0 = arith.cmpi eq, %arg1, %c0_i32 : i32
    %1 = arith.extui %0 : i1 to i32
    %c0_i32_0 = arith.constant 0 : i32
    %2 = arith.cmpi ne, %1, %c0_i32_0 : i32
    scf.if %2 {
      %c0_45 = arith.constant 0 : index
      %c0_46 = arith.constant 0 : index
      %92 = vector.load %arg2[%c0_45, %c0_46] : memref<8x256xbf16, #tpu.memory_space<vmem>>, vector<8x256xbf16>
      %93 = arith.extf %92 : vector<8x256xbf16> to vector<8x256xf32>
      %c0_47 = arith.constant 0 : index
      %c0_48 = arith.constant 0 : index
      %94 = vector.load %arg12[%c0_47, %c0_48] : memref<8x256xf32, #tpu.memory_space<vmem>>, vector<8x256xf32>
      tpu.vector_store %arg12[%c0_47, %c0_48], %93 {strides = array<i32>} : memref<8x256xf32, #tpu.memory_space<vmem>>, vector<8x256xf32>,
    } else {
    }
    %c0 = arith.constant 0 : index
    %c0_1 = arith.constant 0 : index
    %3 = vector.load %arg12[%c0, %c0_1] : memref<8x256xf32, #tpu.memory_space<vmem>>, vector<8x256xf32>
    %c0_2 = arith.constant 0 : index
    %c0_3 = arith.constant 0 : index
    %c0_4 = arith.constant 0 : index
    %4 = vector.load %arg3[%c0_2, %c0_3, %c0_4] : memref<1x1x256xf32, #tpu.memory_space<vmem>>, vector<1x1x256xf32>
    %5 = vector.shape_cast %4 : vector<1x1x256xf32> to vector<1x256xf32>
    %c0_5 = arith.constant 0 : index
    %c0_6 = arith.constant 0 : index
    %c0_7 = arith.constant 0 : index
    %6 = vector.load %arg4[%c0_5, %c0_6, %c0_7] : memref<1x1x256xf32, #tpu.memory_space<vmem>>, vector<1x1x256xf32>
    %7 = vector.shape_cast %6 : vector<1x1x256xf32> to vector<1x256xf32>
    %c0_8 = arith.constant 0 : index
    %c0_9 = arith.constant 0 : index
    %c0_10 = arith.constant 0 : index
    %8 = vector.load %arg7[%c0_8, %c0_9, %c0_10] : memref<1x1x256xf32, #tpu.memory_space<vmem>>, vector<1x1x256xf32>
    %9 = vector.shape_cast %8 : vector<1x1x256xf32> to vector<1x256xf32>
    %c0_11 = arith.constant 0 : index
    %c0_12 = arith.constant 0 : index
    %c0_13 = arith.constant 0 : index
    %10 = vector.load %arg8[%c0_11, %c0_12, %c0_13] : memref<1x1x256xf32, #tpu.memory_space<vmem>>, vector<1x1x256xf32>
    %11 = vector.shape_cast %10 : vector<1x1x256xf32> to vector<1x256xf32>
    %12 = arith.index_cast %arg1 : i32 to index
    %c0_14 = arith.constant 0 : index
    %13 = memref.load %arg9[%12, %c0_14] : memref<1x2xf32, #tpu.memory_space<smem>>
    %14 = arith.index_cast %arg1 : i32 to index
    %c1 = arith.constant 1 : index
    %15 = memref.load %arg9[%14, %c1] : memref<1x2xf32, #tpu.memory_space<smem>>
    %16 = vector.broadcast %9 : vector<1x256xf32> to vector<8x256xf32>
    %17 = arith.mulf %3, %16 : vector<8x256xf32>
    %cst = arith.constant dense<0.000000e+00> : vector<8xf32>
    %18 = vector.multi_reduction <add>, %3, %cst [1] : vector<8x256xf32> to vector<8xf32>
    %19 = vector.shape_cast %18 : vector<8xf32> to vector<8x1xf32>
    %cst_15 = arith.constant 2.560000e+02 : f32
    %20 = vector.broadcast %cst_15 : f32 to vector<8x1xf32>
    %21 = arith.divf %19, %20 : vector<8x1xf32>
    %22 = vector.broadcast %21 : vector<8x1xf32> to vector<8x256xf32>
    %23 = arith.subf %3, %22 : vector<8x256xf32>
    %24 = arith.mulf %23, %23 : vector<8x256xf32>
    %cst_16 = arith.constant dense<0.000000e+00> : vector<8xf32>
    %25 = vector.multi_reduction <add>, %24, %cst_16 [1] : vector<8x256xf32> to vector<8xf32>
    %26 = vector.shape_cast %25 : vector<8xf32> to vector<8x1xf32>
    %cst_17 = arith.constant 2.560000e+02 : f32
    %27 = vector.broadcast %cst_17 : f32 to vector<8x1xf32>
    %28 = arith.divf %26, %27 : vector<8x1xf32>
    %cst_18 = arith.constant 9.99999997E-7 : f32
    %29 = vector.broadcast %cst_18 : f32 to vector<8x1xf32>
    %30 = arith.addf %28, %29 : vector<8x1xf32>
    %31 = math.rsqrt %30 : vector<8x1xf32>
    %32 = vector.broadcast %31 : vector<8x1xf32> to vector<8x256xf32>
    %33 = arith.mulf %23, %32 : vector<8x256xf32>
    %34 = vector.broadcast %5 : vector<1x256xf32> to vector<8x256xf32>
    %35 = arith.mulf %33, %34 : vector<8x256xf32>
    %36 = arith.addf %17, %35 : vector<8x256xf32>
    %cst_19 = arith.constant dense<0.000000e+00> : vector<8xf32>
    %37 = vector.multi_reduction <add>, %36, %cst_19 [1] : vector<8x256xf32> to vector<8xf32>
    %38 = vector.shape_cast %37 : vector<8xf32> to vector<8x1xf32>
    %cst_20 = arith.constant 2.560000e+02 : f32
    %39 = vector.broadcast %cst_20 : f32 to vector<8x1xf32>
    %40 = arith.divf %38, %39 : vector<8x1xf32>
    %41 = vector.broadcast %40 : vector<8x1xf32> to vector<8x256xf32>
    %42 = arith.subf %36, %41 : vector<8x256xf32>
    %43 = arith.mulf %42, %42 : vector<8x256xf32>
    %cst_21 = arith.constant dense<0.000000e+00> : vector<8xf32>
    %44 = vector.multi_reduction <add>, %43, %cst_21 [1] : vector<8x256xf32> to vector<8xf32>
    %45 = vector.shape_cast %44 : vector<8xf32> to vector<8x1xf32>
    %cst_22 = arith.constant 2.560000e+02 : f32
    %46 = vector.broadcast %cst_22 : f32 to vector<8x1xf32>
    %47 = arith.divf %45, %46 : vector<8x1xf32>
    %cst_23 = arith.constant 9.99999997E-7 : f32
    %48 = vector.broadcast %cst_23 : f32 to vector<8x1xf32>
    %49 = arith.addf %47, %48 : vector<8x1xf32>
    %50 = math.rsqrt %49 : vector<8x1xf32>
    %51 = vector.broadcast %50 : vector<8x1xf32> to vector<8x256xf32>
    %52 = arith.mulf %42, %51 : vector<8x256xf32>
    %53 = vector.broadcast %7 : vector<1x256xf32> to vector<8x256xf32>
    %54 = arith.mulf %52, %53 : vector<8x256xf32>
    %55 = arith.truncf %54 : vector<8x256xf32> to vector<8x256xbf16>
    %c0_24 = arith.constant 0 : index
    %c0_25 = arith.constant 0 : index
    %c0_26 = arith.constant 0 : index
    %56 = vector.load %arg5[%c0_24, %c0_25, %c0_26] : memref<1x256x1024xbf16, #tpu.memory_space<vmem>>, vector<1x256x512xbf16>
    %57 = vector.shape_cast %56 : vector<1x256x512xbf16> to vector<256x512xbf16>
    %cst_27 = arith.constant dense<0.000000e+00> : vector<8x512xf32>
    %58 = tpu.matmul %55, %57, %cst_27 {dimension_numbers = #tpu.dot_dimension_numbers<[1], [0], [0], [1], [0, 0, 1, 1], [], []>} : vector<8x256xbf16>, vector<256x512xbf16>, vector<8x512xf32> -> vector<8x512xf32>
    %cst_28 = arith.constant 0.000000e+00 : f32
    %59 = vector.broadcast %cst_28 : f32 to vector<8x512xf32>
    %60 = arith.maximumf %58, %59 : vector<8x512xf32>
    %61 = arith.mulf %60, %60 : vector<8x512xf32>
    %62 = vector.broadcast %13 : f32 to vector<8x512xf32>
    %63 = arith.mulf %62, %61 : vector<8x512xf32>
    %64 = vector.broadcast %15 : f32 to vector<8x512xf32>
    %65 = arith.addf %63, %64 : vector<8x512xf32>
    %66 = arith.truncf %65 : vector<8x512xf32> to vector<8x512xbf16>
    %c0_29 = arith.constant 0 : index
    %c0_30 = arith.constant 0 : index
    %c0_31 = arith.constant 0 : index
    %67 = vector.load %arg6[%c0_29, %c0_30, %c0_31] : memref<1x1024x256xbf16, #tpu.memory_space<vmem>>, vector<1x512x256xbf16>
    %68 = vector.shape_cast %67 : vector<1x512x256xbf16> to vector<512x256xbf16>
    %cst_32 = arith.constant dense<0.000000e+00> : vector<8x256xf32>
    %69 = tpu.matmul %66, %68, %cst_32 {dimension_numbers = #tpu.dot_dimension_numbers<[1], [0], [0], [1], [0, 0, 1, 1], [], []>} : vector<8x512xbf16>, vector<512x256xbf16>, vector<8x256xf32> -> vector<8x256xf32>
    %c0_33 = arith.constant 0 : index
    %c0_34 = arith.constant 0 : index
    %c512 = arith.constant 512 : index
    %70 = vector.load %arg5[%c0_33, %c0_34, %c512] : memref<1x256x1024xbf16, #tpu.memory_space<vmem>>, vector<1x256x512xbf16>
    %71 = vector.shape_cast %70 : vector<1x256x512xbf16> to vector<256x512xbf16>
    %cst_35 = arith.constant dense<0.000000e+00> : vector<8x512xf32>
    %72 = tpu.matmul %55, %71, %cst_35 {dimension_numbers = #tpu.dot_dimension_numbers<[1], [0], [0], [1], [0, 0, 1, 1], [], []>} : vector<8x256xbf16>, vector<256x512xbf16>, vector<8x512xf32> -> vector<8x512xf32>
    %cst_36 = arith.constant 0.000000e+00 : f32
    %73 = vector.broadcast %cst_36 : f32 to vector<8x512xf32>
    %74 = arith.maximumf %72, %73 : vector<8x512xf32>
    %75 = arith.mulf %74, %74 : vector<8x512xf32>
    %76 = vector.broadcast %13 : f32 to vector<8x512xf32>
    %77 = arith.mulf %76, %75 : vector<8x512xf32>
    %78 = vector.broadcast %15 : f32 to vector<8x512xf32>
    %79 = arith.addf %77, %78 : vector<8x512xf32>
    %80 = arith.truncf %79 : vector<8x512xf32> to vector<8x512xbf16>
    %c0_37 = arith.constant 0 : index
    %c512_38 = arith.constant 512 : index
    %c0_39 = arith.constant 0 : index
    %81 = vector.load %arg6[%c0_37, %c512_38, %c0_39] : memref<1x1024x256xbf16, #tpu.memory_space<vmem>>, vector<1x512x256xbf16>
    %82 = vector.shape_cast %81 : vector<1x512x256xbf16> to vector<512x256xbf16>
    %cst_40 = arith.constant dense<0.000000e+00> : vector<8x256xf32>
    %83 = tpu.matmul %80, %82, %cst_40 {dimension_numbers = #tpu.dot_dimension_numbers<[1], [0], [0], [1], [0, 0, 1, 1], [], []>} : vector<8x512xbf16>, vector<512x256xbf16>, vector<8x256xf32> -> vector<8x256xf32>
    %84 = arith.addf %69, %83 : vector<8x256xf32>
    %85 = vector.broadcast %11 : vector<1x256xf32> to vector<8x256xf32>
    %86 = arith.mulf %36, %85 : vector<8x256xf32>
    %87 = arith.addf %86, %84 : vector<8x256xf32>
    %c0_41 = arith.constant 0 : index
    %c0_42 = arith.constant 0 : index
    %88 = vector.load %arg12[%c0_41, %c0_42] : memref<8x256xf32, #tpu.memory_space<vmem>>, vector<8x256xf32>
    tpu.vector_store %arg12[%c0_41, %c0_42], %87 {strides = array<i32>} : memref<8x256xf32, #tpu.memory_space<vmem>>, vector<8x256xf32>,
    %c0_i32_43 = arith.constant 0 : i32
    %89 = arith.cmpi eq, %arg1, %c0_i32_43 : i32
    %90 = arith.extui %89 : i1 to i32
    %c0_i32_44 = arith.constant 0 : i32
    %91 = arith.cmpi ne, %90, %c0_i32_44 : i32
    scf.if %91 {
      %92 = arith.truncf %87 : vector<8x256xf32> to vector<8x256xbf16>
      %c0_45 = arith.constant 0 : index
      %c0_46 = arith.constant 0 : index
      %93 = vector.load %arg11[%c0_45, %c0_46] : memref<8x256xbf16, #tpu.memory_space<vmem>>, vector<8x256xbf16>
      tpu.vector_store %arg11[%c0_45, %c0_46], %92 {strides = array<i32>} : memref<8x256xbf16, #tpu.memory_space<vmem>>, vector<8x256xbf16>,
    } else {
    }
    return
  }
  func.func @transform_0(%arg0: i32, %arg1: i32) -> (i32, i32) {
    %c0_i32 = arith.constant 0 : i32
    %c0_i32_0 = arith.constant 0 : i32
    return %arg0, %c0_i32 : i32, i32
  }
  func.func @transform_1(%arg0: i32, %arg1: i32) -> (i32, i32, i32) {
    %c0_i32 = arith.constant 0 : i32
    %c0_i32_0 = arith.constant 0 : i32
    %c0_i32_1 = arith.constant 0 : i32
    return %arg1, %c0_i32, %c0_i32_0 : i32, i32, i32
  }
  func.func @transform_2(%arg0: i32, %arg1: i32) -> (i32, i32, i32) {
    %c0_i32 = arith.constant 0 : i32
    %c0_i32_0 = arith.constant 0 : i32
    %c0_i32_1 = arith.constant 0 : i32
    return %arg1, %c0_i32, %c0_i32_0 : i32, i32, i32
  }
  func.func @transform_3(%arg0: i32, %arg1: i32) -> (i32, i32, i32) {
    %c0_i32 = arith.constant 0 : i32
    %c0_i32_0 = arith.constant 0 : i32
    %c0_i32_1 = arith.constant 0 : i32
    return %arg1, %c0_i32, %c0_i32_0 : i32, i32, i32
  }
  func.func @transform_4(%arg0: i32, %arg1: i32) -> (i32, i32, i32) {
    %c0_i32 = arith.constant 0 : i32
    %c0_i32_0 = arith.constant 0 : i32
    %c0_i32_1 = arith.constant 0 : i32
    return %arg1, %c0_i32, %c0_i32_0 : i32, i32, i32
  }
  func.func @transform_5(%arg0: i32, %arg1: i32) -> (i32, i32, i32) {
    %c0_i32 = arith.constant 0 : i32
    %c0_i32_0 = arith.constant 0 : i32
    %c0_i32_1 = arith.constant 0 : i32
    return %arg1, %c0_i32, %c0_i32_0 : i32, i32, i32
  }
  func.func @transform_6(%arg0: i32, %arg1: i32) -> (i32, i32, i32) {
    %c0_i32 = arith.constant 0 : i32
    %c0_i32_0 = arith.constant 0 : i32
    %c0_i32_1 = arith.constant 0 : i32
    return %arg1, %c0_i32, %c0_i32_0 : i32, i32, i32
  }
  func.func @transform_7(%arg0: i32, %arg1: i32) -> (i32, i32) {
    %c0_i32 = arith.constant 0 : i32
    %c0_i32_0 = arith.constant 0 : i32
    %c0_i32_1 = arith.constant 0 : i32
    return %c0_i32, %c0_i32_0 : i32, i32
  }
  func.func @transform_8(%arg0: i32, %arg1: i32) -> (i32, i32) {
    %c0_i32 = arith.constant 0 : i32
    %c0_i32_0 = arith.constant 0 : i32
    %c0_i32_1 = arith.constant 0 : i32
    return %c0_i32, %c0_i32_0 : i32, i32
  }
  func.func @transform_9(%arg0: i32, %arg1: i32) -> (i32, i32) {
    %c0_i32 = arith.constant 0 : i32
    %c0_i32_0 = arith.constant 0 : i32
    return %arg0, %c0_i32 : i32, i32
  }
}

module attributes {stable_mosaic.version = 11 : i64} {
  func.func @_head_kernel(%arg0: i32, %arg1: memref<8x1x256xbf16, #tpu.memory_space<vmem>>, %arg2: memref<1x256xf32, #tpu.memory_space<vmem>>, %arg3: memref<1x256xf32, #tpu.memory_space<vmem>>, %arg4: memref<256x10xf32, #tpu.memory_space<vmem>>, %arg5: memref<1x10xf32, #tpu.memory_space<vmem>>, %arg6: memref<8x10xf32, #tpu.memory_space<vmem>>) attributes {dimension_semantics = [#tpu.dimension_semantics<parallel>], iteration_bounds = array<i64: 1>, scalar_prefetch = 0 : i64, scratch_operands = 0 : i64, tpu.core_type = #tpu.core_type<tc>, window_params = [{transform_indices = @transform_0, window_bounds = array<i64: 8, 1, 256>}, {pipeline_mode = #tpu.pipeline_mode<synchronous>, transform_indices = @transform_1, window_bounds = array<i64: 1, 256>}, {pipeline_mode = #tpu.pipeline_mode<synchronous>, transform_indices = @transform_2, window_bounds = array<i64: 1, 256>}, {pipeline_mode = #tpu.pipeline_mode<synchronous>, transform_indices = @transform_3, window_bounds = array<i64: 256, 10>}, {pipeline_mode = #tpu.pipeline_mode<synchronous>, transform_indices = @transform_4, window_bounds = array<i64: 1, 10>}, {transform_indices = @transform_5, window_bounds = array<i64: 8, 10>}]} {
    %c0 = arith.constant 0 : index
    %c0_0 = arith.constant 0 : index
    %c0_1 = arith.constant 0 : index
    %0 = vector.load %arg1[%c0, %c0_0, %c0_1] : memref<8x1x256xbf16, #tpu.memory_space<vmem>>, vector<8x1x256xbf16>
    %1 = arith.extf %0 : vector<8x1x256xbf16> to vector<8x1x256xf32>
    %cst = arith.constant dense<0.000000e+00> : vector<8x256xf32>
    %2 = vector.multi_reduction <add>, %1, %cst [1] : vector<8x1x256xf32> to vector<8x256xf32>
    %cst_2 = arith.constant 1.000000e+00 : f32
    %3 = vector.broadcast %cst_2 : f32 to vector<8x256xf32>
    %4 = arith.divf %2, %3 : vector<8x256xf32>
    %cst_3 = arith.constant dense<0.000000e+00> : vector<8xf32>
    %5 = vector.multi_reduction <add>, %4, %cst_3 [1] : vector<8x256xf32> to vector<8xf32>
    %6 = vector.shape_cast %5 : vector<8xf32> to vector<8x1xf32>
    %cst_4 = arith.constant 2.560000e+02 : f32
    %7 = vector.broadcast %cst_4 : f32 to vector<8x1xf32>
    %8 = arith.divf %6, %7 : vector<8x1xf32>
    %9 = vector.broadcast %8 : vector<8x1xf32> to vector<8x256xf32>
    %10 = arith.subf %4, %9 : vector<8x256xf32>
    %11 = arith.mulf %10, %10 : vector<8x256xf32>
    %cst_5 = arith.constant dense<0.000000e+00> : vector<8xf32>
    %12 = vector.multi_reduction <add>, %11, %cst_5 [1] : vector<8x256xf32> to vector<8xf32>
    %13 = vector.shape_cast %12 : vector<8xf32> to vector<8x1xf32>
    %cst_6 = arith.constant 2.560000e+02 : f32
    %14 = vector.broadcast %cst_6 : f32 to vector<8x1xf32>
    %15 = arith.divf %13, %14 : vector<8x1xf32>
    %cst_7 = arith.constant 9.99999997E-7 : f32
    %16 = vector.broadcast %cst_7 : f32 to vector<8x1xf32>
    %17 = arith.addf %15, %16 : vector<8x1xf32>
    %18 = math.rsqrt %17 : vector<8x1xf32>
    %19 = vector.broadcast %18 : vector<8x1xf32> to vector<8x256xf32>
    %20 = arith.mulf %10, %19 : vector<8x256xf32>
    %c0_8 = arith.constant 0 : index
    %c0_9 = arith.constant 0 : index
    %21 = vector.load %arg2[%c0_8, %c0_9] : memref<1x256xf32, #tpu.memory_space<vmem>>, vector<1x256xf32>
    %22 = vector.broadcast %21 : vector<1x256xf32> to vector<8x256xf32>
    %23 = arith.mulf %20, %22 : vector<8x256xf32>
    %c0_10 = arith.constant 0 : index
    %c0_11 = arith.constant 0 : index
    %24 = vector.load %arg3[%c0_10, %c0_11] : memref<1x256xf32, #tpu.memory_space<vmem>>, vector<1x256xf32>
    %25 = vector.broadcast %24 : vector<1x256xf32> to vector<8x256xf32>
    %26 = arith.addf %23, %25 : vector<8x256xf32>
    %c0_12 = arith.constant 0 : index
    %c0_13 = arith.constant 0 : index
    %27 = vector.load %arg4[%c0_12, %c0_13] : memref<256x10xf32, #tpu.memory_space<vmem>>, vector<256x10xf32>
    %cst_14 = arith.constant dense<0.000000e+00> : vector<8x10xf32>
    %28 = tpu.matmul %26, %27, %cst_14 {dimension_numbers = #tpu.dot_dimension_numbers<[1], [0], [0], [1], [0, 0, 1, 1], [], []>} : vector<8x256xf32>, vector<256x10xf32>, vector<8x10xf32> -> vector<8x10xf32>
    %c0_15 = arith.constant 0 : index
    %c0_16 = arith.constant 0 : index
    %29 = vector.load %arg5[%c0_15, %c0_16] : memref<1x10xf32, #tpu.memory_space<vmem>>, vector<1x10xf32>
    %30 = vector.broadcast %29 : vector<1x10xf32> to vector<8x10xf32>
    %31 = arith.addf %28, %30 : vector<8x10xf32>
    %c0_17 = arith.constant 0 : index
    %c0_18 = arith.constant 0 : index
    %32 = vector.load %arg6[%c0_17, %c0_18] : memref<8x10xf32, #tpu.memory_space<vmem>>, vector<8x10xf32>
    tpu.vector_store %arg6[%c0_17, %c0_18], %31 {strides = array<i32>} : memref<8x10xf32, #tpu.memory_space<vmem>>, vector<8x10xf32>,
    return
  }
  func.func @transform_0(%arg0: i32) -> (i32, i32, i32) {
    %c0_i32 = arith.constant 0 : i32
    %c0_i32_0 = arith.constant 0 : i32
    %c0_i32_1 = arith.constant 0 : i32
    return %arg0, %c0_i32, %c0_i32_0 : i32, i32, i32
  }
  func.func @transform_1(%arg0: i32) -> (i32, i32) {
    %c0_i32 = arith.constant 0 : i32
    %c0_i32_0 = arith.constant 0 : i32
    %c0_i32_1 = arith.constant 0 : i32
    return %c0_i32, %c0_i32_0 : i32, i32
  }
  func.func @transform_2(%arg0: i32) -> (i32, i32) {
    %c0_i32 = arith.constant 0 : i32
    %c0_i32_0 = arith.constant 0 : i32
    %c0_i32_1 = arith.constant 0 : i32
    return %c0_i32, %c0_i32_0 : i32, i32
  }
  func.func @transform_3(%arg0: i32) -> (i32, i32) {
    %c0_i32 = arith.constant 0 : i32
    %c0_i32_0 = arith.constant 0 : i32
    %c0_i32_1 = arith.constant 0 : i32
    return %c0_i32, %c0_i32_0 : i32, i32
  }
  func.func @transform_4(%arg0: i32) -> (i32, i32) {
    %c0_i32 = arith.constant 0 : i32
    %c0_i32_0 = arith.constant 0 : i32
    %c0_i32_1 = arith.constant 0 : i32
    return %c0_i32, %c0_i32_0 : i32, i32
  }
  func.func @transform_5(%arg0: i32) -> (i32, i32) {
    %c0_i32 = arith.constant 0 : i32
    %c0_i32_0 = arith.constant 0 : i32
    return %arg0, %c0_i32 : i32, i32
  }
}

</mosaic_0001>

<bundles_post_ra>
// kernel: metaformer_forward.9
= control target key start
LH: loop header
LB: loop body
LE: loop exit
PB: predicated region body
PF: predicated region fallthrough
CT: control target
= control target key end

     0   :  { %v792_v0 = vmov 0   ;;  %vm189_vm0 = vcmask 154624   ;;  %vm214_vm1 = vcmask 1040384   ;;  %vm215_vm2 = vcmask 1041408   ;;  %s1187_s1 = inlined_call_operand.vmem [shape: bf16[147,32], index: 1, kind: input, shape index: {}]   ;;  %s1188_s0 = inlined_call_operand.vmem [shape: bf16[128,147], index: 0, kind: input, shape index: {}]   ;;  %s1189_s2 = inlined_call_operand.vmem [shape: f32[1,32], index: 2, kind: input, shape index: {}]   ;;  %s1190_s3 = inlined_call_operand.vmem [shape: f32[1,32], index: 3, kind: input, shape index: {}]   ;;  %s1191_s4 = inlined_call_operand.vmem [shape: bf16[128,32], index: 4, kind: output, shape index: {}]  }
   0x1   :  { %221 = vmatprep.subr.bf16.mxu0 %v792_v0  ;;  %704 = vmatprep.subr.bf16.mxu1 %v792_v0  ;;  %v726_v1 = vld [vmem:[%s1187_s1 + $0x38] sm:$0xff]   ;;  %v727_v2 = vld [vmem:[%s1187_s1 + $0x30] sm:$0xff]   ;;  %v728_v3 = vld [vmem:[%s1187_s1 + $0x28] sm:$0xff]   ;;  %v793_v10 = vmov 65535   ;;  %vm319_vm3 = vcmask 261120   ;;  %vm615_vm4 = vcmask 257024  }
   0x2   :  { %222 = vmatpush1.bf16.msra.mxu0 %v726_v1  ;;  %714 = vmatpush1.bf16.msra.mxu1 %v726_v1  ;;  %v729_v4 = vld [vmem:[%s1187_s1 + $0x20] sm:$0xff]   ;;  %v730_v7 = vld [vmem:[%s1187_s1 + $0x18] sm:$0xff]   ;;  %v731_v8 = vld [vmem:[%s1187_s1 + $0x10] sm:$0xff]   ;;  %v216_v11 = vsel %vm214_vm1, 4294967295, %v793_v10 }
   0x3   :  { %223 = vmatprep.subr.bf16.mxu0 %v792_v0  ;;  %705 = vmatprep.subr.bf16.mxu1 %v792_v0  ;;  %v738_v5 = vld [vmem:[%s1188_s0 + $0x4] ss:$8 sps:$4 sm:$0xff]   ;;  %v734_v13 = vld [vmem:[%s1187_s1 + $0x48] ss:$0 sps:$4 sm:$0x33]   ;;  %v217_v14 = vsel %vm215_vm2, %v216_v11, 0 }
   0x4   :  { %663 = vmatprep.mubr.msk.bf16.mxu0 %vm189_vm0, %v738_v5  ;;  %v741_v6 = vld [vmem:[%s1188_s0 + $0x44] ss:$8 sps:$4 sm:$0xff]   ;;  %v219_v15 = vand.u32 %v734_v13, %v217_v14  ;;  %v736_v17 = vld [vmem:[%s1188_s0] ss:$8 sps:$4 sm:$0xff]   ;;  %v742_v19 = vld [vmem:[%s1188_s0 + $0x14] ss:$8 sps:$4 sm:$0xff]  }
   0x5   :  { %667 = vmatprep.mubr.msk.bf16.mxu1 %vm189_vm0, %v741_v6  ;;  %v732_v9 = vld [vmem:[%s1187_s1 + $0x8] sm:$0xff]   ;;  %v733_v12 = vld [vmem:[%s1187_s1] sm:$0xff]   ;;  %v745_v20 = vld [vmem:[%s1188_s0 + $0x54] ss:$8 sps:$4 sm:$0xff]  }
   0x6   :  { %224 = vmatpush1.bf16.msra.mxu0 %v727_v2  ;;  %715 = vmatpush1.bf16.msra.mxu1 %v727_v2  ;;  %v735_v16 = vld [vmem:[%s1187_s1 + $0x40] sm:$0xff]   ;;  %v744_v21 = vld [vmem:[%s1188_s0 + $0x10] ss:$8 sps:$4 sm:$0xff]   ;;  %v754_v27 = vld [vmem:[%s1188_s0 + $0x34] ss:$8 sps:$4 sm:$0xff]  }
   0x7   :  { %225 = vmatprep.subr.bf16.mxu0 %v792_v0  ;;  %706 = vmatprep.subr.bf16.mxu1 %v792_v0  ;;  %v739_v18 = vld [vmem:[%s1188_s0 + $0x40] ss:$8 sps:$4 sm:$0xff]   ;;  %v747_v22 = vld [vmem:[%s1188_s0 + $0x50] ss:$8 sps:$4 sm:$0xff]   ;;  %v748_v23 = vld [vmem:[%s1188_s0 + $0x24] ss:$8 sps:$4 sm:$0xff]  }
   0x8   :  { %v751_v24 = vld [vmem:[%s1188_s0 + $0x64] ss:$8 sps:$4 sm:$0xff]   ;;  %v750_v25 = vld [vmem:[%s1188_s0 + $0x20] ss:$8 sps:$4 sm:$0xff]   ;;  %v757_v28 = vld [vmem:[%s1188_s0 + $0x74] ss:$8 sps:$4 sm:$0xff]  }
   0x9   :  { %v753_v26 = vld [vmem:[%s1188_s0 + $0x60] ss:$8 sps:$4 sm:$0xff]   ;;  %v756_v29 = vld [vmem:[%s1188_s0 + $0x30] ss:$8 sps:$4 sm:$0xff]  }
   0xa   :  { %226 = vmatpush1.bf16.msra.mxu0 %v728_v3  ;;  %716 = vmatpush1.bf16.msra.mxu1 %v728_v3  ;;  %v759_v30 = vld [vmem:[%s1188_s0 + $0x70] ss:$8 sps:$4 sm:$0xff]   ;;  %v908_v31 = vld [vmem:[%s1189_s2] ss:$0 sm:$0xff] }
   0xb   :  { %227 = vmatprep.subr.bf16.mxu0 %v792_v0  ;;  %707 = vmatprep.subr.bf16.mxu1 %v792_v0 }
   0xe   :  { %228 = vmatpush1.bf16.msra.mxu0 %v729_v4  ;;  %717 = vmatpush1.bf16.msra.mxu1 %v729_v4 }
   0xf   :  { %229 = vmatprep.subr.bf16.mxu0 %v792_v0  ;;  %708 = vmatprep.subr.bf16.mxu1 %v792_v0 }
  0x12   :  { %230 = vmatpush1.bf16.msra.mxu0 %v730_v7  ;;  %718 = vmatpush1.bf16.msra.mxu1 %v730_v7 }
  0x13   :  { %231 = vmatprep.subr.bf16.mxu0 %v792_v0  ;;  %709 = vmatprep.subr.bf16.mxu1 %v792_v0 }
  0x16   :  { %232 = vmatpush1.bf16.msra.mxu0 %v731_v8  ;;  %719 = vmatpush1.bf16.msra.mxu1 %v731_v8 }
  0x17   :  { %233 = vmatprep.subr.bf16.mxu0 %v792_v0  ;;  %710 = vmatprep.subr.bf16.mxu1 %v792_v0 }
  0x1a   :  { %234 = vmatpush1.bf16.msra.mxu0 %v732_v9  ;;  %720 = vmatpush1.bf16.msra.mxu1 %v732_v9 }
  0x1b   :  { %235 = vmatprep.subr.bf16.mxu0 %v792_v0  ;;  %711 = vmatprep.subr.bf16.mxu1 %v792_v0 }
  0x1e   :  { %236 = vmatpush1.bf16.msra.mxu0 %v733_v12  ;;  %721 = vmatpush1.bf16.msra.mxu1 %v733_v12 }
  0x1f   :  { %249 = vmatprep.subr.bf16.mxu0 %v792_v0  ;;  %712 = vmatprep.subr.bf16.mxu1 %v792_v0 }
  0x22   :  { %250 = vmatpush2.bf16.msra.mxu0 %v219_v15  ;;  %722 = vmatpush2.bf16.msra.mxu1 %v219_v15 }
  0x23   :  { %251 = vmatprep.subr.bf16.mxu0 %v792_v0  ;;  %713 = vmatprep.subr.bf16.mxu1 %v792_v0 }
  0x26   :  { %252 = vmatpush2.bf16.msra.mxu0 %v735_v16  ;;  %723 = vmatpush2.bf16.msra.mxu1 %v735_v16 }
  0x29   :  { %254 = vmatmul.mubr.bf16.vlgmr.msra.gmra.mxu0 %v736_v17  ;;  %286 = vmatmul.mubr.bf16.vlgmr.msra.gmra.mxu1 %v739_v18 }
  0x2a   :  { %664 = vmatprep.mubr.msk.bf16.mxu0 %vm189_vm0, %v742_v19  ;;  %668 = vmatprep.mubr.msk.bf16.mxu1 %vm189_vm0, %v745_v20 }
  0x31   :  { %262 = vmatmul.mubr.bf16.gmra.mxu0 %v744_v21  ;;  %294 = vmatmul.mubr.bf16.gmra.mxu1 %v747_v22 }
  0x32   :  { %665 = vmatprep.mubr.msk.bf16.mxu0 %vm189_vm0, %v748_v23  ;;  %669 = vmatprep.mubr.msk.bf16.mxu1 %vm189_vm0, %v751_v24 }
  0x39   :  { %270 = vmatmul.mubr.bf16.gmra.mxu0 %v750_v25  ;;  %302 = vmatmul.mubr.bf16.gmra.mxu1 %v753_v26 }
  0x3a   :  { %666 = vmatprep.mubr.msk.bf16.mxu0 %vm189_vm0, %v754_v27  ;;  %670 = vmatprep.mubr.msk.bf16.mxu1 %vm189_vm0, %v757_v28 }
  0x41   :  { %278 = vmatmul.mubr.bf16.gmra.mxu0 %v756_v29  ;;  %310 = vmatmul.mubr.bf16.gmra.mxu1 %v759_v30 }
  0xe9   :  { %v255_v32 = vpop.f32.mrf.mxu0  ;;  %v287_v33 = vpop.f32.mrf.mxu1 }
  0xea   :  { %v911_v34 = vadd.f32 %v908_v31, %v255_v32  ;;  %v914_v35 = vadd.f32 %v908_v31, %v287_v33 }
  0xeb   :  { %v257_v36 = vpop.f32.mrf.mxu0  ;;  %v289_v37 = vpop.f32.mrf.mxu1 }
  0xec   :  { %v320_v38 = vsel %vm319_vm3, %v911_v34, 0.0  ;;  %v344_v42 = vsel %vm319_vm3, %v914_v35, 0.0 }
  0xed   :  { %v258_v39 = vpop.f32.mrf.mxu0  ;;  %v290_v40 = vpop.f32.mrf.mxu1  ;;  %321 = vadd.xlane.f32.xlu0 %v320_v38 }
  0xee   :  { %v919_v41 = vadd.f32 %v908_v31, %v290_v40  ;;  %v924_v45 = vadd.f32 %v908_v31, %v258_v39 }
  0xef   :  { %v260_v43 = vpop.f32.mrf.mxu0  ;;  %v292_v44 = vpop.f32.mrf.mxu1 }
  0xf0   :  { %v347_v46 = vsel %vm319_vm3, %v919_v41, 0.0  ;;  %v323_v54 = vsel %vm319_vm3, %v924_v45, 0.0 }
  0xf1   :  { %348 = vadd.xlane.f32.xlu1 %v347_v46  ;;  %v263_v47 = vpop.f32.mrf.mxu0  ;;  %345 = vadd.xlane.f32.xlu0 %v344_v42  ;;  %v295_v48 = vpop.f32.mrf.mxu1 }
  0xf2   :  { %v929_v49 = vadd.f32 %v908_v31, %v263_v47  ;;  %v932_v50 = vadd.f32 %v908_v31, %v295_v48 }
  0xf3   :  { %v265_v51 = vpop.f32.mrf.mxu0  ;;  %v297_v52 = vpop.f32.mrf.mxu1 }
  0xf4   :  { %v326_v53 = vsel %vm319_vm3, %v929_v49, 0.0  ;;  %v350_v59 = vsel %vm319_vm3, %v932_v50, 0.0 }
  0xf5   :  { %v266_v55 = vpop.f32.mrf.mxu0  ;;  %327 = vadd.xlane.f32.xlu1 %v326_v53  ;;  %324 = vadd.xlane.f32.xlu0 %v323_v54  ;;  %v298_v56 = vpop.f32.mrf.mxu1 }
  0xf6   :  { %v939_v57 = vadd.f32 %v908_v31, %v266_v55  ;;  %v942_v58 = vadd.f32 %v908_v31, %v298_v56 }
  0xf7   :  { %v268_v60 = vpop.f32.mrf.mxu0  ;;  %v300_v61 = vpop.f32.mrf.mxu1 }
  0xf8   :  { %v329_v62 = vsel %vm319_vm3, %v939_v57, 0.0  ;;  %v353_v3 = vsel %vm319_vm3, %v942_v58, 0.0 }
  0xf9   :  { %v271_v63 = vpop.f32.mrf.mxu0  ;;  %330 = vadd.xlane.f32.xlu1 %v329_v62  ;;  %351 = vadd.xlane.f32.xlu0 %v350_v59  ;;  %v303_v0 = vpop.f32.mrf.mxu1 }
  0xfa   :  { %v949_v1 = vadd.f32 %v908_v31, %v271_v63  ;;  %v952_v2 = vadd.f32 %v908_v31, %v303_v0 }
  0xfb   :  { %v273_v4 = vpop.f32.mrf.mxu0  ;;  %v305_v5 = vpop.f32.mrf.mxu1 }
  0xfc   :  { %v332_v6 = vsel %vm319_vm3, %v949_v1, 0.0  ;;  %v356_v11 = vsel %vm319_vm3, %v952_v2, 0.0 }
  0xfd   :  { %v274_v7 = vpop.f32.mrf.mxu0  ;;  %354 = vadd.xlane.f32.xlu1 %v353_v3  ;;  %333 = vadd.xlane.f32.xlu0 %v332_v6  ;;  %v306_v8 = vpop.f32.mrf.mxu1 }
  0xfe   :  { %v959_v9 = vadd.f32 %v908_v31, %v274_v7  ;;  %v962_v10 = vadd.f32 %v908_v31, %v306_v8 }
  0xff   :  { %v276_v12 = vpop.f32.mrf.mxu0  ;;  %v308_v13 = vpop.f32.mrf.mxu1 }
 0x100   :  { %v335_v14 = vsel %vm319_vm3, %v959_v9, 0.0  ;;  %v359_v19 = vsel %vm319_vm3, %v962_v10, 0.0 }
 0x101   :  { %v279_v15 = vpop.f32.mrf.mxu0  ;;  %336 = vadd.xlane.f32.xlu1 %v335_v14  ;;  %357 = vadd.xlane.f32.xlu0 %v356_v11  ;;  %v311_v16 = vpop.f32.mrf.mxu1 }
 0x102   :  { %v969_v17 = vadd.f32 %v908_v31, %v279_v15  ;;  %v972_v18 = vadd.f32 %v908_v31, %v311_v16 }
 0x103   :  { %v281_v20 = vpop.f32.mrf.mxu0  ;;  %v313_v21 = vpop.f32.mrf.mxu1 }
 0x104   :  { %v338_v22 = vsel %vm319_vm3, %v969_v17, 0.0  ;;  %v362_v27 = vsel %vm319_vm3, %v972_v18, 0.0 }
 0x105   :  { %v282_v23 = vpop.f32.mrf.mxu0  ;;  %360 = vadd.xlane.f32.xlu1 %v359_v19  ;;  %339 = vadd.xlane.f32.xlu0 %v338_v22  ;;  %v314_v24 = vpop.f32.mrf.mxu1 }
 0x106   :  { %v979_v25 = vadd.f32 %v908_v31, %v282_v23  ;;  %v982_v26 = vadd.f32 %v908_v31, %v314_v24 }
 0x107   :  { %v284_v28 = vpop.f32.mrf.mxu0  ;;  %v316_v29 = vpop.f32.mrf.mxu1 }
 0x108   :  { %v341_v30 = vsel %vm319_vm3, %v979_v25, 0.0  ;;  %v365_v32 = vsel %vm319_vm3, %v982_v26, 0.0 }
 0x109   :  { %342 = vadd.xlane.f32.xlu1 %v341_v30  ;;  %363 = vadd.xlane.f32.xlu0 %v362_v27 }
 0x10d   :  { %366 = vadd.xlane.f32.xlu1 %v365_v32 }
 0x176   :  { %v322_v33 = vpop.xlane.xlu0 %321 }
 0x177   :  { %v369_v36 = vmul.f32 0.03125, %v322_v33 }
 0x179   :  { %v991_v37 = vsub.f32 %v911_v34, %v369_v36 }
 0x17a   :  { %v349_v31 = vpop.xlane.xlu1 %348  ;;  %v346_v38 = vpop.xlane.xlu0 %345 }
 0x17b   :  { %v377_v39 = vmul.f32 0.03125, %v346_v38  ;;  %v401_v40 = vmul.f32 %v991_v37, %v991_v37  ;;  %v378_v42 = vmul.f32 0.03125, %v349_v31 }
 0x17d   :  { %v996_v43 = vsub.f32 %v914_v35, %v377_v39  ;;  %v417_v44 = vsel %vm319_vm3, %v401_v40, 0.0  ;;  %v1002_v52 = vsub.f32 %v919_v41, %v378_v42 }
 0x17e   :  { %v328_v46 = vpop.xlane.xlu1 %327  ;;  %418 = vadd.xlane.f32.xlu0 %v417_v44  ;;  %v325_v47 = vpop.xlane.xlu0 %324 }
 0x17f   :  { %v371_v48 = vmul.f32 0.03125, %v328_v46  ;;  %v370_v51 = vmul.f32 0.03125, %v325_v47  ;;  %v409_v34 = vmul.f32 %v996_v43, %v996_v43 }
 0x181   :  { %v1005_v53 = vsub.f32 %v929_v49, %v371_v48  ;;  %v1008_v54 = vsub.f32 %v924_v45, %v370_v51  ;;  %v441_v35 = vsel %vm319_vm3, %v409_v34, 0.0  ;;  %v410_v49 = vmul.f32 %v1002_v52, %v1002_v52 }
 0x182   :  { %v331_v55 = vpop.xlane.xlu1 %330  ;;  %442 = vadd.xlane.f32.xlu0 %v441_v35  ;;  %v352_v56 = vpop.xlane.xlu0 %351 }
 0x183   :  { %v372_v59 = vmul.f32 0.03125, %v331_v55  ;;  %v379_v60 = vmul.f32 0.03125, %v352_v56  ;;  %v403_v61 = vmul.f32 %v1005_v53, %v1005_v53  ;;  %v402_v41 = vmul.f32 %v1008_v54, %v1008_v54 }
 0x184   :  { %v444_v11 = vsel %vm319_vm3, %v410_v49, 0.0 }
 0x185   :  { %v1018_v62 = vsub.f32 %v939_v57, %v372_v59  ;;  %v1021_v45 = vsub.f32 %v932_v50, %v379_v60  ;;  %v423_v63 = vsel %vm319_vm3, %v403_v61, 0.0  ;;  %v420_v0 = vsel %vm319_vm3, %v402_v41, 0.0 }
 0x186   :  { %v355_v3 = vpop.xlane.xlu1 %354  ;;  %424 = vadd.xlane.f32.xlu0 %v423_v63  ;;  %421 = vadd.xlane.f32.xlu1 %v420_v0  ;;  %v334_v4 = vpop.xlane.xlu0 %333 }
 0x187   :  { %v380_v5 = vmul.f32 0.03125, %v355_v3  ;;  %v373_v6 = vmul.f32 0.03125, %v334_v4  ;;  %v411_v7 = vmul.f32 %v1021_v45, %v1021_v45  ;;  %v404_v57 = vmul.f32 %v1018_v62, %v1018_v62 }
 0x189   :  { %v1030_v8 = vsub.f32 %v942_v58, %v380_v5  ;;  %v1033_v50 = vsub.f32 %v949_v1, %v373_v6  ;;  %v447_v12 = vsel %vm319_vm3, %v411_v7, 0.0  ;;  %v426_v20 = vsel %vm319_vm3, %v404_v57, 0.0 }
 0x18a   :  { %v337_v13 = vpop.xlane.xlu1 %336  ;;  %445 = vadd.xlane.f32.xlu1 %v444_v11  ;;  %448 = vadd.xlane.f32.xlu0 %v447_v12  ;;  %v358_v14 = vpop.xlane.xlu0 %357 }
 0x18b   :  { %v374_v15 = vmul.f32 0.03125, %v337_v13  ;;  %v381_v16 = vmul.f32 0.03125, %v358_v14  ;;  %v405_v19 = vmul.f32 %v1033_v50, %v1033_v50  ;;  %v412_v22 = vmul.f32 %v1030_v8, %v1030_v8 }
 0x18d   :  { %v1041_v58 = vsub.f32 %v959_v9, %v374_v15  ;;  %v1044_v1 = vsub.f32 %v952_v2, %v381_v16  ;;  %v429_v21 = vsel %vm319_vm3, %v405_v19, 0.0  ;;  %v450_v32 = vsel %vm319_vm3, %v412_v22, 0.0 }
 0x18e   :  { %v361_v23 = vpop.xlane.xlu1 %360  ;;  %427 = vadd.xlane.f32.xlu1 %v426_v20  ;;  %430 = vadd.xlane.f32.xlu0 %v429_v21  ;;  %v340_v24 = vpop.xlane.xlu0 %339 }
 0x18f   :  { %v382_v27 = vmul.f32 0.03125, %v361_v23  ;;  %v375_v28 = vmul.f32 0.03125, %v340_v24  ;;  %v413_v29 = vmul.f32 %v1044_v1, %v1044_v1  ;;  %v406_v9 = vmul.f32 %v1041_v58, %v1041_v58  ;;  %v1089_v23 = vld [vmem:[%s1190_s3] ss:$0 sm:$0xff] }
 0x191   :  { %v1054_v2 = vsub.f32 %v962_v10, %v382_v27  ;;  %v1057_v30 = vsub.f32 %v969_v17, %v375_v28  ;;  %v453_v33 = vsel %vm319_vm3, %v413_v29, 0.0  ;;  %v432_v42 = vsel %vm319_vm3, %v406_v9, 0.0 }
 0x192   :  { %v343_v36 = vpop.xlane.xlu1 %342  ;;  %451 = vadd.xlane.f32.xlu1 %v450_v32  ;;  %454 = vadd.xlane.f32.xlu0 %v453_v33  ;;  %v364_v31 = vpop.xlane.xlu0 %363 }
 0x193   :  { %v376_v38 = vmul.f32 0.03125, %v343_v36  ;;  %v383_v39 = vmul.f32 0.03125, %v364_v31  ;;  %v407_v40 = vmul.f32 %v1057_v30, %v1057_v30  ;;  %v414_v46 = vmul.f32 %v1054_v2, %v1054_v2 }
 0x195   :  { %v1065_v10 = vsub.f32 %v979_v25, %v376_v38  ;;  %v1068_v17 = vsub.f32 %v972_v18, %v383_v39  ;;  %v435_v44 = vsel %vm319_vm3, %v407_v40, 0.0  ;;  %v456_v25 = vsel %vm319_vm3, %v414_v46, 0.0 }
 0x196   :  { %v367_v47 = vpop.xlane.xlu1 %366  ;;  %433 = vadd.xlane.f32.xlu1 %v432_v42  ;;  %436 = vadd.xlane.f32.xlu0 %v435_v44 }
 0x197   :  { %v384_v48 = vmul.f32 0.03125, %v367_v47  ;;  %v415_v51 = vmul.f32 %v1068_v17, %v1068_v17  ;;  %v408_v35 = vmul.f32 %v1065_v10, %v1065_v10 }
 0x199   :  { %v1076_v34 = vsub.f32 %v982_v26, %v384_v48  ;;  %v459_v18 = vsel %vm319_vm3, %v415_v51, 0.0  ;;  %v438_v55 = vsel %vm319_vm3, %v408_v35, 0.0 }
 0x19a   :  { %457 = vadd.xlane.f32.xlu1 %v456_v25  ;;  %460 = vadd.xlane.f32.xlu0 %v459_v18 }
 0x19b   :  { %v416_v56 = vmul.f32 %v1076_v34, %v1076_v34 }
 0x19d   :  { %v462_v59 = vsel %vm319_vm3, %v416_v56, 0.0 }
 0x19e   :  { %439 = vadd.xlane.f32.xlu1 %v438_v55 }
 0x1a2   :  { %463 = vadd.xlane.f32.xlu1 %v462_v59 }
 0x207   :  { %v419_v26 = vpop.xlane.xlu0 %418 }
 0x208   :  { %v465_v60 = vmul.f32 0.03125, %v419_v26 }
 0x20a   :  { %v481_v61 = vadd.f32 1e-06, %v465_v60 }
 0x20b   :  { %v443_v41 = vpop.xlane.xlu0 %442 }
 0x20c   :  { %760 = vrsqrt.f32 %v481_v61  ;;  %v473_v49 = vmul.f32 0.03125, %v443_v41 }
 0x20e   :  { %v489_v63 = vadd.f32 1e-06, %v473_v49 }
 0x20f   :  { %v422_v0 = vpop.xlane.xlu1 %421  ;;  %v425_v3 = vpop.xlane.xlu0 %424 }
 0x210   :  { %762 = vrsqrt.f32 %v489_v63  ;;  %v466_v4 = vmul.f32 0.03125, %v422_v0  ;;  %v467_v5 = vmul.f32 0.03125, %v425_v3 }
 0x212   :  { %v482_v6 = vadd.f32 1e-06, %v466_v4  ;;  %v483_v7 = vadd.f32 1e-06, %v467_v5 }
 0x213   :  { %v446_v57 = vpop.xlane.xlu1 %445  ;;  %v449_v11 = vpop.xlane.xlu0 %448 }
 0x214   :  { %764 = vrsqrt.f32 %v482_v6  ;;  %v474_v12 = vmul.f32 0.03125, %v446_v57  ;;  %v475_v13 = vmul.f32 0.03125, %v449_v11 }
 0x215   :  { %766 = vrsqrt.f32 %v483_v7 }
 0x216   :  { %v490_v14 = vadd.f32 1e-06, %v474_v12  ;;  %v491_v15 = vadd.f32 1e-06, %v475_v13 }
 0x217   :  { %v428_v16 = vpop.xlane.xlu1 %427  ;;  %v431_v19 = vpop.xlane.xlu0 %430 }
 0x218   :  { %768 = vrsqrt.f32 %v490_v14  ;;  %v468_v20 = vmul.f32 0.03125, %v428_v16  ;;  %v469_v21 = vmul.f32 0.03125, %v431_v19 }
 0x219   :  { %v761_v22 = vpop.eup %760  ;;  %770 = vrsqrt.f32 %v491_v15 }
 0x21a   :  { %v513_v24 = vmul.f32 %v761_v22, %v991_v37  ;;  %v484_v27 = vadd.f32 1e-06, %v468_v20  ;;  %v485_v28 = vadd.f32 1e-06, %v469_v21 }
 0x21b   :  { %v452_v29 = vpop.xlane.xlu1 %451  ;;  %v455_v9 = vpop.xlane.xlu0 %454 }
 0x21c   :  { %v535_v32 = vmul.f32 %v1089_v23, %v513_v24  ;;  %772 = vrsqrt.f32 %v484_v27  ;;  %v476_v33 = vmul.f32 0.03125, %v452_v29  ;;  %v477_v36 = vmul.f32 0.03125, %v455_v9 }
 0x21d   :  { %v763_v31 = vpop.eup %762  ;;  %774 = vrsqrt.f32 %v485_v28 }
 0x21e   :  { %v688_v38 = vpack.c.bf16 %v535_v32, %v535_v32  ;;  %v521_v39 = vmul.f32 %v763_v31, %v996_v43  ;;  %v492_v40 = vadd.f32 1e-06, %v476_v33  ;;  %v493_v42 = vadd.f32 1e-06, %v477_v36 }
 0x21f   :  { %v434_v44 = vpop.xlane.xlu1 %433  ;;  %v437_v46 = vpop.xlane.xlu0 %436 }
 0x220   :  { %616 = vst.msk [vmem:[%s1191_s4] sm:$0xf] %vm615_vm4, %v688_v38  ;;  %v543_v37 = vmul.f32 %v1089_v23, %v521_v39  ;;  %776 = vrsqrt.f32 %v492_v40  ;;  %v470_v47 = vmul.f32 0.03125, %v434_v44  ;;  %v471_v48 = vmul.f32 0.03125, %v437_v46 }
 0x221   :  { %v765_v51 = vpop.eup %764  ;;  %778 = vrsqrt.f32 %v493_v42 }
 0x222   :  { %v767_v25 = vpop.eup %766  ;;  %v696_v18 = vpack.c.bf16 %v543_v37, %v543_v37  ;;  %v514_v43 = vmul.f32 %v765_v51, %v1008_v54  ;;  %v486_v35 = vadd.f32 1e-06, %v470_v47  ;;  %v487_v55 = vadd.f32 1e-06, %v471_v48 }
 0x223   :  { %v515_v56 = vmul.f32 %v767_v25, %v1005_v53  ;;  %v458_v59 = vpop.xlane.xlu1 %457  ;;  %v461_v26 = vpop.xlane.xlu0 %460 }
 0x224   :  { %624 = vst.msk [vmem:[%s1191_s4 + $0x20] sm:$0xf] %vm615_vm4, %v696_v18  ;;  %v536_v60 = vmul.f32 %v1089_v23, %v514_v43  ;;  %780 = vrsqrt.f32 %v486_v35  ;;  %v478_v61 = vmul.f32 0.03125, %v458_v59  ;;  %v479_v41 = vmul.f32 0.03125, %v461_v26 }
 0x225   :  { %v769_v49 = vpop.eup %768  ;;  %v537_v63 = vmul.f32 %v1089_v23, %v515_v56  ;;  %782 = vrsqrt.f32 %v487_v55 }
 0x226   :  { %v771_v54 = vpop.eup %770  ;;  %v689_v0 = vpack.c.bf16 %v536_v60, %v536_v60  ;;  %v522_v53 = vmul.f32 %v769_v49, %v1002_v52  ;;  %v494_v3 = vadd.f32 1e-06, %v478_v61  ;;  %v495_v4 = vadd.f32 1e-06, %v479_v41 }
 0x227   :  { %v690_v5 = vpack.c.bf16 %v537_v63, %v537_v63  ;;  %v523_v6 = vmul.f32 %v771_v54, %v1021_v45  ;;  %v440_v7 = vpop.xlane.xlu1 %439 }
 0x228   :  { %617 = vst.msk [vmem:[%s1191_s4 + $0x4] sm:$0xf] %vm615_vm4, %v689_v0  ;;  %v544_v57 = vmul.f32 %v1089_v23, %v522_v53  ;;  %784 = vrsqrt.f32 %v494_v3  ;;  %v472_v11 = vmul.f32 0.03125, %v440_v7 }
 0x229   :  { %v773_v12 = vpop.eup %772  ;;  %618 = vst.msk [vmem:[%s1191_s4 + $0x8] sm:$0xf] %vm615_vm4, %v690_v5  ;;  %v545_v52 = vmul.f32 %v1089_v23, %v523_v6  ;;  %786 = vrsqrt.f32 %v495_v4 }
 0x22a   :  { %v775_v45 = vpop.eup %774  ;;  %v697_v13 = vpack.c.bf16 %v544_v57, %v544_v57  ;;  %v516_v14 = vmul.f32 %v773_v12, %v1018_v62  ;;  %v488_v15 = vadd.f32 1e-06, %v472_v11 }
 0x22b   :  { %v698_v16 = vpack.c.bf16 %v545_v52, %v545_v52  ;;  %v517_v19 = vmul.f32 %v775_v45, %v1033_v50  ;;  %v464_v20 = vpop.xlane.xlu1 %463 }
 0x22c   :  { %625 = vst.msk [vmem:[%s1191_s4 + $0x24] sm:$0xf] %vm615_vm4, %v697_v13  ;;  %v538_v21 = vmul.f32 %v1089_v23, %v516_v14  ;;  %788 = vrsqrt.f32 %v488_v15  ;;  %v480_v22 = vmul.f32 0.03125, %v464_v20 }
 0x22d   :  { %v777_v24 = vpop.eup %776  ;;  %626 = vst.msk [vmem:[%s1191_s4 + $0x28] sm:$0xf] %vm615_vm4, %v698_v16  ;;  %v539_v62 = vmul.f32 %v1089_v23, %v517_v19 }
 0x22e   :  { %v779_v27 = vpop.eup %778  ;;  %v691_v50 = vpack.c.bf16 %v538_v21, %v538_v21  ;;  %v524_v28 = vmul.f32 %v777_v24, %v1030_v8  ;;  %v496_v29 = vadd.f32 1e-06, %v480_v22 }
 0x22f   :  { %v692_v9 = vpack.c.bf16 %v539_v62, %v539_v62  ;;  %v525_v32 = vmul.f32 %v779_v27, %v1044_v1 }
 0x230   :  { %619 = vst.msk [vmem:[%s1191_s4 + $0xc] sm:$0xf] %vm615_vm4, %v691_v50  ;;  %v546_v33 = vmul.f32 %v1089_v23, %v524_v28  ;;  %790 = vrsqrt.f32 %v496_v29 }
 0x231   :  { %v781_v36 = vpop.eup %780  ;;  %620 = vst.msk [vmem:[%s1191_s4 + $0x10] sm:$0xf] %vm615_vm4, %v692_v9  ;;  %v547_v8 = vmul.f32 %v1089_v23, %v525_v32 }
 0x232   :  { %v783_v31 = vpop.eup %782  ;;  %v699_v38 = vpack.c.bf16 %v546_v33, %v546_v33  ;;  %v518_v1 = vmul.f32 %v781_v36, %v1041_v58 }
 0x233   :  { %v700_v39 = vpack.c.bf16 %v547_v8, %v547_v8  ;;  %v519_v40 = vmul.f32 %v783_v31, %v1057_v30 }
 0x234   :  { %627 = vst.msk [vmem:[%s1191_s4 + $0x2c] sm:$0xf] %vm615_vm4, %v699_v38  ;;  %v540_v42 = vmul.f32 %v1089_v23, %v518_v1 }
 0x235   :  { %v785_v44 = vpop.eup %784  ;;  %628 = vst.msk [vmem:[%s1191_s4 + $0x30] sm:$0xf] %vm615_vm4, %v700_v39  ;;  %v541_v46 = vmul.f32 %v1089_v23, %v519_v40 }
 0x236   :  { %v787_v37 = vpop.eup %786  ;;  %v693_v58 = vpack.c.bf16 %v540_v42, %v540_v42  ;;  %v526_v47 = vmul.f32 %v785_v44, %v1054_v2 }
 0x237   :  { %v694_v30 = vpack.c.bf16 %v541_v46, %v541_v46  ;;  %v527_v48 = vmul.f32 %v787_v37, %v1068_v17 }
 0x238   :  { %621 = vst.msk [vmem:[%s1191_s4 + $0x14] sm:$0xf] %vm615_vm4, %v693_v58  ;;  %v548_v51 = vmul.f32 %v1089_v23, %v526_v47 }
 0x239   :  { %v789_v25 = vpop.eup %788  ;;  %622 = vst.msk [vmem:[%s1191_s4 + $0x18] sm:$0xf] %vm615_vm4, %v694_v30  ;;  %v549_v18 = vmul.f32 %v1089_v23, %v527_v48 }
 0x23a   :  { %v701_v43 = vpack.c.bf16 %v548_v51, %v548_v51  ;;  %v520_v2 = vmul.f32 %v789_v25, %v1065_v10 }
 0x23b   :  { %v702_v35 = vpack.c.bf16 %v549_v18, %v549_v18 }
 0x23c   :  { %629 = vst.msk [vmem:[%s1191_s4 + $0x34] sm:$0xf] %vm615_vm4, %v701_v43  ;;  %v542_v17 = vmul.f32 %v1089_v23, %v520_v2 }
 0x23d   :  { %v791_v55 = vpop.eup %790  ;;  %630 = vst.msk [vmem:[%s1191_s4 + $0x38] sm:$0xf] %vm615_vm4, %v702_v35 }
 0x23e   :  { %v695_v56 = vpack.c.bf16 %v542_v17, %v542_v17  ;;  %v528_v59 = vmul.f32 %v791_v55, %v1076_v34 }
 0x240   :  { %623 = vst.msk [vmem:[%s1191_s4 + $0x1c] sm:$0xf] %vm615_vm4, %v695_v56  ;;  %v550_v10 = vmul.f32 %v1089_v23, %v528_v59 }
 0x242   :  { %v703_v26 = vpack.c.bf16 %v550_v10, %v550_v10 }
 0x244   :  { %631 = vst.msk [vmem:[%s1191_s4 + $0x3c] sm:$0xf] %vm615_vm4, %v703_v26 }

// kernel: metaformer_forward.10
= control target key start
LH: loop header
LB: loop body
LE: loop exit
PB: predicated region body
PF: predicated region fallthrough
CT: control target
= control target key end

     0   :  { %14 = vsyncpa [#allocation4], 0  ;;  %s2640_s0 = inlined_call_operand.vmem [shape: bf16[128,32], index: 0, kind: input, shape index: {}]   ;;  %s2641_s1 = inlined_call_operand.vmem [shape: f32[1,1,32], index: 1, kind: input, shape index: {}]   ;;  %s2642_s2 = inlined_call_operand.vmem [shape: f32[1,1,32], index: 2, kind: input, shape index: {}]   ;;  %s2643_s3 = inlined_call_operand.vmem [shape: bf16[1,32,128], index: 3, kind: input, shape index: {}]   ;;  %s2644_s4 = inlined_call_operand.vmem [shape: bf16[1,128,32], index: 4, kind: input, shape index: {}]   ;;  %s2645_s5 = inlined_call_operand.vmem [shape: f32[1,1,32], index: 5, kind: input, shape index: {}]   ;;  %s2646_s6 = inlined_call_operand.vmem [shape: f32[1,1,32], index: 6, kind: input, shape index: {}]   ;;  %s2647_s7 = inlined_call_operand.vmem [shape: f32[1,2], index: 7, kind: input, shape index: {}]   ;;  %s2648_s8 = inlined_call_operand.vmem [shape: f32[1,32], index: 8, kind: input, shape index: {}]   ;;  %s2649_s9 = inlined_call_operand.vmem [shape: bf16[128,32], index: 9, kind: output, shape index: {}]  }
   0x1   :  { %s35_s11 = sshll.u32 %s2647_s7, 4  ;;  %s36_s11 = int_to_ptr.vmem [resolvable:$true] %s35_s11 }
   0x2   :  { %s1673_s12 = scalar_lea.vmem %s36_s11, 16  ;;  %p1678_p1 = scmp.lt.s32.totalorder %s36_s11, %s36_s11 }
   0x3   :  { %p1674_p0 = scmp.ne.s32.totalorder %s36_s11, %s1673_s12  ;;  %p1679_p2 = scmp.lt.s32.totalorder %s1673_s12, %s1673_s12 }
   0x5   :  { %p1680_p3 = por %p1679_p2, %p1678_p1 }
   0x7   :  { %p1681_p4 = pnand %p1680_p3, %p1674_p0 }
   0x9   :  { %1684 = shalt.err (!%p1681_p4)
}
   0xa   :  { %s1687_s13 = smov [#allocation3]  }
   0xb   :  { %38 = dma.vmem_to_smem %s36_s11, 16, %s1687_s13, [#allocation4]  }
   0xc   :  { %1685 = dma.done.wait [#allocation4], 16  }
   0xd   :  { %1686 = vsyncadd [#allocation4], 4294967280 }
   0xe   :  { %44 = sfence }
   0xf   :  { %v1434_v0 = vld [vmem:[%s2640_s0] sm:$0xff]   ;;  %vm82_vm0 = vcmask 261120   ;;  %v1465_v1 = vld [vmem:[%s2640_s0 + $0x8] sm:$0xff]   ;;  %v1466_v2 = vld [vmem:[%s2640_s0 + $0x10] sm:$0xff]   ;;  %s120_s28 = sld [smem:[#allocation3]]  ;;  %vm1355_vm1 = vcmask 257024  }
  0x10   :  { %v1435_v3 = vunpack.c.l.bf16 %v1434_v0  ;;  %v1439_v4 = vunpack.c.l.bf16 %v1465_v1  ;;  %v1436_v5 = vunpack.c.h.bf16 %v1434_v0  ;;  %v1440_v6 = vunpack.c.h.bf16 %v1465_v1  ;;  %v1467_v7 = vld [vmem:[%s2640_s0 + $0x18] sm:$0xff]   ;;  %v1468_v8 = vld [vmem:[%s2640_s0 + $0x20] sm:$0xff]   ;;  %v1469_v9 = vld [vmem:[%s2640_s0 + $0x28] sm:$0xff]  }
  0x11   :  { %v1443_v10 = vunpack.c.l.bf16 %v1466_v2  ;;  %v1444_v11 = vunpack.c.h.bf16 %v1466_v2  ;;  %v1447_v12 = vunpack.c.l.bf16 %v1467_v7  ;;  %v1448_v13 = vunpack.c.h.bf16 %v1467_v7  ;;  %v1470_v14 = vld [vmem:[%s2640_s0 + $0x30] sm:$0xff]   ;;  %v1471_v15 = vld [vmem:[%s2640_s0 + $0x38] sm:$0xff]   ;;  %s1377_s0 = sld [smem:[#allocation3 + $0x1]] }
  0x12   :  { %83 = vst.msk [vmem:[#allocation2] sm:$0xff] %vm82_vm0, %v1435_v3  ;;  %85 = vst.msk [vmem:[#allocation2 + $0x10] sm:$0xff] %vm82_vm0, %v1439_v4  ;;  %v1451_v16 = vunpack.c.l.bf16 %v1468_v8  ;;  %v1452_v17 = vunpack.c.h.bf16 %v1468_v8  ;;  %v1455_v18 = vunpack.c.l.bf16 %v1469_v9  ;;  %v1456_v19 = vunpack.c.h.bf16 %v1469_v9 }
  0x13   :  { %84 = vst.msk [vmem:[#allocation2 + $0x8] sm:$0xff] %vm82_vm0, %v1436_v5  ;;  %86 = vst.msk [vmem:[#allocation2 + $0x18] sm:$0xff] %vm82_vm0, %v1440_v6  ;;  %v1459_v20 = vunpack.c.l.bf16 %v1470_v14  ;;  %v1460_v21 = vunpack.c.h.bf16 %v1470_v14  ;;  %v1463_v22 = vunpack.c.l.bf16 %v1471_v15  ;;  %v1464_v23 = vunpack.c.h.bf16 %v1471_v15 }
  0x14   :  { %87 = vst.msk [vmem:[#allocation2 + $0x20] sm:$0xff] %vm82_vm0, %v1443_v10  ;;  %88 = vst.msk [vmem:[#allocation2 + $0x28] sm:$0xff] %vm82_vm0, %v1444_v11 }
  0x15   :  { %89 = vst.msk [vmem:[#allocation2 + $0x30] sm:$0xff] %vm82_vm0, %v1447_v12  ;;  %90 = vst.msk [vmem:[#allocation2 + $0x38] sm:$0xff] %vm82_vm0, %v1448_v13 }
  0x16   :  { %91 = vst.msk [vmem:[#allocation2 + $0x40] sm:$0xff] %vm82_vm0, %v1451_v16  ;;  %92 = vst.msk [vmem:[#allocation2 + $0x48] sm:$0xff] %vm82_vm0, %v1452_v17 }
  0x17   :  { %93 = vst.msk [vmem:[#allocation2 + $0x50] sm:$0xff] %vm82_vm0, %v1455_v18  ;;  %94 = vst.msk [vmem:[#allocation2 + $0x58] sm:$0xff] %vm82_vm0, %v1456_v19 }
  0x18   :  { %95 = vst.msk [vmem:[#allocation2 + $0x60] sm:$0xff] %vm82_vm0, %v1459_v20  ;;  %96 = vst.msk [vmem:[#allocation2 + $0x68] sm:$0xff] %vm82_vm0, %v1460_v21 }
  0x19   :  { %97 = vst.msk [vmem:[#allocation2 + $0x70] sm:$0xff] %vm82_vm0, %v1463_v22  ;;  %98 = vst.msk [vmem:[#allocation2 + $0x78] sm:$0xff] %vm82_vm0, %v1464_v23  ;;  %v1781_v24 = vld [vmem:[#allocation2] sm:$0xff]  ;;  %v1783_v25 = vld [vmem:[#allocation2 + $0x10] sm:$0xff] }
  0x1a   :  { %v1785_v26 = vld [vmem:[#allocation2 + $0x8] sm:$0xff]  ;;  %v146_v27 = vsel %vm82_vm0, %v1781_v24, 0.0  ;;  %v152_v28 = vsel %vm82_vm0, %v1783_v25, 0.0  ;;  %v1791_v29 = vld [vmem:[#allocation2 + $0x18] sm:$0xff] }
  0x1b   :  { %147 = vadd.xlane.f32.xlu0 %v146_v27  ;;  %153 = vadd.xlane.f32.xlu1 %v152_v28  ;;  %v149_v30 = vsel %vm82_vm0, %v1785_v26, 0.0  ;;  %v155_v31 = vsel %vm82_vm0, %v1791_v29, 0.0  ;;  %v1797_v32 = vld [vmem:[#allocation2 + $0x20] sm:$0xff]  ;;  %v1799_v33 = vld [vmem:[#allocation2 + $0x28] sm:$0xff] }
  0x1c   :  { %v158_v34 = vsel %vm82_vm0, %v1797_v32, 0.0  ;;  %v161_v35 = vsel %vm82_vm0, %v1799_v33, 0.0  ;;  %v1805_v36 = vld [vmem:[#allocation2 + $0x30] sm:$0xff]  ;;  %v1807_v37 = vld [vmem:[#allocation2 + $0x38] sm:$0xff] }
  0x1d   :  { %v164_v38 = vsel %vm82_vm0, %v1805_v36, 0.0  ;;  %v167_v39 = vsel %vm82_vm0, %v1807_v37, 0.0  ;;  %v1813_v40 = vld [vmem:[#allocation2 + $0x40] sm:$0xff]  ;;  %v1815_v41 = vld [vmem:[#allocation2 + $0x48] sm:$0xff] }
  0x1e   :  { %v170_v42 = vsel %vm82_vm0, %v1813_v40, 0.0  ;;  %v173_v43 = vsel %vm82_vm0, %v1815_v41, 0.0  ;;  %v1821_v44 = vld [vmem:[#allocation2 + $0x50] sm:$0xff]  ;;  %v1823_v45 = vld [vmem:[#allocation2 + $0x58] sm:$0xff] }
  0x1f   :  { %150 = vadd.xlane.f32.xlu0 %v149_v30  ;;  %156 = vadd.xlane.f32.xlu1 %v155_v31  ;;  %v176_v46 = vsel %vm82_vm0, %v1821_v44, 0.0  ;;  %v179_v47 = vsel %vm82_vm0, %v1823_v45, 0.0  ;;  %v1829_v48 = vld [vmem:[#allocation2 + $0x60] sm:$0xff]  ;;  %v1831_v49 = vld [vmem:[#allocation2 + $0x68] sm:$0xff] }
  0x20   :  { %v182_v50 = vsel %vm82_vm0, %v1829_v48, 0.0  ;;  %v185_v51 = vsel %vm82_vm0, %v1831_v49, 0.0  ;;  %v1837_v52 = vld [vmem:[#allocation2 + $0x70] sm:$0xff]  ;;  %v1839_v53 = vld [vmem:[#allocation2 + $0x78] sm:$0xff] }
  0x21   :  { %v188_v54 = vsel %vm82_vm0, %v1837_v52, 0.0  ;;  %v191_v55 = vsel %vm82_vm0, %v1839_v53, 0.0 }
  0x23   :  { %159 = vadd.xlane.f32.xlu0 %v158_v34  ;;  %162 = vadd.xlane.f32.xlu1 %v161_v35 }
  0x27   :  { %165 = vadd.xlane.f32.xlu0 %v164_v38  ;;  %168 = vadd.xlane.f32.xlu1 %v167_v39 }
  0x2b   :  { %171 = vadd.xlane.f32.xlu0 %v170_v42  ;;  %174 = vadd.xlane.f32.xlu1 %v173_v43 }
  0x2f   :  { %177 = vadd.xlane.f32.xlu0 %v176_v46  ;;  %180 = vadd.xlane.f32.xlu1 %v179_v47 }
  0x33   :  { %183 = vadd.xlane.f32.xlu0 %v182_v50  ;;  %186 = vadd.xlane.f32.xlu1 %v185_v51 }
  0x37   :  { %189 = vadd.xlane.f32.xlu0 %v188_v54  ;;  %192 = vadd.xlane.f32.xlu1 %v191_v55 }
  0xa4   :  { %v148_v56 = vpop.xlane.xlu0 %147  ;;  %v154_v57 = vpop.xlane.xlu1 %153 }
  0xa5   :  { %v195_v58 = vmul.f32 0.03125, %v148_v56  ;;  %v197_v59 = vmul.f32 0.03125, %v154_v57 }
  0xa7   :  { %v1846_v60 = vsub.f32 %v1781_v24, %v195_v58  ;;  %v1849_v61 = vsub.f32 %v1783_v25, %v197_v59 }
  0xa8   :  { %v151_v62 = vpop.xlane.xlu0 %150  ;;  %v157_v63 = vpop.xlane.xlu1 %156 }
  0xa9   :  { %v196_v0 = vmul.f32 0.03125, %v151_v62  ;;  %v198_v1 = vmul.f32 0.03125, %v157_v63  ;;  %v227_v2 = vmul.f32 %v1846_v60, %v1846_v60  ;;  %v229_v3 = vmul.f32 %v1849_v61, %v1849_v61 }
  0xab   :  { %v1856_v4 = vsub.f32 %v1785_v26, %v196_v0  ;;  %v1859_v5 = vsub.f32 %v1791_v29, %v198_v1  ;;  %v243_v6 = vsel %vm82_vm0, %v227_v2, 0.0  ;;  %v249_v9 = vsel %vm82_vm0, %v229_v3, 0.0 }
  0xac   :  { %244 = vadd.xlane.f32.xlu0 %v243_v6  ;;  %v160_v7 = vpop.xlane.xlu0 %159  ;;  %v163_v8 = vpop.xlane.xlu1 %162 }
  0xad   :  { %v199_v10 = vmul.f32 0.03125, %v160_v7  ;;  %v200_v11 = vmul.f32 0.03125, %v163_v8  ;;  %v228_v12 = vmul.f32 %v1856_v4, %v1856_v4  ;;  %v230_v13 = vmul.f32 %v1859_v5, %v1859_v5 }
  0xaf   :  { %v1868_v14 = vsub.f32 %v1797_v32, %v199_v10  ;;  %v1871_v15 = vsub.f32 %v1799_v33, %v200_v11  ;;  %v246_v16 = vsel %vm82_vm0, %v228_v12, 0.0  ;;  %v252_v19 = vsel %vm82_vm0, %v230_v13, 0.0 }
  0xb0   :  { %250 = vadd.xlane.f32.xlu0 %v249_v9  ;;  %247 = vadd.xlane.f32.xlu1 %v246_v16  ;;  %v166_v17 = vpop.xlane.xlu0 %165  ;;  %v169_v18 = vpop.xlane.xlu1 %168 }
  0xb1   :  { %v201_v20 = vmul.f32 0.03125, %v166_v17  ;;  %v202_v21 = vmul.f32 0.03125, %v169_v18  ;;  %v231_v22 = vmul.f32 %v1868_v14, %v1868_v14  ;;  %v232_v23 = vmul.f32 %v1871_v15, %v1871_v15 }
  0xb3   :  { %v1880_v27 = vsub.f32 %v1805_v36, %v201_v20  ;;  %v1883_v28 = vsub.f32 %v1807_v37, %v202_v21  ;;  %v255_v30 = vsel %vm82_vm0, %v231_v22, 0.0  ;;  %v258_v35 = vsel %vm82_vm0, %v232_v23, 0.0 }
  0xb4   :  { %253 = vadd.xlane.f32.xlu1 %v252_v19  ;;  %256 = vadd.xlane.f32.xlu0 %v255_v30  ;;  %v172_v31 = vpop.xlane.xlu0 %171  ;;  %v175_v34 = vpop.xlane.xlu1 %174 }
  0xb5   :  { %v203_v38 = vmul.f32 0.03125, %v172_v31  ;;  %v204_v39 = vmul.f32 0.03125, %v175_v34  ;;  %v233_v42 = vmul.f32 %v1880_v27, %v1880_v27  ;;  %v234_v43 = vmul.f32 %v1883_v28, %v1883_v28 }
  0xb7   :  { %v1892_v46 = vsub.f32 %v1813_v40, %v203_v38  ;;  %v1895_v47 = vsub.f32 %v1815_v41, %v204_v39  ;;  %v261_v50 = vsel %vm82_vm0, %v233_v42, 0.0  ;;  %v264_v55 = vsel %vm82_vm0, %v234_v43, 0.0 }
  0xb8   :  { %259 = vadd.xlane.f32.xlu1 %v258_v35  ;;  %262 = vadd.xlane.f32.xlu0 %v261_v50  ;;  %v178_v51 = vpop.xlane.xlu0 %177  ;;  %v181_v54 = vpop.xlane.xlu1 %180 }
  0xb9   :  { %v205_v56 = vmul.f32 0.03125, %v178_v51  ;;  %v206_v57 = vmul.f32 0.03125, %v181_v54  ;;  %v235_v58 = vmul.f32 %v1892_v46, %v1892_v46  ;;  %v236_v59 = vmul.f32 %v1895_v47, %v1895_v47 }
  0xbb   :  { %v1904_v62 = vsub.f32 %v1821_v44, %v205_v56  ;;  %v1907_v63 = vsub.f32 %v1823_v45, %v206_v57  ;;  %v267_v0 = vsel %vm82_vm0, %v235_v58, 0.0  ;;  %v270_v3 = vsel %vm82_vm0, %v236_v59, 0.0 }
  0xbc   :  { %265 = vadd.xlane.f32.xlu1 %v264_v55  ;;  %268 = vadd.xlane.f32.xlu0 %v267_v0  ;;  %v184_v1 = vpop.xlane.xlu0 %183  ;;  %v187_v2 = vpop.xlane.xlu1 %186 }
  0xbd   :  { %v207_v6 = vmul.f32 0.03125, %v184_v1  ;;  %v208_v7 = vmul.f32 0.03125, %v187_v2  ;;  %v237_v8 = vmul.f32 %v1904_v62, %v1904_v62  ;;  %v238_v9 = vmul.f32 %v1907_v63, %v1907_v63 }
  0xbf   :  { %v1916_v10 = vsub.f32 %v1829_v48, %v207_v6  ;;  %v1919_v11 = vsub.f32 %v1831_v49, %v208_v7  ;;  %v273_v12 = vsel %vm82_vm0, %v237_v8, 0.0  ;;  %v276_v17 = vsel %vm82_vm0, %v238_v9, 0.0 }
  0xc0   :  { %271 = vadd.xlane.f32.xlu1 %v270_v3  ;;  %274 = vadd.xlane.f32.xlu0 %v273_v12  ;;  %v190_v13 = vpop.xlane.xlu0 %189  ;;  %v193_v16 = vpop.xlane.xlu1 %192 }
  0xc1   :  { %v209_v18 = vmul.f32 0.03125, %v190_v13  ;;  %v210_v19 = vmul.f32 0.03125, %v193_v16  ;;  %v239_v20 = vmul.f32 %v1916_v10, %v1916_v10  ;;  %v240_v21 = vmul.f32 %v1919_v11, %v1919_v11 }
  0xc3   :  { %v1928_v22 = vsub.f32 %v1837_v52, %v209_v18  ;;  %v1931_v23 = vsub.f32 %v1839_v53, %v210_v19  ;;  %v279_v30 = vsel %vm82_vm0, %v239_v20, 0.0  ;;  %v282_v31 = vsel %vm82_vm0, %v240_v21, 0.0  ;;  %v1944_v19 = vld [vmem:[%s2645_s5] ss:$0 sm:$0xff] }
  0xc4   :  { %277 = vadd.xlane.f32.xlu1 %v276_v17  ;;  %280 = vadd.xlane.f32.xlu0 %v279_v30 }
  0xc5   :  { %v241_v34 = vmul.f32 %v1928_v22, %v1928_v22  ;;  %v242_v35 = vmul.f32 %v1931_v23, %v1931_v23 }
  0xc7   :  { %v285_v38 = vsel %vm82_vm0, %v241_v34, 0.0  ;;  %v288_v39 = vsel %vm82_vm0, %v242_v35, 0.0 }
  0xc8   :  { %283 = vadd.xlane.f32.xlu1 %v282_v31  ;;  %286 = vadd.xlane.f32.xlu0 %v285_v38  ;;  %v1949_v31 = vld [vmem:[%s2641_s1] ss:$0 sm:$0xff]  ;;  %v129_v38 = vmul.f32 %v1944_v19, %v1781_v24 }
  0xcc   :  { %289 = vadd.xlane.f32.xlu1 %v288_v39 }
 0x135   :  { %v245_v42 = vpop.xlane.xlu0 %244 }
 0x136   :  { %v291_v43 = vmul.f32 0.03125, %v245_v42 }
 0x138   :  { %v307_v50 = vadd.f32 1e-06, %v291_v43 }
 0x139   :  { %v248_v51 = vpop.xlane.xlu1 %247  ;;  %v251_v54 = vpop.xlane.xlu0 %250 }
 0x13a   :  { %1577 = vrsqrt.f32 %v307_v50  ;;  %v292_v55 = vmul.f32 0.03125, %v248_v51  ;;  %v293_v56 = vmul.f32 0.03125, %v251_v54 }
 0x13c   :  { %v308_v57 = vadd.f32 1e-06, %v292_v55  ;;  %v309_v58 = vadd.f32 1e-06, %v293_v56 }
 0x13d   :  { %v254_v59 = vpop.xlane.xlu1 %253  ;;  %v257_v0 = vpop.xlane.xlu0 %256 }
 0x13e   :  { %1579 = vrsqrt.f32 %v308_v57  ;;  %v294_v1 = vmul.f32 0.03125, %v254_v59  ;;  %v295_v2 = vmul.f32 0.03125, %v257_v0 }
 0x13f   :  { %1581 = vrsqrt.f32 %v309_v58 }
 0x140   :  { %v310_v3 = vadd.f32 1e-06, %v294_v1  ;;  %v311_v6 = vadd.f32 1e-06, %v295_v2  ;;  %v131_v2 = vmul.f32 %v1944_v19, %v1783_v25 }
 0x141   :  { %v260_v7 = vpop.xlane.xlu1 %259  ;;  %v263_v8 = vpop.xlane.xlu0 %262 }
 0x142   :  { %1583 = vrsqrt.f32 %v310_v3  ;;  %v296_v9 = vmul.f32 0.03125, %v260_v7  ;;  %v297_v12 = vmul.f32 0.03125, %v263_v8 }
 0x143   :  { %1585 = vrsqrt.f32 %v311_v6 }
 0x144   :  { %v312_v13 = vadd.f32 1e-06, %v296_v9  ;;  %v313_v16 = vadd.f32 1e-06, %v297_v12 }
 0x145   :  { %v266_v17 = vpop.xlane.xlu1 %265  ;;  %v269_v18 = vpop.xlane.xlu0 %268 }
 0x146   :  { %1587 = vrsqrt.f32 %v312_v13  ;;  %v298_v20 = vmul.f32 0.03125, %v266_v17  ;;  %v299_v21 = vmul.f32 0.03125, %v269_v18  ;;  %v133_v17 = vmul.f32 %v1944_v19, %v1797_v32 }
 0x147   :  { %v1578_v30 = vpop.eup %1577  ;;  %1589 = vrsqrt.f32 %v313_v16 }
 0x148   :  { %v314_v34 = vadd.f32 1e-06, %v298_v20  ;;  %v315_v35 = vadd.f32 1e-06, %v299_v21  ;;  %v339_v39 = vmul.f32 %v1578_v30, %v1846_v60  ;;  %v130_v60 = vmul.f32 %v1944_v19, %v1785_v26 }
 0x149   :  { %v272_v42 = vpop.xlane.xlu1 %271  ;;  %v275_v43 = vpop.xlane.xlu0 %274  ;;  %v132_v26 = vmul.f32 %v1944_v19, %v1791_v29 }
 0x14a   :  { %1591 = vrsqrt.f32 %v314_v34  ;;  %v300_v50 = vmul.f32 0.03125, %v272_v42  ;;  %v301_v51 = vmul.f32 0.03125, %v275_v43  ;;  %v361_v54 = vmul.f32 %v1949_v31, %v339_v39 }
 0x14b   :  { %v1580_v55 = vpop.eup %1579  ;;  %1593 = vrsqrt.f32 %v315_v35  ;;  %v134_v35 = vmul.f32 %v1944_v19, %v1799_v33 }
 0x14c   :  { %v1582_v56 = vpop.eup %1581  ;;  %v316_v57 = vadd.f32 1e-06, %v300_v50  ;;  %v317_v58 = vadd.f32 1e-06, %v301_v51  ;;  %v1955_v59 = vadd.f32 %v361_v54, %v129_v38  ;;  %v340_v0 = vmul.f32 %v1580_v55, %v1856_v4 }
 0x14d   :  { %v278_v1 = vpop.xlane.xlu1 %277  ;;  %v281_v24 = vpop.xlane.xlu0 %280  ;;  %v341_v3 = vmul.f32 %v1582_v56, %v1849_v61 }
 0x14e   :  { %1595 = vrsqrt.f32 %v316_v57  ;;  %v302_v6 = vmul.f32 0.03125, %v278_v1  ;;  %v303_v7 = vmul.f32 0.03125, %v281_v24  ;;  %v393_v8 = vsel %vm82_vm0, %v1955_v59, 0.0 }
 0x14f   :  { %v1584_v9 = vpop.eup %1583  ;;  %1597 = vrsqrt.f32 %v317_v58  ;;  %394 = vadd.xlane.f32.xlu0 %v393_v8  ;;  %v362_v4 = vmul.f32 %v1949_v31, %v340_v0  ;;  %v363_v12 = vmul.f32 %v1949_v31, %v341_v3  ;;  %v135_v57 = vmul.f32 %v1944_v19, %v1805_v36 }
 0x150   :  { %v1586_v13 = vpop.eup %1585  ;;  %v318_v25 = vadd.f32 1e-06, %v302_v6  ;;  %v319_v16 = vadd.f32 1e-06, %v303_v7  ;;  %v342_v61 = vmul.f32 %v1584_v9, %v1859_v5  ;;  %v137_v9 = vmul.f32 %v1944_v19, %v1813_v40 }
 0x151   :  { %v284_v18 = vpop.xlane.xlu1 %283  ;;  %v287_v20 = vpop.xlane.xlu0 %286  ;;  %v1972_v21 = vadd.f32 %v362_v4, %v130_v60  ;;  %v1974_v30 = vadd.f32 %v363_v12, %v131_v2  ;;  %v343_v34 = vmul.f32 %v1586_v13, %v1868_v14  ;;  %v138_v40 = vmul.f32 %v1944_v19, %v1815_v41 }
 0x152   :  { %1599 = vrsqrt.f32 %v318_v25  ;;  %v304_v29 = vmul.f32 0.03125, %v284_v18  ;;  %v305_v38 = vmul.f32 0.03125, %v287_v20  ;;  %v364_v39 = vmul.f32 %v1949_v31, %v342_v61 }
 0x153   :  { %v1588_v5 = vpop.eup %1587  ;;  %1601 = vrsqrt.f32 %v319_v16  ;;  %v396_v32 = vsel %vm82_vm0, %v1972_v21, 0.0  ;;  %v399_v42 = vsel %vm82_vm0, %v1974_v30, 0.0  ;;  %v365_v43 = vmul.f32 %v1949_v31, %v343_v34 }
 0x154   :  { %v1590_v50 = vpop.eup %1589  ;;  %v320_v14 = vadd.f32 1e-06, %v304_v29  ;;  %v321_v51 = vadd.f32 1e-06, %v305_v38  ;;  %397 = vadd.xlane.f32.xlu1 %v396_v32  ;;  %400 = vadd.xlane.f32.xlu0 %v399_v42  ;;  %v1985_v33 = vadd.f32 %v364_v39, %v132_v26  ;;  %v344_v54 = vmul.f32 %v1588_v5, %v1871_v15 }
 0x155   :  { %v290_v55 = vpop.xlane.xlu1 %289  ;;  %v1988_v56 = vadd.f32 %v365_v43, %v133_v17  ;;  %v345_v58 = vmul.f32 %v1590_v50, %v1880_v27  ;;  %v136_v27 = vmul.f32 %v1944_v19, %v1807_v37  ;;  %v139_v17 = vmul.f32 %v1944_v19, %v1821_v44 }
 0x156   :  { %1603 = vrsqrt.f32 %v320_v14  ;;  %v306_v0 = vmul.f32 0.03125, %v290_v55  ;;  %v402_v1 = vsel %vm82_vm0, %v1985_v33, 0.0  ;;  %v366_v24 = vmul.f32 %v1949_v31, %v344_v54 }
 0x157   :  { %v1592_v60 = vpop.eup %1591  ;;  %1605 = vrsqrt.f32 %v321_v51  ;;  %v405_v15 = vsel %vm82_vm0, %v1988_v56, 0.0  ;;  %v367_v2 = vmul.f32 %v1949_v31, %v345_v58  ;;  %v140_v44 = vmul.f32 %v1944_v19, %v1823_v45 }
 0x158   :  { %v1594_v3 = vpop.eup %1593  ;;  %v322_v6 = vadd.f32 1e-06, %v306_v0  ;;  %403 = vadd.xlane.f32.xlu1 %v402_v1  ;;  %406 = vadd.xlane.f32.xlu0 %v405_v15  ;;  %v1999_v36 = vadd.f32 %v366_v24, %v134_v35  ;;  %v346_v7 = vmul.f32 %v1592_v60, %v1883_v28  ;;  %v141_v5 = vmul.f32 %v1944_v19, %v1829_v48 }
 0x159   :  { %v2004_v8 = vadd.f32 %v367_v2, %v135_v57  ;;  %v347_v4 = vmul.f32 %v1594_v3, %v1892_v46  ;;  %v142_v48 = vmul.f32 %v1944_v19, %v1831_v49  ;;  %v143_v55 = vmul.f32 %v1944_v19, %v1837_v52 }
 0x15a   :  { %1607 = vrsqrt.f32 %v322_v6  ;;  %v408_v12 = vsel %vm82_vm0, %v1999_v36, 0.0  ;;  %v368_v26 = vmul.f32 %v1949_v31, %v346_v7  ;;  %v144_v52 = vmul.f32 %v1944_v19, %v1839_v53 }
 0x15b   :  { %v1596_v13 = vpop.eup %1595  ;;  %v411_v25 = vsel %vm82_vm0, %v2004_v8, 0.0  ;;  %v369_v37 = vmul.f32 %v1949_v31, %v347_v4 }
 0x15c   :  { %v1598_v28 = vpop.eup %1597  ;;  %409 = vadd.xlane.f32.xlu1 %v408_v12  ;;  %412 = vadd.xlane.f32.xlu0 %v411_v25  ;;  %v2015_v16 = vadd.f32 %v368_v26, %v136_v27  ;;  %v348_v46 = vmul.f32 %v1596_v13, %v1895_v47 }
 0x15d   :  { %v2020_v61 = vadd.f32 %v369_v37, %v137_v9  ;;  %v349_v18 = vmul.f32 %v1598_v28, %v1904_v62 }
 0x15e   :  { %v414_v20 = vsel %vm82_vm0, %v2015_v16, 0.0  ;;  %v370_v34 = vmul.f32 %v1949_v31, %v348_v46 }
 0x15f   :  { %v1600_v35 = vpop.eup %1599  ;;  %v417_v29 = vsel %vm82_vm0, %v2020_v61, 0.0  ;;  %v371_v41 = vmul.f32 %v1949_v31, %v349_v18 }
 0x160   :  { %v1602_v38 = vpop.eup %1601  ;;  %415 = vadd.xlane.f32.xlu1 %v414_v20  ;;  %418 = vadd.xlane.f32.xlu0 %v417_v29  ;;  %v2031_v47 = vadd.f32 %v370_v34, %v138_v40  ;;  %v350_v62 = vmul.f32 %v1600_v35, %v1907_v63 }
 0x161   :  { %v2036_v39 = vadd.f32 %v371_v41, %v139_v17  ;;  %v351_v32 = vmul.f32 %v1602_v38, %v1916_v10 }
 0x162   :  { %v420_v42 = vsel %vm82_vm0, %v2031_v47, 0.0  ;;  %v372_v43 = vmul.f32 %v1949_v31, %v350_v62 }
 0x163   :  { %v1604_v50 = vpop.eup %1603  ;;  %v423_v14 = vsel %vm82_vm0, %v2036_v39, 0.0  ;;  %v373_v45 = vmul.f32 %v1949_v31, %v351_v32 }
 0x164   :  { %v1606_v51 = vpop.eup %1605  ;;  %421 = vadd.xlane.f32.xlu1 %v420_v42  ;;  %424 = vadd.xlane.f32.xlu0 %v423_v14  ;;  %v2047_v63 = vadd.f32 %v372_v43, %v140_v44  ;;  %v352_v10 = vmul.f32 %v1604_v50, %v1919_v11 }
 0x165   :  { %v2052_v54 = vadd.f32 %v373_v45, %v141_v5  ;;  %v353_v57 = vmul.f32 %v1606_v51, %v1928_v22 }
 0x166   :  { %v426_v58 = vsel %vm82_vm0, %v2047_v63, 0.0  ;;  %v374_v0 = vmul.f32 %v1949_v31, %v352_v10 }
 0x167   :  { %v1608_v1 = vpop.eup %1607  ;;  %v429_v24 = vsel %vm82_vm0, %v2052_v54, 0.0  ;;  %v375_v49 = vmul.f32 %v1949_v31, %v353_v57 }
 0x168   :  { %427 = vadd.xlane.f32.xlu1 %v426_v58  ;;  %430 = vadd.xlane.f32.xlu0 %v429_v24  ;;  %v2063_v11 = vadd.f32 %v374_v0, %v142_v48  ;;  %v354_v22 = vmul.f32 %v1608_v1, %v1931_v23 }
 0x169   :  { %v2068_v60 = vadd.f32 %v375_v49, %v143_v55 }
 0x16a   :  { %v432_v15 = vsel %vm82_vm0, %v2063_v11, 0.0  ;;  %v376_v2 = vmul.f32 %v1949_v31, %v354_v22 }
 0x16b   :  { %v435_v3 = vsel %vm82_vm0, %v2068_v60, 0.0 }
 0x16c   :  { %433 = vadd.xlane.f32.xlu1 %v432_v15  ;;  %436 = vadd.xlane.f32.xlu0 %v435_v3  ;;  %v2075_v6 = vadd.f32 %v376_v2, %v144_v52 }
 0x16e   :  { %v438_v27 = vsel %vm82_vm0, %v2075_v6, 0.0 }
 0x170   :  { %439 = vadd.xlane.f32.xlu1 %v438_v27 }
 0x1d8   :  { %v395_v53 = vpop.xlane.xlu0 %394 }
 0x1d9   :  { %v441_v23 = vmul.f32 0.03125, %v395_v53 }
 0x1db   :  { %v2080_v19 = vsub.f32 %v1955_v59, %v441_v23 }
 0x1dd   :  { %v398_v7 = vpop.xlane.xlu1 %397  ;;  %v401_v9 = vpop.xlane.xlu0 %400  ;;  %v473_v31 = vmul.f32 %v2080_v19, %v2080_v19 }
 0x1de   :  { %v442_v4 = vmul.f32 0.03125, %v398_v7  ;;  %v443_v12 = vmul.f32 0.03125, %v401_v9 }
 0x1df   :  { %v489_v26 = vsel %vm82_vm0, %v473_v31, 0.0 }
 0x1e0   :  { %v2086_v13 = vsub.f32 %v1972_v21, %v442_v4  ;;  %v2089_v25 = vsub.f32 %v1974_v30, %v443_v12  ;;  %490 = vadd.xlane.f32.xlu0 %v489_v26 }
 0x1e1   :  { %v404_v37 = vpop.xlane.xlu1 %403  ;;  %v407_v28 = vpop.xlane.xlu0 %406 }
 0x1e2   :  { %v444_v40 = vmul.f32 0.03125, %v404_v37  ;;  %v445_v46 = vmul.f32 0.03125, %v407_v28  ;;  %v474_v17 = vmul.f32 %v2086_v13, %v2086_v13  ;;  %v475_v18 = vmul.f32 %v2089_v25, %v2089_v25 }
 0x1e4   :  { %v2096_v20 = vsub.f32 %v1985_v33, %v444_v40  ;;  %v2099_v34 = vsub.f32 %v1988_v56, %v445_v46  ;;  %v492_v35 = vsel %vm82_vm0, %v474_v17, 0.0  ;;  %v495_v29 = vsel %vm82_vm0, %v475_v18, 0.0 }
 0x1e5   :  { %493 = vadd.xlane.f32.xlu1 %v492_v35  ;;  %v410_v41 = vpop.xlane.xlu1 %409  ;;  %496 = vadd.xlane.f32.xlu0 %v495_v29  ;;  %v413_v38 = vpop.xlane.xlu0 %412 }
 0x1e6   :  { %v446_v44 = vmul.f32 0.03125, %v410_v41  ;;  %v447_v62 = vmul.f32 0.03125, %v413_v38  ;;  %v476_v5 = vmul.f32 %v2096_v20, %v2096_v20  ;;  %v477_v32 = vmul.f32 %v2099_v34, %v2099_v34 }
 0x1e8   :  { %v2108_v42 = vsub.f32 %v1999_v36, %v446_v44  ;;  %v2111_v43 = vsub.f32 %v2004_v8, %v447_v62  ;;  %v498_v50 = vsel %vm82_vm0, %v476_v5, 0.0  ;;  %v501_v14 = vsel %vm82_vm0, %v477_v32, 0.0 }
 0x1e9   :  { %499 = vadd.xlane.f32.xlu1 %v498_v50  ;;  %v416_v45 = vpop.xlane.xlu1 %415  ;;  %502 = vadd.xlane.f32.xlu0 %v501_v14  ;;  %v419_v51 = vpop.xlane.xlu0 %418 }
 0x1ea   :  { %v448_v48 = vmul.f32 0.03125, %v416_v45  ;;  %v449_v10 = vmul.f32 0.03125, %v419_v51  ;;  %v478_v55 = vmul.f32 %v2108_v42, %v2108_v42  ;;  %v479_v57 = vmul.f32 %v2111_v43, %v2111_v43 }
 0x1ec   :  { %v2120_v58 = vsub.f32 %v2015_v16, %v448_v48  ;;  %v2123_v0 = vsub.f32 %v2020_v61, %v449_v10  ;;  %v504_v1 = vsel %vm82_vm0, %v478_v55, 0.0  ;;  %v507_v24 = vsel %vm82_vm0, %v479_v57, 0.0 }
 0x1ed   :  { %505 = vadd.xlane.f32.xlu1 %v504_v1  ;;  %v422_v49 = vpop.xlane.xlu1 %421  ;;  %508 = vadd.xlane.f32.xlu0 %v507_v24  ;;  %v425_v52 = vpop.xlane.xlu0 %424 }
 0x1ee   :  { %v450_v22 = vmul.f32 0.03125, %v422_v49  ;;  %v451_v15 = vmul.f32 0.03125, %v425_v52  ;;  %v480_v2 = vmul.f32 %v2120_v58, %v2120_v58  ;;  %v481_v3 = vmul.f32 %v2123_v0, %v2123_v0  ;;  %v1567_v49 = vld [vmem:[%s2643_s3 + $0x8] sm:$0xff]   ;;  %v1568_v52 = vld [vmem:[%s2643_s3] sm:$0xff]  }
 0x1ef   :  { %1498 = vmatprep.subr.bf16.mxu0 %v1567_v49 }
 0x1f0   :  { %v2132_v27 = vsub.f32 %v2031_v47, %v450_v22  ;;  %v2135_v53 = vsub.f32 %v2036_v39, %v451_v15  ;;  %v510_v23 = vsel %vm82_vm0, %v480_v2, 0.0  ;;  %v513_v7 = vsel %vm82_vm0, %v481_v3, 0.0  ;;  %1499 = vmatpush3.bf16.msra.mxu0 %v1567_v49  ;;  %v2184_v22 = vld [vmem:[%s2644_s4 + $0x38] sm:$0xff]   ;;  %v2190_v15 = vld [vmem:[%s2644_s4 + $0x30] sm:$0xff]   ;;  %v2198_v2 = vld [vmem:[%s2644_s4 + $0x28] sm:$0xff]  }
 0x1f1   :  { %511 = vadd.xlane.f32.xlu1 %v510_v23  ;;  %v428_v9 = vpop.xlane.xlu1 %427  ;;  %514 = vadd.xlane.f32.xlu0 %v513_v7  ;;  %v431_v31 = vpop.xlane.xlu0 %430  ;;  %v2205_v3 = vld [vmem:[%s2644_s4 + $0x20] sm:$0xff]  }
 0x1f2   :  { %v452_v4 = vmul.f32 0.03125, %v428_v9  ;;  %v453_v12 = vmul.f32 0.03125, %v431_v31  ;;  %v482_v26 = vmul.f32 %v2132_v27, %v2132_v27  ;;  %v483_v37 = vmul.f32 %v2135_v53, %v2135_v53  ;;  %1500 = vmatprep.subr.bf16.mxu0 %v1568_v52  ;;  %1550 = vmatprep.subr.bf16.mxu1 %v2184_v22 }
 0x1f3   :  { %1558 = vmatpush3.bf16.msra.mxu1 %v2184_v22 }
 0x1f4   :  { %v2144_v28 = vsub.f32 %v2047_v63, %v452_v4  ;;  %v2147_v40 = vsub.f32 %v2052_v54, %v453_v12  ;;  %v516_v46 = vsel %vm82_vm0, %v482_v26, 0.0  ;;  %v519_v17 = vsel %vm82_vm0, %v483_v37, 0.0  ;;  %1501 = vmatpush3.bf16.msra.mxu0 %v1568_v52  ;;  %1551 = vmatprep.subr.bf16.mxu1 %v2190_v15 }
 0x1f5   :  { %517 = vadd.xlane.f32.xlu1 %v516_v46  ;;  %v434_v18 = vpop.xlane.xlu1 %433  ;;  %520 = vadd.xlane.f32.xlu0 %v519_v17  ;;  %v437_v35 = vpop.xlane.xlu0 %436 }
 0x1f6   :  { %v454_v29 = vmul.f32 0.03125, %v434_v18  ;;  %v455_v41 = vmul.f32 0.03125, %v437_v35  ;;  %v484_v38 = vmul.f32 %v2144_v28, %v2144_v28  ;;  %v485_v44 = vmul.f32 %v2147_v40, %v2147_v40  ;;  %1518 = vmatprep.subr.bf16.mxu0 %v2184_v22 }
 0x1f7   :  { %1559 = vmatpush3.bf16.msra.mxu1 %v2190_v15 }
 0x1f8   :  { %v2156_v62 = vsub.f32 %v2063_v11, %v454_v29  ;;  %v2159_v5 = vsub.f32 %v2068_v60, %v455_v41  ;;  %v522_v32 = vsel %vm82_vm0, %v484_v38, 0.0  ;;  %v525_v50 = vsel %vm82_vm0, %v485_v44, 0.0  ;;  %1552 = vmatprep.subr.bf16.mxu1 %v2198_v2 }
 0x1f9   :  { %523 = vadd.xlane.f32.xlu1 %v522_v32  ;;  %v440_v14 = vpop.xlane.xlu1 %439  ;;  %526 = vadd.xlane.f32.xlu0 %v525_v50 }
 0x1fa   :  { %v456_v45 = vmul.f32 0.03125, %v440_v14  ;;  %v486_v51 = vmul.f32 %v2156_v62, %v2156_v62  ;;  %v487_v48 = vmul.f32 %v2159_v5, %v2159_v5 }
 0x1fb   :  { %1560 = vmatpush3.bf16.msra.mxu1 %v2198_v2 }
 0x1fc   :  { %v2168_v10 = vsub.f32 %v2075_v6, %v456_v45  ;;  %v528_v55 = vsel %vm82_vm0, %v486_v51, 0.0  ;;  %v531_v57 = vsel %vm82_vm0, %v487_v48, 0.0  ;;  %1553 = vmatprep.subr.bf16.mxu1 %v2205_v3 }
 0x1fd   :  { %529 = vadd.xlane.f32.xlu1 %v528_v55  ;;  %532 = vadd.xlane.f32.xlu0 %v531_v57 }
 0x1fe   :  { %v488_v1 = vmul.f32 %v2168_v10, %v2168_v10 }
 0x1ff   :  { %1561 = vmatpush3.bf16.msra.mxu1 %v2205_v3 }
 0x200   :  { %v534_v24 = vsel %vm82_vm0, %v488_v1, 0.0 }
 0x201   :  { %535 = vadd.xlane.f32.xlu1 %v534_v24 }
 0x269   :  { %v491_v23 = vpop.xlane.xlu0 %490 }
 0x26a   :  { %v537_v7 = vmul.f32 0.03125, %v491_v23 }
 0x26c   :  { %v553_v9 = vadd.f32 1e-06, %v537_v7 }
 0x26e   :  { %1609 = vrsqrt.f32 %v553_v9  ;;  %v494_v31 = vpop.xlane.xlu1 %493  ;;  %v497_v4 = vpop.xlane.xlu0 %496 }
 0x26f   :  { %v538_v12 = vmul.f32 0.03125, %v494_v31  ;;  %v539_v26 = vmul.f32 0.03125, %v497_v4 }
 0x271   :  { %v554_v37 = vadd.f32 1e-06, %v538_v12  ;;  %v555_v46 = vadd.f32 1e-06, %v539_v26  ;;  %v2214_v12 = vld [vmem:[%s2642_s2] ss:$0 sm:$0xff] }
 0x272   :  { %v500_v17 = vpop.xlane.xlu1 %499  ;;  %v503_v18 = vpop.xlane.xlu0 %502 }
 0x273   :  { %1611 = vrsqrt.f32 %v554_v37  ;;  %v540_v35 = vmul.f32 0.03125, %v500_v17  ;;  %v541_v29 = vmul.f32 0.03125, %v503_v18 }
 0x274   :  { %1613 = vrsqrt.f32 %v555_v46 }
 0x275   :  { %v556_v41 = vadd.f32 1e-06, %v540_v35  ;;  %v557_v38 = vadd.f32 1e-06, %v541_v29 }
 0x276   :  { %v506_v44 = vpop.xlane.xlu1 %505  ;;  %v509_v32 = vpop.xlane.xlu0 %508 }
 0x277   :  { %1615 = vrsqrt.f32 %v556_v41  ;;  %v542_v50 = vmul.f32 0.03125, %v506_v44  ;;  %v543_v14 = vmul.f32 0.03125, %v509_v32 }
 0x278   :  { %1617 = vrsqrt.f32 %v557_v38 }
 0x279   :  { %v558_v45 = vadd.f32 1e-06, %v542_v50  ;;  %v559_v51 = vadd.f32 1e-06, %v543_v14 }
 0x27a   :  { %v512_v48 = vpop.xlane.xlu1 %511  ;;  %v515_v55 = vpop.xlane.xlu0 %514 }
 0x27b   :  { %v1610_v57 = vpop.eup %1609  ;;  %1619 = vrsqrt.f32 %v558_v45  ;;  %v544_v1 = vmul.f32 0.03125, %v512_v48  ;;  %v545_v24 = vmul.f32 0.03125, %v515_v55 }
 0x27c   :  { %1621 = vrsqrt.f32 %v559_v51  ;;  %v585_v9 = vmul.f32 %v1610_v57, %v2080_v19 }
 0x27d   :  { %v560_v49 = vadd.f32 1e-06, %v544_v1  ;;  %v561_v52 = vadd.f32 1e-06, %v545_v24 }
 0x27e   :  { %v518_v23 = vpop.xlane.xlu1 %517  ;;  %v521_v7 = vpop.xlane.xlu0 %520  ;;  %v607_v41 = vmul.f32 %v2214_v12, %v585_v9 }
 0x27f   :  { %1623 = vrsqrt.f32 %v560_v49  ;;  %v546_v31 = vmul.f32 0.03125, %v518_v23  ;;  %v547_v4 = vmul.f32 0.03125, %v521_v7 }
 0x280   :  { %v1612_v26 = vpop.eup %1611  ;;  %1625 = vrsqrt.f32 %v561_v52 }
 0x281   :  { %v1614_v37 = vpop.eup %1613  ;;  %v562_v46 = vadd.f32 1e-06, %v546_v31  ;;  %v563_v17 = vadd.f32 1e-06, %v547_v4  ;;  %v586_v18 = vmul.f32 %v1612_v26, %v2086_v13 }
 0x282   :  { %v524_v35 = vpop.xlane.xlu1 %523  ;;  %v527_v29 = vpop.xlane.xlu0 %526  ;;  %v587_v19 = vmul.f32 %v1614_v37, %v2089_v25 }
 0x283   :  { %1627 = vrsqrt.f32 %v562_v46  ;;  %v548_v38 = vmul.f32 0.03125, %v524_v35  ;;  %v549_v44 = vmul.f32 0.03125, %v527_v29  ;;  %v608_v32 = vmul.f32 %v2214_v12, %v586_v18 }
 0x284   :  { %v1616_v50 = vpop.eup %1615  ;;  %1629 = vrsqrt.f32 %v563_v17  ;;  %v609_v1 = vmul.f32 %v2214_v12, %v587_v19 }
 0x285   :  { %v1618_v14 = vpop.eup %1617  ;;  %v564_v45 = vadd.f32 1e-06, %v548_v38  ;;  %v565_v51 = vadd.f32 1e-06, %v549_v44  ;;  %v623_v48 = vpack.c.bf16 %v608_v32, %v607_v41  ;;  %v588_v55 = vmul.f32 %v1616_v50, %v2096_v20 }
 0x286   :  { %v530_v13 = vpop.xlane.xlu1 %529  ;;  %v533_v57 = vpop.xlane.xlu0 %532  ;;  %v589_v24 = vmul.f32 %v1618_v14, %v2099_v34 }
 0x287   :  { %1631 = vrsqrt.f32 %v564_v45  ;;  %v550_v25 = vmul.f32 0.03125, %v530_v13  ;;  %v551_v49 = vmul.f32 0.03125, %v533_v57  ;;  %1502 = vmatprep.mubr.msk.bf16.mxu0 %vm82_vm0, %v623_v48  ;;  %v610_v52 = vmul.f32 %v2214_v12, %v588_v55 }
 0x288   :  { %v1620_v23 = vpop.eup %1619  ;;  %1633 = vrsqrt.f32 %v565_v51  ;;  %v611_v37 = vmul.f32 %v2214_v12, %v589_v24 }
 0x289   :  { %v1622_v7 = vpop.eup %1621  ;;  %v566_v9 = vadd.f32 1e-06, %v550_v25  ;;  %v567_v31 = vadd.f32 1e-06, %v551_v49  ;;  %v624_v4 = vpack.c.bf16 %v610_v52, %v609_v1  ;;  %v590_v20 = vmul.f32 %v1620_v23, %v2108_v42 }
 0x28a   :  { %v536_v26 = vpop.xlane.xlu1 %535  ;;  %v591_v17 = vmul.f32 %v1622_v7, %v2111_v43 }
 0x28b   :  { %1635 = vrsqrt.f32 %v566_v9  ;;  %v552_v34 = vmul.f32 0.03125, %v536_v26  ;;  %1503 = vmatmul.mubr.msk.bf16.vlgmr.msra.gmra.mxu0 %vm82_vm0, %v624_v4  ;;  %v612_v46 = vmul.f32 %v2214_v12, %v590_v20 }
 0x28c   :  { %v1624_v18 = vpop.eup %1623  ;;  %1637 = vrsqrt.f32 %v567_v31  ;;  %1519 = vmatpush3.bf16.msra.mxu0 %v2184_v22  ;;  %v613_v19 = vmul.f32 %v2214_v12, %v591_v17 }
 0x28d   :  { %v1626_v35 = vpop.eup %1625  ;;  %v568_v29 = vadd.f32 1e-06, %v552_v34  ;;  %v625_v41 = vpack.c.bf16 %v612_v46, %v611_v37  ;;  %v592_v42 = vmul.f32 %v1624_v18, %v2120_v58  ;;  %1520 = vmatprep.subr.bf16.mxu0 %v2190_v15  ;;  %v2274_v18 = vstv %s120_s28 }
 0x28e   :  { %v593_v43 = vmul.f32 %v1626_v35, %v2123_v0 }
 0x28f   :  { %1639 = vrsqrt.f32 %v568_v29  ;;  %1506 = vmatprep.mubr.msk.bf16.mxu0 %vm82_vm0, %v625_v41  ;;  %v614_v38 = vmul.f32 %v2214_v12, %v592_v42 }
 0x290   :  { %v1628_v44 = vpop.eup %1627  ;;  %1521 = vmatpush3.bf16.msra.mxu0 %v2190_v15  ;;  %v615_v58 = vmul.f32 %v2214_v12, %v593_v43 }
 0x291   :  { %v1630_v22 = vpop.eup %1629  ;;  %v626_v32 = vpack.c.bf16 %v614_v38, %v613_v19  ;;  %v594_v50 = vmul.f32 %v1628_v44, %v2132_v27  ;;  %1522 = vmatprep.subr.bf16.mxu0 %v2198_v2 }
 0x292   :  { %v595_v45 = vmul.f32 %v1630_v22, %v2135_v53  ;;  %v2279_v22 = vstv %s1377_s0 }
 0x293   :  { %1507 = vmatmul.mubr.msk.bf16.gmra.mxu0 %vm82_vm0, %v626_v32  ;;  %v616_v14 = vmul.f32 %v2214_v12, %v594_v50 }
 0x294   :  { %v1632_v51 = vpop.eup %1631  ;;  %1523 = vmatpush3.bf16.msra.mxu0 %v2198_v2  ;;  %v617_v27 = vmul.f32 %v2214_v12, %v595_v45 }
 0x295   :  { %v1634_v0 = vpop.eup %1633  ;;  %v627_v48 = vpack.c.bf16 %v616_v14, %v615_v58  ;;  %v596_v15 = vmul.f32 %v1632_v51, %v2144_v28  ;;  %1524 = vmatprep.subr.bf16.mxu0 %v2205_v3 }
 0x296   :  { %v597_v13 = vmul.f32 %v1634_v0, %v2147_v40 }
 0x297   :  { %1510 = vmatprep.mubr.msk.bf16.mxu0 %vm82_vm0, %v627_v48  ;;  %v618_v55 = vmul.f32 %v2214_v12, %v596_v15 }
 0x298   :  { %v1636_v57 = vpop.eup %1635  ;;  %1525 = vmatpush3.bf16.msra.mxu0 %v2205_v3  ;;  %v619_v28 = vmul.f32 %v2214_v12, %v597_v13 }
 0x299   :  { %v1638_v53 = vpop.eup %1637  ;;  %v628_v1 = vpack.c.bf16 %v618_v55, %v617_v27  ;;  %v598_v2 = vmul.f32 %v1636_v57, %v2156_v62  ;;  %v1573_v62 = vld [vmem:[%s2644_s4 + $0x18] sm:$0xff]  }
 0x29a   :  { %v599_v25 = vmul.f32 %v1638_v53, %v2159_v5  ;;  %1526 = vmatprep.subr.bf16.mxu0 %v1573_v62  ;;  %1554 = vmatprep.subr.bf16.mxu1 %v1573_v62  ;;  %v1574_v5 = vld [vmem:[%s2644_s4 + $0x10] sm:$0xff]  }
 0x29b   :  { %1511 = vmatmul.mubr.msk.bf16.gmra.mxu0 %vm82_vm0, %v628_v1  ;;  %v620_v24 = vmul.f32 %v2214_v12, %v598_v2  ;;  %1562 = vmatpush3.bf16.msra.mxu1 %v1573_v62 }
 0x29c   :  { %v1640_v49 = vpop.eup %1639  ;;  %v621_v40 = vmul.f32 %v2214_v12, %v599_v25  ;;  %1527 = vmatpush3.bf16.msra.mxu0 %v1573_v62  ;;  %1555 = vmatprep.subr.bf16.mxu1 %v1574_v5 }
 0x29d   :  { %v629_v52 = vpack.c.bf16 %v620_v24, %v619_v28  ;;  %v600_v23 = vmul.f32 %v1640_v49, %v2168_v10  ;;  %1528 = vmatprep.subr.bf16.mxu0 %v1574_v5  ;;  %v1575_v10 = vld [vmem:[%s2644_s4 + $0x8] sm:$0xff]  }
 0x29f   :  { %1514 = vmatprep.mubr.msk.bf16.mxu0 %vm82_vm0, %v629_v52  ;;  %v622_v3 = vmul.f32 %v2214_v12, %v600_v23  ;;  %1563 = vmatpush3.bf16.msra.mxu1 %v1574_v5  ;;  %v1576_v12 = vld [vmem:[%s2644_s4] sm:$0xff]  }
 0x2a0   :  { %1529 = vmatpush3.bf16.msra.mxu0 %v1574_v5  ;;  %1556 = vmatprep.subr.bf16.mxu1 %v1575_v10 }
 0x2a1   :  { %v630_v7 = vpack.c.bf16 %v622_v3, %v621_v40  ;;  %1530 = vmatprep.subr.bf16.mxu0 %v1575_v10 }
 0x2a3   :  { %1515 = vmatmul.mubr.msk.bf16.gmra.mxu0 %vm82_vm0, %v630_v7  ;;  %1564 = vmatpush3.bf16.msra.mxu1 %v1575_v10 }
 0x2a4   :  { %1531 = vmatpush3.bf16.msra.mxu0 %v1575_v10  ;;  %1557 = vmatprep.subr.bf16.mxu1 %v1576_v12 }
 0x2a5   :  { %1532 = vmatprep.subr.bf16.mxu0 %v1576_v12 }
 0x2a7   :  { %1565 = vmatpush3.bf16.msra.mxu1 %v1576_v12 }
 0x2a8   :  { %1533 = vmatpush3.bf16.msra.mxu0 %v1576_v12 }
 0x34b   :  { %v1504_v9 = vpop.f32.mrf.mxu0 }
 0x34c   :  { %v770_v31 = vmax.f32 %v1504_v9, 0.0 }
 0x34d   :  { %v705_v4 = vpop.f32.mrf.mxu0 }
 0x34e   :  { %v768_v20 = vmax.f32 %v705_v4, 0.0  ;;  %v786_v46 = vmul.f32 %v770_v31, %v770_v31 }
 0x34f   :  { %v1505_v26 = vpop.f32.mrf.mxu0 }
 0x350   :  { %v784_v37 = vmul.f32 %v768_v20, %v768_v20  ;;  %v771_v34 = vmax.f32 %v1505_v26, 0.0  ;;  %v803_v43 = vmul.f32 %v2274_v18, %v786_v46 }
 0x351   :  { %v708_v17 = vpop.f32.mrf.mxu0 }
 0x352   :  { %v787_v35 = vmul.f32 %v771_v34, %v771_v34  ;;  %v769_v29 = vmax.f32 %v708_v17, 0.0  ;;  %v801_v42 = vmul.f32 %v2274_v18, %v784_v37  ;;  %v820_v48 = vadd.f32 %v2279_v22, %v803_v43 }
 0x353   :  { %v1508_v41 = vpop.f32.mrf.mxu0 }
 0x354   :  { %v804_v19 = vmul.f32 %v2274_v18, %v787_v35  ;;  %v785_v38 = vmul.f32 %v769_v29, %v769_v29  ;;  %v774_v50 = vmax.f32 %v1508_v41, 0.0  ;;  %v818_v51 = vadd.f32 %v2279_v22, %v801_v42 }
 0x355   :  { %v721_v44 = vpop.f32.mrf.mxu0 }
 0x356   :  { %v802_v32 = vmul.f32 %v2274_v18, %v785_v38  ;;  %v772_v58 = vmax.f32 %v721_v44, 0.0  ;;  %v821_v14 = vadd.f32 %v2279_v22, %v804_v19  ;;  %v790_v13 = vmul.f32 %v774_v50, %v774_v50 }
 0x357   :  { %v1509_v45 = vpop.f32.mrf.mxu0 }
 0x358   :  { %v819_v0 = vadd.f32 %v2279_v22, %v802_v32  ;;  %v788_v15 = vmul.f32 %v772_v58, %v772_v58  ;;  %v775_v27 = vmax.f32 %v1509_v45, 0.0  ;;  %v835_v1 = vpack.c.bf16 %v821_v14, %v820_v48 }
 0x359   :  { %v724_v55 = vpop.f32.mrf.mxu0  ;;  %v807_v23 = vmul.f32 %v2274_v18, %v790_v13 }
 0x35a   :  { %v773_v57 = vmax.f32 %v724_v55, 0.0  ;;  %v834_v53 = vpack.c.bf16 %v819_v0, %v818_v51  ;;  %v791_v2 = vmul.f32 %v775_v27, %v775_v27  ;;  %v805_v25 = vmul.f32 %v2274_v18, %v788_v15 }
 0x35b   :  { %v1512_v28 = vpop.f32.mrf.mxu0  ;;  %v824_v20 = vadd.f32 %v2279_v22, %v807_v23 }
 0x35c   :  { %v789_v24 = vmul.f32 %v773_v57, %v773_v57  ;;  %1534 = vmatprep.mubr.bf16.mxu0 %v834_v53  ;;  %v808_v49 = vmul.f32 %v2274_v18, %v791_v2  ;;  %v778_v3 = vmax.f32 %v1512_v28, 0.0  ;;  %v822_v4 = vadd.f32 %v2279_v22, %v805_v25 }
 0x35d   :  { %v737_v52 = vpop.f32.mrf.mxu0  ;;  %1535 = vmatmul.mubr.bf16.vlgmr.msra.gmra.mxu0 %v835_v1 }
 0x35e   :  { %v806_v40 = vmul.f32 %v2274_v18, %v789_v24  ;;  %v776_v7 = vmax.f32 %v737_v52, 0.0  ;;  %v825_v5 = vadd.f32 %v2279_v22, %v808_v49  ;;  %v794_v26 = vmul.f32 %v778_v3, %v778_v3 }
 0x35f   :  { %v1513_v62 = vpop.f32.mrf.mxu0 }
 0x360   :  { %v779_v10 = vmax.f32 %v1513_v62, 0.0  ;;  %v823_v12 = vadd.f32 %v2279_v22, %v806_v40  ;;  %v792_v9 = vmul.f32 %v776_v7, %v776_v7  ;;  %v837_v41 = vpack.c.bf16 %v825_v5, %v824_v20  ;;  %v2313_v62 = vld [vmem:[%s2646_s6] ss:$0 sm:$0xff] }
 0x361   :  { %v740_v31 = vpop.f32.mrf.mxu0  ;;  %v811_v38 = vmul.f32 %v2274_v18, %v794_v26 }
 0x362   :  { %v795_v37 = vmul.f32 %v779_v10, %v779_v10  ;;  %v777_v34 = vmax.f32 %v740_v31, 0.0  ;;  %v836_v17 = vpack.c.bf16 %v823_v12, %v822_v4  ;;  %v809_v42 = vmul.f32 %v2274_v18, %v792_v9 }
 0x363   :  { %v1516_v46 = vpop.f32.mrf.mxu0  ;;  %v828_v15 = vadd.f32 %v2279_v22, %v811_v38  ;;  %v1009_v12 = vmul.f32 %v2313_v62, %v1955_v59  ;;  %v1012_v4 = vmul.f32 %v2313_v62, %v1985_v33  ;;  %v1010_v59 = vmul.f32 %v2313_v62, %v1972_v21 }
 0x364   :  { %v812_v35 = vmul.f32 %v2274_v18, %v795_v37  ;;  %v793_v29 = vmul.f32 %v777_v34, %v777_v34  ;;  %1538 = vmatprep.mubr.bf16.mxu1 %v836_v17  ;;  %v782_v44 = vmax.f32 %v1516_v46, 0.0  ;;  %v826_v0 = vadd.f32 %v2279_v22, %v809_v42 }
 0x365   :  { %v753_v19 = vpop.f32.mrf.mxu0  ;;  %1539 = vmatmul.mubr.bf16.vlgmr.msra.gmra.mxu1 %v837_v41  ;;  %v1015_v46 = vmul.f32 %v2313_v62, %v2004_v8  ;;  %v1016_v8 = vmul.f32 %v2313_v62, %v2015_v16  ;;  %v1019_v16 = vmul.f32 %v2313_v62, %v2036_v39 }
 0x366   :  { %v810_v43 = vmul.f32 %v2274_v18, %v793_v29  ;;  %v780_v32 = vmax.f32 %v753_v19, 0.0  ;;  %v829_v58 = vadd.f32 %v2279_v22, %v812_v35  ;;  %v798_v27 = vmul.f32 %v782_v44, %v782_v44 }
 0x367   :  { %v1517_v50 = vpop.f32.mrf.mxu0  ;;  %v1013_v35 = vmul.f32 %v2313_v62, %v1988_v56 }
 0x368   :  { %v827_v14 = vadd.f32 %v2279_v22, %v810_v43  ;;  %v796_v45 = vmul.f32 %v780_v32, %v780_v32  ;;  %v783_v51 = vmax.f32 %v1517_v50, 0.0  ;;  %v839_v28 = vpack.c.bf16 %v829_v58, %v828_v15 }
 0x369   :  { %v756_v48 = vpop.f32.mrf.mxu0  ;;  %v815_v24 = vmul.f32 %v2274_v18, %v798_v27  ;;  %v1014_v43 = vmul.f32 %v2313_v62, %v1999_v36 }
 0x36a   :  { %v799_v55 = vmul.f32 %v783_v51, %v783_v51  ;;  %v781_v13 = vmax.f32 %v756_v48, 0.0  ;;  %v838_v57 = vpack.c.bf16 %v827_v14, %v826_v0  ;;  %v813_v53 = vmul.f32 %v2274_v18, %v796_v45 }
 0x36b   :  { %v832_v40 = vadd.f32 %v2279_v22, %v815_v24  ;;  %v1017_v45 = vmul.f32 %v2313_v62, %v2020_v61  ;;  %v1020_v0 = vmul.f32 %v2313_v62, %v2047_v63 }
 0x36c   :  { %v816_v1 = vmul.f32 %v2274_v18, %v799_v55  ;;  %v797_v2 = vmul.f32 %v781_v13, %v781_v13  ;;  %1542 = vmatprep.mubr.bf16.mxu1 %v838_v57  ;;  %v830_v49 = vadd.f32 %v2279_v22, %v813_v53  ;;  %v1018_v55 = vmul.f32 %v2313_v62, %v2031_v47 }
 0x36d   :  { %1543 = vmatmul.mubr.bf16.gmra.mxu1 %v839_v28  ;;  %v1021_v28 = vmul.f32 %v2313_v62, %v2052_v54 }
 0x36e   :  { %v814_v25 = vmul.f32 %v2274_v18, %v797_v2  ;;  %v833_v52 = vadd.f32 %v2279_v22, %v816_v1  ;;  %v1011_v18 = vmul.f32 %v2313_v62, %v1974_v30  ;;  %v1023_v1 = vmul.f32 %v2313_v62, %v2068_v60 }
 0x370   :  { %v831_v23 = vadd.f32 %v2279_v22, %v814_v25  ;;  %v841_v7 = vpack.c.bf16 %v833_v52, %v832_v40  ;;  %v1022_v40 = vmul.f32 %v2313_v62, %v2063_v11 }
 0x372   :  { %v840_v3 = vpack.c.bf16 %v831_v23, %v830_v49  ;;  %v1024_v49 = vmul.f32 %v2313_v62, %v2075_v6 }
 0x374   :  { %1546 = vmatprep.mubr.bf16.mxu1 %v840_v3 }
 0x375   :  { %1547 = vmatmul.mubr.bf16.gmra.mxu1 %v841_v7 }
 0x41d   :  { %v1536_v5 = vpop.f32.mrf.mxu0 }
 0x41e   :  { %v2317_v10 = vadd.f32 %v1536_v5, %v1011_v18 }
 0x41f   :  { %v940_v9 = vpop.f32.mrf.mxu0 }
 0x420   :  { %1043 = vst.msk [vmem:[#allocation2 + $0x10] sm:$0xff] %vm82_vm0, %v2317_v10  ;;  %v2323_v22 = vadd.f32 %v1009_v12, %v940_v9  ;;  %v1067_v31 = vsel %vm82_vm0, %v2317_v10, 0.0 }
 0x421   :  { %1068 = vadd.xlane.f32.xlu0 %v1067_v31  ;;  %v1537_v30 = vpop.f32.mrf.mxu0 }
 0x422   :  { %1041 = vst.msk [vmem:[#allocation2] sm:$0xff] %vm82_vm0, %v2323_v22  ;;  %v2331_v20 = vadd.f32 %v1537_v30, %v1012_v4  ;;  %v1061_v34 = vsel %vm82_vm0, %v2323_v22, 0.0 }
 0x423   :  { %v943_v26 = vpop.f32.mrf.mxu0 }
 0x424   :  { %1044 = vst.msk [vmem:[#allocation2 + $0x18] sm:$0xff] %vm82_vm0, %v2331_v20  ;;  %v2337_v37 = vadd.f32 %v1010_v59, %v943_v26  ;;  %v1070_v33 = vsel %vm82_vm0, %v2331_v20, 0.0 }
 0x425   :  { %1062 = vadd.xlane.f32.xlu0 %v1061_v34  ;;  %1071 = vadd.xlane.f32.xlu1 %v1070_v33  ;;  %v1540_v21 = vpop.f32.mrf.mxu1 }
 0x426   :  { %1042 = vst.msk [vmem:[#allocation2 + $0x8] sm:$0xff] %vm82_vm0, %v2337_v37  ;;  %v2347_v17 = vadd.f32 %v1540_v21, %v1015_v46  ;;  %v1064_v41 = vsel %vm82_vm0, %v2337_v37, 0.0 }
 0x427   :  { %v956_v29 = vpop.f32.mrf.mxu1 }
 0x428   :  { %1047 = vst.msk [vmem:[#allocation2 + $0x30] sm:$0xff] %vm82_vm0, %v2347_v17  ;;  %v2355_v42 = vadd.f32 %v1013_v35, %v956_v29  ;;  %v1079_v19 = vsel %vm82_vm0, %v2347_v17, 0.0 }
 0x429   :  { %1065 = vadd.xlane.f32.xlu1 %v1064_v41  ;;  %v1541_v38 = vpop.f32.mrf.mxu1  ;;  %1080 = vadd.xlane.f32.xlu0 %v1079_v19 }
 0x42a   :  { %1045 = vst.msk [vmem:[#allocation2 + $0x20] sm:$0xff] %vm82_vm0, %v2355_v42  ;;  %v2363_v56 = vadd.f32 %v1541_v38, %v1016_v8  ;;  %v1073_v50 = vsel %vm82_vm0, %v2355_v42, 0.0 }
 0x42b   :  { %v959_v44 = vpop.f32.mrf.mxu1 }
 0x42c   :  { %1048 = vst.msk [vmem:[#allocation2 + $0x38] sm:$0xff] %vm82_vm0, %v2363_v56  ;;  %v2369_v32 = vadd.f32 %v1014_v43, %v959_v44  ;;  %v1082_v58 = vsel %vm82_vm0, %v2363_v56, 0.0 }
 0x42d   :  { %v1544_v14 = vpop.f32.mrf.mxu1  ;;  %1074 = vadd.xlane.f32.xlu0 %v1073_v50  ;;  %1083 = vadd.xlane.f32.xlu1 %v1082_v58 }
 0x42e   :  { %1046 = vst.msk [vmem:[#allocation2 + $0x28] sm:$0xff] %vm82_vm0, %v2369_v32  ;;  %v2379_v36 = vadd.f32 %v1544_v14, %v1019_v16  ;;  %v1076_v15 = vsel %vm82_vm0, %v2369_v32, 0.0 }
 0x42f   :  { %v972_v51 = vpop.f32.mrf.mxu1 }
 0x430   :  { %1051 = vst.msk [vmem:[#allocation2 + $0x50] sm:$0xff] %vm82_vm0, %v2379_v36  ;;  %v2385_v39 = vadd.f32 %v1017_v45, %v972_v51  ;;  %v1091_v48 = vsel %vm82_vm0, %v2379_v36, 0.0 }
 0x431   :  { %v1545_v27 = vpop.f32.mrf.mxu1  ;;  %1092 = vadd.xlane.f32.xlu0 %v1091_v48  ;;  %1077 = vadd.xlane.f32.xlu1 %v1076_v15 }
 0x432   :  { %1049 = vst.msk [vmem:[#allocation2 + $0x40] sm:$0xff] %vm82_vm0, %v2385_v39  ;;  %v2395_v61 = vadd.f32 %v1545_v27, %v1020_v0  ;;  %v1085_v57 = vsel %vm82_vm0, %v2385_v39, 0.0 }
 0x433   :  { %v975_v13 = vpop.f32.mrf.mxu1 }
 0x434   :  { %1052 = vst.msk [vmem:[#allocation2 + $0x58] sm:$0xff] %vm82_vm0, %v2395_v61  ;;  %v2401_v63 = vadd.f32 %v1018_v55, %v975_v13  ;;  %v1094_v53 = vsel %vm82_vm0, %v2395_v61, 0.0 }
 0x435   :  { %1086 = vadd.xlane.f32.xlu0 %v1085_v57  ;;  %1095 = vadd.xlane.f32.xlu1 %v1094_v53  ;;  %v1548_v2 = vpop.f32.mrf.mxu1 }
 0x436   :  { %1050 = vst.msk [vmem:[#allocation2 + $0x48] sm:$0xff] %vm82_vm0, %v2401_v63  ;;  %v2411_v47 = vadd.f32 %v1548_v2, %v1023_v1  ;;  %v1088_v60 = vsel %vm82_vm0, %v2401_v63, 0.0 }
 0x437   :  { %v988_v24 = vpop.f32.mrf.mxu1 }
 0x438   :  { %1055 = vst.msk [vmem:[#allocation2 + $0x70] sm:$0xff] %vm82_vm0, %v2411_v47  ;;  %v2417_v25 = vadd.f32 %v1021_v28, %v988_v24  ;;  %v1103_v6 = vsel %vm82_vm0, %v2411_v47, 0.0 }
 0x439   :  { %1089 = vadd.xlane.f32.xlu1 %v1088_v60  ;;  %v1549_v52 = vpop.f32.mrf.mxu1 }
 0x43a   :  { %1053 = vst.msk [vmem:[#allocation2 + $0x60] sm:$0xff] %vm82_vm0, %v2417_v25  ;;  %v2425_v23 = vadd.f32 %v1549_v52, %v1024_v49  ;;  %v1097_v54 = vsel %vm82_vm0, %v2417_v25, 0.0 }
 0x43b   :  { %1098 = vadd.xlane.f32.xlu0 %v1097_v54  ;;  %v991_v3 = vpop.f32.mrf.mxu1 }
 0x43c   :  { %1056 = vst.msk [vmem:[#allocation2 + $0x78] sm:$0xff] %vm82_vm0, %v2425_v23  ;;  %v2433_v7 = vadd.f32 %v1022_v40, %v991_v3  ;;  %v1106_v11 = vsel %vm82_vm0, %v2425_v23, 0.0 }
 0x43e   :  { %1054 = vst.msk [vmem:[#allocation2 + $0x68] sm:$0xff] %vm82_vm0, %v2433_v7  ;;  %v1100_v18 = vsel %vm82_vm0, %v2433_v7, 0.0 }
 0x43f   :  { %1104 = vadd.xlane.f32.xlu0 %v1103_v6  ;;  %1101 = vadd.xlane.f32.xlu1 %v1100_v18 }
 0x443   :  { %1107 = vadd.xlane.f32.xlu1 %v1106_v11 }
 0x4aa   :  { %v1069_v62 = vpop.xlane.xlu0 %1068 }
 0x4ab   :  { %v1111_v5 = vmul.f32 0.03125, %v1069_v62 }
 0x4ad   :  { %v2444_v12 = vsub.f32 %v2317_v10, %v1111_v5 }
 0x4ae   :  { %v1063_v9 = vpop.xlane.xlu0 %1062  ;;  %v1072_v31 = vpop.xlane.xlu1 %1071 }
 0x4af   :  { %v1109_v4 = vmul.f32 0.03125, %v1063_v9  ;;  %v1112_v30 = vmul.f32 0.03125, %v1072_v31  ;;  %v1143_v59 = vmul.f32 %v2444_v12, %v2444_v12 }
 0x4b1   :  { %v2449_v26 = vsub.f32 %v2323_v22, %v1109_v4  ;;  %v2452_v34 = vsub.f32 %v2331_v20, %v1112_v30  ;;  %v1163_v33 = vsel %vm82_vm0, %v1143_v59, 0.0 }
 0x4b2   :  { %v1066_v46 = vpop.xlane.xlu1 %1065  ;;  %1164 = vadd.xlane.f32.xlu0 %v1163_v33  ;;  %v1081_v21 = vpop.xlane.xlu0 %1080 }
 0x4b3   :  { %v1110_v10 = vmul.f32 0.03125, %v1066_v46  ;;  %v1141_v35 = vmul.f32 %v2449_v26, %v2449_v26  ;;  %v1144_v29 = vmul.f32 %v2452_v34, %v2452_v34  ;;  %v1115_v41 = vmul.f32 0.03125, %v1081_v21 }
 0x4b5   :  { %v2460_v8 = vsub.f32 %v2337_v37, %v1110_v10  ;;  %v1157_v22 = vsel %vm82_vm0, %v1141_v35, 0.0  ;;  %v1166_v20 = vsel %vm82_vm0, %v1144_v29, 0.0  ;;  %v2465_v19 = vsub.f32 %v2347_v17, %v1115_v41 }
 0x4b6   :  { %1158 = vadd.xlane.f32.xlu0 %v1157_v22  ;;  %1167 = vadd.xlane.f32.xlu1 %v1166_v20  ;;  %v1075_v38 = vpop.xlane.xlu0 %1074  ;;  %v1084_v43 = vpop.xlane.xlu1 %1083 }
 0x4b7   :  { %v1142_v44 = vmul.f32 %v2460_v8, %v2460_v8  ;;  %v1113_v16 = vmul.f32 0.03125, %v1075_v38  ;;  %v1116_v50 = vmul.f32 0.03125, %v1084_v43  ;;  %v1147_v37 = vmul.f32 %v2465_v19, %v2465_v19 }
 0x4b9   :  { %v1160_v58 = vsel %vm82_vm0, %v1142_v44, 0.0  ;;  %v2473_v14 = vsub.f32 %v2355_v42, %v1113_v16  ;;  %v2476_v17 = vsub.f32 %v2363_v56, %v1116_v50  ;;  %v1175_v45 = vsel %vm82_vm0, %v1147_v37, 0.0 }
 0x4ba   :  { %1161 = vadd.xlane.f32.xlu1 %v1160_v58  ;;  %v1093_v51 = vpop.xlane.xlu0 %1092  ;;  %v1078_v0 = vpop.xlane.xlu1 %1077  ;;  %1176 = vadd.xlane.f32.xlu0 %v1175_v45 }
 0x4bb   :  { %v1119_v48 = vmul.f32 0.03125, %v1093_v51  ;;  %v1114_v15 = vmul.f32 0.03125, %v1078_v0  ;;  %v1145_v27 = vmul.f32 %v2473_v14, %v2473_v14  ;;  %v1148_v55 = vmul.f32 %v2476_v17, %v2476_v17 }
 0x4bd   :  { %v2484_v42 = vsub.f32 %v2379_v36, %v1119_v48  ;;  %v2487_v56 = vsub.f32 %v2369_v32, %v1114_v15  ;;  %v1169_v13 = vsel %vm82_vm0, %v1145_v27, 0.0  ;;  %v1178_v57 = vsel %vm82_vm0, %v1148_v55, 0.0 }
 0x4be   :  { %v1087_v53 = vpop.xlane.xlu0 %1086  ;;  %v1096_v1 = vpop.xlane.xlu1 %1095  ;;  %1170 = vadd.xlane.f32.xlu0 %v1169_v13  ;;  %1179 = vadd.xlane.f32.xlu1 %v1178_v57 }
 0x4bf   :  { %v1117_v2 = vmul.f32 0.03125, %v1087_v53  ;;  %v1120_v28 = vmul.f32 0.03125, %v1096_v1  ;;  %v1151_v24 = vmul.f32 %v2484_v42, %v2484_v42  ;;  %v1146_v36 = vmul.f32 %v2487_v56, %v2487_v56 }
 0x4c1   :  { %v2496_v60 = vsub.f32 %v2385_v39, %v1117_v2  ;;  %v2499_v32 = vsub.f32 %v2395_v61, %v1120_v28  ;;  %v1187_v49 = vsel %vm82_vm0, %v1151_v24, 0.0  ;;  %v1172_v52 = vsel %vm82_vm0, %v1146_v36, 0.0 }
 0x4c2   :  { %v1090_v54 = vpop.xlane.xlu1 %1089  ;;  %1188 = vadd.xlane.f32.xlu0 %v1187_v49  ;;  %1173 = vadd.xlane.f32.xlu1 %v1172_v52 }
 0x4c3   :  { %v1118_v40 = vmul.f32 0.03125, %v1090_v54  ;;  %v1149_v3 = vmul.f32 %v2496_v60, %v2496_v60  ;;  %v1152_v6 = vmul.f32 %v2499_v32, %v2499_v32  ;;  %v2542_v54 = vld [vmem:[%s2648_s8] ss:$0 sm:$0xff] }
 0x4c4   :  { %v1099_v18 = vpop.xlane.xlu0 %1098 }
 0x4c5   :  { %v2508_v39 = vsub.f32 %v2401_v63, %v1118_v40  ;;  %v1121_v61 = vmul.f32 0.03125, %v1099_v18  ;;  %v1181_v11 = vsel %vm82_vm0, %v1149_v3, 0.0  ;;  %v1190_v62 = vsel %vm82_vm0, %v1152_v6, 0.0 }
 0x4c6   :  { %1182 = vadd.xlane.f32.xlu0 %v1181_v11  ;;  %1191 = vadd.xlane.f32.xlu1 %v1190_v62 }
 0x4c7   :  { %v2513_v5 = vsub.f32 %v2417_v25, %v1121_v61  ;;  %v1150_v9 = vmul.f32 %v2508_v39, %v2508_v39 }
 0x4c8   :  { %v1105_v31 = vpop.xlane.xlu0 %1104  ;;  %v1102_v4 = vpop.xlane.xlu1 %1101 }
 0x4c9   :  { %v1123_v30 = vmul.f32 0.03125, %v1105_v31  ;;  %v1122_v59 = vmul.f32 0.03125, %v1102_v4  ;;  %v1184_v63 = vsel %vm82_vm0, %v1150_v9, 0.0  ;;  %v1153_v33 = vmul.f32 %v2513_v5, %v2513_v5 }
 0x4ca   :  { %1185 = vadd.xlane.f32.xlu1 %v1184_v63 }
 0x4cb   :  { %v2521_v46 = vsub.f32 %v2411_v47, %v1123_v30  ;;  %v2524_v21 = vsub.f32 %v2433_v7, %v1122_v59  ;;  %v1193_v25 = vsel %vm82_vm0, %v1153_v33, 0.0 }
 0x4cc   :  { %1194 = vadd.xlane.f32.xlu0 %v1193_v25  ;;  %v1108_v10 = vpop.xlane.xlu1 %1107 }
 0x4cd   :  { %v1124_v35 = vmul.f32 0.03125, %v1108_v10  ;;  %v1155_v29 = vmul.f32 %v2521_v46, %v2521_v46  ;;  %v1154_v41 = vmul.f32 %v2524_v21, %v2524_v21 }
 0x4cf   :  { %v2532_v22 = vsub.f32 %v2425_v23, %v1124_v35  ;;  %v1199_v47 = vsel %vm82_vm0, %v1155_v29, 0.0  ;;  %v1196_v20 = vsel %vm82_vm0, %v1154_v41, 0.0 }
 0x4d0   :  { %1200 = vadd.xlane.f32.xlu0 %v1199_v47  ;;  %1197 = vadd.xlane.f32.xlu1 %v1196_v20 }
 0x4d1   :  { %v1156_v7 = vmul.f32 %v2532_v22, %v2532_v22 }
 0x4d3   :  { %v1202_v38 = vsel %vm82_vm0, %v1156_v7, 0.0 }
 0x4d4   :  { %1203 = vadd.xlane.f32.xlu1 %v1202_v38 }
 0x53b   :  { %v1165_v43 = vpop.xlane.xlu0 %1164 }
 0x53c   :  { %v1207_v44 = vmul.f32 0.03125, %v1165_v43 }
 0x53e   :  { %v1223_v16 = vadd.f32 1e-06, %v1207_v44 }
 0x53f   :  { %v1159_v50 = vpop.xlane.xlu0 %1158  ;;  %v1168_v37 = vpop.xlane.xlu1 %1167 }
 0x540   :  { %1641 = vrsqrt.f32 %v1223_v16  ;;  %v1205_v23 = vmul.f32 0.03125, %v1159_v50  ;;  %v1208_v58 = vmul.f32 0.03125, %v1168_v37 }
 0x542   :  { %v1221_v45 = vadd.f32 1e-06, %v1205_v23  ;;  %v1224_v51 = vadd.f32 1e-06, %v1208_v58 }
 0x543   :  { %v1162_v0 = vpop.xlane.xlu1 %1161  ;;  %v1177_v48 = vpop.xlane.xlu0 %1176 }
 0x544   :  { %1643 = vrsqrt.f32 %v1221_v45  ;;  %v1206_v15 = vmul.f32 0.03125, %v1162_v0  ;;  %v1211_v27 = vmul.f32 0.03125, %v1177_v48 }
 0x545   :  { %1645 = vrsqrt.f32 %v1224_v51 }
 0x546   :  { %v1222_v55 = vadd.f32 1e-06, %v1206_v15  ;;  %v1227_v13 = vadd.f32 1e-06, %v1211_v27 }
 0x547   :  { %v1171_v57 = vpop.xlane.xlu0 %1170  ;;  %v1180_v53 = vpop.xlane.xlu1 %1179 }
 0x548   :  { %1647 = vrsqrt.f32 %v1222_v55  ;;  %v1209_v1 = vmul.f32 0.03125, %v1171_v57  ;;  %v1212_v2 = vmul.f32 0.03125, %v1180_v53 }
 0x549   :  { %1649 = vrsqrt.f32 %v1227_v13 }
 0x54a   :  { %v1225_v28 = vadd.f32 1e-06, %v1209_v1  ;;  %v1228_v24 = vadd.f32 1e-06, %v1212_v2 }
 0x54b   :  { %v1189_v36 = vpop.xlane.xlu0 %1188  ;;  %v1174_v49 = vpop.xlane.xlu1 %1173 }
 0x54c   :  { %1651 = vrsqrt.f32 %v1225_v28  ;;  %v1215_v40 = vmul.f32 0.03125, %v1189_v36  ;;  %v1210_v3 = vmul.f32 0.03125, %v1174_v49 }
 0x54d   :  { %v1642_v52 = vpop.eup %1641  ;;  %1653 = vrsqrt.f32 %v1228_v24 }
 0x54e   :  { %v1255_v6 = vmul.f32 %v1642_v52, %v2444_v12  ;;  %v1231_v18 = vadd.f32 1e-06, %v1215_v40  ;;  %v1226_v61 = vadd.f32 1e-06, %v1210_v3 }
 0x54f   :  { %v1183_v62 = vpop.xlane.xlu0 %1182  ;;  %v1192_v9 = vpop.xlane.xlu1 %1191 }
 0x550   :  { %v1277_v11 = vmul.f32 %v2542_v54, %v1255_v6  ;;  %1655 = vrsqrt.f32 %v1231_v18  ;;  %v1213_v4 = vmul.f32 0.03125, %v1183_v62  ;;  %v1216_v30 = vmul.f32 0.03125, %v1192_v9 }
 0x551   :  { %v1644_v31 = vpop.eup %1643  ;;  %1657 = vrsqrt.f32 %v1226_v61 }
 0x552   :  { %v1646_v59 = vpop.eup %1645  ;;  %v1419_v63 = vpack.c.bf16 %v1277_v11, %v1277_v11  ;;  %v1253_v33 = vmul.f32 %v1644_v31, %v2449_v26  ;;  %v1229_v12 = vadd.f32 1e-06, %v1213_v4  ;;  %v1232_v10 = vadd.f32 1e-06, %v1216_v30 }
 0x553   :  { %v1256_v25 = vmul.f32 %v1646_v59, %v2452_v34  ;;  %v1186_v29 = vpop.xlane.xlu1 %1185 }
 0x554   :  { %1358 = vst.msk [vmem:[%s2649_s9 + $0x8] sm:$0xf] %vm1355_vm1, %v1419_v63  ;;  %v1275_v35 = vmul.f32 %v2542_v54, %v1253_v33  ;;  %1659 = vrsqrt.f32 %v1229_v12  ;;  %v1214_v20 = vmul.f32 0.03125, %v1186_v29 }
 0x555   :  { %v1648_v41 = vpop.eup %1647  ;;  %v1278_v47 = vmul.f32 %v2542_v54, %v1256_v25  ;;  %1661 = vrsqrt.f32 %v1232_v10  ;;  %v1195_v34 = vpop.xlane.xlu0 %1194 }
 0x556   :  { %v1650_v7 = vpop.eup %1649  ;;  %v1417_v26 = vpack.c.bf16 %v1275_v35, %v1275_v35  ;;  %v1254_v38 = vmul.f32 %v1648_v41, %v2460_v8  ;;  %v1230_v16 = vadd.f32 1e-06, %v1214_v20  ;;  %v1217_v50 = vmul.f32 0.03125, %v1195_v34 }
 0x557   :  { %v1420_v43 = vpack.c.bf16 %v1278_v47, %v1278_v47  ;;  %v1259_v44 = vmul.f32 %v1650_v7, %v2465_v19 }
 0x558   :  { %1356 = vst.msk [vmem:[%s2649_s9] sm:$0xf] %vm1355_vm1, %v1417_v26  ;;  %v1276_v37 = vmul.f32 %v2542_v54, %v1254_v38  ;;  %1663 = vrsqrt.f32 %v1230_v16  ;;  %v1233_v23 = vadd.f32 1e-06, %v1217_v50 }
 0x559   :  { %1359 = vst.msk [vmem:[%s2649_s9 + $0xc] sm:$0xf] %vm1355_vm1, %v1420_v43  ;;  %v1281_v8 = vmul.f32 %v2542_v54, %v1259_v44  ;;  %v1652_v58 = vpop.eup %1651  ;;  %v1201_v45 = vpop.xlane.xlu0 %1200 }
 0x55a   :  { %v1418_v19 = vpack.c.bf16 %v1276_v37, %v1276_v37  ;;  %v1198_v51 = vpop.xlane.xlu1 %1197  ;;  %v1654_v0 = vpop.eup %1653  ;;  %v1257_v15 = vmul.f32 %v1652_v58, %v2473_v14  ;;  %1665 = vrsqrt.f32 %v1233_v23  ;;  %v1219_v27 = vmul.f32 0.03125, %v1201_v45 }
 0x55b   :  { %v1423_v48 = vpack.c.bf16 %v1281_v8, %v1281_v8  ;;  %v1260_v55 = vmul.f32 %v1654_v0, %v2476_v17  ;;  %v1218_v13 = vmul.f32 0.03125, %v1198_v51 }
 0x55c   :  { %1357 = vst.msk [vmem:[%s2649_s9 + $0x4] sm:$0xf] %vm1355_vm1, %v1418_v19  ;;  %v1279_v57 = vmul.f32 %v2542_v54, %v1257_v15  ;;  %v1235_v53 = vadd.f32 1e-06, %v1219_v27 }
 0x55d   :  { %1362 = vst.msk [vmem:[%s2649_s9 + $0x18] sm:$0xf] %vm1355_vm1, %v1423_v48  ;;  %v1656_v1 = vpop.eup %1655  ;;  %v1282_v14 = vmul.f32 %v2542_v54, %v1260_v55  ;;  %v1234_v2 = vadd.f32 1e-06, %v1218_v13 }
 0x55e   :  { %v1204_v28 = vpop.xlane.xlu1 %1203  ;;  %v1658_v24 = vpop.eup %1657  ;;  %v1421_v36 = vpack.c.bf16 %v1279_v57, %v1279_v57  ;;  %v1263_v49 = vmul.f32 %v1656_v1, %v2484_v42  ;;  %1667 = vrsqrt.f32 %v1235_v53 }
 0x55f   :  { %v1220_v17 = vmul.f32 0.03125, %v1204_v28  ;;  %v1424_v52 = vpack.c.bf16 %v1282_v14, %v1282_v14  ;;  %v1258_v40 = vmul.f32 %v1658_v24, %v2487_v56  ;;  %1669 = vrsqrt.f32 %v1234_v2 }
 0x560   :  { %1360 = vst.msk [vmem:[%s2649_s9 + $0x10] sm:$0xf] %vm1355_vm1, %v1421_v36  ;;  %v1285_v3 = vmul.f32 %v2542_v54, %v1263_v49 }
 0x561   :  { %v1236_v6 = vadd.f32 1e-06, %v1220_v17  ;;  %v1660_v18 = vpop.eup %1659  ;;  %1363 = vst.msk [vmem:[%s2649_s9 + $0x1c] sm:$0xf] %vm1355_vm1, %v1424_v52  ;;  %v1280_v42 = vmul.f32 %v2542_v54, %v1258_v40 }
 0x562   :  { %v1662_v61 = vpop.eup %1661  ;;  %v1427_v11 = vpack.c.bf16 %v1285_v3, %v1285_v3  ;;  %v1261_v56 = vmul.f32 %v1660_v18, %v2496_v60 }
 0x563   :  { %1671 = vrsqrt.f32 %v1236_v6  ;;  %v1422_v62 = vpack.c.bf16 %v1280_v42, %v1280_v42  ;;  %v1264_v9 = vmul.f32 %v1662_v61, %v2499_v32 }
 0x564   :  { %1366 = vst.msk [vmem:[%s2649_s9 + $0x28] sm:$0xf] %vm1355_vm1, %v1427_v11  ;;  %v1283_v31 = vmul.f32 %v2542_v54, %v1261_v56 }
 0x565   :  { %v1664_v4 = vpop.eup %1663  ;;  %1361 = vst.msk [vmem:[%s2649_s9 + $0x14] sm:$0xf] %vm1355_vm1, %v1422_v62  ;;  %v1286_v30 = vmul.f32 %v2542_v54, %v1264_v9 }
 0x566   :  { %v1425_v60 = vpack.c.bf16 %v1283_v31, %v1283_v31  ;;  %v1262_v59 = vmul.f32 %v1664_v4, %v2508_v39 }
 0x567   :  { %v1666_v63 = vpop.eup %1665  ;;  %v1428_v32 = vpack.c.bf16 %v1286_v30, %v1286_v30 }
 0x568   :  { %1364 = vst.msk [vmem:[%s2649_s9 + $0x20] sm:$0xf] %vm1355_vm1, %v1425_v60  ;;  %v1284_v33 = vmul.f32 %v2542_v54, %v1262_v59  ;;  %v1265_v25 = vmul.f32 %v1666_v63, %v2513_v5 }
 0x569   :  { %1367 = vst.msk [vmem:[%s2649_s9 + $0x2c] sm:$0xf] %vm1355_vm1, %v1428_v32 }
 0x56a   :  { %v1426_v12 = vpack.c.bf16 %v1284_v33, %v1284_v33  ;;  %v1287_v10 = vmul.f32 %v2542_v54, %v1265_v25 }
 0x56b   :  { %v1668_v39 = vpop.eup %1667 }
 0x56c   :  { %v1670_v35 = vpop.eup %1669  ;;  %1365 = vst.msk [vmem:[%s2649_s9 + $0x24] sm:$0xf] %vm1355_vm1, %v1426_v12  ;;  %v1429_v29 = vpack.c.bf16 %v1287_v10, %v1287_v10  ;;  %v1267_v41 = vmul.f32 %v1668_v39, %v2521_v46 }
 0x56d   :  { %v1266_v5 = vmul.f32 %v1670_v35, %v2524_v21 }
 0x56e   :  { %1368 = vst.msk [vmem:[%s2649_s9 + $0x30] sm:$0xf] %vm1355_vm1, %v1429_v29  ;;  %v1289_v47 = vmul.f32 %v2542_v54, %v1267_v41 }
 0x56f   :  { %v1288_v7 = vmul.f32 %v2542_v54, %v1266_v5 }
 0x570   :  { %v1672_v20 = vpop.eup %1671  ;;  %v1431_v26 = vpack.c.bf16 %v1289_v47, %v1289_v47 }
 0x571   :  { %v1268_v38 = vmul.f32 %v1672_v20, %v2532_v22  ;;  %v1430_v34 = vpack.c.bf16 %v1288_v7, %v1288_v7 }
 0x572   :  { %1370 = vst.msk [vmem:[%s2649_s9 + $0x38] sm:$0xf] %vm1355_vm1, %v1431_v26 }
 0x573   :  { %v1290_v46 = vmul.f32 %v2542_v54, %v1268_v38  ;;  %1369 = vst.msk [vmem:[%s2649_s9 + $0x34] sm:$0xf] %vm1355_vm1, %v1430_v34 }
 0x575   :  { %v1432_v21 = vpack.c.bf16 %v1290_v46, %v1290_v46 }
 0x577   :  { %1371 = vst.msk [vmem:[%s2649_s9 + $0x3c] sm:$0xf] %vm1355_vm1, %v1432_v21 }
 0x578   :  { %1376 = vsyncpa [#allocation4], 1 }

// kernel: metaformer_forward.11
= control target key start
LH: loop header
LB: loop body
LE: loop exit
PB: predicated region body
PF: predicated region fallthrough
CT: control target
= control target key end

     0   :  { %vm207_vm0 = vcmask 261120   ;;  %vm328_vm1 = vcmask 519168   ;;  %s554_s1 = inlined_call_operand.vmem [shape: bf16[288,64], index: 1, kind: input, shape index: {}]   ;;  %s555_s3 = inlined_call_operand.vmem [shape: f32[1,64], index: 3, kind: input, shape index: {}]   ;;  %s556_s0 = inlined_call_operand.vmem [shape: bf16[32,288], index: 0, kind: input, shape index: {}]   ;;  %s557_s2 = inlined_call_operand.vmem [shape: f32[1,64], index: 2, kind: input, shape index: {}]   ;;  %s558_s4 = inlined_call_operand.vmem [shape: bf16[32,64], index: 4, kind: output, shape index: {}]  }
   0x1   :  { %v412_v0 = vld [vmem:[%s554_s1 + $0x78] sm:$0xff]   ;;  %v414_v2 = vld [vmem:[%s554_s1 + $0x70] sm:$0xff]   ;;  %v416_v4 = vld [vmem:[%s554_s1 + $0x68] sm:$0xff]  }
   0x2   :  { %v413_v1 = vld [vmem:[%s554_s1 + $0x38] sm:$0xff]   ;;  %372 = vmatprep.subr.bf16.mxu0 %v412_v0  ;;  %v415_v3 = vld [vmem:[%s554_s1 + $0x30] sm:$0xff]   ;;  %v417_v5 = vld [vmem:[%s554_s1 + $0x28] sm:$0xff]  }
   0x3   :  { %373 = vmatpush3.bf16.msra.mxu0 %v413_v1  ;;  %v418_v6 = vld [vmem:[%s554_s1 + $0x60] sm:$0xff]   ;;  %v420_v8 = vld [vmem:[%s554_s1 + $0x58] sm:$0xff]   ;;  %v427_v10 = vld [vmem:[%s554_s1 + $0x88] sm:$0xff]  }
   0x4   :  { %374 = vmatprep.subr.bf16.mxu0 %v414_v2  ;;  %v419_v7 = vld [vmem:[%s554_s1 + $0x20] sm:$0xff]   ;;  %v421_v9 = vld [vmem:[%s554_s1 + $0x18] sm:$0xff]   ;;  %v422_v11 = vld [vmem:[%s554_s1 + $0x50] sm:$0xff]   ;;  %404 = vmatprep.subr.bf16.mxu1 %v427_v10 }
   0x5   :  { %v423_v12 = vld [vmem:[%s554_s1 + $0x10] sm:$0xff]   ;;  %v424_v13 = vld [vmem:[%s554_s1 + $0x48] sm:$0xff]   ;;  %405 = vmatpush3.bf16.msra.mxu1 %v427_v10  ;;  %v432_v15 = vld [vmem:[%s554_s1 + $0x80] sm:$0xff]  }
   0x6   :  { %v431_v14 = vld [vmem:[%s556_s0 + $0x4] ss:$12 sps:$4 sm:$0xff]   ;;  %v433_v16 = vld [vmem:[%s556_s0 + $0x8] ss:$12 sps:$4 sm:$0xff]   ;;  %406 = vmatprep.subr.bf16.mxu1 %v432_v15  ;;  %v434_v17 = vld [vmem:[%s556_s0 + $0x20] ss:$12 sps:$4 sm:$0xff]  }
   0x7   :  { %375 = vmatpush3.bf16.msra.mxu0 %v415_v3  ;;  %246 = vmatprep.mubr.bf16.mxu0 %v431_v14  ;;  %v425_v18 = vld [vmem:[%s554_s1 + $0x8] sm:$0xff]   ;;  %v426_v19 = vld [vmem:[%s554_s1 + $0x40] sm:$0xff]  }
   0x8   :  { %376 = vmatprep.subr.bf16.mxu0 %v416_v4  ;;  %408 = vmatprep.mubr.msk.bf16.mxu1 %vm207_vm0, %v433_v16  ;;  %v428_v20 = vld [vmem:[%s554_s1] sm:$0xff]   ;;  %v435_v22 = vld [vmem:[%s556_s0 + $0x1c] ss:$12 sps:$4 sm:$0xff]  }
   0x9   :  { %407 = vmatpush3.bf16.msra.mxu1 %v432_v15  ;;  %v429_v21 = vld [vmem:[%s556_s0] ss:$12 sps:$4 sm:$0xff]   ;;  %v437_v23 = vld [vmem:[%s556_s0 + $0x18] ss:$12 sps:$4 sm:$0xff]  }
   0xa   :  { %v337_v28 = vld [vmem:[%s557_s2] ss:$0 sm:$0xff] }
   0xb   :  { %377 = vmatpush3.bf16.msra.mxu0 %v417_v5 }
   0xc   :  { %378 = vmatprep.subr.bf16.mxu0 %v418_v6  ;;  %409 = vmatmul.mubr.msk.bf16.vlgmr.msra.gmra.mxu1 %vm207_vm0, %v434_v17 }
   0xf   :  { %379 = vmatpush3.bf16.msra.mxu0 %v419_v7 }
  0x10   :  { %380 = vmatprep.subr.bf16.mxu0 %v420_v8 }
  0x13   :  { %381 = vmatpush3.bf16.msra.mxu0 %v421_v9 }
  0x14   :  { %382 = vmatprep.subr.bf16.mxu0 %v422_v11 }
  0x17   :  { %383 = vmatpush3.bf16.msra.mxu0 %v423_v12 }
  0x18   :  { %384 = vmatprep.subr.bf16.mxu0 %v424_v13 }
  0x1b   :  { %385 = vmatpush3.bf16.msra.mxu0 %v425_v18 }
  0x1c   :  { %386 = vmatprep.subr.bf16.mxu0 %v426_v19 }
  0x1f   :  { %387 = vmatpush3.bf16.msra.mxu0 %v428_v20 }
  0x22   :  { %247 = vmatmul.mubr.bf16.vlgmr.msra.gmra.mxu0 %v429_v21 }
  0x23   :  { %254 = vmatprep.mubr.bf16.mxu0 %v435_v22 }
  0x2a   :  { %255 = vmatmul.mubr.bf16.gmra.mxu0 %v437_v23 }
  0xcc   :  { %v410_v24 = vpop.f32.mrf.mxu1 }
  0xce   :  { %v297_v26 = vpop.f32.mrf.mxu1 }
  0xd0   :  { %v411_v31 = vpop.f32.mrf.mxu1 }
  0xd2   :  { %v300_v37 = vpop.f32.mrf.mxu1 }
  0xe2   :  { %v388_v25 = vpop.f32.mrf.mxu0 }
  0xe4   :  { %v389_v27 = vpop.f32.mrf.mxu0 }
  0xe5   :  { %v390_v29 = vadd.f32 %v389_v27, %v388_v25 }
  0xe6   :  { %v391_v30 = vpop.f32.mrf.mxu0 }
  0xe7   :  { %v249_v32 = vadd.f32 %v390_v29, %v337_v28 }
  0xe8   :  { %v392_v33 = vpop.f32.mrf.mxu0 }
  0xe9   :  { %v393_v34 = vadd.f32 %v392_v33, %v391_v30  ;;  %v298_v35 = vadd.f32 %v297_v26, %v249_v32 }
  0xea   :  { %v394_v36 = vpop.f32.mrf.mxu0 }
  0xeb   :  { %v368_v38 = vpack.c.bf16 %v298_v35, %v298_v35  ;;  %v252_v39 = vadd.f32 %v393_v34, %v337_v28 }
  0xec   :  { %v395_v40 = vpop.f32.mrf.mxu0 }
  0xed   :  { %329 = vst.msk [vmem:[%s558_s4] sm:$0xf] %vm328_vm1, %v368_v38  ;;  %v396_v41 = vadd.f32 %v395_v40, %v394_v36  ;;  %v301_v42 = vadd.f32 %v300_v37, %v252_v39 }
  0xee   :  { %v397_v43 = vpop.f32.mrf.mxu0 }
  0xef   :  { %v257_v44 = vadd.f32 %v396_v41, %v337_v28  ;;  %v369_v45 = vpack.c.bf16 %v301_v42, %v301_v42 }
  0xf0   :  { %v398_v46 = vpop.f32.mrf.mxu0 }
  0xf1   :  { %v306_v47 = vadd.f32 %v410_v24, %v257_v44  ;;  %330 = vst.msk [vmem:[%s558_s4 + $0x4] sm:$0xf] %vm328_vm1, %v369_v45  ;;  %v399_v48 = vadd.f32 %v398_v46, %v397_v43 }
  0xf3   :  { %v370_v49 = vpack.c.bf16 %v306_v47, %v306_v47  ;;  %v260_v50 = vadd.f32 %v399_v48, %v337_v28 }
  0xf5   :  { %331 = vst.msk [vmem:[%s558_s4 + $0x8] sm:$0xf] %vm328_vm1, %v370_v49  ;;  %v309_v51 = vadd.f32 %v411_v31, %v260_v50 }
  0xf7   :  { %v371_v52 = vpack.c.bf16 %v309_v51, %v309_v51 }
  0xf9   :  { %332 = vst.msk [vmem:[%s558_s4 + $0xc] sm:$0xf] %vm328_vm1, %v371_v52 }

// kernel: metaformer_forward.12
= control target key start
LH: loop header
LB: loop body
LE: loop exit
PB: predicated region body
PF: predicated region fallthrough
CT: control target
= control target key end

     0   :  { %14 = vsyncpa [#allocation4], 0  ;;  %s1037_s0 = inlined_call_operand.vmem [shape: bf16[32,64], index: 0, kind: input, shape index: {}]   ;;  %s1038_s1 = inlined_call_operand.vmem [shape: f32[1,1,64], index: 1, kind: input, shape index: {}]   ;;  %s1039_s2 = inlined_call_operand.vmem [shape: f32[1,1,64], index: 2, kind: input, shape index: {}]   ;;  %s1040_s3 = inlined_call_operand.vmem [shape: bf16[1,64,256], index: 3, kind: input, shape index: {}]   ;;  %s1041_s4 = inlined_call_operand.vmem [shape: bf16[1,256,64], index: 4, kind: input, shape index: {}]   ;;  %s1042_s5 = inlined_call_operand.vmem [shape: f32[1,1,64], index: 5, kind: input, shape index: {}]   ;;  %s1043_s6 = inlined_call_operand.vmem [shape: f32[1,1,64], index: 6, kind: input, shape index: {}]   ;;  %s1044_s7 = inlined_call_operand.vmem [shape: f32[1,2], index: 7, kind: input, shape index: {}]   ;;  %s1045_s8 = inlined_call_operand.vmem [shape: f32[1,64], index: 8, kind: input, shape index: {}]   ;;  %s1046_s9 = inlined_call_operand.vmem [shape: bf16[32,64], index: 9, kind: output, shape index: {}]  }
   0x1   :  { %s35_s11 = sshll.u32 %s1044_s7, 4  ;;  %s36_s11 = int_to_ptr.vmem [resolvable:$true] %s35_s11 }
   0x2   :  { %s780_s12 = scalar_lea.vmem %s36_s11, 16  ;;  %p785_p1 = scmp.lt.s32.totalorder %s36_s11, %s36_s11 }
   0x3   :  { %p781_p0 = scmp.ne.s32.totalorder %s36_s11, %s780_s12  ;;  %p786_p2 = scmp.lt.s32.totalorder %s780_s12, %s780_s12 }
   0x5   :  { %p787_p3 = por %p786_p2, %p785_p1 }
   0x7   :  { %p788_p4 = pnand %p787_p3, %p781_p0 }
   0x9   :  { %791 = shalt.err (!%p788_p4)
}
   0xa   :  { %s794_s13 = smov [#allocation3]  }
   0xb   :  { %38 = dma.vmem_to_smem %s36_s11, 16, %s794_s13, [#allocation4]  }
   0xc   :  { %792 = dma.done.wait [#allocation4], 16  }
   0xd   :  { %793 = vsyncadd [#allocation4], 4294967280 }
   0xe   :  { %44 = sfence }
   0xf   :  { %v690_v0 = vld [vmem:[%s1037_s0] sm:$0xff]   ;;  %vm58_vm0 = vcmask 523264   ;;  %v697_v1 = vld [vmem:[%s1037_s0 + $0x8] sm:$0xff]   ;;  %s72_s18 = sld [smem:[#allocation3]]  ;;  %vm639_vm1 = vcmask 519168  }
  0x10   :  { %v691_v2 = vunpack.c.l.bf16 %v690_v0  ;;  %v695_v3 = vunpack.c.l.bf16 %v697_v1  ;;  %v692_v4 = vunpack.c.h.bf16 %v690_v0  ;;  %v696_v5 = vunpack.c.h.bf16 %v697_v1  ;;  %v650_v46 = vld [vmem:[%s1042_s5] ss:$0 sm:$0xff] }
  0x11   :  { %v651_v48 = vld [vmem:[%s1038_s1] ss:$0 sm:$0xff] }
  0x12   :  { %59 = vst.msk [vmem:[#allocation2] sm:$0xff] %vm58_vm0, %v691_v2  ;;  %61 = vst.msk [vmem:[#allocation2 + $0x10] sm:$0xff] %vm58_vm0, %v695_v3 }
  0x13   :  { %60 = vst.msk [vmem:[#allocation2 + $0x8] sm:$0xff] %vm58_vm0, %v692_v4  ;;  %62 = vst.msk [vmem:[#allocation2 + $0x18] sm:$0xff] %vm58_vm0, %v696_v5 }
  0x19   :  { %v63_v6 = vld [vmem:[#allocation2] sm:$0xff]  ;;  %v65_v7 = vld [vmem:[#allocation2 + $0x10] sm:$0xff] }
  0x1a   :  { %v64_v8 = vld [vmem:[#allocation2 + $0x8] sm:$0xff]  ;;  %v86_v9 = vsel %vm58_vm0, %v63_v6, 0.0  ;;  %v92_v10 = vsel %vm58_vm0, %v65_v7, 0.0  ;;  %v861_v11 = vld [vmem:[#allocation2 + $0x18] sm:$0xff]  ;;  %v81_v49 = vmul.f32 %v650_v46, %v63_v6  ;;  %v83_v57 = vmul.f32 %v650_v46, %v65_v7 }
  0x1b   :  { %87 = vadd.xlane.f32.xlu0 %v86_v9  ;;  %93 = vadd.xlane.f32.xlu1 %v92_v10  ;;  %v89_v12 = vsel %vm58_vm0, %v64_v8, 0.0  ;;  %v95_v13 = vsel %vm58_vm0, %v861_v11, 0.0  ;;  %v82_v55 = vmul.f32 %v650_v46, %v64_v8  ;;  %v84_v0 = vmul.f32 %v650_v46, %v861_v11 }
  0x1f   :  { %90 = vadd.xlane.f32.xlu0 %v89_v12  ;;  %96 = vadd.xlane.f32.xlu1 %v95_v13 }
  0xa4   :  { %v88_v14 = vpop.xlane.xlu0 %87  ;;  %v94_v15 = vpop.xlane.xlu1 %93 }
  0xa5   :  { %v99_v16 = vmul.f32 0.015625, %v88_v14  ;;  %v101_v17 = vmul.f32 0.015625, %v94_v15 }
  0xa7   :  { %v103_v18 = vsub.f32 %v63_v6, %v99_v16  ;;  %v105_v19 = vsub.f32 %v65_v7, %v101_v17 }
  0xa8   :  { %v91_v20 = vpop.xlane.xlu0 %90  ;;  %v97_v21 = vpop.xlane.xlu1 %96 }
  0xa9   :  { %v100_v22 = vmul.f32 0.015625, %v91_v20  ;;  %v102_v23 = vmul.f32 0.015625, %v97_v21  ;;  %v107_v24 = vmul.f32 %v103_v18, %v103_v18  ;;  %v109_v25 = vmul.f32 %v105_v19, %v105_v19 }
  0xab   :  { %v104_v26 = vsub.f32 %v64_v8, %v100_v22  ;;  %v106_v27 = vsub.f32 %v861_v11, %v102_v23  ;;  %v111_v28 = vsel %vm58_vm0, %v107_v24, 0.0  ;;  %v117_v29 = vsel %vm58_vm0, %v109_v25, 0.0 }
  0xac   :  { %112 = vadd.xlane.f32.xlu0 %v111_v28  ;;  %v728_v28 = vld [vmem:[%s1040_s3 + $0x34] ss:$8 sps:$4 sm:$0xff]  }
  0xad   :  { %v108_v30 = vmul.f32 %v104_v26, %v104_v26  ;;  %v110_v31 = vmul.f32 %v106_v27, %v106_v27  ;;  %279 = vmatprep.subr.bf16.mxu0 %v728_v28 }
  0xaf   :  { %v114_v32 = vsel %vm58_vm0, %v108_v30, 0.0  ;;  %v120_v33 = vsel %vm58_vm0, %v110_v31, 0.0  ;;  %v731_v30 = vld [vmem:[%s1040_s3 + $0x24] ss:$8 sps:$4 sm:$0xff]   ;;  %v733_v31 = vld [vmem:[%s1040_s3 + $0x20] ss:$8 sps:$4 sm:$0xff]  }
  0xb0   :  { %118 = vadd.xlane.f32.xlu0 %v117_v29  ;;  %115 = vadd.xlane.f32.xlu1 %v114_v32  ;;  %v730_v29 = vld [vmem:[%s1040_s3 + $0x30] ss:$8 sps:$4 sm:$0xff]   ;;  %v734_v32 = vld [vmem:[%s1040_s3 + $0x14] ss:$8 sps:$4 sm:$0xff]  }
  0xb1   :  { %280 = vmatpush1.bf16.msra.mxu0 %v730_v29 }
  0xb2   :  { %281 = vmatprep.subr.bf16.mxu0 %v731_v30 }
  0xb4   :  { %121 = vadd.xlane.f32.xlu1 %v120_v33  ;;  %v795_v33 = vmov 0  }
  0xb5   :  { %303 = vmatprep.mubr.bf16.mxu0 %v795_v33  ;;  %282 = vmatpush1.bf16.msra.mxu0 %v733_v31  ;;  %v340_v31 = vstv %s72_s18 }
  0xb6   :  { %283 = vmatprep.subr.bf16.mxu0 %v734_v32 }
 0x135   :  { %v113_v34 = vpop.xlane.xlu0 %112 }
 0x136   :  { %v123_v35 = vmul.f32 0.015625, %v113_v34  ;;  %v736_v34 = vld [vmem:[%s1040_s3 + $0x10] ss:$8 sps:$4 sm:$0xff]  }
 0x137   :  { %284 = vmatpush1.bf16.msra.mxu0 %v736_v34 }
 0x138   :  { %v127_v36 = vadd.f32 1e-06, %v123_v35  ;;  %v737_v35 = vld [vmem:[%s1040_s3 + $0x4] ss:$8 sps:$4 sm:$0xff]  }
 0x139   :  { %v116_v37 = vpop.xlane.xlu1 %115  ;;  %v119_v38 = vpop.xlane.xlu0 %118  ;;  %285 = vmatprep.subr.bf16.mxu0 %v737_v35 }
 0x13a   :  { %756 = vrsqrt.f32 %v127_v36  ;;  %v124_v39 = vmul.f32 0.015625, %v116_v37  ;;  %v125_v40 = vmul.f32 0.015625, %v119_v38  ;;  %v739_v36 = vld [vmem:[%s1040_s3] ss:$8 sps:$4 sm:$0xff]   ;;  %v740_v37 = vld [vmem:[%s1041_s4 + $0x78] sm:$0xff]   ;;  %s649_s3 = sld [smem:[#allocation3 + $0x1]] }
 0x13b   :  { %286 = vmatpush1.bf16.msra.mxu0 %v739_v36  ;;  %v741_v38 = vld [vmem:[%s1041_s4 + $0x38] sm:$0xff]   ;;  %698 = vmatprep.subr.bf16.mxu1 %v740_v37 }
 0x13c   :  { %v128_v41 = vadd.f32 1e-06, %v124_v39  ;;  %v129_v42 = vadd.f32 1e-06, %v125_v40  ;;  %v742_v39 = vld [vmem:[%s1041_s4 + $0x70] sm:$0xff]   ;;  %699 = vmatpush3.bf16.msra.mxu1 %v741_v38 }
 0x13d   :  { %v122_v43 = vpop.xlane.xlu1 %121  ;;  %v743_v40 = vld [vmem:[%s1041_s4 + $0x30] sm:$0xff]   ;;  %700 = vmatprep.subr.bf16.mxu1 %v742_v39 }
 0x13e   :  { %758 = vrsqrt.f32 %v128_v41  ;;  %v126_v44 = vmul.f32 0.015625, %v122_v43  ;;  %v744_v41 = vld [vmem:[%s1041_s4 + $0x68] sm:$0xff]   ;;  %v746_v43 = vld [vmem:[%s1041_s4 + $0x60] sm:$0xff]  }
 0x13f   :  { %760 = vrsqrt.f32 %v129_v42  ;;  %v745_v42 = vld [vmem:[%s1041_s4 + $0x28] sm:$0xff]  }
 0x140   :  { %v130_v45 = vadd.f32 1e-06, %v126_v44  ;;  %701 = vmatpush3.bf16.msra.mxu1 %v743_v40  ;;  %v747_v44 = vld [vmem:[%s1041_s4 + $0x20] sm:$0xff]  }
 0x141   :  { %702 = vmatprep.subr.bf16.mxu1 %v744_v41  ;;  %v349_v41 = vstv %s649_s3 }
 0x142   :  { %762 = vrsqrt.f32 %v130_v45 }
 0x144   :  { %703 = vmatpush3.bf16.msra.mxu1 %v745_v42 }
 0x145   :  { %704 = vmatprep.subr.bf16.mxu1 %v746_v43 }
 0x147   :  { %v757_v47 = vpop.eup %756 }
 0x148   :  { %v135_v50 = vmul.f32 %v757_v47, %v103_v18  ;;  %705 = vmatpush3.bf16.msra.mxu1 %v747_v44 }
 0x14a   :  { %v145_v51 = vmul.f32 %v651_v48, %v135_v50 }
 0x14b   :  { %v759_v52 = vpop.eup %758 }
 0x14c   :  { %v761_v53 = vpop.eup %760  ;;  %v877_v54 = vadd.f32 %v145_v51, %v81_v49  ;;  %v136_v56 = vmul.f32 %v759_v52, %v104_v26 }
 0x14d   :  { %v137_v58 = vmul.f32 %v761_v53, %v105_v19 }
 0x14e   :  { %v153_v59 = vsel %vm58_vm0, %v877_v54, 0.0  ;;  %v146_v60 = vmul.f32 %v651_v48, %v136_v56 }
 0x14f   :  { %v763_v61 = vpop.eup %762  ;;  %154 = vadd.xlane.f32.xlu0 %v153_v59  ;;  %v147_v62 = vmul.f32 %v651_v48, %v137_v58 }
 0x150   :  { %v881_v63 = vadd.f32 %v146_v60, %v82_v55  ;;  %v138_v1 = vmul.f32 %v763_v61, %v106_v27  ;;  %v652_v61 = vld [vmem:[%s1039_s2] ss:$0 sm:$0xff] }
 0x151   :  { %v884_v2 = vadd.f32 %v147_v62, %v83_v57 }
 0x152   :  { %v156_v3 = vsel %vm58_vm0, %v881_v63, 0.0  ;;  %v148_v4 = vmul.f32 %v651_v48, %v138_v1 }
 0x153   :  { %157 = vadd.xlane.f32.xlu1 %v156_v3  ;;  %v159_v5 = vsel %vm58_vm0, %v884_v2, 0.0 }
 0x154   :  { %160 = vadd.xlane.f32.xlu0 %v159_v5  ;;  %v890_v6 = vadd.f32 %v148_v4, %v84_v0 }
 0x156   :  { %v162_v7 = vsel %vm58_vm0, %v890_v6, 0.0 }
 0x157   :  { %163 = vadd.xlane.f32.xlu1 %v162_v7 }
 0x1d8   :  { %v155_v8 = vpop.xlane.xlu0 %154 }
 0x1d9   :  { %v165_v9 = vmul.f32 0.015625, %v155_v8 }
 0x1db   :  { %v895_v10 = vsub.f32 %v877_v54, %v165_v9 }
 0x1dc   :  { %v158_v11 = vpop.xlane.xlu1 %157 }
 0x1dd   :  { %v166_v12 = vmul.f32 0.015625, %v158_v11  ;;  %v161_v13 = vpop.xlane.xlu0 %160  ;;  %v173_v14 = vmul.f32 %v895_v10, %v895_v10 }
 0x1de   :  { %v167_v15 = vmul.f32 0.015625, %v161_v13  ;;  %v749_v13 = vld [vmem:[%s1041_s4 + $0x18] sm:$0xff]  }
 0x1df   :  { %v900_v16 = vsub.f32 %v881_v63, %v166_v12  ;;  %v177_v17 = vsel %vm58_vm0, %v173_v14, 0.0  ;;  %v748_v12 = vld [vmem:[%s1041_s4 + $0x58] sm:$0xff]   ;;  %v750_v14 = vld [vmem:[%s1041_s4 + $0x50] sm:$0xff]  }
 0x1e0   :  { %v904_v18 = vsub.f32 %v884_v2, %v167_v15  ;;  %v164_v19 = vpop.xlane.xlu1 %163  ;;  %178 = vadd.xlane.f32.xlu0 %v177_v17  ;;  %706 = vmatprep.subr.bf16.mxu1 %v748_v12  ;;  %v751_v15 = vld [vmem:[%s1041_s4 + $0x10] sm:$0xff]   ;;  %v753_v17 = vld [vmem:[%s1041_s4 + $0x8] sm:$0xff]  }
 0x1e1   :  { %v168_v20 = vmul.f32 0.015625, %v164_v19  ;;  %v174_v21 = vmul.f32 %v900_v16, %v900_v16  ;;  %707 = vmatpush3.bf16.msra.mxu1 %v749_v13  ;;  %v755_v19 = vld [vmem:[%s1041_s4] sm:$0xff]  }
 0x1e2   :  { %v175_v22 = vmul.f32 %v904_v18, %v904_v18  ;;  %708 = vmatprep.subr.bf16.mxu1 %v750_v14 }
 0x1e3   :  { %v911_v23 = vsub.f32 %v890_v6, %v168_v20  ;;  %v180_v24 = vsel %vm58_vm0, %v174_v21, 0.0 }
 0x1e4   :  { %181 = vadd.xlane.f32.xlu1 %v180_v24  ;;  %v183_v25 = vsel %vm58_vm0, %v175_v22, 0.0 }
 0x1e5   :  { %184 = vadd.xlane.f32.xlu0 %v183_v25  ;;  %v176_v26 = vmul.f32 %v911_v23, %v911_v23  ;;  %709 = vmatpush3.bf16.msra.mxu1 %v751_v15 }
 0x1e7   :  { %v186_v27 = vsel %vm58_vm0, %v176_v26, 0.0 }
 0x1e8   :  { %187 = vadd.xlane.f32.xlu1 %v186_v27 }
 0x269   :  { %v179_v45 = vpop.xlane.xlu0 %178 }
 0x26a   :  { %v189_v46 = vmul.f32 0.015625, %v179_v45 }
 0x26c   :  { %v193_v47 = vadd.f32 1e-06, %v189_v46 }
 0x26d   :  { %v182_v48 = vpop.xlane.xlu1 %181 }
 0x26e   :  { %764 = vrsqrt.f32 %v193_v47  ;;  %v190_v49 = vmul.f32 0.015625, %v182_v48  ;;  %v185_v50 = vpop.xlane.xlu0 %184 }
 0x26f   :  { %v191_v51 = vmul.f32 0.015625, %v185_v50 }
 0x270   :  { %v194_v52 = vadd.f32 1e-06, %v190_v49 }
 0x271   :  { %v195_v53 = vadd.f32 1e-06, %v191_v51  ;;  %v188_v55 = vpop.xlane.xlu1 %187 }
 0x272   :  { %766 = vrsqrt.f32 %v194_v52  ;;  %v192_v56 = vmul.f32 0.015625, %v188_v55 }
 0x273   :  { %768 = vrsqrt.f32 %v195_v53 }
 0x274   :  { %v196_v57 = vadd.f32 1e-06, %v192_v56 }
 0x276   :  { %770 = vrsqrt.f32 %v196_v57 }
 0x27b   :  { %v765_v58 = vpop.eup %764 }
 0x27c   :  { %v201_v59 = vmul.f32 %v765_v58, %v895_v10 }
 0x27e   :  { %v211_v1 = vmul.f32 %v652_v61, %v201_v59 }
 0x27f   :  { %v767_v60 = vpop.eup %766 }
 0x280   :  { %v202_v62 = vmul.f32 %v767_v60, %v900_v16  ;;  %v769_v0 = vpop.eup %768  ;;  %v752_v16 = vld [vmem:[%s1041_s4 + $0x48] sm:$0xff]  }
 0x281   :  { %v203_v8 = vmul.f32 %v769_v0, %v904_v18  ;;  %710 = vmatprep.subr.bf16.mxu1 %v752_v16  ;;  %v754_v18 = vld [vmem:[%s1041_s4 + $0x40] sm:$0xff]  }
 0x282   :  { %v212_v3 = vmul.f32 %v652_v61, %v202_v62  ;;  %711 = vmatpush3.bf16.msra.mxu1 %v753_v17 }
 0x283   :  { %v771_v4 = vpop.eup %770  ;;  %v213_v10 = vmul.f32 %v652_v61, %v203_v8  ;;  %712 = vmatprep.subr.bf16.mxu1 %v754_v18 }
 0x284   :  { %v215_v5 = vpack.c.bf16 %v212_v3, %v211_v1  ;;  %v204_v7 = vmul.f32 %v771_v4, %v911_v23 }
 0x286   :  { %661 = vmatmul.mubr.msk.bf16.vlgmr.msra.gmra.mxu0 %vm58_vm0, %v215_v5  ;;  %v214_v9 = vmul.f32 %v652_v61, %v204_v7  ;;  %713 = vmatpush3.bf16.msra.mxu1 %v755_v19  ;;  %v679_v7 = vld [vmem:[%s1043_s6] ss:$0 sm:$0xff] }
 0x287   :  { %313 = vmatprep.mubr.bf16.mxu0 %v795_v33  ;;  %v546_v15 = vmul.f32 %v679_v7, %v881_v63 }
 0x288   :  { %v216_v11 = vpack.c.bf16 %v214_v9, %v213_v10  ;;  %v545_v10 = vmul.f32 %v679_v7, %v877_v54 }
 0x28e   :  { %662 = vmatmul.mubr.msk.bf16.gmra.mxu0 %vm58_vm0, %v216_v11 }
 0x346   :  { %v305_v20 = vpop.f32.mrf.mxu0 }
 0x347   :  { %v324_v22 = vmax.f32 %v305_v20, 0.0 }
 0x348   :  { %v307_v21 = vpop.f32.mrf.mxu0 }
 0x349   :  { %v325_v23 = vmax.f32 %v307_v21, 0.0  ;;  %v332_v28 = vmul.f32 %v324_v22, %v324_v22  ;;  %v547_v21 = vmul.f32 %v679_v7, %v884_v2 }
 0x34a   :  { %v309_v24 = vpop.f32.mrf.mxu0 }
 0x34b   :  { %v326_v25 = vmax.f32 %v309_v24, 0.0  ;;  %v333_v26 = vmul.f32 %v325_v23, %v325_v23  ;;  %v341_v37 = vmul.f32 %v340_v31, %v332_v28 }
 0x34c   :  { %v311_v27 = vpop.f32.mrf.mxu0 }
 0x34d   :  { %v334_v29 = vmul.f32 %v326_v25, %v326_v25  ;;  %v327_v30 = vmax.f32 %v311_v27, 0.0  ;;  %v342_v35 = vmul.f32 %v340_v31, %v333_v26  ;;  %v350_v49 = vadd.f32 %v349_v41, %v341_v37 }
 0x34e   :  { %v315_v32 = vpop.f32.mrf.mxu0  ;;  %v548_v25 = vmul.f32 %v679_v7, %v890_v6 }
 0x34f   :  { %v343_v33 = vmul.f32 %v340_v31, %v334_v29  ;;  %v335_v34 = vmul.f32 %v327_v30, %v327_v30  ;;  %v328_v39 = vmax.f32 %v315_v32, 0.0  ;;  %v351_v48 = vadd.f32 %v349_v41, %v342_v35 }
 0x350   :  { %v317_v36 = vpop.f32.mrf.mxu0 }
 0x351   :  { %v344_v38 = vmul.f32 %v340_v31, %v335_v34  ;;  %v329_v40 = vmax.f32 %v317_v36, 0.0  ;;  %v352_v43 = vadd.f32 %v349_v41, %v343_v33  ;;  %v336_v50 = vmul.f32 %v328_v39, %v328_v39 }
 0x352   :  { %v319_v42 = vpop.f32.mrf.mxu0 }
 0x353   :  { %v337_v44 = vmul.f32 %v329_v40, %v329_v40  ;;  %v330_v45 = vmax.f32 %v319_v42, 0.0  ;;  %v353_v46 = vadd.f32 %v349_v41, %v344_v38  ;;  %v358_v58 = vpack.c.bf16 %v352_v43, %v350_v49 }
 0x354   :  { %v321_v47 = vpop.f32.mrf.mxu0  ;;  %v345_v59 = vmul.f32 %v340_v31, %v336_v50 }
 0x355   :  { %v338_v51 = vmul.f32 %v330_v45, %v330_v45  ;;  %v331_v52 = vmax.f32 %v321_v47, 0.0  ;;  %v359_v53 = vpack.c.bf16 %v353_v46, %v351_v48  ;;  %v346_v55 = vmul.f32 %v340_v31, %v337_v44 }
 0x356   :  { %v354_v1 = vadd.f32 %v349_v41, %v345_v59 }
 0x357   :  { %v347_v56 = vmul.f32 %v340_v31, %v338_v51  ;;  %v339_v57 = vmul.f32 %v331_v52, %v331_v52  ;;  %522 = vmatprep.mubr.bf16.mxu1 %v359_v53  ;;  %v355_v61 = vadd.f32 %v349_v41, %v346_v55 }
 0x358   :  { %523 = vmatmul.mubr.bf16.vlgmr.msra.gmra.mxu1 %v358_v58 }
 0x359   :  { %v348_v60 = vmul.f32 %v340_v31, %v339_v57  ;;  %v356_v62 = vadd.f32 %v349_v41, %v347_v56 }
 0x35b   :  { %v357_v0 = vadd.f32 %v349_v41, %v348_v60  ;;  %v360_v4 = vpack.c.bf16 %v356_v62, %v354_v1 }
 0x35d   :  { %v361_v3 = vpack.c.bf16 %v357_v0, %v355_v61  ;;  %v680_v61 = vld [vmem:[%s1045_s8] ss:$0 sm:$0xff] }
 0x35f   :  { %530 = vmatprep.mubr.bf16.mxu1 %v361_v3 }
 0x360   :  { %531 = vmatmul.mubr.bf16.gmra.mxu1 %v360_v4 }
 0x418   :  { %v714_v5 = vpop.f32.mrf.mxu1 }
 0x41a   :  { %v715_v8 = vpop.f32.mrf.mxu1 }
 0x41b   :  { %v716_v9 = vadd.f32 %v715_v8, %v714_v5 }
 0x41c   :  { %v717_v11 = vpop.f32.mrf.mxu1 }
 0x41d   :  { %v549_v12 = vadd.f32 %v716_v9, %v545_v10 }
 0x41e   :  { %v718_v13 = vpop.f32.mrf.mxu1 }
 0x41f   :  { %553 = vst.msk [vmem:[#allocation2] sm:$0xff] %vm58_vm0, %v549_v12  ;;  %v719_v14 = vadd.f32 %v718_v13, %v717_v11  ;;  %v561_v16 = vsel %vm58_vm0, %v549_v12, 0.0 }
 0x420   :  { %562 = vadd.xlane.f32.xlu0 %v561_v16  ;;  %v720_v17 = vpop.f32.mrf.mxu1 }
 0x421   :  { %v550_v18 = vadd.f32 %v719_v14, %v546_v15 }
 0x422   :  { %v721_v19 = vpop.f32.mrf.mxu1 }
 0x423   :  { %554 = vst.msk [vmem:[#allocation2 + $0x8] sm:$0xff] %vm58_vm0, %v550_v18  ;;  %v722_v20 = vadd.f32 %v721_v19, %v720_v17  ;;  %v564_v54 = vsel %vm58_vm0, %v550_v18, 0.0 }
 0x424   :  { %565 = vadd.xlane.f32.xlu1 %v564_v54  ;;  %v723_v22 = vpop.f32.mrf.mxu1 }
 0x425   :  { %v551_v23 = vadd.f32 %v722_v20, %v547_v21 }
 0x426   :  { %v724_v24 = vpop.f32.mrf.mxu1 }
 0x427   :  { %555 = vst.msk [vmem:[#allocation2 + $0x10] sm:$0xff] %vm58_vm0, %v551_v23  ;;  %v725_v63 = vadd.f32 %v724_v24, %v723_v22  ;;  %v567_v26 = vsel %vm58_vm0, %v551_v23, 0.0 }
 0x428   :  { %568 = vadd.xlane.f32.xlu0 %v567_v26 }
 0x429   :  { %v552_v27 = vadd.f32 %v725_v63, %v548_v25 }
 0x42b   :  { %556 = vst.msk [vmem:[#allocation2 + $0x18] sm:$0xff] %vm58_vm0, %v552_v27  ;;  %v570_v28 = vsel %vm58_vm0, %v552_v27, 0.0 }
 0x42c   :  { %571 = vadd.xlane.f32.xlu1 %v570_v28 }
 0x4a9   :  { %v563_v2 = vpop.xlane.xlu0 %562 }
 0x4aa   :  { %v573_v29 = vmul.f32 0.015625, %v563_v2 }
 0x4ac   :  { %v577_v30 = vsub.f32 %v549_v12, %v573_v29 }
 0x4ad   :  { %v566_v31 = vpop.xlane.xlu1 %565 }
 0x4ae   :  { %v574_v32 = vmul.f32 0.015625, %v566_v31  ;;  %v581_v33 = vmul.f32 %v577_v30, %v577_v30 }
 0x4b0   :  { %v578_v34 = vsub.f32 %v550_v18, %v574_v32  ;;  %v585_v35 = vsel %vm58_vm0, %v581_v33, 0.0 }
 0x4b1   :  { %586 = vadd.xlane.f32.xlu0 %v585_v35  ;;  %v569_v6 = vpop.xlane.xlu0 %568 }
 0x4b2   :  { %v575_v36 = vmul.f32 0.015625, %v569_v6  ;;  %v582_v37 = vmul.f32 %v578_v34, %v578_v34 }
 0x4b4   :  { %v579_v38 = vsub.f32 %v551_v23, %v575_v36  ;;  %v588_v39 = vsel %vm58_vm0, %v582_v37, 0.0 }
 0x4b5   :  { %589 = vadd.xlane.f32.xlu1 %v588_v39  ;;  %v572_v40 = vpop.xlane.xlu1 %571 }
 0x4b6   :  { %v576_v41 = vmul.f32 0.015625, %v572_v40  ;;  %v583_v42 = vmul.f32 %v579_v38, %v579_v38 }
 0x4b8   :  { %v580_v43 = vsub.f32 %v552_v27, %v576_v41  ;;  %v591_v44 = vsel %vm58_vm0, %v583_v42, 0.0 }
 0x4b9   :  { %592 = vadd.xlane.f32.xlu0 %v591_v44 }
 0x4ba   :  { %v584_v45 = vmul.f32 %v580_v43, %v580_v43 }
 0x4bc   :  { %v594_v46 = vsel %vm58_vm0, %v584_v45, 0.0 }
 0x4bd   :  { %595 = vadd.xlane.f32.xlu1 %v594_v46 }
 0x53a   :  { %v587_v47 = vpop.xlane.xlu0 %586 }
 0x53b   :  { %v597_v48 = vmul.f32 0.015625, %v587_v47 }
 0x53d   :  { %v601_v49 = vadd.f32 1e-06, %v597_v48 }
 0x53e   :  { %v590_v50 = vpop.xlane.xlu1 %589 }
 0x53f   :  { %772 = vrsqrt.f32 %v601_v49  ;;  %v598_v51 = vmul.f32 0.015625, %v590_v50 }
 0x541   :  { %v602_v52 = vadd.f32 1e-06, %v598_v51 }
 0x542   :  { %v593_v53 = vpop.xlane.xlu0 %592 }
 0x543   :  { %774 = vrsqrt.f32 %v602_v52  ;;  %v599_v55 = vmul.f32 0.015625, %v593_v53 }
 0x545   :  { %v603_v56 = vadd.f32 1e-06, %v599_v55 }
 0x546   :  { %v596_v57 = vpop.xlane.xlu1 %595 }
 0x547   :  { %776 = vrsqrt.f32 %v603_v56  ;;  %v600_v58 = vmul.f32 0.015625, %v596_v57 }
 0x549   :  { %v604_v59 = vadd.f32 1e-06, %v600_v58 }
 0x54b   :  { %778 = vrsqrt.f32 %v604_v59 }
 0x54c   :  { %v773_v60 = vpop.eup %772 }
 0x54d   :  { %v609_v62 = vmul.f32 %v773_v60, %v577_v30 }
 0x54f   :  { %v619_v0 = vmul.f32 %v680_v61, %v609_v62 }
 0x550   :  { %v775_v1 = vpop.eup %774 }
 0x551   :  { %v685_v3 = vpack.c.bf16 %v619_v0, %v619_v0  ;;  %v610_v4 = vmul.f32 %v775_v1, %v578_v34 }
 0x553   :  { %640 = vst.msk [vmem:[%s1046_s9] sm:$0xf] %vm639_vm1, %v685_v3  ;;  %v620_v5 = vmul.f32 %v680_v61, %v610_v4 }
 0x554   :  { %v777_v7 = vpop.eup %776 }
 0x555   :  { %v686_v8 = vpack.c.bf16 %v620_v5, %v620_v5  ;;  %v611_v9 = vmul.f32 %v777_v7, %v579_v38 }
 0x557   :  { %641 = vst.msk [vmem:[%s1046_s9 + $0x4] sm:$0xf] %vm639_vm1, %v686_v8  ;;  %v621_v10 = vmul.f32 %v680_v61, %v611_v9 }
 0x558   :  { %v779_v11 = vpop.eup %778 }
 0x559   :  { %v687_v12 = vpack.c.bf16 %v621_v10, %v621_v10  ;;  %v612_v13 = vmul.f32 %v779_v11, %v580_v43 }
 0x55b   :  { %642 = vst.msk [vmem:[%s1046_s9 + $0x8] sm:$0xf] %vm639_vm1, %v687_v12  ;;  %v622_v14 = vmul.f32 %v680_v61, %v612_v13 }
 0x55d   :  { %v688_v15 = vpack.c.bf16 %v622_v14, %v622_v14 }
 0x55f   :  { %643 = vst.msk [vmem:[%s1046_s9 + $0xc] sm:$0xf] %vm639_vm1, %v688_v15 }
 0x560   :  { %648 = vsyncpa [#allocation4], 1 }

// kernel: metaformer_forward.13
= control target key start
LH: loop header
LB: loop body
LE: loop exit
PB: predicated region body
PF: predicated region fallthrough
CT: control target
= control target key end

     0   :  { %v610_v35 = vmov 0.0   ;;  %vm611_vm0 = vmmov 0   ;;  %vm333_vm1 = vcmask 523264   ;;  %s760_s1 = inlined_call_operand.vmem [shape: bf16[576,128], index: 1, kind: input, shape index: {}]   ;;  %s761_s3 = inlined_call_operand.vmem [shape: f32[1,128], index: 3, kind: input, shape index: {}]   ;;  %s762_s0 = inlined_call_operand.vmem [shape: bf16[8,576], index: 0, kind: input, shape index: {}]   ;;  %s763_s2 = inlined_call_operand.vmem [shape: f32[1,128], index: 2, kind: input, shape index: {}]   ;;  %s764_s4 = inlined_call_operand.vmem [shape: bf16[8,128], index: 4, kind: output, shape index: {}]  }
   0x1   :  { %v569_v0 = vld [vmem:[%s760_s1 + $0x78] sm:$0xff]   ;;  %v573_v4 = vld [vmem:[%s760_s1 + $0x70] sm:$0xff]   ;;  %v577_v8 = vld [vmem:[%s760_s1 + $0x68] sm:$0xff]  }
   0x2   :  { %v570_v1 = vld [vmem:[%s760_s1 + $0x38] sm:$0xff]   ;;  %506 = vmatprep.subr.bf16.mxu0 %v569_v0  ;;  %v574_v5 = vld [vmem:[%s760_s1 + $0x30] sm:$0xff]   ;;  %v578_v9 = vld [vmem:[%s760_s1 + $0x28] sm:$0xff]  }
   0x3   :  { %v571_v2 = vld [vmem:[%s760_s1 + $0xf8] sm:$0xff]   ;;  %507 = vmatpush3.bf16.msra.mxu0 %v570_v1  ;;  %v575_v6 = vld [vmem:[%s760_s1 + $0xf0] sm:$0xff]   ;;  %v579_v10 = vld [vmem:[%s760_s1 + $0xe8] sm:$0xff]  }
   0x4   :  { %v572_v3 = vld [vmem:[%s760_s1 + $0xb8] sm:$0xff]   ;;  %528 = vmatprep.subr.bf16.mxu1 %v571_v2  ;;  %508 = vmatprep.subr.bf16.mxu0 %v573_v4  ;;  %v576_v7 = vld [vmem:[%s760_s1 + $0xb0] sm:$0xff]   ;;  %v580_v11 = vld [vmem:[%s760_s1 + $0xa8] sm:$0xff]  }
   0x5   :  { %529 = vmatpush3.bf16.msra.mxu1 %v572_v3  ;;  %v581_v12 = vld [vmem:[%s760_s1 + $0x60] sm:$0xff]   ;;  %v585_v16 = vld [vmem:[%s760_s1 + $0x58] sm:$0xff]   ;;  %v589_v20 = vld [vmem:[%s760_s1 + $0x50] sm:$0xff]  }
   0x6   :  { %530 = vmatprep.subr.bf16.mxu1 %v575_v6  ;;  %v582_v13 = vld [vmem:[%s760_s1 + $0x20] sm:$0xff]   ;;  %v586_v17 = vld [vmem:[%s760_s1 + $0x18] sm:$0xff]   ;;  %v590_v21 = vld [vmem:[%s760_s1 + $0x10] sm:$0xff]  }
   0x7   :  { %509 = vmatpush3.bf16.msra.mxu0 %v574_v5  ;;  %v583_v14 = vld [vmem:[%s760_s1 + $0xe0] sm:$0xff]   ;;  %v587_v18 = vld [vmem:[%s760_s1 + $0xd8] sm:$0xff]   ;;  %v591_v22 = vld [vmem:[%s760_s1 + $0xd0] sm:$0xff]  }
   0x8   :  { %510 = vmatprep.subr.bf16.mxu0 %v577_v8  ;;  %v584_v15 = vld [vmem:[%s760_s1 + $0xa0] sm:$0xff]   ;;  %v588_v19 = vld [vmem:[%s760_s1 + $0x98] sm:$0xff]   ;;  %v592_v23 = vld [vmem:[%s760_s1 + $0x90] sm:$0xff]  }
   0x9   :  { %531 = vmatpush3.bf16.msra.mxu1 %v576_v7  ;;  %v593_v24 = vld [vmem:[%s760_s1 + $0x48] sm:$0xff]   ;;  %v597_v28 = vld [vmem:[%s760_s1 + $0x40] sm:$0xff]   ;;  %v606_v39 = vld [vmem:[%s760_s1 + $0x118] sm:$0xff]  }
   0xa   :  { %532 = vmatprep.subr.bf16.mxu1 %v579_v10  ;;  %v594_v25 = vld [vmem:[%s760_s1 + $0x8] sm:$0xff]   ;;  %v598_v29 = vld [vmem:[%s760_s1] sm:$0xff]   ;;  %v607_v40 = vld [vmem:[%s760_s1 + $0x110] sm:$0xff]  }
   0xb   :  { %511 = vmatpush3.bf16.msra.mxu0 %v578_v9  ;;  %v595_v26 = vld [vmem:[%s760_s1 + $0xc8] sm:$0xff]   ;;  %v599_v30 = vld [vmem:[%s760_s1 + $0xc0] sm:$0xff]   ;;  %v602_v43 = vld [vmem:[%s762_s0 + $0x10] ss:$0 sps:$4 sm:$0xff]  }
   0xc   :  { %512 = vmatprep.subr.bf16.mxu0 %v581_v12  ;;  %v596_v27 = vld [vmem:[%s760_s1 + $0x88] sm:$0xff]   ;;  %v18_v31 = vld [vmem:[%s762_s0] sm:$0xff] }
   0xd   :  { %533 = vmatpush3.bf16.msra.mxu1 %v580_v11  ;;  %v464_v32 = vcombine.low %v18_v31, %v18_v31  ;;  %v465_v33 = vcombine.high %v18_v31, %v18_v31  ;;  %v603_v34 = vld [vmem:[%s760_s1 + $0x80] sm:$0xff]   ;;  %v19_v36 = vld [vmem:[%s762_s0 + $0x8] sm:$0xff] }
   0xe   :  { %534 = vmatprep.subr.bf16.mxu1 %v583_v14  ;;  %v466_v37 = vcombine.low %v19_v36, %v19_v36  ;;  %v467_v38 = vcombine.high %v19_v36, %v19_v36  ;;  %v608_v41 = vld [vmem:[%s760_s1 + $0x108] sm:$0xff]   ;;  %v609_v42 = vld [vmem:[%s760_s1 + $0x100] sm:$0xff]  }
   0xf   :  { %513 = vmatpush3.bf16.msra.mxu0 %v582_v13  ;;  %369 = vmatprep.mubr.bf16.mxu0 %v465_v33  ;;  %v463_v52 = vld [vmem:[%s763_s2] ss:$0 sm:$0xff] }
  0x10   :  { %514 = vmatprep.subr.bf16.mxu0 %v585_v16  ;;  %409 = vmatprep.mubr.bf16.mxu1 %v467_v38 }
  0x11   :  { %535 = vmatpush3.bf16.msra.mxu1 %v584_v15 }
  0x12   :  { %536 = vmatprep.subr.bf16.mxu1 %v587_v18 }
  0x13   :  { %515 = vmatpush3.bf16.msra.mxu0 %v586_v17 }
  0x14   :  { %516 = vmatprep.subr.bf16.mxu0 %v589_v20 }
  0x15   :  { %537 = vmatpush3.bf16.msra.mxu1 %v588_v19 }
  0x16   :  { %538 = vmatprep.subr.bf16.mxu1 %v591_v22 }
  0x17   :  { %517 = vmatpush3.bf16.msra.mxu0 %v590_v21 }
  0x18   :  { %518 = vmatprep.subr.bf16.mxu0 %v593_v24 }
  0x19   :  { %539 = vmatpush3.bf16.msra.mxu1 %v592_v23 }
  0x1a   :  { %540 = vmatprep.subr.bf16.mxu1 %v595_v26 }
  0x1b   :  { %519 = vmatpush3.bf16.msra.mxu0 %v594_v25 }
  0x1c   :  { %520 = vmatprep.subr.bf16.mxu0 %v597_v28 }
  0x1d   :  { %541 = vmatpush3.bf16.msra.mxu1 %v596_v27 }
  0x1e   :  { %542 = vmatprep.subr.bf16.mxu1 %v599_v30 }
  0x1f   :  { %521 = vmatpush3.bf16.msra.mxu0 %v598_v29 }
  0x20   :  { %555 = vmatprep.subr.bf16.mxu0 %v610_v35 }
  0x21   :  { %543 = vmatpush3.bf16.msra.mxu1 %v603_v34 }
  0x22   :  { %370 = vmatmul.mubr.bf16.vlgmr.msra.gmra.mxu0 %v464_v32 }
  0x23   :  { %556 = vmatpush3.bf16.msra.mxu0 %v606_v39  ;;  %563 = vmatprep.mubr.msk.bf16.mxu0 %vm611_vm0, %v610_v35 }
  0x24   :  { %410 = vmatmul.mubr.bf16.vlgmr.msra.gmra.mxu1 %v466_v37  ;;  %557 = vmatprep.subr.bf16.mxu0 %v610_v35 }
  0x27   :  { %558 = vmatpush3.bf16.msra.mxu0 %v607_v40 }
  0x28   :  { %559 = vmatprep.subr.bf16.mxu0 %v610_v35 }
  0x2b   :  { %560 = vmatpush3.bf16.msra.mxu0 %v608_v41 }
  0x2c   :  { %561 = vmatprep.subr.bf16.mxu0 %v610_v35 }
  0x2f   :  { %562 = vmatpush3.bf16.msra.mxu0 %v609_v42 }
  0x32   :  { %564 = vmatmul.mubr.msk.bf16.vlgmr.msra.gmra.mxu0 %vm333_vm1, %v602_v43 }
  0xe2   :  { %v522_v44 = vpop.f32.mrf.mxu0 }
  0xe4   :  { %v523_v45 = vpop.f32.mrf.mxu0  ;;  %v544_v46 = vpop.f32.mrf.mxu1 }
  0xe5   :  { %v524_v51 = vadd.f32 %v523_v45, %v522_v44 }
  0xe6   :  { %v525_v47 = vpop.f32.mrf.mxu0  ;;  %v545_v48 = vpop.f32.mrf.mxu1 }
  0xe7   :  { %v372_v54 = vadd.f32 %v524_v51, %v463_v52  ;;  %v546_v55 = vadd.f32 %v545_v48, %v544_v46 }
  0xe8   :  { %v526_v49 = vpop.f32.mrf.mxu0  ;;  %v547_v50 = vpop.f32.mrf.mxu1 }
  0xe9   :  { %v412_v56 = vadd.f32 %v546_v55, %v372_v54 }
  0xea   :  { %v548_v53 = vpop.f32.mrf.mxu1 }
  0xf2   :  { %v451_v57 = vpop.f32.mrf.mxu0 }
  0xf3   :  { %v452_v58 = vadd.f32 %v451_v57, %v412_v56 }
  0xf4   :  { %v565_v59 = vpop.f32.mrf.mxu0 }
  0xf5   :  { %v457_v60 = vpack.c.bf16 %v452_v58, %v452_v58 }
  0xf6   :  { %v454_v61 = vpop.f32.mrf.mxu0 }
  0xf7   :  { %458 = vst [vmem:[%s764_s4] sm:$0xf] %v457_v60 }
  0xf8   :  { %v566_v62 = vpop.f32.mrf.mxu0 }

// kernel: metaformer_forward.14
= control target key start
LH: loop header
LB: loop body
LE: loop exit
PB: predicated region body
PF: predicated region fallthrough
CT: control target
= control target key end

     0   :  { %14 = vsyncpa [#allocation4], 0  ;;  %s1662_s30 = smov 0   ;;  %s1664_s10 = smov 0   ;;  %s1840_s0 = inlined_call_operand.vmem [shape: bf16[8,128], index: 0, kind: input, shape index: {}]   ;;  %s1841_s1 = inlined_call_operand.vmem [shape: f32[2,1,128], index: 1, kind: input, shape index: {}]   ;;  %s1842_s2 = inlined_call_operand.vmem [shape: f32[2,1,128], index: 2, kind: input, shape index: {}]   ;;  %s1843_s3 = inlined_call_operand.vmem [shape: bf16[2,128,512], index: 3, kind: input, shape index: {}]   ;;  %s1844_s4 = inlined_call_operand.vmem [shape: bf16[2,512,128], index: 4, kind: input, shape index: {}]   ;;  %s1845_s5 = inlined_call_operand.vmem [shape: f32[2,1,128], index: 5, kind: input, shape index: {}]   ;;  %s1846_s6 = inlined_call_operand.vmem [shape: f32[2,1,128], index: 6, kind: input, shape index: {}]   ;;  %s1847_s7 = inlined_call_operand.vmem [shape: f32[2,2], index: 7, kind: input, shape index: {}]   ;;  %s1848_s8 = inlined_call_operand.vmem [shape: f32[1,128], index: 8, kind: input, shape index: {}]   ;;  %s1849_s9 = inlined_call_operand.vmem [shape: bf16[8,128], index: 9, kind: output, shape index: {}]  }
   0x1   :  { %s1666_s11 = smov 0  }
   0x2 LB: > { %s1313_s12 = sadd.s32 4294967295, %s1608_s11   ;;  %s29_s13 = sadd.s32 1, %s1604_s10  ;;  %s1608_s11 = sphi %s1666_s11, %s20_s11   ;;  %s1604_s10 = sphi %s1664_s10, %s1853_s10   ;;  %s1600_s30 = sphi %s1662_s30, %s1852_s30  }
   0x3   : > { %p30_p0 = scmp.ge.s32.totalorder %s29_s13, 2  ;;  %p1314_p1 = scmp.ge.s32.totalorder %s1608_s11, 1 }
   0x4   : > { %p287_p2 = scmp.lt.s32.totalorder %s1608_s11, 3  ;;  %p1687_p4 = scmp.eq.s32.totalorder %s1313_s12, 0 }
   0x5   : > { %s1855_s13 = smov (%p30_p0, %s29_s13), 0  ;;  %s307_s18 = sshll.u32 %s1847_s7, 4  ;;  %s308_s18 = int_to_ptr.vmem [resolvable:$true] %s307_s18 }
   0x6   : > { %p1683_p3 = pnand %p1314_p1, %p287_p2  ;;  %s1567_s19 = scalar_lea.vmem %s308_s18, 32 }
   0x7   : > { %p1568_p7 = scmp.ne.s32.totalorder %s308_s18, %s1567_s19  ;;  %p1575_p11 = scmp.lt.s32.totalorder %s308_s18, %s308_s18 }
   0x8   : > { %p1449_p5 = pneg %p1683_p3  ;;  %p1576_p12 = scmp.lt.s32.totalorder %s1567_s19, %s1567_s19 }
   0xa   : > { %p1450_p6 = pnand %p1687_p4, %p1449_p5  ;;  %p1577_p13 = por %p1576_p12, %p1575_p11 }
   0xc   : > { %p1569_p8 = pneg %p1450_p6 }
   0xe   : > { %p1570_p9 = pnand %p1569_p8, %p1568_p7 }
  0x10   : > { %p1571_p10 = pneg %p1570_p9 }
  0x12   : > { %p1578_p0 = pnand %p1577_p13, %p1571_p10 }
  0x14   : > { %1581 = shalt.err (!%p1578_p0)
}
  0x15   : > { %s1610_s20 = smov [#allocation3]   ;;  %363 = sbr.rel (%p1683_p3) target bundleno = 1375 (0x55f), region = 56 }
  0x16   : > { %1452 = dma.vmem_to_smem (!%p1450_p6), %s308_s18, 32, %s1610_s20, [#allocation4]  }
  0x1a   : > { %1595 = dma.done.wait (%p1687_p4), [#allocation4], 32  }
  0x1b   : > { %1597 = vsyncadd (%p1687_p4), [#allocation4], 4294967264 }
  0x1c   : > { %369 = sfence }
  0x1d   : > { %p424_p1 = scmp.lt.s32.totalorder %s1600_s30, 1  ;;  %p1324_p2 = scmp.ne.s32.totalorder %s1600_s30, 0 }
  0x1f   : > { %s1706_s21 = scalar_select %p424_p1, %s1600_s30, 1 }
  0x20   : > { %454 = sbr.rel (%p1324_p2) target bundleno = 41 (0x29), region = 64 }
  0x21   : > { %s426_s24 = scalar_lea.vmem %s1841_s1, %s1706_s21  ;;  %s429_s27 = scalar_lea.vmem %s1842_s2, %s1706_s21 }
  0x22   : > { %s1399_s28 = sshll.u32 %s1706_s21, 8  ;;  %s442_s14 = scalar_lea.vmem %s1845_s5, %s1706_s21 }
  0x23   : > { %s1724_s17 = scalar_lea.vmem %s1843_s3, %s1399_s28  ;;  %s1729_s20 = scalar_lea.vmem %s1844_s4, %s1399_s28 }
  0x24   : > { %s445_s25 = scalar_lea.vmem %s1846_s6, %s1706_s21 }
  0x25   : > { %v455_v0 = vld [vmem:[%s1840_s0] sm:$0xf] }
  0x26   : > { %v456_v1 = vunpack.c.l.bf16 %v455_v0 }
  0x28   : > { %457 = vst [vmem:[#allocation2] sm:$0xff] %v456_v1 }
  0x29 PF: > { %v1326_v10 = vld [vmem:[%s442_s14] ss:$0 sm:$0xff]  ;;  %v1481_v17 = vld [vmem:[%s1724_s17 + $0xe4] ss:$16 sps:$4 sm:$0xff]   ;;  %v1483_v18 = vld [vmem:[%s1724_s17 + $0xec] ss:$16 sps:$4 sm:$0xff]  }
  0x2a   : > { %v1327_v12 = vld [vmem:[%s426_s24] ss:$0 sm:$0xff]  ;;  %v1486_v20 = vld [vmem:[%s1724_s17 + $0xe8] ss:$16 sps:$4 sm:$0xff]   ;;  %v1487_v21 = vld [vmem:[%s1724_s17 + $0xc4] ss:$16 sps:$4 sm:$0xff]   ;;  %705 = vmatprep.subr.bf16.mxu0 %v1481_v17  ;;  %746 = vmatprep.subr.bf16.mxu1 %v1483_v18 }
  0x2b   : > { %v1485_v19 = vld [vmem:[%s1724_s17 + $0xe0] ss:$16 sps:$4 sm:$0xff]   ;;  %v1489_v22 = vld [vmem:[%s1724_s17 + $0xcc] ss:$16 sps:$4 sm:$0xff]   ;;  %747 = vmatpush1.bf16.msra.mxu1 %v1486_v20  ;;  %v1492_v24 = vld [vmem:[%s1724_s17 + $0xc8] ss:$16 sps:$4 sm:$0xff]  }
  0x2c   : > { %706 = vmatpush1.bf16.msra.mxu0 %v1485_v19  ;;  %v1491_v23 = vld [vmem:[%s1724_s17 + $0xc0] ss:$16 sps:$4 sm:$0xff]   ;;  %748 = vmatprep.subr.bf16.mxu1 %v1489_v22  ;;  %v1493_v29 = vld [vmem:[%s1724_s17 + $0xa4] ss:$16 sps:$4 sm:$0xff]   ;;  %v1495_v30 = vld [vmem:[%s1724_s17 + $0xac] ss:$16 sps:$4 sm:$0xff]  }
  0x2d   : > { %707 = vmatprep.subr.bf16.mxu0 %v1487_v21  ;;  %v1497_v31 = vld [vmem:[%s1724_s17 + $0xa0] ss:$16 sps:$4 sm:$0xff]   ;;  %v1498_v32 = vld [vmem:[%s1724_s17 + $0xa8] ss:$16 sps:$4 sm:$0xff]   ;;  %v1499_v33 = vld [vmem:[%s1724_s17 + $0x84] ss:$16 sps:$4 sm:$0xff]  }
  0x2e   : > { %v1501_v34 = vld [vmem:[%s1724_s17 + $0x8c] ss:$16 sps:$4 sm:$0xff]   ;;  %v1503_v35 = vld [vmem:[%s1724_s17 + $0x80] ss:$16 sps:$4 sm:$0xff]   ;;  %v1504_v36 = vld [vmem:[%s1724_s17 + $0x88] ss:$16 sps:$4 sm:$0xff]  }
  0x2f   : > { %v458_v2 = vld [vmem:[#allocation2] sm:$0xff]  ;;  %749 = vmatpush1.bf16.msra.mxu1 %v1492_v24  ;;  %v1507_v38 = vld [vmem:[%s1724_s17 + $0x6c] ss:$16 sps:$4 sm:$0xff]   ;;  %v1510_v40 = vld [vmem:[%s1724_s17 + $0x68] ss:$16 sps:$4 sm:$0xff]   ;;  %v1611_v47 = vmov 0  }
  0x30   : > { %474 = vadd.xlane.f32.xlu0 %v458_v2  ;;  %v473_v13 = vmul.f32 %v1326_v10, %v458_v2  ;;  %708 = vmatpush1.bf16.msra.mxu0 %v1491_v23  ;;  %v1505_v37 = vld [vmem:[%s1724_s17 + $0x64] ss:$16 sps:$4 sm:$0xff]   ;;  %v1509_v39 = vld [vmem:[%s1724_s17 + $0x60] ss:$16 sps:$4 sm:$0xff]   ;;  %v1513_v42 = vld [vmem:[%s1724_s17 + $0x4c] ss:$16 sps:$4 sm:$0xff]  }
  0x31   : > { %709 = vmatprep.subr.bf16.mxu0 %v1493_v29  ;;  %750 = vmatprep.subr.bf16.mxu1 %v1495_v30  ;;  %v1511_v41 = vld [vmem:[%s1724_s17 + $0x44] ss:$16 sps:$4 sm:$0xff]   ;;  %v1515_v43 = vld [vmem:[%s1724_s17 + $0x40] ss:$16 sps:$4 sm:$0xff]   ;;  %v1516_v44 = vld [vmem:[%s1724_s17 + $0x48] ss:$16 sps:$4 sm:$0xff]  }
  0x32   : > { %v1517_v45 = vld [vmem:[%s1724_s17 + $0x24] ss:$16 sps:$4 sm:$0xff]   ;;  %v1519_v46 = vld [vmem:[%s1724_s17 + $0x2c] ss:$16 sps:$4 sm:$0xff]   ;;  %737 = vmatprep.mubr.bf16.mxu0 %v1611_v47  ;;  %778 = vmatprep.mubr.bf16.mxu1 %v1611_v47  ;;  %v1521_v48 = vld [vmem:[%s1724_s17 + $0x20] ss:$16 sps:$4 sm:$0xff]  }
  0x33   : > { %751 = vmatpush1.bf16.msra.mxu1 %v1498_v32  ;;  %v1522_v49 = vld [vmem:[%s1724_s17 + $0x28] ss:$16 sps:$4 sm:$0xff]   ;;  %v1523_v50 = vld [vmem:[%s1724_s17 + $0x4] ss:$16 sps:$4 sm:$0xff]   ;;  %v1525_v51 = vld [vmem:[%s1724_s17 + $0xc] ss:$16 sps:$4 sm:$0xff]  }
  0x34   : > { %710 = vmatpush1.bf16.msra.mxu0 %v1497_v31  ;;  %752 = vmatprep.subr.bf16.mxu1 %v1501_v34  ;;  %v1527_v52 = vld [vmem:[%s1724_s17] ss:$16 sps:$4 sm:$0xff]   ;;  %v1528_v53 = vld [vmem:[%s1724_s17 + $0x8] ss:$16 sps:$4 sm:$0xff]   ;;  %p1394_p3 = scmp.ne.s32.totalorder %s1600_s30, 1 }
  0x35   : > { %711 = vmatprep.subr.bf16.mxu0 %v1499_v33  ;;  %v1529_v54 = vld [vmem:[%s1729_s20 + $0x78] sm:$0xff]   ;;  %v1328_v60 = vld [vmem:[%s429_s27] ss:$0 sm:$0xff]  ;;  %v1549_v19 = vld [vmem:[%s1729_s20 + $0x50] sm:$0xff]   ;;  %s1325_s27 = sshll.u32 %s1600_s30, 7 }
  0x36   : > { %v1530_v55 = vld [vmem:[%s1729_s20 + $0xf8] sm:$0xff]   ;;  %v1541_v10 = vld [vmem:[%s1729_s20 + $0x60] sm:$0xff]   ;;  %v1550_v20 = vld [vmem:[%s1729_s20 + $0xd0] sm:$0xff]   ;;  %s465_s12 = sadd.s32 1, %s1325_s27  ;;  %s464_s14 = sld [smem:[#allocation3 + %s1325_s27]] }
  0x37   : > { %753 = vmatpush1.bf16.msra.mxu1 %v1504_v36  ;;  %v1531_v63 = vld [vmem:[%s1729_s20 + $0x38] sm:$0xff]   ;;  %v1551_v21 = vld [vmem:[%s1729_s20 + $0x10] sm:$0xff]   ;;  %v1553_v23 = vld [vmem:[%s1729_s20 + $0x48] sm:$0xff]   ;;  %s466_s15 = sld [smem:[#allocation3 + %s465_s12]] }
  0x38   : > { %712 = vmatpush1.bf16.msra.mxu0 %v1503_v35  ;;  %754 = vmatprep.subr.bf16.mxu1 %v1507_v38  ;;  %v1532_v0 = vld [vmem:[%s1729_s20 + $0xb8] sm:$0xff]   ;;  %v1552_v22 = vld [vmem:[%s1729_s20 + $0x90] sm:$0xff]   ;;  %v1554_v24 = vld [vmem:[%s1729_s20 + $0xc8] sm:$0xff]  }
  0x39   : > { %713 = vmatprep.subr.bf16.mxu0 %v1505_v37  ;;  %v1547_v17 = vld [vmem:[%s1729_s20 + $0x18] sm:$0xff]   ;;  %v1559_v29 = vld [vmem:[%s1729_s20] sm:$0xff]  }
  0x3a   : > { %v1548_v18 = vld [vmem:[%s1729_s20 + $0x98] sm:$0xff]   ;;  %v1560_v30 = vld [vmem:[%s1729_s20 + $0x80] sm:$0xff]  }
  0x3b   : > { %755 = vmatpush1.bf16.msra.mxu1 %v1510_v40 }
  0x3c   : > { %714 = vmatpush1.bf16.msra.mxu0 %v1509_v39  ;;  %756 = vmatprep.subr.bf16.mxu1 %v1513_v42  ;;  %v795_v35 = vstv %s464_s14 }
  0x3d   : > { %715 = vmatprep.subr.bf16.mxu0 %v1511_v41  ;;  %v800_v42 = vstv %s466_s15 }
  0x3f   : > { %757 = vmatpush1.bf16.msra.mxu1 %v1516_v44 }
  0x40   : > { %716 = vmatpush1.bf16.msra.mxu0 %v1515_v43  ;;  %758 = vmatprep.subr.bf16.mxu1 %v1519_v46 }
  0x41   : > { %717 = vmatprep.subr.bf16.mxu0 %v1517_v45 }
  0x43   : > { %759 = vmatpush1.bf16.msra.mxu1 %v1522_v49 }
  0x44   : > { %718 = vmatpush1.bf16.msra.mxu0 %v1521_v48  ;;  %760 = vmatprep.subr.bf16.mxu1 %v1525_v51 }
  0x45   : > { %719 = vmatprep.subr.bf16.mxu0 %v1523_v50 }
  0x47   : > { %761 = vmatpush1.bf16.msra.mxu1 %v1528_v53 }
  0x48   : > { %720 = vmatpush1.bf16.msra.mxu0 %v1527_v52  ;;  %1423 = vmatprep.subr.bf16.mxu1 %v1530_v55 }
  0x49   : > { %1401 = vmatprep.subr.bf16.mxu0 %v1529_v54 }
  0xb9   : > { %v475_v3 = vpop.xlane.xlu0 %474 }
  0xba   : > { %v477_v4 = vmul.f32 0.0078125, %v475_v3  ;;  %v1534_v3 = vld [vmem:[%s1729_s20 + $0xf0] sm:$0xff]  }
  0xbc   : > { %v478_v5 = vsub.f32 %v458_v2, %v477_v4  ;;  %v1533_v2 = vld [vmem:[%s1729_s20 + $0x70] sm:$0xff]  }
  0xbd   : > { %v1535_v4 = vld [vmem:[%s1729_s20 + $0x30] sm:$0xff]  }
  0xbe   : > { %v479_v6 = vmul.f32 %v478_v5, %v478_v5 }
  0xc0   : > { %480 = vadd.xlane.f32.xlu0 %v479_v6  ;;  %v1537_v6 = vld [vmem:[%s1729_s20 + $0x68] sm:$0xff]  }
 0x149   : > { %v481_v7 = vpop.xlane.xlu0 %480 }
 0x14a   : > { %v482_v8 = vmul.f32 0.0078125, %v481_v7  ;;  %v1538_v7 = vld [vmem:[%s1729_s20 + $0xe8] sm:$0xff]  }
 0x14c   : > { %v483_v9 = vadd.f32 1e-06, %v482_v8  ;;  %v1539_v8 = vld [vmem:[%s1729_s20 + $0x28] sm:$0xff]  }
 0x14e   : > { %1561 = vrsqrt.f32 %v483_v9  ;;  %v1540_v9 = vld [vmem:[%s1729_s20 + $0xa8] sm:$0xff]  }
 0x15b   : > { %v1562_v11 = vpop.eup %1561 }
 0x15c   : > { %v485_v14 = vmul.f32 %v1562_v11, %v478_v5  ;;  %v1536_v5 = vld [vmem:[%s1729_s20 + $0xb0] sm:$0xff]   ;;  %v1542_v11 = vld [vmem:[%s1729_s20 + $0xe0] sm:$0xff]  }
 0x15e   : > { %v492_v15 = vmul.f32 %v1327_v12, %v485_v14  ;;  %v1543_v12 = vld [vmem:[%s1729_s20 + $0x20] sm:$0xff]   ;;  %v1545_v14 = vld [vmem:[%s1729_s20 + $0x58] sm:$0xff]  }
 0x160   : > { %v1739_v16 = vadd.f32 %v492_v15, %v473_v13  ;;  %v1544_v13 = vld [vmem:[%s1729_s20 + $0xa0] sm:$0xff]   ;;  %v1546_v15 = vld [vmem:[%s1729_s20 + $0xd8] sm:$0xff]  }
 0x162   : > { %494 = vadd.xlane.f32.xlu1 %v1739_v16 }
 0x1eb   : > { %v495_v25 = vpop.xlane.xlu1 %494 }
 0x1ec   : > { %v496_v26 = vmul.f32 0.0078125, %v495_v25  ;;  %v1555_v25 = vld [vmem:[%s1729_s20 + $0x8] sm:$0xff]  }
 0x1ee   : > { %v1751_v27 = vsub.f32 %v1739_v16, %v496_v26  ;;  %v1556_v26 = vld [vmem:[%s1729_s20 + $0x88] sm:$0xff]  }
 0x1f0   : > { %v498_v28 = vmul.f32 %v1751_v27, %v1751_v27 }
 0x1f2   : > { %499 = vadd.xlane.f32.xlu1 %v498_v28  ;;  %v1558_v28 = vld [vmem:[%s1729_s20 + $0xc0] sm:$0xff]  }
 0x27b   : > { %v500_v56 = vpop.xlane.xlu1 %499 }
 0x27c   : > { %v501_v57 = vmul.f32 0.0078125, %v500_v56 }
 0x27e   : > { %v502_v58 = vadd.f32 1e-06, %v501_v57 }
 0x280   : > { %1563 = vrsqrt.f32 %v502_v58 }
 0x28d   : > { %v1564_v59 = vpop.eup %1563 }
 0x28e   : > { %v504_v61 = vmul.f32 %v1564_v59, %v1751_v27  ;;  %v1557_v27 = vld [vmem:[%s1729_s20 + $0x40] sm:$0xff]  }
 0x290   : > { %v511_v62 = vmul.f32 %v1328_v60, %v504_v61 }
 0x292   : > { %v512_v1 = vpack.c.bf16 %v511_v62, %v511_v62 }
 0x294   : > { %738 = vmatmul.mubr.bf16.vlgmr.msra.gmra.mxu0 %v512_v1  ;;  %779 = vmatmul.mubr.bf16.vlgmr.msra.gmra.mxu1 %v512_v1 }
 0x295   : > { %1402 = vmatpush3.bf16.msra.mxu0 %v1531_v63  ;;  %1424 = vmatpush3.bf16.msra.mxu1 %v1532_v0  ;;  %v1393_v0 = vld [vmem:[%s445_s25] ss:$0 sm:$0xff] }
 0x296   : > { %1403 = vmatprep.subr.bf16.mxu0 %v1533_v2  ;;  %1425 = vmatprep.subr.bf16.mxu1 %v1534_v3 }
 0x299   : > { %1404 = vmatpush3.bf16.msra.mxu0 %v1535_v4  ;;  %1426 = vmatpush3.bf16.msra.mxu1 %v1536_v5 }
 0x29a   : > { %1405 = vmatprep.subr.bf16.mxu0 %v1537_v6  ;;  %1427 = vmatprep.subr.bf16.mxu1 %v1538_v7  ;;  %v1151_v7 = vmul.f32 %v1393_v0, %v1739_v16 }
 0x29d   : > { %1406 = vmatpush3.bf16.msra.mxu0 %v1539_v8  ;;  %1428 = vmatpush3.bf16.msra.mxu1 %v1540_v9 }
 0x29e   : > { %1407 = vmatprep.subr.bf16.mxu0 %v1541_v10  ;;  %1429 = vmatprep.subr.bf16.mxu1 %v1542_v11 }
 0x2a1   : > { %1408 = vmatpush3.bf16.msra.mxu0 %v1543_v12  ;;  %1430 = vmatpush3.bf16.msra.mxu1 %v1544_v13 }
 0x2a2   : > { %1409 = vmatprep.subr.bf16.mxu0 %v1545_v14  ;;  %1431 = vmatprep.subr.bf16.mxu1 %v1546_v15 }
 0x2a5   : > { %1410 = vmatpush3.bf16.msra.mxu0 %v1547_v17  ;;  %1432 = vmatpush3.bf16.msra.mxu1 %v1548_v18 }
 0x2a6   : > { %1411 = vmatprep.subr.bf16.mxu0 %v1549_v19  ;;  %1433 = vmatprep.subr.bf16.mxu1 %v1550_v20 }
 0x2a9   : > { %1412 = vmatpush3.bf16.msra.mxu0 %v1551_v21  ;;  %1434 = vmatpush3.bf16.msra.mxu1 %v1552_v22 }
 0x2aa   : > { %1413 = vmatprep.subr.bf16.mxu0 %v1553_v23  ;;  %1435 = vmatprep.subr.bf16.mxu1 %v1554_v24 }
 0x2ad   : > { %1414 = vmatpush3.bf16.msra.mxu0 %v1555_v25  ;;  %1436 = vmatpush3.bf16.msra.mxu1 %v1556_v26 }
 0x2ae   : > { %1415 = vmatprep.subr.bf16.mxu0 %v1557_v27  ;;  %1437 = vmatprep.subr.bf16.mxu1 %v1558_v28 }
 0x2b1   : > { %1416 = vmatpush3.bf16.msra.mxu0 %v1559_v29  ;;  %1438 = vmatpush3.bf16.msra.mxu1 %v1560_v30 }
 0x354   : > { %v739_v31 = vpop.f32.mrf.mxu0  ;;  %v780_v32 = vpop.f32.mrf.mxu1 }
 0x355   : > { %v787_v33 = vmax.f32 %v739_v31, 0.0  ;;  %v789_v34 = vmax.f32 %v780_v32, 0.0 }
 0x356   : > { %v741_v36 = vpop.f32.mrf.mxu0  ;;  %v782_v37 = vpop.f32.mrf.mxu1 }
 0x357   : > { %v791_v38 = vmul.f32 %v787_v33, %v787_v33  ;;  %v793_v39 = vmul.f32 %v789_v34, %v789_v34  ;;  %v788_v40 = vmax.f32 %v741_v36, 0.0  ;;  %v790_v41 = vmax.f32 %v782_v37, 0.0 }
 0x358   : > { %v743_v43 = vpop.f32.mrf.mxu0  ;;  %v784_v44 = vpop.f32.mrf.mxu1 }
 0x359   : > { %v796_v45 = vmul.f32 %v795_v35, %v791_v38  ;;  %v798_v46 = vmul.f32 %v795_v35, %v793_v39  ;;  %v792_v47 = vmul.f32 %v788_v40, %v788_v40  ;;  %v794_v48 = vmul.f32 %v790_v41, %v790_v41 }
 0x35a   : > { %v744_v49 = vpop.f32.mrf.mxu0  ;;  %v785_v50 = vpop.f32.mrf.mxu1 }
 0x35b   : > { %v797_v51 = vmul.f32 %v795_v35, %v792_v47  ;;  %v799_v52 = vmul.f32 %v795_v35, %v794_v48  ;;  %v801_v53 = vadd.f32 %v800_v42, %v796_v45  ;;  %v803_v54 = vadd.f32 %v800_v42, %v798_v46 }
 0x35d   : > { %v802_v55 = vadd.f32 %v800_v42, %v797_v51  ;;  %v804_v56 = vadd.f32 %v800_v42, %v799_v52  ;;  %v805_v59 = vpack.c.bf16 %v801_v53, %v801_v53  ;;  %v807_v60 = vpack.c.bf16 %v803_v54, %v803_v54 }
 0x35f   : > { %v806_v57 = vpack.c.bf16 %v802_v55, %v802_v55  ;;  %v808_v58 = vpack.c.bf16 %v804_v56, %v804_v56 }
 0x361   : > { %1097 = vmatprep.mubr.bf16.mxu0 %v806_v57  ;;  %1137 = vmatprep.mubr.bf16.mxu1 %v808_v58 }
 0x362   : > { %1098 = vmatmul.mubr.bf16.vlgmr.msra.gmra.mxu0 %v805_v59  ;;  %1138 = vmatmul.mubr.bf16.vlgmr.msra.gmra.mxu1 %v807_v60 }
 0x422   : > { %v1417_v61 = vpop.f32.mrf.mxu0  ;;  %v1439_v62 = vpop.f32.mrf.mxu1 }
 0x424   : > { %v1418_v63 = vpop.f32.mrf.mxu0  ;;  %v1440_v1 = vpop.f32.mrf.mxu1 }
 0x425   : > { %v1419_v2 = vadd.f32 %v1418_v63, %v1417_v61  ;;  %v1441_v3 = vadd.f32 %v1440_v1, %v1439_v62 }
 0x426   : > { %v1420_v4 = vpop.f32.mrf.mxu0  ;;  %v1442_v5 = vpop.f32.mrf.mxu1 }
 0x427   : > { %v1140_v6 = vadd.f32 %v1441_v3, %v1419_v2  ;;  %1157 = sbr.rel (%p1394_p3) target bundleno = 1375 (0x55f), region = 68 }
 0x428   : > { %v1421_v8 = vpop.f32.mrf.mxu0  ;;  %v1443_v9 = vpop.f32.mrf.mxu1 }
 0x429   : > { %v1152_v10 = vadd.f32 %v1151_v7, %v1140_v6 }
 0x42b   : > { %1153 = vst [vmem:[#allocation2] sm:$0xff] %v1152_v10 }
 0x42c   : > { %1159 = vadd.xlane.f32.xlu0 %v1152_v10  ;;  %v1395_v16 = vld [vmem:[%s1848_s8] ss:$0 sm:$0xff] }
 0x4b5   : > { %v1160_v11 = vpop.xlane.xlu0 %1159 }
 0x4b6   : > { %v1161_v12 = vmul.f32 0.0078125, %v1160_v11 }
 0x4b8   : > { %v1162_v13 = vsub.f32 %v1152_v10, %v1161_v12 }
 0x4ba   : > { %v1163_v14 = vmul.f32 %v1162_v13, %v1162_v13 }
 0x4bc   : > { %1164 = vadd.xlane.f32.xlu0 %v1163_v14 }
 0x545   : > { %v1165_v15 = vpop.xlane.xlu0 %1164 }
 0x546   : > { %v1166_v17 = vmul.f32 0.0078125, %v1165_v15 }
 0x548   : > { %v1167_v18 = vadd.f32 1e-06, %v1166_v17 }
 0x54a   : > { %1565 = vrsqrt.f32 %v1167_v18 }
 0x557   : > { %v1566_v19 = vpop.eup %1565 }
 0x558   : > { %v1169_v20 = vmul.f32 %v1566_v19, %v1162_v13 }
 0x55a   : > { %v1176_v21 = vmul.f32 %v1395_v16, %v1169_v20 }
 0x55c   : > { %v1177_v22 = vpack.c.bf16 %v1176_v21, %v1176_v21 }
 0x55e   : > { %1178 = vst [vmem:[%s1849_s9] sm:$0xf] %v1177_v22 }
 0x55f PF: > { %s20_s11 = sadd.s32 1, %s1608_s11   ;;  %s1852_s30 = smov %s1604_s10 }
 0x560   : > { %p17_p4 = scmp.ge.s32.totalorder %s20_s11, 4   ;;  %s1853_s10 = smov %s1855_s13 }
 0x562   :  { %19 = sbr.rel (!%p17_p4) target bundleno = 2 (0x2), region = 117 }
 0x567   :  { %1198 = vsyncpa [#allocation4], 1 }
 0x568   :  { %1200 = vsyncpa [#allocation4 + $0x1], 1 }

// kernel: metaformer_forward.15
= control target key start
LH: loop header
LB: loop body
LE: loop exit
PB: predicated region body
PF: predicated region fallthrough
CT: control target
= control target key end

     0   :  { %s2021_s1 = inlined_call_operand.vmem [shape: bf16[1152,256], index: 1, kind: input, shape index: {}]   ;;  %s2022_s3 = inlined_call_operand.vmem [shape: f32[1,256], index: 3, kind: input, shape index: {}]   ;;  %s2023_s0 = inlined_call_operand.vmem [shape: bf16[8,1152], index: 0, kind: input, shape index: {}]   ;;  %s2024_s2 = inlined_call_operand.vmem [shape: f32[1,256], index: 2, kind: input, shape index: {}]   ;;  %s2025_s4 = inlined_call_operand.vmem [shape: bf16[8,256], index: 4, kind: output, shape index: {}]  }
   0x1   :  { %v1305_v0 = vld [vmem:[%s2021_s1 + $0x74] ss:$8 sps:$4 sm:$0xff]   ;;  %v1307_v1 = vld [vmem:[%s2021_s1 + $0x70] ss:$8 sps:$4 sm:$0xff]   ;;  %v1311_v4 = vld [vmem:[%s2021_s1 + $0x64] ss:$8 sps:$4 sm:$0xff]  }
   0x2   :  { %931 = vmatprep.subr.bf16.mxu0 %v1305_v0  ;;  %v1308_v2 = vld [vmem:[%s2021_s1 + $0x174] ss:$8 sps:$4 sm:$0xff]   ;;  %v1310_v3 = vld [vmem:[%s2021_s1 + $0x170] ss:$8 sps:$4 sm:$0xff]   ;;  %v1313_v5 = vld [vmem:[%s2021_s1 + $0x60] ss:$8 sps:$4 sm:$0xff]  }
   0x3   :  { %932 = vmatpush1.bf16.msra.mxu0 %v1307_v1  ;;  %972 = vmatprep.subr.bf16.mxu1 %v1308_v2  ;;  %v1314_v6 = vld [vmem:[%s2021_s1 + $0x164] ss:$8 sps:$4 sm:$0xff]   ;;  %v1316_v7 = vld [vmem:[%s2021_s1 + $0x160] ss:$8 sps:$4 sm:$0xff]   ;;  %v1317_v8 = vld [vmem:[%s2021_s1 + $0x54] ss:$8 sps:$4 sm:$0xff]  }
   0x4   :  { %973 = vmatpush1.bf16.msra.mxu1 %v1310_v3  ;;  %933 = vmatprep.subr.bf16.mxu0 %v1311_v4  ;;  %v1319_v9 = vld [vmem:[%s2021_s1 + $0x50] ss:$8 sps:$4 sm:$0xff]   ;;  %v1320_v10 = vld [vmem:[%s2021_s1 + $0x154] ss:$8 sps:$4 sm:$0xff]   ;;  %v1323_v11 = vld [vmem:[%s2021_s1 + $0x44] ss:$8 sps:$4 sm:$0xff]  }
   0x5   :  { %974 = vmatprep.subr.bf16.mxu1 %v1314_v6  ;;  %v1322_v12 = vld [vmem:[%s2021_s1 + $0x150] ss:$8 sps:$4 sm:$0xff]   ;;  %v1326_v13 = vld [vmem:[%s2021_s1 + $0x144] ss:$8 sps:$4 sm:$0xff]   ;;  %v1325_v14 = vld [vmem:[%s2021_s1 + $0x40] ss:$8 sps:$4 sm:$0xff]  }
   0x6   :  { %v1329_v15 = vld [vmem:[%s2021_s1 + $0x34] ss:$8 sps:$4 sm:$0xff]   ;;  %v1328_v16 = vld [vmem:[%s2021_s1 + $0x140] ss:$8 sps:$4 sm:$0xff]   ;;  %v1331_v18 = vld [vmem:[%s2021_s1 + $0x30] ss:$8 sps:$4 sm:$0xff]  }
   0x7   :  { %934 = vmatpush1.bf16.msra.mxu0 %v1313_v5  ;;  %v1332_v17 = vld [vmem:[%s2021_s1 + $0x134] ss:$8 sps:$4 sm:$0xff]   ;;  %v1335_v19 = vld [vmem:[%s2021_s1 + $0x24] ss:$8 sps:$4 sm:$0xff]   ;;  %v1334_v20 = vld [vmem:[%s2021_s1 + $0x130] ss:$8 sps:$4 sm:$0xff]  }
   0x8   :  { %935 = vmatprep.subr.bf16.mxu0 %v1317_v8  ;;  %975 = vmatpush1.bf16.msra.mxu1 %v1316_v7  ;;  %v1338_v21 = vld [vmem:[%s2021_s1 + $0x124] ss:$8 sps:$4 sm:$0xff]   ;;  %v1337_v22 = vld [vmem:[%s2021_s1 + $0x20] ss:$8 sps:$4 sm:$0xff]   ;;  %v1341_v23 = vld [vmem:[%s2021_s1 + $0x14] ss:$8 sps:$4 sm:$0xff]  }
   0x9   :  { %976 = vmatprep.subr.bf16.mxu1 %v1320_v10  ;;  %v1340_v24 = vld [vmem:[%s2021_s1 + $0x120] ss:$8 sps:$4 sm:$0xff]   ;;  %v1344_v25 = vld [vmem:[%s2021_s1 + $0x114] ss:$8 sps:$4 sm:$0xff]   ;;  %v1343_v26 = vld [vmem:[%s2021_s1 + $0x10] ss:$8 sps:$4 sm:$0xff]  }
   0xa   :  { %v1347_v27 = vld [vmem:[%s2021_s1 + $0x4] ss:$8 sps:$4 sm:$0xff]   ;;  %v1346_v28 = vld [vmem:[%s2021_s1 + $0x110] ss:$8 sps:$4 sm:$0xff]   ;;  %v1349_v30 = vld [vmem:[%s2021_s1] ss:$8 sps:$4 sm:$0xff]  }
   0xb   :  { %936 = vmatpush1.bf16.msra.mxu0 %v1319_v9  ;;  %v1350_v29 = vld [vmem:[%s2021_s1 + $0x104] ss:$8 sps:$4 sm:$0xff]   ;;  %v1353_v31 = vld [vmem:[%s2021_s1 + $0xf4] ss:$8 sps:$4 sm:$0xff]   ;;  %v1352_v32 = vld [vmem:[%s2021_s1 + $0x100] ss:$8 sps:$4 sm:$0xff]  }
   0xc   :  { %937 = vmatprep.subr.bf16.mxu0 %v1323_v11  ;;  %977 = vmatpush1.bf16.msra.mxu1 %v1322_v12  ;;  %v1356_v33 = vld [vmem:[%s2021_s1 + $0x1f4] ss:$8 sps:$4 sm:$0xff]   ;;  %v1355_v34 = vld [vmem:[%s2021_s1 + $0xf0] ss:$8 sps:$4 sm:$0xff]   ;;  %v1359_v35 = vld [vmem:[%s2021_s1 + $0xe4] ss:$8 sps:$4 sm:$0xff]  }
   0xd   :  { %978 = vmatprep.subr.bf16.mxu1 %v1326_v13  ;;  %v1358_v36 = vld [vmem:[%s2021_s1 + $0x1f0] ss:$8 sps:$4 sm:$0xff]   ;;  %v1362_v37 = vld [vmem:[%s2021_s1 + $0x1e4] ss:$8 sps:$4 sm:$0xff]   ;;  %v1361_v38 = vld [vmem:[%s2021_s1 + $0xe0] ss:$8 sps:$4 sm:$0xff]  }
   0xe   :  { %v1365_v39 = vld [vmem:[%s2021_s1 + $0xd4] ss:$8 sps:$4 sm:$0xff]   ;;  %v1364_v40 = vld [vmem:[%s2021_s1 + $0x1e0] ss:$8 sps:$4 sm:$0xff]   ;;  %v1367_v42 = vld [vmem:[%s2021_s1 + $0xd0] ss:$8 sps:$4 sm:$0xff]  }
   0xf   :  { %938 = vmatpush1.bf16.msra.mxu0 %v1325_v14  ;;  %v1368_v41 = vld [vmem:[%s2021_s1 + $0x1d4] ss:$8 sps:$4 sm:$0xff]   ;;  %v1371_v43 = vld [vmem:[%s2021_s1 + $0xc4] ss:$8 sps:$4 sm:$0xff]   ;;  %v1370_v44 = vld [vmem:[%s2021_s1 + $0x1d0] ss:$8 sps:$4 sm:$0xff]  }
  0x10   :  { %939 = vmatprep.subr.bf16.mxu0 %v1329_v15  ;;  %979 = vmatpush1.bf16.msra.mxu1 %v1328_v16  ;;  %v1374_v45 = vld [vmem:[%s2021_s1 + $0x1c4] ss:$8 sps:$4 sm:$0xff]   ;;  %v1373_v47 = vld [vmem:[%s2021_s1 + $0xc0] ss:$8 sps:$4 sm:$0xff]   ;;  %v1377_v49 = vld [vmem:[%s2021_s1 + $0xb4] ss:$8 sps:$4 sm:$0xff]  }
  0x11   :  { %980 = vmatprep.subr.bf16.mxu1 %v1332_v17  ;;  %v18_v46 = vld [vmem:[%s2023_s0] sm:$0xff]  ;;  %v19_v50 = vld [vmem:[%s2023_s0 + $0x8] sm:$0xff]  ;;  %v1380_v53 = vld [vmem:[%s2021_s1 + $0x1b4] ss:$8 sps:$4 sm:$0xff]  }
  0x12   :  { %v1150_v48 = vcombine.high %v18_v46, %v18_v46  ;;  %v1376_v51 = vld [vmem:[%s2021_s1 + $0x1c0] ss:$8 sps:$4 sm:$0xff]   ;;  %v1152_v52 = vcombine.high %v19_v50, %v19_v50  ;;  %v1379_v54 = vld [vmem:[%s2021_s1 + $0xb0] ss:$8 sps:$4 sm:$0xff]   ;;  %v1383_v55 = vld [vmem:[%s2021_s1 + $0xa4] ss:$8 sps:$4 sm:$0xff]   ;;  %v1149_v5 = vcombine.low %v18_v46, %v18_v46  ;;  %v1151_v8 = vcombine.low %v19_v50, %v19_v50 }
  0x13   :  { %940 = vmatpush1.bf16.msra.mxu0 %v1331_v18  ;;  %v1382_v56 = vld [vmem:[%s2021_s1 + $0x1b0] ss:$8 sps:$4 sm:$0xff]   ;;  %v1386_v57 = vld [vmem:[%s2021_s1 + $0x1a4] ss:$8 sps:$4 sm:$0xff]   ;;  %v1385_v58 = vld [vmem:[%s2021_s1 + $0xa0] ss:$8 sps:$4 sm:$0xff]  }
  0x14   :  { %941 = vmatprep.subr.bf16.mxu0 %v1335_v19  ;;  %981 = vmatpush1.bf16.msra.mxu1 %v1334_v20  ;;  %v1389_v59 = vld [vmem:[%s2021_s1 + $0x94] ss:$8 sps:$4 sm:$0xff]   ;;  %v1388_v60 = vld [vmem:[%s2021_s1 + $0x1a0] ss:$8 sps:$4 sm:$0xff]   ;;  %v1391_v62 = vld [vmem:[%s2021_s1 + $0x90] ss:$8 sps:$4 sm:$0xff]  }
  0x15   :  { %982 = vmatprep.subr.bf16.mxu1 %v1338_v21  ;;  %963 = vmatprep.mubr.bf16.mxu0 %v1150_v48  ;;  %v1392_v61 = vld [vmem:[%s2021_s1 + $0x194] ss:$8 sps:$4 sm:$0xff]   ;;  %v1395_v63 = vld [vmem:[%s2021_s1 + $0x84] ss:$8 sps:$4 sm:$0xff]   ;;  %v1394_v0 = vld [vmem:[%s2021_s1 + $0x190] ss:$8 sps:$4 sm:$0xff]  }
  0x16   :  { %1004 = vmatprep.mubr.bf16.mxu1 %v1152_v52  ;;  %v1398_v1 = vld [vmem:[%s2021_s1 + $0x184] ss:$8 sps:$4 sm:$0xff]   ;;  %v1397_v2 = vld [vmem:[%s2021_s1 + $0x80] ss:$8 sps:$4 sm:$0xff]   ;;  %v1405_v3 = vld [vmem:[%s2021_s1 + $0x274] ss:$8 sps:$4 sm:$0xff]  }
  0x17   :  { %942 = vmatpush1.bf16.msra.mxu0 %v1337_v22  ;;  %v1402_v4 = vld [vmem:[%s2021_s1 + $0x180] ss:$8 sps:$4 sm:$0xff]   ;;  %v1410_v6 = vld [vmem:[%s2021_s1 + $0x374] ss:$8 sps:$4 sm:$0xff]   ;;  %v1403_v7 = vld [vmem:[%s2021_s1 + $0x270] ss:$8 sps:$4 sm:$0xff]  }
  0x18   :  { %943 = vmatprep.subr.bf16.mxu0 %v1341_v23  ;;  %983 = vmatpush1.bf16.msra.mxu1 %v1340_v24  ;;  %v1413_v9 = vld [vmem:[%s2021_s1 + $0x264] ss:$8 sps:$4 sm:$0xff]   ;;  %v1408_v10 = vld [vmem:[%s2021_s1 + $0x370] ss:$8 sps:$4 sm:$0xff]   ;;  %v1411_v12 = vld [vmem:[%s2021_s1 + $0x260] ss:$8 sps:$4 sm:$0xff]  }
  0x19   :  { %984 = vmatprep.subr.bf16.mxu1 %v1344_v25  ;;  %v1416_v11 = vld [vmem:[%s2021_s1 + $0x364] ss:$8 sps:$4 sm:$0xff]   ;;  %v1419_v13 = vld [vmem:[%s2021_s1 + $0x254] ss:$8 sps:$4 sm:$0xff]   ;;  %v1414_v14 = vld [vmem:[%s2021_s1 + $0x360] ss:$8 sps:$4 sm:$0xff]  }
  0x1a   :  { %v1422_v15 = vld [vmem:[%s2021_s1 + $0x354] ss:$8 sps:$4 sm:$0xff]   ;;  %v1417_v16 = vld [vmem:[%s2021_s1 + $0x250] ss:$8 sps:$4 sm:$0xff]   ;;  %v1425_v17 = vld [vmem:[%s2021_s1 + $0x244] ss:$8 sps:$4 sm:$0xff]  }
  0x1b   :  { %944 = vmatpush1.bf16.msra.mxu0 %v1343_v26  ;;  %v1420_v18 = vld [vmem:[%s2021_s1 + $0x350] ss:$8 sps:$4 sm:$0xff]   ;;  %v1428_v19 = vld [vmem:[%s2021_s1 + $0x344] ss:$8 sps:$4 sm:$0xff]   ;;  %v1423_v20 = vld [vmem:[%s2021_s1 + $0x240] ss:$8 sps:$4 sm:$0xff]  }
  0x1c   :  { %945 = vmatprep.subr.bf16.mxu0 %v1347_v27  ;;  %985 = vmatpush1.bf16.msra.mxu1 %v1346_v28  ;;  %v1431_v21 = vld [vmem:[%s2021_s1 + $0x234] ss:$8 sps:$4 sm:$0xff]   ;;  %v1426_v22 = vld [vmem:[%s2021_s1 + $0x340] ss:$8 sps:$4 sm:$0xff]   ;;  %v1429_v24 = vld [vmem:[%s2021_s1 + $0x230] ss:$8 sps:$4 sm:$0xff]  }
  0x1d   :  { %986 = vmatprep.subr.bf16.mxu1 %v1350_v29  ;;  %v1434_v23 = vld [vmem:[%s2021_s1 + $0x334] ss:$8 sps:$4 sm:$0xff]   ;;  %v1437_v25 = vld [vmem:[%s2021_s1 + $0x224] ss:$8 sps:$4 sm:$0xff]   ;;  %v1432_v26 = vld [vmem:[%s2021_s1 + $0x330] ss:$8 sps:$4 sm:$0xff]  }
  0x1e   :  { %v1440_v27 = vld [vmem:[%s2021_s1 + $0x324] ss:$8 sps:$4 sm:$0xff]   ;;  %v1435_v28 = vld [vmem:[%s2021_s1 + $0x220] ss:$8 sps:$4 sm:$0xff]   ;;  %v1443_v29 = vld [vmem:[%s2021_s1 + $0x214] ss:$8 sps:$4 sm:$0xff]  }
  0x1f   :  { %946 = vmatpush1.bf16.msra.mxu0 %v1349_v30  ;;  %v1438_v30 = vld [vmem:[%s2021_s1 + $0x320] ss:$8 sps:$4 sm:$0xff]   ;;  %v1456_v46 = vld [vmem:[%s2021_s1 + $0x3f0] ss:$8 sps:$4 sm:$0xff]  }
  0x20   :  { %947 = vmatprep.subr.bf16.mxu0 %v1353_v31  ;;  %987 = vmatpush1.bf16.msra.mxu1 %v1352_v32  ;;  %v1446_v31 = vld [vmem:[%s2021_s1 + $0x314] ss:$8 sps:$4 sm:$0xff]   ;;  %v1459_v48 = vld [vmem:[%s2021_s1 + $0x2e0] ss:$8 sps:$4 sm:$0xff]   ;;  %v1465_v52 = vld [vmem:[%s2021_s1 + $0x2d0] ss:$8 sps:$4 sm:$0xff]  }
  0x21   :  { %988 = vmatprep.subr.bf16.mxu1 %v1356_v33  ;;  %v1835_v32 = vld [vmem:[%s2023_s0 + $0x10] sm:$0xff]  ;;  %v1462_v50 = vld [vmem:[%s2021_s1 + $0x3e0] ss:$8 sps:$4 sm:$0xff]  }
  0x22   :  { %v1441_v33 = vld [vmem:[%s2021_s1 + $0x210] ss:$8 sps:$4 sm:$0xff]  }
  0x23   :  { %948 = vmatpush2.bf16.msra.mxu0 %v1355_v34  ;;  %v1154_v34 = vcombine.high %v1835_v32, %v1835_v32 }
  0x24   :  { %949 = vmatprep.subr.bf16.mxu0 %v1359_v35  ;;  %989 = vmatpush2.bf16.msra.mxu1 %v1358_v36  ;;  %v1845_v35 = vld [vmem:[%s2023_s0 + $0x18] sm:$0xff]  ;;  %v1449_v36 = vld [vmem:[%s2021_s1 + $0x204] ss:$8 sps:$4 sm:$0xff]  }
  0x25   :  { %990 = vmatprep.subr.bf16.mxu1 %v1362_v37  ;;  %v1156_v37 = vcombine.high %v1845_v35, %v1845_v35 }
  0x27   :  { %950 = vmatpush2.bf16.msra.mxu0 %v1361_v38  ;;  %v1444_v38 = vld [vmem:[%s2021_s1 + $0x310] ss:$8 sps:$4 sm:$0xff]  }
  0x28   :  { %951 = vmatprep.subr.bf16.mxu0 %v1365_v39  ;;  %991 = vmatpush2.bf16.msra.mxu1 %v1364_v40  ;;  %v1452_v39 = vld [vmem:[%s2021_s1 + $0x304] ss:$8 sps:$4 sm:$0xff]   ;;  %v1447_v40 = vld [vmem:[%s2021_s1 + $0x200] ss:$8 sps:$4 sm:$0xff]  }
  0x29   :  { %992 = vmatprep.subr.bf16.mxu1 %v1368_v41  ;;  %v1455_v41 = vld [vmem:[%s2021_s1 + $0x2f4] ss:$8 sps:$4 sm:$0xff]  }
  0x2b   :  { %952 = vmatpush2.bf16.msra.mxu0 %v1367_v42  ;;  %v1450_v42 = vld [vmem:[%s2021_s1 + $0x300] ss:$8 sps:$4 sm:$0xff]  }
  0x2c   :  { %953 = vmatprep.subr.bf16.mxu0 %v1371_v43  ;;  %993 = vmatpush2.bf16.msra.mxu1 %v1370_v44  ;;  %v1458_v43 = vld [vmem:[%s2021_s1 + $0x3f4] ss:$8 sps:$4 sm:$0xff]   ;;  %v1453_v44 = vld [vmem:[%s2021_s1 + $0x2f0] ss:$8 sps:$4 sm:$0xff]  }
  0x2d   :  { %994 = vmatprep.subr.bf16.mxu1 %v1374_v45  ;;  %v1461_v45 = vld [vmem:[%s2021_s1 + $0x2e4] ss:$8 sps:$4 sm:$0xff]  }
  0x2f   :  { %954 = vmatpush2.bf16.msra.mxu0 %v1373_v47  ;;  %v1464_v47 = vld [vmem:[%s2021_s1 + $0x3e4] ss:$8 sps:$4 sm:$0xff]  }
  0x30   :  { %955 = vmatprep.subr.bf16.mxu0 %v1377_v49  ;;  %995 = vmatpush2.bf16.msra.mxu1 %v1376_v51  ;;  %v1467_v49 = vld [vmem:[%s2021_s1 + $0x2d4] ss:$8 sps:$4 sm:$0xff]  }
  0x31   :  { %996 = vmatprep.subr.bf16.mxu1 %v1380_v53  ;;  %v1470_v51 = vld [vmem:[%s2021_s1 + $0x3d4] ss:$8 sps:$4 sm:$0xff]   ;;  %v1473_v53 = vld [vmem:[%s2021_s1 + $0x2c4] ss:$8 sps:$4 sm:$0xff]  }
  0x33   :  { %956 = vmatpush2.bf16.msra.mxu0 %v1379_v54  ;;  %v1468_v54 = vld [vmem:[%s2021_s1 + $0x3d0] ss:$8 sps:$4 sm:$0xff]  }
  0x34   :  { %957 = vmatprep.subr.bf16.mxu0 %v1383_v55  ;;  %997 = vmatpush2.bf16.msra.mxu1 %v1382_v56  ;;  %v1476_v55 = vld [vmem:[%s2021_s1 + $0x3c4] ss:$8 sps:$4 sm:$0xff]   ;;  %v1471_v56 = vld [vmem:[%s2021_s1 + $0x2c0] ss:$8 sps:$4 sm:$0xff]  }
  0x35   :  { %998 = vmatprep.subr.bf16.mxu1 %v1386_v57  ;;  %v1479_v57 = vld [vmem:[%s2021_s1 + $0x2b4] ss:$8 sps:$4 sm:$0xff]  }
  0x37   :  { %958 = vmatpush2.bf16.msra.mxu0 %v1385_v58  ;;  %v1474_v58 = vld [vmem:[%s2021_s1 + $0x3c0] ss:$8 sps:$4 sm:$0xff]  }
  0x38   :  { %959 = vmatprep.subr.bf16.mxu0 %v1389_v59  ;;  %999 = vmatpush2.bf16.msra.mxu1 %v1388_v60  ;;  %v1482_v59 = vld [vmem:[%s2021_s1 + $0x3b4] ss:$8 sps:$4 sm:$0xff]   ;;  %v1477_v60 = vld [vmem:[%s2021_s1 + $0x2b0] ss:$8 sps:$4 sm:$0xff]  }
  0x39   :  { %1000 = vmatprep.subr.bf16.mxu1 %v1392_v61  ;;  %v1485_v61 = vld [vmem:[%s2021_s1 + $0x2a4] ss:$8 sps:$4 sm:$0xff]  }
  0x3b   :  { %960 = vmatpush2.bf16.msra.mxu0 %v1391_v62  ;;  %v1480_v62 = vld [vmem:[%s2021_s1 + $0x3b0] ss:$8 sps:$4 sm:$0xff]  }
  0x3c   :  { %961 = vmatprep.subr.bf16.mxu0 %v1395_v63  ;;  %1001 = vmatpush2.bf16.msra.mxu1 %v1394_v0  ;;  %v1488_v63 = vld [vmem:[%s2021_s1 + $0x3a4] ss:$8 sps:$4 sm:$0xff]   ;;  %v1483_v0 = vld [vmem:[%s2021_s1 + $0x2a0] ss:$8 sps:$4 sm:$0xff]  }
  0x3d   :  { %1002 = vmatprep.subr.bf16.mxu1 %v1398_v1  ;;  %v1491_v1 = vld [vmem:[%s2021_s1 + $0x294] ss:$8 sps:$4 sm:$0xff]  }
  0x3f   :  { %962 = vmatpush2.bf16.msra.mxu0 %v1397_v2  ;;  %v1486_v2 = vld [vmem:[%s2021_s1 + $0x3a0] ss:$8 sps:$4 sm:$0xff]  }
  0x40   :  { %1013 = vmatprep.subr.bf16.mxu0 %v1405_v3  ;;  %1003 = vmatpush2.bf16.msra.mxu1 %v1402_v4  ;;  %v1494_v3 = vld [vmem:[%s2021_s1 + $0x394] ss:$8 sps:$4 sm:$0xff]   ;;  %v1489_v4 = vld [vmem:[%s2021_s1 + $0x290] ss:$8 sps:$4 sm:$0xff]  }
  0x41   :  { %1054 = vmatprep.subr.bf16.mxu1 %v1410_v6  ;;  %v1492_v6 = vld [vmem:[%s2021_s1 + $0x390] ss:$8 sps:$4 sm:$0xff]  }
  0x42   :  { %964 = vmatmul.mubr.bf16.vlgmr.msra.gmra.mxu0 %v1149_v5  ;;  %v1497_v5 = vld [vmem:[%s2021_s1 + $0x284] ss:$8 sps:$4 sm:$0xff]  }
  0x43   :  { %1014 = vmatpush1.bf16.msra.mxu0 %v1403_v7  ;;  %1005 = vmatmul.mubr.bf16.vlgmr.msra.gmra.mxu1 %v1151_v8  ;;  %v1500_v7 = vld [vmem:[%s2021_s1 + $0x384] ss:$8 sps:$4 sm:$0xff]   ;;  %v1495_v8 = vld [vmem:[%s2021_s1 + $0x280] ss:$8 sps:$4 sm:$0xff]  }
  0x44   :  { %1015 = vmatprep.subr.bf16.mxu0 %v1413_v9  ;;  %1055 = vmatpush1.bf16.msra.mxu1 %v1408_v10  ;;  %v1505_v9 = vld [vmem:[%s2021_s1 + $0x474] ss:$8 sps:$4 sm:$0xff]   ;;  %v1498_v10 = vld [vmem:[%s2021_s1 + $0x380] ss:$8 sps:$4 sm:$0xff]  }
  0x45   :  { %1056 = vmatprep.subr.bf16.mxu1 %v1416_v11  ;;  %1045 = vmatprep.mubr.bf16.mxu0 %v1154_v34  ;;  %v1153_v11 = vcombine.low %v1835_v32, %v1835_v32 }
  0x46   :  { %1086 = vmatprep.mubr.bf16.mxu1 %v1156_v37 }
  0x47   :  { %1016 = vmatpush1.bf16.msra.mxu0 %v1411_v12  ;;  %v1503_v12 = vld [vmem:[%s2021_s1 + $0x470] ss:$8 sps:$4 sm:$0xff]  }
  0x48   :  { %1017 = vmatprep.subr.bf16.mxu0 %v1419_v13  ;;  %1057 = vmatpush1.bf16.msra.mxu1 %v1414_v14  ;;  %v1155_v13 = vcombine.low %v1845_v35, %v1845_v35  ;;  %v1510_v14 = vld [vmem:[%s2021_s1 + $0x464] ss:$8 sps:$4 sm:$0xff]  }
  0x49   :  { %1058 = vmatprep.subr.bf16.mxu1 %v1422_v15  ;;  %v1508_v15 = vld [vmem:[%s2021_s1 + $0x460] ss:$8 sps:$4 sm:$0xff]  }
  0x4b   :  { %1018 = vmatpush1.bf16.msra.mxu0 %v1417_v16  ;;  %v1530_v16 = vmov 0  }
  0x4c   :  { %1019 = vmatprep.subr.bf16.mxu0 %v1425_v17  ;;  %1059 = vmatpush1.bf16.msra.mxu1 %v1420_v18  ;;  %v1513_v17 = vld [vmem:[%s2021_s1 + $0x454] ss:$8 sps:$4 sm:$0xff]   ;;  %v1511_v18 = vld [vmem:[%s2021_s1 + $0x450] ss:$8 sps:$4 sm:$0xff]  }
  0x4d   :  { %1060 = vmatprep.subr.bf16.mxu1 %v1428_v19  ;;  %v1516_v19 = vld [vmem:[%s2021_s1 + $0x444] ss:$8 sps:$4 sm:$0xff]  }
  0x4f   :  { %1020 = vmatpush1.bf16.msra.mxu0 %v1423_v20  ;;  %v1514_v20 = vld [vmem:[%s2021_s1 + $0x440] ss:$8 sps:$4 sm:$0xff]  }
  0x50   :  { %1021 = vmatprep.subr.bf16.mxu0 %v1431_v21  ;;  %1061 = vmatpush1.bf16.msra.mxu1 %v1426_v22  ;;  %v1519_v21 = vld [vmem:[%s2021_s1 + $0x434] ss:$8 sps:$4 sm:$0xff]   ;;  %v1517_v22 = vld [vmem:[%s2021_s1 + $0x430] ss:$8 sps:$4 sm:$0xff]  }
  0x51   :  { %1062 = vmatprep.subr.bf16.mxu1 %v1434_v23  ;;  %v1522_v23 = vld [vmem:[%s2021_s1 + $0x424] ss:$8 sps:$4 sm:$0xff]  }
  0x53   :  { %1022 = vmatpush1.bf16.msra.mxu0 %v1429_v24  ;;  %v1520_v24 = vld [vmem:[%s2021_s1 + $0x420] ss:$8 sps:$4 sm:$0xff]  }
  0x54   :  { %1023 = vmatprep.subr.bf16.mxu0 %v1437_v25  ;;  %1063 = vmatpush1.bf16.msra.mxu1 %v1432_v26  ;;  %v1525_v25 = vld [vmem:[%s2021_s1 + $0x414] ss:$8 sps:$4 sm:$0xff]   ;;  %v1523_v26 = vld [vmem:[%s2021_s1 + $0x410] ss:$8 sps:$4 sm:$0xff]  }
  0x55   :  { %1064 = vmatprep.subr.bf16.mxu1 %v1440_v27  ;;  %v1528_v27 = vld [vmem:[%s2021_s1 + $0x404] ss:$8 sps:$4 sm:$0xff]  }
  0x57   :  { %1024 = vmatpush1.bf16.msra.mxu0 %v1435_v28  ;;  %v1526_v28 = vld [vmem:[%s2021_s1 + $0x400] ss:$8 sps:$4 sm:$0xff]  }
  0x58   :  { %1025 = vmatprep.subr.bf16.mxu0 %v1443_v29  ;;  %1065 = vmatpush1.bf16.msra.mxu1 %v1438_v30  ;;  %v1529_v29 = vld [vmem:[%s2023_s0 + $0x20] ss:$0 sps:$4 sm:$0xff]   ;;  %v169_v30 = vlaneseq }
  0x59   :  { %1066 = vmatprep.subr.bf16.mxu1 %v1446_v31 }
  0x5a   :  { %v170_v31 = vshrl.u32 %v169_v30, 7 }
  0x5b   :  { %1026 = vmatpush1.bf16.msra.mxu0 %v1441_v33  ;;  %v167_v33 = vld [vmem:[%s2024_s2] sm:$0x3] }
  0x5c   :  { %1027 = vmatprep.subr.bf16.mxu0 %v1449_v36  ;;  %1067 = vmatpush1.bf16.msra.mxu1 %v1444_v38  ;;  %v171_v32 = vsub.s32 0, %v170_v31  ;;  %v175_v34 = vsub.s32 1, %v170_v31 }
  0x5d   :  { %1068 = vmatprep.subr.bf16.mxu1 %v1452_v39 }
  0x5e   :  { %v172_v35 = vrot.slane %v167_v33, %v171_v32  ;;  %v176_v36 = vrot.slane %v167_v33, %v175_v34 }
  0x5f   :  { %1028 = vmatpush1.bf16.msra.mxu0 %v1447_v40 }
  0x60   :  { %1029 = vmatprep.subr.bf16.mxu0 %v1455_v41  ;;  %1069 = vmatpush1.bf16.msra.mxu1 %v1450_v42 }
  0x61   :  { %1070 = vmatprep.subr.bf16.mxu1 %v1458_v43 }
  0x63   :  { %1030 = vmatpush2.bf16.msra.mxu0 %v1453_v44 }
  0x64   :  { %1031 = vmatprep.subr.bf16.mxu0 %v1461_v45  ;;  %1071 = vmatpush2.bf16.msra.mxu1 %v1456_v46 }
  0x65   :  { %1072 = vmatprep.subr.bf16.mxu1 %v1464_v47 }
  0x67   :  { %1032 = vmatpush2.bf16.msra.mxu0 %v1459_v48 }
  0x68   :  { %1033 = vmatprep.subr.bf16.mxu0 %v1467_v49  ;;  %1073 = vmatpush2.bf16.msra.mxu1 %v1462_v50 }
  0x69   :  { %1074 = vmatprep.subr.bf16.mxu1 %v1470_v51 }
  0x6b   :  { %1034 = vmatpush2.bf16.msra.mxu0 %v1465_v52 }
  0x6c   :  { %1035 = vmatprep.subr.bf16.mxu0 %v1473_v53  ;;  %1075 = vmatpush2.bf16.msra.mxu1 %v1468_v54 }
  0x6d   :  { %1076 = vmatprep.subr.bf16.mxu1 %v1476_v55 }
  0x6f   :  { %1036 = vmatpush2.bf16.msra.mxu0 %v1471_v56 }
  0x70   :  { %1037 = vmatprep.subr.bf16.mxu0 %v1479_v57  ;;  %1077 = vmatpush2.bf16.msra.mxu1 %v1474_v58 }
  0x71   :  { %1078 = vmatprep.subr.bf16.mxu1 %v1482_v59 }
  0x73   :  { %1038 = vmatpush2.bf16.msra.mxu0 %v1477_v60 }
  0x74   :  { %1039 = vmatprep.subr.bf16.mxu0 %v1485_v61  ;;  %1079 = vmatpush2.bf16.msra.mxu1 %v1480_v62 }
  0x75   :  { %1080 = vmatprep.subr.bf16.mxu1 %v1488_v63 }
  0x77   :  { %1040 = vmatpush2.bf16.msra.mxu0 %v1483_v0 }
  0x78   :  { %1041 = vmatprep.subr.bf16.mxu0 %v1491_v1  ;;  %1081 = vmatpush2.bf16.msra.mxu1 %v1486_v2 }
  0x79   :  { %1082 = vmatprep.subr.bf16.mxu1 %v1494_v3 }
  0x7b   :  { %1042 = vmatpush2.bf16.msra.mxu0 %v1489_v4 }
  0x7c   :  { %1043 = vmatprep.subr.bf16.mxu0 %v1497_v5  ;;  %1083 = vmatpush2.bf16.msra.mxu1 %v1492_v6 }
  0x7d   :  { %1084 = vmatprep.subr.bf16.mxu1 %v1500_v7 }
  0x7f   :  { %1044 = vmatpush2.bf16.msra.mxu0 %v1495_v8 }
  0x80   :  { %1095 = vmatprep.subr.bf16.mxu0 %v1505_v9  ;;  %1085 = vmatpush2.bf16.msra.mxu1 %v1498_v10 }
  0x82   :  { %1046 = vmatmul.mubr.bf16.vlgmr.msra.gmra.mxu0 %v1153_v11 }
  0x83   :  { %1096 = vmatpush1.bf16.msra.mxu0 %v1503_v12  ;;  %1127 = vmatprep.mubr.bf16.mxu0 %v1530_v16 }
  0x84   :  { %1087 = vmatmul.mubr.bf16.vlgmr.msra.gmra.mxu1 %v1155_v13  ;;  %1097 = vmatprep.subr.bf16.mxu0 %v1510_v14 }
  0x87   :  { %1098 = vmatpush1.bf16.msra.mxu0 %v1508_v15 }
  0x88   :  { %1099 = vmatprep.subr.bf16.mxu0 %v1513_v17 }
  0x8b   :  { %1100 = vmatpush1.bf16.msra.mxu0 %v1511_v18 }
  0x8c   :  { %1101 = vmatprep.subr.bf16.mxu0 %v1516_v19 }
  0x8f   :  { %1102 = vmatpush1.bf16.msra.mxu0 %v1514_v20 }
  0x90   :  { %1103 = vmatprep.subr.bf16.mxu0 %v1519_v21 }
  0x93   :  { %1104 = vmatpush1.bf16.msra.mxu0 %v1517_v22 }
  0x94   :  { %1105 = vmatprep.subr.bf16.mxu0 %v1522_v23 }
  0x97   :  { %1106 = vmatpush1.bf16.msra.mxu0 %v1520_v24 }
  0x98   :  { %1107 = vmatprep.subr.bf16.mxu0 %v1525_v25 }
  0x9b   :  { %1108 = vmatpush1.bf16.msra.mxu0 %v1523_v26 }
  0x9c   :  { %1109 = vmatprep.subr.bf16.mxu0 %v1528_v27 }
  0x9f   :  { %1110 = vmatpush1.bf16.msra.mxu0 %v1526_v28 }
  0xa2   :  { %1128 = vmatmul.mubr.bf16.vlgmr.msra.gmra.mxu0 %v1529_v29 }
 0x102   :  { %v965_v37 = vpop.f32.mrf.mxu0 }
 0x103   :  { %v966_v38 = vadd.f32 %v965_v37, %v172_v35  ;;  %v1006_v40 = vpop.f32.mrf.mxu1 }
 0x104   :  { %v967_v39 = vpop.f32.mrf.mxu0 }
 0x105   :  { %v968_v41 = vadd.f32 %v967_v39, %v176_v36  ;;  %v1007_v42 = vadd.f32 %v1006_v40, %v966_v38  ;;  %v1008_v44 = vpop.f32.mrf.mxu1 }
 0x106   :  { %v969_v43 = vpop.f32.mrf.mxu0 }
 0x107   :  { %v1009_v45 = vadd.f32 %v1008_v44, %v968_v41  ;;  %v1010_v47 = vpop.f32.mrf.mxu1 }
 0x108   :  { %v970_v46 = vpop.f32.mrf.mxu0 }
 0x109   :  { %v1011_v48 = vpop.f32.mrf.mxu1 }
 0x142   :  { %v1047_v49 = vpop.f32.mrf.mxu0 }
 0x143   :  { %v1048_v57 = vadd.f32 %v1047_v49, %v1007_v42 }
 0x144   :  { %v1049_v50 = vpop.f32.mrf.mxu0  ;;  %v1088_v51 = vpop.f32.mrf.mxu1 }
 0x145   :  { %v1050_v58 = vadd.f32 %v1049_v50, %v1009_v45  ;;  %v1089_v60 = vadd.f32 %v1088_v51, %v1048_v57 }
 0x146   :  { %v1051_v52 = vpop.f32.mrf.mxu0  ;;  %v1090_v53 = vpop.f32.mrf.mxu1 }
 0x147   :  { %v1091_v61 = vadd.f32 %v1090_v53, %v1050_v58 }
 0x148   :  { %v1052_v54 = vpop.f32.mrf.mxu0  ;;  %v1092_v55 = vpop.f32.mrf.mxu1 }
 0x14a   :  { %v1093_v56 = vpop.f32.mrf.mxu1 }
 0x162   :  { %v1129_v59 = vpop.f32.mrf.mxu0 }
 0x163   :  { %v1130_v63 = vadd.f32 %v1129_v59, %v1089_v60 }
 0x164   :  { %v1131_v62 = vpop.f32.mrf.mxu0 }
 0x165   :  { %v1132_v0 = vadd.f32 %v1131_v62, %v1091_v61 }
 0x166   :  { %v1133_v1 = vpop.f32.mrf.mxu0 }
 0x167   :  { %v1303_v2 = vpack.c.bf16 %v1132_v0, %v1130_v63 }
 0x168   :  { %v1134_v3 = vpop.f32.mrf.mxu0 }
 0x169   :  { %1144 = vst [vmem:[%s2025_s4] sm:$0xff] %v1303_v2 }

// kernel: metaformer_forward.17
= control target key start
LH: loop header
LB: loop body
LE: loop exit
PB: predicated region body
PF: predicated region fallthrough
CT: control target
= control target key end

     0   :  { %v52_v0 = vlaneseq  ;;  %vm116_vm0 = vcmask 1041409   ;;  %vm118_vm1 = vcmask 1042434   ;;  %vm120_vm2 = vcmask 1043459   ;;  %s1055_s0 = inlined_call_operand.vmem [shape: bf16[8,1,256], index: 0, kind: input, shape index: {}]   ;;  %s1056_s3 = inlined_call_operand.vmem [shape: f32[256,10], index: 3, kind: input, shape index: {}]   ;;  %s1057_s1 = inlined_call_operand.vmem [shape: f32[1,256], index: 1, kind: input, shape index: {}]   ;;  %s1058_s2 = inlined_call_operand.vmem [shape: f32[1,256], index: 2, kind: input, shape index: {}]   ;;  %s1059_s4 = inlined_call_operand.vmem [shape: f32[1,10], index: 4, kind: input, shape index: {}]   ;;  %s1060_s5 = inlined_call_operand.vmem [shape: f32[8,10], index: 5, kind: output, shape index: {}]  }
   0x1   :  { %v20_v1 = vld [vmem:[%s1055_s0] sm:$0x3]  ;;  %v21_v2 = vld [vmem:[%s1055_s0 + $0x2] sm:$0x3]  ;;  %v22_v3 = vld [vmem:[%s1055_s0 + $0x4] sm:$0x3] }
   0x2   :  { %v23_v4 = vld [vmem:[%s1055_s0 + $0x6] sm:$0x3]  ;;  %v24_v5 = vld [vmem:[%s1055_s0 + $0x8] sm:$0x3]  ;;  %v25_v6 = vld [vmem:[%s1055_s0 + $0xa] sm:$0x3]  ;;  %v739_v7 = vunpack.c.l.bf16 %v20_v1  ;;  %v741_v8 = vunpack.c.l.bf16 %v21_v2  ;;  %v745_v10 = vunpack.c.l.bf16 %v22_v3 }
   0x3   :  { %v743_v9 = vshrl.u32 %v52_v0, 7  ;;  %v26_v11 = vld [vmem:[%s1055_s0 + $0xc] sm:$0x3]  ;;  %v750_v12 = vunpack.c.l.bf16 %v23_v4  ;;  %v27_v15 = vld [vmem:[%s1055_s0 + $0xe] sm:$0x3]  ;;  %v761_v16 = vunpack.c.l.bf16 %v24_v5  ;;  %v763_v17 = vunpack.c.l.bf16 %v25_v6 }
   0x4   :  { %v773_v22 = vunpack.c.l.bf16 %v26_v11  ;;  %v779_v25 = vunpack.c.l.bf16 %v27_v15  ;;  %vm122_vm3 = vcmask 1044484   ;;  %vm124_vm4 = vcmask 1045509  }
   0x5   :  { %v753_v13 = vsub.s32 0, %v743_v9  ;;  %v756_v14 = vsub.s32 2, %v743_v9  ;;  %vm126_vm5 = vcmask 1046534   ;;  %vm128_vm6 = vcmask 1047559  }
   0x6   :  { %v686_v51 = vmov 269488144   ;;  %v687_v53 = vmov 842150450   ;;  %v688_v55 = vmov 1414812756  }
   0x7   :  { %v55_v18 = vrot.slane %v739_v7, %v753_v13  ;;  %v59_v19 = vrot.slane %v739_v7, %v756_v14  ;;  %v63_v20 = vrot.slane %v741_v8, %v753_v13  ;;  %v67_v21 = vrot.slane %v741_v8, %v756_v14 }
   0x8   :  { %v71_v23 = vrot.slane %v745_v10, %v753_v13  ;;  %v75_v24 = vrot.slane %v745_v10, %v756_v14  ;;  %v79_v26 = vrot.slane %v750_v12, %v753_v13  ;;  %v83_v27 = vrot.slane %v750_v12, %v756_v14 }
   0x9   :  { %v87_v28 = vrot.slane %v761_v16, %v753_v13  ;;  %v91_v29 = vrot.slane %v761_v16, %v756_v14  ;;  %v95_v30 = vrot.slane %v763_v17, %v753_v13  ;;  %v99_v31 = vrot.slane %v763_v17, %v756_v14 }
   0xa   :  { %v117_v32 = vsel %vm116_vm0, %v63_v20, %v55_v18  ;;  %v130_v33 = vsel %vm116_vm0, %v67_v21, %v59_v19  ;;  %v103_v34 = vrot.slane %v773_v22, %v753_v13  ;;  %v107_v35 = vrot.slane %v773_v22, %v756_v14 }
   0xb   :  { %v119_v36 = vsel %vm118_vm1, %v71_v23, %v117_v32  ;;  %v131_v37 = vsel %vm118_vm1, %v75_v24, %v130_v33  ;;  %v111_v38 = vrot.slane %v779_v25, %v753_v13  ;;  %v115_v39 = vrot.slane %v779_v25, %v756_v14 }
   0xc   :  { %v121_v40 = vsel %vm120_vm2, %v79_v26, %v119_v36  ;;  %v132_v41 = vsel %vm120_vm2, %v83_v27, %v131_v37  ;;  %v146_v52 = vunpack.c.l.s4 %v686_v51  ;;  %v153_v54 = vunpack.c.l.s4 %v687_v53 }
   0xd   :  { %v123_v42 = vsel %vm122_vm3, %v87_v28, %v121_v40  ;;  %v133_v43 = vsel %vm122_vm3, %v91_v29, %v132_v41  ;;  %v160_v56 = vunpack.c.l.s4 %v688_v55  ;;  %v689_v57 = vmov 1987475062  }
   0xe   :  { %v125_v44 = vsel %vm124_vm4, %v95_v30, %v123_v42  ;;  %v134_v45 = vsel %vm124_vm4, %v99_v31, %v133_v43  ;;  %v167_v58 = vunpack.c.l.s4 %v689_v57  ;;  %v147_v59 = vunpack.c.0.s8 %v146_v52 }
   0xf   :  { %v127_v46 = vsel %vm126_vm5, %v103_v34, %v125_v44  ;;  %v135_v47 = vsel %vm126_vm5, %v107_v35, %v134_v45  ;;  %v154_v60 = vunpack.c.0.s8 %v153_v54  ;;  %v161_v61 = vunpack.c.0.s8 %v160_v56 }
  0x10   :  { %v129_v48 = vsel %vm128_vm6, %v111_v38, %v127_v46  ;;  %v136_v49 = vsel %vm128_vm6, %v115_v39, %v135_v47  ;;  %v168_v62 = vunpack.c.0.s8 %v167_v58  ;;  %v816_v63 = vsub.s32 %v147_v59, %v743_v9 }
  0x11   :  { %v139_v50 = vadd.f32 %v136_v49, %v129_v48  ;;  %v819_v0 = vsub.s32 %v154_v60, %v743_v9  ;;  %v822_v1 = vsub.s32 %v161_v61, %v743_v9  ;;  %vm637_vm7 = vcmask 80896  }
  0x12   :  { %v825_v2 = vsub.s32 %v168_v62, %v743_v9 }
  0x13   :  { %140 = vadd.xlane.f32.xlu0 %v139_v50 }
  0x9c   :  { %v141_v3 = vpop.xlane.xlu0 %140 }
  0x9d   :  { %v143_v4 = vmul.f32 0.00390625, %v141_v3  ;;  %v471_v3 = vld [vmem:[%s1056_s3 + $0xf8] sm:$0xff] }
  0x9e   :  { %644 = vmatprep.subr.mxu0 %v471_v3 }
  0x9f   :  { %v151_v5 = vrot.slane %v143_v4, %v816_v63  ;;  %v158_v6 = vrot.slane %v143_v4, %v819_v0  ;;  %v165_v11 = vrot.slane %v143_v4, %v822_v1  ;;  %v172_v15 = vrot.slane %v143_v4, %v825_v2  ;;  %v455_v4 = vld [vmem:[%s1056_s3 + $0x78] sm:$0xff] }
  0xa0   :  { %645 = vmatpush3.msra.mxu0 %v455_v4 }
  0xa1   :  { %v173_v18 = vrot.slane %v151_v5, 1  ;;  %v174_v19 = vrot.slane %v158_v6, 1  ;;  %v175_v20 = vrot.slane %v165_v11, 1  ;;  %v176_v21 = vrot.slane %v172_v15, 1 }
  0xa2   :  { %v832_v23 = vsub.f32 %v739_v7, %v151_v5  ;;  %v835_v24 = vsub.f32 %v745_v10, %v158_v6  ;;  %v844_v28 = vsub.f32 %v761_v16, %v165_v11  ;;  %v852_v7 = vsub.f32 %v773_v22, %v172_v15  ;;  %v470_v5 = vld [vmem:[%s1056_s3 + $0xf0] sm:$0xff]  ;;  %v469_v11 = vld [vmem:[%s1056_s3 + $0xe8] sm:$0xff] }
  0xa3   :  { %v838_v26 = vsub.f32 %v741_v8, %v173_v18  ;;  %v841_v27 = vsub.f32 %v750_v12, %v174_v19  ;;  %v847_v29 = vsub.f32 %v763_v17, %v175_v20  ;;  %v859_v12 = vsub.f32 %v779_v25, %v176_v21  ;;  %v454_v6 = vld [vmem:[%s1056_s3 + $0x70] sm:$0xff]  ;;  %646 = vmatprep.subr.mxu0 %v470_v5  ;;  %v453_v15 = vld [vmem:[%s1056_s3 + $0x68] sm:$0xff]  ;;  %v468_v18 = vld [vmem:[%s1056_s3 + $0xe0] sm:$0xff] }
  0xa4   :  { %v193_v30 = vmul.f32 %v832_v23, %v832_v23  ;;  %v195_v8 = vmul.f32 %v835_v24, %v835_v24  ;;  %v197_v17 = vmul.f32 %v844_v28, %v844_v28  ;;  %v199_v36 = vmul.f32 %v852_v7, %v852_v7  ;;  %647 = vmatpush3.msra.mxu0 %v454_v6  ;;  %v452_v19 = vld [vmem:[%s1056_s3 + $0x60] sm:$0xff]  ;;  %v467_v20 = vld [vmem:[%s1056_s3 + $0xd8] sm:$0xff] }
  0xa5   :  { %v194_v10 = vmul.f32 %v838_v26, %v838_v26  ;;  %v196_v16 = vmul.f32 %v841_v27, %v841_v27  ;;  %v198_v34 = vmul.f32 %v847_v29, %v847_v29  ;;  %v200_v37 = vmul.f32 %v859_v12, %v859_v12  ;;  %648 = vmatprep.subr.mxu0 %v469_v11  ;;  %v451_v21 = vld [vmem:[%s1056_s3 + $0x58] sm:$0xff] }
  0xa6   :  { %v212_v32 = vrot.slane %v193_v30, %v753_v13  ;;  %v216_v33 = vrot.slane %v193_v30, %v756_v14  ;;  %v228_v25 = vrot.slane %v195_v8, %v753_v13  ;;  %v232_v35 = vrot.slane %v195_v8, %v756_v14  ;;  %649 = vmatpush3.msra.mxu0 %v453_v15  ;;  %v466_v30 = vld [vmem:[%s1056_s3 + $0xd0] sm:$0xff]  ;;  %v465_v8 = vld [vmem:[%s1056_s3 + $0xc8] sm:$0xff] }
  0xa7   :  { %v220_v31 = vrot.slane %v194_v10, %v753_v13  ;;  %v224_v22 = vrot.slane %v194_v10, %v756_v14  ;;  %v236_v38 = vrot.slane %v196_v16, %v753_v13  ;;  %v240_v39 = vrot.slane %v196_v16, %v756_v14  ;;  %650 = vmatprep.subr.mxu0 %v468_v18  ;;  %v450_v10 = vld [vmem:[%s1056_s3 + $0x50] sm:$0xff]  ;;  %v449_v16 = vld [vmem:[%s1056_s3 + $0x48] sm:$0xff] }
  0xa8   :  { %v244_v42 = vrot.slane %v197_v17, %v753_v13  ;;  %v248_v43 = vrot.slane %v197_v17, %v756_v14  ;;  %v252_v46 = vrot.slane %v198_v34, %v753_v13  ;;  %v256_v47 = vrot.slane %v198_v34, %v756_v14  ;;  %651 = vmatpush3.msra.mxu0 %v452_v19  ;;  %v464_v17 = vld [vmem:[%s1056_s3 + $0xc0] sm:$0xff]  ;;  %v446_v34 = vld [vmem:[%s1056_s3 + $0x30] sm:$0xff] }
  0xa9   :  { %v273_v40 = vsel %vm116_vm0, %v220_v31, %v212_v32  ;;  %v280_v41 = vsel %vm116_vm0, %v224_v22, %v216_v33  ;;  %v260_v50 = vrot.slane %v199_v36, %v753_v13  ;;  %v264_v51 = vrot.slane %v199_v36, %v756_v14  ;;  %652 = vmatprep.subr.mxu0 %v467_v20  ;;  %v448_v31 = vld [vmem:[%s1056_s3 + $0x40] sm:$0xff]  ;;  %v463_v22 = vld [vmem:[%s1056_s3 + $0xb8] sm:$0xff]  ;;  %v462_v33 = vld [vmem:[%s1056_s3 + $0xb0] sm:$0xff] }
  0xaa   :  { %v274_v44 = vsel %vm118_vm1, %v228_v25, %v273_v40  ;;  %v281_v45 = vsel %vm118_vm1, %v232_v35, %v280_v41  ;;  %v268_v54 = vrot.slane %v200_v37, %v753_v13  ;;  %v272_v55 = vrot.slane %v200_v37, %v756_v14  ;;  %653 = vmatpush3.msra.mxu0 %v451_v21  ;;  %v447_v32 = vld [vmem:[%s1056_s3 + $0x38] sm:$0xff]  ;;  %v461_v25 = vld [vmem:[%s1056_s3 + $0xa8] sm:$0xff]  ;;  %v460_v36 = vld [vmem:[%s1056_s3 + $0xa0] sm:$0xff] }
  0xab   :  { %v275_v48 = vsel %vm120_vm2, %v236_v38, %v274_v44  ;;  %v282_v49 = vsel %vm120_vm2, %v240_v39, %v281_v45  ;;  %654 = vmatprep.subr.mxu0 %v466_v30  ;;  %v445_v35 = vld [vmem:[%s1056_s3 + $0x28] sm:$0xff]  ;;  %v444_v37 = vld [vmem:[%s1056_s3 + $0x20] sm:$0xff]  ;;  %v459_v38 = vld [vmem:[%s1056_s3 + $0x98] sm:$0xff] }
  0xac   :  { %v276_v52 = vsel %vm122_vm3, %v244_v42, %v275_v48  ;;  %v283_v53 = vsel %vm122_vm3, %v248_v43, %v282_v49  ;;  %655 = vmatpush3.msra.mxu0 %v450_v10  ;;  %v443_v39 = vld [vmem:[%s1056_s3 + $0x18] sm:$0xff]  ;;  %v458_v40 = vld [vmem:[%s1056_s3 + $0x90] sm:$0xff]  ;;  %v457_v42 = vld [vmem:[%s1056_s3 + $0x88] sm:$0xff] }
  0xad   :  { %v277_v56 = vsel %vm124_vm4, %v252_v46, %v276_v52  ;;  %v284_v57 = vsel %vm124_vm4, %v256_v47, %v283_v53  ;;  %656 = vmatprep.subr.mxu0 %v465_v8  ;;  %v442_v41 = vld [vmem:[%s1056_s3 + $0x10] sm:$0xff]  ;;  %v441_v43 = vld [vmem:[%s1056_s3 + $0x8] sm:$0xff]  ;;  %v456_v44 = vld [vmem:[%s1056_s3 + $0x80] sm:$0xff]  ;;  %v352_v46 = vsub.s32 1, %v743_v9  ;;  %v690_v47 = vmov 1983009808  }
  0xae   :  { %v278_v58 = vsel %vm126_vm5, %v260_v50, %v277_v56  ;;  %v285_v59 = vsel %vm126_vm5, %v264_v51, %v284_v57  ;;  %657 = vmatpush3.msra.mxu0 %v449_v16  ;;  %v440_v45 = vld [vmem:[%s1056_s3] sm:$0xff]  ;;  %v357_v48 = vunpack.c.l.s4 %v690_v47 }
  0xaf   :  { %v279_v60 = vsel %vm128_vm6, %v268_v54, %v278_v58  ;;  %v286_v61 = vsel %vm128_vm6, %v272_v55, %v285_v59  ;;  %658 = vmatprep.subr.mxu0 %v464_v17  ;;  %v344_v49 = vld [vmem:[%s1057_s1] sm:$0x3] }
  0xb0   :  { %v289_v62 = vadd.f32 %v286_v61, %v279_v60  ;;  %659 = vmatpush3.msra.mxu0 %v448_v31  ;;  %v392_v52 = vld [vmem:[%s1058_s2] sm:$0x3]  ;;  %v349_v53 = vrot.slane %v344_v49, %v753_v13  ;;  %v353_v54 = vrot.slane %v344_v49, %v352_v46  ;;  %v358_v55 = vunpack.c.0.s8 %v357_v48 }
  0xb1   :  { %660 = vmatprep.subr.mxu0 %v463_v22  ;;  %v397_v57 = vrot.slane %v392_v52, %v753_v13  ;;  %v401_v58 = vrot.slane %v392_v52, %v352_v46 }
  0xb2   :  { %290 = vadd.xlane.f32.xlu0 %v289_v62  ;;  %661 = vmatpush3.msra.mxu0 %v447_v32  ;;  %v354_v59 = vcombine.low %v349_v53, %v353_v54  ;;  %v361_v60 = vsub.s32 %v358_v55, %v743_v9  ;;  %v355_v61 = vcombine.high %v349_v53, %v353_v54 }
  0xb3   :  { %662 = vmatprep.subr.mxu0 %v462_v33  ;;  %v402_v62 = vcombine.low %v397_v57, %v401_v58  ;;  %v403_v5 = vcombine.high %v397_v57, %v401_v58 }
  0xb4   :  { %663 = vmatpush3.msra.mxu0 %v446_v34  ;;  %v362_v3 = vrot.slane %v354_v59, %v361_v60  ;;  %v369_v4 = vrot.slane %v355_v61, %v361_v60 }
  0xb5   :  { %664 = vmatprep.subr.mxu0 %v461_v25  ;;  %v410_v6 = vrot.slane %v402_v62, %v361_v60  ;;  %v417_v18 = vrot.slane %v403_v5, %v361_v60 }
  0xb6   :  { %665 = vmatpush3.msra.mxu0 %v445_v35  ;;  %v370_v11 = vcombine.high %v362_v3, %v362_v3  ;;  %v371_v15 = vcombine.high %v369_v4, %v369_v4  ;;  %v372_v21 = vrot.slane %v362_v3, 1  ;;  %v374_v10 = vrot.slane %v369_v4, 1 }
  0xb7   :  { %666 = vmatprep.subr.mxu0 %v460_v36  ;;  %v418_v19 = vcombine.high %v410_v6, %v410_v6  ;;  %v419_v22 = vcombine.high %v417_v18, %v417_v18  ;;  %v420_v32 = vrot.slane %v410_v6, 1  ;;  %v422_v46 = vrot.slane %v417_v18, 1 }
  0xb8   :  { %667 = vmatpush3.msra.mxu0 %v444_v37  ;;  %v373_v30 = vrot.slane %v370_v11, 1  ;;  %v375_v31 = vrot.slane %v371_v15, 1 }
  0xb9   :  { %668 = vmatprep.subr.mxu0 %v459_v38  ;;  %v421_v33 = vrot.slane %v418_v19, 1 }
  0xba   :  { %669 = vmatpush3.msra.mxu0 %v443_v39 }
  0xbb   :  { %670 = vmatprep.subr.mxu0 %v458_v40 }
  0xbc   :  { %671 = vmatpush3.msra.mxu0 %v442_v41 }
  0xbd   :  { %672 = vmatprep.subr.mxu0 %v457_v42 }
  0xbe   :  { %673 = vmatpush3.msra.mxu0 %v441_v43 }
  0xbf   :  { %674 = vmatprep.subr.mxu0 %v456_v44 }
  0xc0   :  { %675 = vmatpush3.msra.mxu0 %v440_v45 }
 0x13b   :  { %v291_v50 = vpop.xlane.xlu0 %290 }
 0x13c   :  { %v292_v51 = vmul.f32 0.00390625, %v291_v50 }
 0x13e   :  { %v293_v56 = vadd.f32 1e-06, %v292_v51 }
 0x140   :  { %684 = vrsqrt.f32 %v293_v56 }
 0x14d   :  { %v685_v20 = vpop.eup %684 }
 0x14e   :  { %v302_v8 = vrot.slane %v685_v20, %v816_v63  ;;  %v309_v16 = vrot.slane %v685_v20, %v819_v0  ;;  %v316_v9 = vrot.slane %v685_v20, %v822_v1  ;;  %v323_v17 = vrot.slane %v685_v20, %v825_v2 }
 0x150   :  { %v324_v34 = vrot.slane %v302_v8, 1  ;;  %v325_v25 = vrot.slane %v309_v16, 1  ;;  %v326_v35 = vrot.slane %v316_v9, 1  ;;  %v327_v36 = vrot.slane %v323_v17, 1 }
 0x151   :  { %v336_v37 = vmul.f32 %v302_v8, %v832_v23  ;;  %v338_v38 = vmul.f32 %v309_v16, %v835_v24  ;;  %v340_v63 = vmul.f32 %v316_v9, %v844_v28  ;;  %v342_v0 = vmul.f32 %v323_v17, %v852_v7 }
 0x152   :  { %v337_v1 = vmul.f32 %v324_v34, %v838_v26  ;;  %v339_v2 = vmul.f32 %v325_v25, %v841_v27  ;;  %v341_v39 = vmul.f32 %v326_v35, %v847_v29  ;;  %v343_v40 = vmul.f32 %v327_v36, %v859_v12 }
 0x153   :  { %v384_v41 = vmul.f32 %v362_v3, %v336_v37  ;;  %v386_v42 = vmul.f32 %v370_v11, %v338_v38  ;;  %v388_v43 = vmul.f32 %v369_v4, %v340_v63  ;;  %v390_v24 = vmul.f32 %v371_v15, %v342_v0 }
 0x154   :  { %v385_v44 = vmul.f32 %v372_v21, %v337_v1  ;;  %v387_v45 = vmul.f32 %v373_v30, %v339_v2  ;;  %v389_v23 = vmul.f32 %v374_v10, %v341_v39  ;;  %v391_v48 = vmul.f32 %v375_v31, %v343_v40 }
 0x155   :  { %v432_v47 = vadd.f32 %v410_v6, %v384_v41  ;;  %v434_v28 = vadd.f32 %v418_v19, %v386_v42  ;;  %v423_v7 = vrot.slane %v419_v22, 1  ;;  %v436_v50 = vadd.f32 %v417_v18, %v388_v43 }
 0x156   :  { %v433_v49 = vadd.f32 %v420_v32, %v385_v44  ;;  %v435_v26 = vadd.f32 %v421_v33, %v387_v45  ;;  %v437_v27 = vadd.f32 %v422_v46, %v389_v23  ;;  %v438_v51 = vadd.f32 %v419_v22, %v390_v24  ;;  %v643_v32 = vld [vmem:[%s1059_s4] ss:$0 sm:$0xff] }
 0x157   :  { %v494_v29 = vrot.slane %v432_v47, %v756_v14  ;;  %v510_v52 = vrot.slane %v434_v28, %v756_v14  ;;  %v490_v53 = vrot.slane %v432_v47, %v753_v13  ;;  %v439_v55 = vadd.f32 %v423_v7, %v391_v48 }
 0x158   :  { %v502_v12 = vrot.slane %v433_v49, %v756_v14  ;;  %v498_v54 = vrot.slane %v433_v49, %v753_v13  ;;  %v518_v56 = vrot.slane %v435_v26, %v756_v14  ;;  %v506_v58 = vrot.slane %v434_v28, %v753_v13 }
 0x159   :  { %v526_v59 = vrot.slane %v436_v50, %v756_v14  ;;  %v514_v61 = vrot.slane %v435_v26, %v753_v13  ;;  %v534_v3 = vrot.slane %v437_v27, %v756_v14  ;;  %v522_v5 = vrot.slane %v436_v50, %v753_v13 }
 0x15a   :  { %v558_v57 = vsel %vm116_vm0, %v502_v12, %v494_v29  ;;  %v551_v62 = vsel %vm116_vm0, %v498_v54, %v490_v53  ;;  %v542_v11 = vrot.slane %v438_v51, %v756_v14  ;;  %v530_v18 = vrot.slane %v437_v27, %v753_v13 }
 0x15b   :  { %v559_v60 = vsel %vm118_vm1, %v510_v52, %v558_v57  ;;  %v552_v6 = vsel %vm118_vm1, %v506_v58, %v551_v62  ;;  %v550_v20 = vrot.slane %v439_v55, %v756_v14  ;;  %v538_v30 = vrot.slane %v438_v51, %v753_v13 }
 0x15c   :  { %v560_v4 = vsel %vm120_vm2, %v518_v56, %v559_v60  ;;  %v553_v19 = vsel %vm120_vm2, %v514_v61, %v552_v6  ;;  %v546_v16 = vrot.slane %v439_v55, %v753_v13 }
 0x15d   :  { %v561_v15 = vsel %vm122_vm3, %v526_v59, %v560_v4  ;;  %v554_v10 = vsel %vm122_vm3, %v522_v5, %v553_v19 }
 0x15e   :  { %v562_v21 = vsel %vm124_vm4, %v534_v3, %v561_v15  ;;  %v555_v9 = vsel %vm124_vm4, %v530_v18, %v554_v10 }
 0x15f   :  { %v563_v8 = vsel %vm126_vm5, %v542_v11, %v562_v21  ;;  %v556_v31 = vsel %vm126_vm5, %v538_v30, %v555_v9 }
 0x160   :  { %v564_v17 = vsel %vm128_vm6, %v550_v20, %v563_v8  ;;  %v557_v22 = vsel %vm128_vm6, %v546_v16, %v556_v31 }
 0x161   :  { %631 = vmatprep.mubr.f32.mxu0 %v564_v17 }
 0x162   :  { %632 = vmatmul.mubr.f32.vlgmr.msra.gmra.mxu0 %v557_v22 }
 0x222   :  { %v676_v14 = vpop.f32.mrf.mxu0 }
 0x224   :  { %v677_v33 = vpop.f32.mrf.mxu0 }
 0x225   :  { %v678_v34 = vadd.f32 %v677_v33, %v676_v14 }
 0x227   :  { %v634_v25 = vadd.f32 %v678_v34, %v643_v32 }
 0x229   :  { %638 = vst.msk [vmem:[%s1060_s5] sm:$0xff] %vm637_vm7, %v634_v25 }

// kernel: metaformer_forward.16
= control target key start
LH: loop header
LB: loop body
LE: loop exit
PB: predicated region body
PF: predicated region fallthrough
CT: control target
= control target key end

     0   :  { %14 = vsyncpa [#allocation4], 0  ;;  %s3454_s0 = inlined_call_operand.vmem [shape: bf16[8,256], index: 0, kind: input, shape index: {}]   ;;  %s3455_s1 = inlined_call_operand.vmem [shape: f32[1,1,256], index: 1, kind: input, shape index: {}]   ;;  %s3456_s2 = inlined_call_operand.vmem [shape: f32[1,1,256], index: 2, kind: input, shape index: {}]   ;;  %s3457_s3 = inlined_call_operand.vmem [shape: bf16[1,256,1024], index: 3, kind: input, shape index: {}]   ;;  %s3458_s4 = inlined_call_operand.vmem [shape: bf16[1,1024,256], index: 4, kind: input, shape index: {}]   ;;  %s3459_s5 = inlined_call_operand.vmem [shape: f32[1,1,256], index: 5, kind: input, shape index: {}]   ;;  %s3460_s6 = inlined_call_operand.vmem [shape: f32[1,1,256], index: 6, kind: input, shape index: {}]   ;;  %s3461_s7 = inlined_call_operand.vmem [shape: f32[1,2], index: 7, kind: input, shape index: {}]   ;;  %s3462_s8 = inlined_call_operand.vmem [shape: f32[1,256], index: 8, kind: input, shape index: {}]   ;;  %s3463_s9 = inlined_call_operand.vmem [shape: bf16[8,256], index: 9, kind: output, shape index: {}]  }
   0x1   :  { %s35_s11 = sshll.u32 %s3461_s7, 4  ;;  %s36_s11 = int_to_ptr.vmem [resolvable:$true] %s35_s11 }
   0x2   :  { %s2536_s12 = scalar_lea.vmem %s36_s11, 16  ;;  %p2541_p1 = scmp.lt.s32.totalorder %s36_s11, %s36_s11 }
   0x3   :  { %p2537_p0 = scmp.ne.s32.totalorder %s36_s11, %s2536_s12  ;;  %p2542_p2 = scmp.lt.s32.totalorder %s2536_s12, %s2536_s12 }
   0x5   :  { %p2543_p3 = por %p2542_p2, %p2541_p1 }
   0x7   :  { %p2544_p4 = pnand %p2543_p3, %p2537_p0 }
   0x9   :  { %2547 = shalt.err (!%p2544_p4)
}
   0xa   :  { %s2550_s13 = smov [#allocation3]  }
   0xb   :  { %38 = dma.vmem_to_smem %s36_s11, 16, %s2550_s13, [#allocation4]  }
   0xc   :  { %2548 = dma.done.wait [#allocation4], 16  }
   0xd   :  { %2549 = vsyncadd [#allocation4], 4294967280 }
   0xe   :  { %44 = sfence }
   0xf   :  { %v49_v0 = vld [vmem:[%s3454_s0] sm:$0xff]  ;;  %v65_v14 = vlaneseq  ;;  %v169_v36 = vld [vmem:[%s3457_s3 + $0x1c8] sm:$0xff]  ;;  %s2080_s27 = sld [smem:[#allocation3 + $0x1]] }
  0x10   :  { %v50_v1 = vunpack.c.l.bf16 %v49_v0  ;;  %v51_v2 = vunpack.c.h.bf16 %v49_v0  ;;  %v58_v18 = vld [vmem:[%s3459_s5] sm:$0x3]  ;;  %v171_v38 = vld [vmem:[%s3457_s3 + $0x1e8] sm:$0xff] }
  0x11   :  { %v66_v15 = vshrl.u32 %v65_v14, 7  ;;  %v56_v19 = vld [vmem:[%s3455_s1] sm:$0x3]  ;;  %v2112_v42 = vcombine.high %v169_v36, %v171_v38  ;;  %v2111_v43 = vcombine.low %v169_v36, %v171_v38  ;;  %v165_v45 = vld [vmem:[%s3457_s3 + $0x188] sm:$0xff] }
  0x12   :  { %v77_v3 = vadd.f32 %v51_v2, %v50_v1  ;;  %v168_v34 = vld [vmem:[%s3457_s3 + $0x1c0] sm:$0xff]  ;;  %v167_v46 = vld [vmem:[%s3457_s3 + $0x1a8] sm:$0xff] }
  0x13   :  { %v2607_v16 = vsub.s32 0, %v66_v15  ;;  %v2609_v17 = vsub.s32 1, %v66_v15  ;;  %v170_v35 = vld [vmem:[%s3457_s3 + $0x1e0] sm:$0xff]  ;;  %v2108_v48 = vcombine.high %v165_v45, %v167_v46  ;;  %v161_v50 = vld [vmem:[%s3457_s3 + $0x148] sm:$0xff]  ;;  %565 = vmatprep.subr.bf16.mxu1 %v2112_v42  ;;  %v2107_v53 = vcombine.low %v165_v45, %v167_v46 }
  0x14   :  { %78 = vadd.xlane.f32.xlu0 %v77_v3  ;;  %v2110_v37 = vcombine.high %v168_v34, %v170_v35  ;;  %v2109_v39 = vcombine.low %v168_v34, %v170_v35  ;;  %v164_v40 = vld [vmem:[%s3457_s3 + $0x180] sm:$0xff]  ;;  %v163_v51 = vld [vmem:[%s3457_s3 + $0x168] sm:$0xff]  ;;  %566 = vmatpush1.bf16.msra.mxu1 %v2111_v43 }
  0x15   :  { %v68_v20 = vrot.slane %v58_v18, %v2607_v16  ;;  %v72_v21 = vrot.slane %v58_v18, %v2609_v17  ;;  %v98_v22 = vrot.slane %v56_v19, %v2607_v16  ;;  %v102_v23 = vrot.slane %v56_v19, %v2609_v17  ;;  %v166_v41 = vld [vmem:[%s3457_s3 + $0x1a0] sm:$0xff]  ;;  %567 = vmatprep.subr.bf16.mxu1 %v2108_v48  ;;  %v157_v58 = vld [vmem:[%s3457_s3 + $0x108] sm:$0xff] }
  0x16   :  { %v2106_v44 = vcombine.high %v164_v40, %v166_v41  ;;  %v160_v47 = vld [vmem:[%s3457_s3 + $0x140] sm:$0xff]  ;;  %524 = vmatprep.subr.bf16.mxu0 %v2110_v37  ;;  %v2105_v52 = vcombine.low %v164_v40, %v166_v41  ;;  %v2104_v55 = vcombine.high %v161_v50, %v163_v51  ;;  %v159_v59 = vld [vmem:[%s3457_s3 + $0x128] sm:$0xff]  ;;  %v2103_v61 = vcombine.low %v161_v50, %v163_v51 }
  0x17   :  { %v75_v25 = vmul.f32 %v68_v20, %v50_v1  ;;  %v76_v26 = vmul.f32 %v72_v21, %v51_v2  ;;  %v162_v49 = vld [vmem:[%s3457_s3 + $0x160] sm:$0xff]  ;;  %525 = vmatpush1.bf16.msra.mxu0 %v2109_v39  ;;  %v2100_v63 = vcombine.high %v157_v58, %v159_v59  ;;  %v155_v3 = vld [vmem:[%s3457_s3 + $0xe8] sm:$0xff] }
  0x18   :  { %526 = vmatprep.subr.bf16.mxu0 %v2106_v44  ;;  %v2102_v54 = vcombine.high %v160_v47, %v162_v49  ;;  %v156_v56 = vld [vmem:[%s3457_s3 + $0x100] sm:$0xff]  ;;  %v2101_v60 = vcombine.low %v160_v47, %v162_v49  ;;  %568 = vmatpush1.bf16.msra.mxu1 %v2107_v53  ;;  %v145_v20 = vld [vmem:[%s3457_s3 + $0x48] sm:$0xff] }
  0x19   :  { %v158_v57 = vld [vmem:[%s3457_s3 + $0x120] sm:$0xff]  ;;  %569 = vmatprep.subr.bf16.mxu1 %v2104_v55  ;;  %v147_v21 = vld [vmem:[%s3457_s3 + $0x68] sm:$0xff] }
  0x1a   :  { %v2098_v62 = vcombine.high %v156_v56, %v158_v57  ;;  %v152_v0 = vld [vmem:[%s3457_s3 + $0xc0] sm:$0xff]  ;;  %v201_v38 = vld [vmem:[%s3457_s3 + $0x3c8] sm:$0xff] }
  0x1b   :  { %527 = vmatpush1.bf16.msra.mxu0 %v2105_v52  ;;  %v144_v18 = vld [vmem:[%s3457_s3 + $0x40] sm:$0xff]  ;;  %v203_v39 = vld [vmem:[%s3457_s3 + $0x3e8] sm:$0xff] }
  0x1c   :  { %528 = vmatprep.subr.bf16.mxu0 %v2102_v54  ;;  %570 = vmatpush1.bf16.msra.mxu1 %v2103_v61  ;;  %v146_v19 = vld [vmem:[%s3457_s3 + $0x60] sm:$0xff]  ;;  %v2144_v43 = vcombine.high %v201_v38, %v203_v39  ;;  %v197_v46 = vld [vmem:[%s3457_s3 + $0x388] sm:$0xff]  ;;  %v2143_v49 = vcombine.low %v201_v38, %v203_v39 }
  0x1d   :  { %571 = vmatprep.subr.bf16.mxu1 %v2100_v63  ;;  %v200_v36 = vld [vmem:[%s3457_s3 + $0x3c0] sm:$0xff]  ;;  %v199_v47 = vld [vmem:[%s3457_s3 + $0x3a8] sm:$0xff] }
  0x1e   :  { %v202_v37 = vld [vmem:[%s3457_s3 + $0x3e0] sm:$0xff]  ;;  %v2140_v51 = vcombine.high %v197_v46, %v199_v47  ;;  %v2139_v53 = vcombine.low %v197_v46, %v199_v47  ;;  %v193_v63 = vld [vmem:[%s3457_s3 + $0x348] sm:$0xff] }
  0x1f   :  { %529 = vmatpush1.bf16.msra.mxu0 %v2101_v60  ;;  %v2142_v42 = vcombine.high %v200_v36, %v202_v37  ;;  %v196_v44 = vld [vmem:[%s3457_s3 + $0x380] sm:$0xff]  ;;  %v2141_v48 = vcombine.low %v200_v36, %v202_v37 }
  0x20   :  { %530 = vmatprep.subr.bf16.mxu0 %v2098_v62  ;;  %v198_v45 = vld [vmem:[%s3457_s3 + $0x3a0] sm:$0xff] }
  0x21   :  { %v2138_v50 = vcombine.high %v196_v44, %v198_v45  ;;  %v2137_v52 = vcombine.low %v196_v44, %v198_v45  ;;  %v192_v61 = vld [vmem:[%s3457_s3 + $0x340] sm:$0xff] }
  0x22   :  { %v194_v62 = vld [vmem:[%s3457_s3 + $0x360] sm:$0xff] }
  0x23   :  { %v172_v39 = vld [vmem:[%s3457_s3 + $0x200] sm:$0xff] }
  0x9d   :  { %v79_v4 = vpop.xlane.xlu0 %78 }
  0x9e   :  { %v81_v5 = vmul.f32 0.00390625, %v79_v4  ;;  %v2097_v4 = vcombine.low %v156_v56, %v158_v57 }
  0xa0   :  { %v82_v6 = vsub.f32 %v50_v1, %v81_v5  ;;  %v83_v7 = vsub.f32 %v51_v2, %v81_v5  ;;  %v154_v1 = vld [vmem:[%s3457_s3 + $0xe0] sm:$0xff]  ;;  %v153_v2 = vld [vmem:[%s3457_s3 + $0xc8] sm:$0xff]  ;;  %v2099_v5 = vcombine.low %v157_v58, %v159_v59  ;;  %531 = vmatpush1.bf16.msra.mxu0 %v2097_v4 }
  0xa2   :  { %v84_v8 = vmul.f32 %v82_v6, %v82_v6  ;;  %v85_v9 = vmul.f32 %v83_v7, %v83_v7  ;;  %572 = vmatpush1.bf16.msra.mxu1 %v2099_v5  ;;  %v188_v5 = vld [vmem:[%s3457_s3 + $0x300] sm:$0xff] }
  0xa4   :  { %v86_v10 = vadd.f32 %v85_v9, %v84_v8  ;;  %v148_v8 = vld [vmem:[%s3457_s3 + $0x80] sm:$0xff] }
  0xa5   :  { %v150_v9 = vld [vmem:[%s3457_s3 + $0xa0] sm:$0xff] }
  0xa6   :  { %87 = vadd.xlane.f32.xlu0 %v86_v10  ;;  %v149_v10 = vld [vmem:[%s3457_s3 + $0x88] sm:$0xff]  ;;  %v2090_v14 = vcombine.high %v148_v8, %v150_v9 }
 0x12f   :  { %v88_v11 = vpop.xlane.xlu0 %87 }
 0x130   :  { %v89_v12 = vmul.f32 0.00390625, %v88_v11  ;;  %v151_v11 = vld [vmem:[%s3457_s3 + $0xa8] sm:$0xff] }
 0x131   :  { %v2092_v15 = vcombine.high %v149_v10, %v151_v11 }
 0x132   :  { %v90_v13 = vadd.f32 1e-06, %v89_v12  ;;  %v2093_v12 = vcombine.low %v152_v0, %v154_v1 }
 0x134   :  { %2532 = vrsqrt.f32 %v90_v13  ;;  %v2095_v13 = vcombine.low %v153_v2, %v155_v3 }
 0x141   :  { %v2533_v24 = vpop.eup %2532 }
 0x142   :  { %v92_v27 = vmul.f32 %v2533_v24, %v82_v6  ;;  %v93_v28 = vmul.f32 %v2533_v24, %v83_v7  ;;  %v2094_v6 = vcombine.high %v152_v0, %v154_v1  ;;  %v2096_v7 = vcombine.high %v153_v2, %v155_v3  ;;  %v195_v1 = vld [vmem:[%s3457_s3 + $0x368] sm:$0xff] }
 0x143   :  { %v2086_v24 = vcombine.high %v144_v18, %v146_v19  ;;  %v2134_v0 = vcombine.high %v192_v61, %v194_v62  ;;  %v2136_v2 = vcombine.high %v193_v63, %v195_v1  ;;  %v2133_v3 = vcombine.low %v192_v61, %v194_v62  ;;  %v57_v62 = vld [vmem:[%s3456_s2] sm:$0x3]  ;;  %s61_s2 = sld [smem:[#allocation3]] }
 0x144   :  { %v105_v29 = vmul.f32 %v98_v22, %v92_v27  ;;  %v106_v30 = vmul.f32 %v102_v23, %v93_v28  ;;  %532 = vmatprep.subr.bf16.mxu0 %v2094_v6  ;;  %573 = vmatprep.subr.bf16.mxu1 %v2096_v7  ;;  %v2089_v22 = vcombine.low %v148_v8, %v150_v9  ;;  %v142_v27 = vld [vmem:[%s3457_s3 + $0x20] sm:$0xff]  ;;  %v141_v28 = vld [vmem:[%s3457_s3 + $0x8] sm:$0xff] }
 0x145   :  { %533 = vmatpush1.bf16.msra.mxu0 %v2093_v12  ;;  %574 = vmatpush1.bf16.msra.mxu1 %v2095_v13  ;;  %v2091_v23 = vcombine.low %v149_v10, %v151_v11  ;;  %v2135_v4 = vcombine.low %v193_v63, %v195_v1  ;;  %v190_v6 = vld [vmem:[%s3457_s3 + $0x320] sm:$0xff]  ;;  %v189_v7 = vld [vmem:[%s3457_s3 + $0x308] sm:$0xff]  ;;  %v133_v63 = vrot.slane %v57_v62, %v2609_v17 }
 0x146   :  { %v2621_v31 = vadd.f32 %v105_v29, %v75_v25  ;;  %v2623_v32 = vadd.f32 %v106_v30, %v76_v26  ;;  %534 = vmatprep.subr.bf16.mxu0 %v2090_v14  ;;  %575 = vmatprep.subr.bf16.mxu1 %v2092_v15  ;;  %v2088_v25 = vcombine.high %v145_v20, %v147_v21  ;;  %v140_v26 = vld [vmem:[%s3457_s3] sm:$0xff]  ;;  %v143_v29 = vld [vmem:[%s3457_s3 + $0x28] sm:$0xff] }
 0x147   :  { %v2085_v30 = vcombine.low %v144_v18, %v146_v19  ;;  %v2082_v34 = vcombine.high %v140_v26, %v142_v27  ;;  %v2084_v35 = vcombine.high %v141_v28, %v143_v29  ;;  %v2081_v40 = vcombine.low %v140_v26, %v142_v27  ;;  %v191_v9 = vld [vmem:[%s3457_s3 + $0x328] sm:$0xff]  ;;  %v184_v13 = vld [vmem:[%s3457_s3 + $0x2c0] sm:$0xff] }
 0x148   :  { %v109_v33 = vadd.f32 %v2623_v32, %v2621_v31  ;;  %v2083_v41 = vcombine.low %v141_v28, %v143_v29  ;;  %v2130_v8 = vcombine.high %v188_v5, %v190_v6  ;;  %v2132_v10 = vcombine.high %v189_v7, %v191_v9  ;;  %v186_v14 = vld [vmem:[%s3457_s3 + $0x2e0] sm:$0xff]  ;;  %v185_v15 = vld [vmem:[%s3457_s3 + $0x2c8] sm:$0xff] }
 0x149   :  { %535 = vmatpush1.bf16.msra.mxu0 %v2089_v22  ;;  %576 = vmatpush1.bf16.msra.mxu1 %v2091_v23  ;;  %v2129_v11 = vcombine.low %v188_v5, %v190_v6  ;;  %v2131_v12 = vcombine.low %v189_v7, %v191_v9  ;;  %v2126_v18 = vcombine.high %v184_v13, %v186_v14  ;;  %v187_v19 = vld [vmem:[%s3457_s3 + $0x2e8] sm:$0xff]  ;;  %v182_v22 = vld [vmem:[%s3457_s3 + $0x2a0] sm:$0xff]  ;;  %v716_v6 = vld [vmem:[%s3457_s3 + $0x190] sm:$0xff] }
 0x14a   :  { %110 = vadd.xlane.f32.xlu1 %v109_v33  ;;  %536 = vmatprep.subr.bf16.mxu0 %v2086_v24  ;;  %v2087_v33 = vcombine.low %v145_v20, %v147_v21  ;;  %v2125_v20 = vcombine.low %v184_v13, %v186_v14  ;;  %v180_v21 = vld [vmem:[%s3457_s3 + $0x280] sm:$0xff]  ;;  %v2128_v23 = vcombine.high %v185_v15, %v187_v19  ;;  %v181_v26 = vld [vmem:[%s3457_s3 + $0x288] sm:$0xff]  ;;  %v718_v7 = vld [vmem:[%s3457_s3 + $0x1b0] sm:$0xff] }
 0x14b   :  { %577 = vmatprep.subr.bf16.mxu1 %v2088_v25  ;;  %v2127_v24 = vcombine.low %v185_v15, %v187_v19  ;;  %v2122_v25 = vcombine.high %v180_v21, %v182_v22  ;;  %v183_v27 = vld [vmem:[%s3457_s3 + $0x2a8] sm:$0xff]  ;;  %v176_v29 = vld [vmem:[%s3457_s3 + $0x240] sm:$0xff]  ;;  %v714_v13 = vld [vmem:[%s3457_s3 + $0x170] sm:$0xff] }
 0x14c   :  { %v2124_v28 = vcombine.high %v181_v26, %v183_v27  ;;  %v2123_v36 = vcombine.low %v181_v26, %v183_v27  ;;  %v713_v14 = vld [vmem:[%s3457_s3 + $0x158] sm:$0xff] }
 0x14d   :  { %537 = vmatpush1.bf16.msra.mxu0 %v2085_v30  ;;  %578 = vmatpush1.bf16.msra.mxu1 %v2087_v33  ;;  %v178_v30 = vld [vmem:[%s3457_s3 + $0x260] sm:$0xff]  ;;  %v177_v33 = vld [vmem:[%s3457_s3 + $0x248] sm:$0xff]  ;;  %v715_v15 = vld [vmem:[%s3457_s3 + $0x178] sm:$0xff] }
 0x14e   :  { %538 = vmatprep.subr.bf16.mxu0 %v2082_v34  ;;  %579 = vmatprep.subr.bf16.mxu1 %v2084_v35  ;;  %v179_v34 = vld [vmem:[%s3457_s3 + $0x268] sm:$0xff]  ;;  %v2121_v35 = vcombine.low %v180_v21, %v182_v22  ;;  %v2118_v37 = vcombine.high %v176_v29, %v178_v30  ;;  %v2168_v21 = vcombine.high %v713_v14, %v715_v15  ;;  %v708_v22 = vld [vmem:[%s3457_s3 + $0x110] sm:$0xff] }
 0x14f   :  { %v2120_v38 = vcombine.high %v177_v33, %v179_v34  ;;  %v2119_v44 = vcombine.low %v177_v33, %v179_v34  ;;  %v2167_v27 = vcombine.low %v713_v14, %v715_v15  ;;  %v706_v33 = vld [vmem:[%s3457_s3 + $0xf0] sm:$0xff]  ;;  %v705_v34 = vld [vmem:[%s3457_s3 + $0xd8] sm:$0xff] }
 0x151   :  { %539 = vmatpush1.bf16.msra.mxu0 %v2081_v40  ;;  %580 = vmatpush1.bf16.msra.mxu1 %v2083_v41  ;;  %v174_v40 = vld [vmem:[%s3457_s3 + $0x220] sm:$0xff]  ;;  %v173_v41 = vld [vmem:[%s3457_s3 + $0x208] sm:$0xff] }
 0x152   :  { %540 = vmatprep.subr.bf16.mxu0 %v2142_v42  ;;  %581 = vmatprep.subr.bf16.mxu1 %v2144_v43  ;;  %v175_v42 = vld [vmem:[%s3457_s3 + $0x228] sm:$0xff]  ;;  %v2117_v43 = vcombine.low %v176_v29, %v178_v30  ;;  %v2114_v45 = vcombine.high %v172_v39, %v174_v40  ;;  %v2113_v47 = vcombine.low %v172_v39, %v174_v40  ;;  %v704_v30 = vld [vmem:[%s3457_s3 + $0xd0] sm:$0xff] }
 0x153   :  { %v2116_v46 = vcombine.high %v173_v41, %v175_v42  ;;  %v700_v40 = vld [vmem:[%s3457_s3 + $0x90] sm:$0xff] }
 0x155   :  { %541 = vmatpush2.bf16.msra.mxu0 %v2141_v48  ;;  %582 = vmatpush2.bf16.msra.mxu1 %v2143_v49  ;;  %v2115_v48 = vcombine.low %v173_v41, %v175_v42  ;;  %v720_v49 = vld [vmem:[%s3457_s3 + $0x1d0] sm:$0xff]  ;;  %v701_v42 = vld [vmem:[%s3457_s3 + $0x98] sm:$0xff] }
 0x156   :  { %542 = vmatprep.subr.bf16.mxu0 %v2138_v50  ;;  %583 = vmatprep.subr.bf16.mxu1 %v2140_v51  ;;  %v722_v50 = vld [vmem:[%s3457_s3 + $0x1f0] sm:$0xff]  ;;  %v721_v51 = vld [vmem:[%s3457_s3 + $0x1d8] sm:$0xff] }
 0x157   :  { %v702_v41 = vld [vmem:[%s3457_s3 + $0xb0] sm:$0xff] }
 0x159   :  { %543 = vmatpush2.bf16.msra.mxu0 %v2137_v52  ;;  %584 = vmatpush2.bf16.msra.mxu1 %v2139_v53  ;;  %v2174_v52 = vcombine.high %v720_v49, %v722_v50  ;;  %v723_v53 = vld [vmem:[%s3457_s3 + $0x1f8] sm:$0xff] }
 0x15a   :  { %544 = vmatprep.subr.bf16.mxu0 %v2134_v0  ;;  %585 = vmatprep.subr.bf16.mxu1 %v2136_v2  ;;  %v129_v0 = vrot.slane %v57_v62, %v2607_v16 }
 0x15d   :  { %545 = vmatpush2.bf16.msra.mxu0 %v2133_v3  ;;  %586 = vmatpush2.bf16.msra.mxu1 %v2135_v4 }
 0x15e   :  { %546 = vmatprep.subr.bf16.mxu0 %v2130_v8  ;;  %587 = vmatprep.subr.bf16.mxu1 %v2132_v10  ;;  %v717_v8 = vld [vmem:[%s3457_s3 + $0x198] sm:$0xff]  ;;  %v712_v10 = vld [vmem:[%s3457_s3 + $0x150] sm:$0xff] }
 0x15f   :  { %v2165_v26 = vcombine.low %v712_v10, %v714_v13 }
 0x161   :  { %547 = vmatpush2.bf16.msra.mxu0 %v2129_v11  ;;  %588 = vmatpush2.bf16.msra.mxu1 %v2131_v12  ;;  %v2170_v11 = vcombine.high %v716_v6, %v718_v7 }
 0x162   :  { %548 = vmatprep.subr.bf16.mxu0 %v2126_v18  ;;  %589 = vmatprep.subr.bf16.mxu1 %v2128_v23  ;;  %v2169_v18 = vcombine.low %v716_v6, %v718_v7  ;;  %v710_v23 = vld [vmem:[%s3457_s3 + $0x130] sm:$0xff] }
 0x165   :  { %549 = vmatpush2.bf16.msra.mxu0 %v2125_v20  ;;  %590 = vmatpush2.bf16.msra.mxu1 %v2127_v24  ;;  %v2166_v20 = vcombine.high %v712_v10, %v714_v13  ;;  %v709_v24 = vld [vmem:[%s3457_s3 + $0x118] sm:$0xff]  ;;  %v750_v10 = vld [vmem:[%s3457_s3 + $0x3b0] sm:$0xff] }
 0x166   :  { %550 = vmatprep.subr.bf16.mxu0 %v2122_v25  ;;  %591 = vmatprep.subr.bf16.mxu1 %v2124_v28  ;;  %v711_v25 = vld [vmem:[%s3457_s3 + $0x138] sm:$0xff]  ;;  %v2162_v28 = vcombine.high %v708_v22, %v710_v23 }
 0x167   :  { %v2164_v29 = vcombine.high %v709_v24, %v711_v25 }
 0x169   :  { %551 = vmatpush2.bf16.msra.mxu0 %v2121_v35  ;;  %592 = vmatpush2.bf16.msra.mxu1 %v2123_v36  ;;  %v707_v35 = vld [vmem:[%s3457_s3 + $0xf8] sm:$0xff]  ;;  %v2161_v36 = vcombine.low %v708_v22, %v710_v23 }
 0x16a   :  { %552 = vmatprep.subr.bf16.mxu0 %v2118_v37  ;;  %593 = vmatprep.subr.bf16.mxu1 %v2120_v38  ;;  %v2163_v37 = vcombine.low %v709_v24, %v711_v25  ;;  %v2158_v38 = vcombine.high %v704_v30, %v706_v33  ;;  %v2160_v39 = vcombine.high %v705_v34, %v707_v35  ;;  %v747_v22 = vld [vmem:[%s3457_s3 + $0x378] sm:$0xff] }
 0x16d   :  { %553 = vmatpush2.bf16.msra.mxu0 %v2117_v43  ;;  %594 = vmatpush2.bf16.msra.mxu1 %v2119_v44  ;;  %v703_v43 = vld [vmem:[%s3457_s3 + $0xb8] sm:$0xff]  ;;  %v2157_v44 = vcombine.low %v704_v30, %v706_v33 }
 0x16e   :  { %554 = vmatprep.subr.bf16.mxu0 %v2114_v45  ;;  %595 = vmatprep.subr.bf16.mxu1 %v2116_v46  ;;  %v2159_v45 = vcombine.low %v705_v34, %v707_v35  ;;  %v2154_v46 = vcombine.high %v700_v40, %v702_v41  ;;  %v743_v30 = vld [vmem:[%s3457_s3 + $0x338] sm:$0xff] }
 0x171   :  { %555 = vmatpush2.bf16.msra.mxu0 %v2113_v47  ;;  %596 = vmatpush2.bf16.msra.mxu1 %v2115_v48  ;;  %v2156_v47 = vcombine.high %v701_v42, %v703_v43  ;;  %v696_v48 = vld [vmem:[%s3457_s3 + $0x50] sm:$0xff] }
 0x172   :  { %1076 = vmatprep.subr.bf16.mxu0 %v2174_v52  ;;  %v2153_v52 = vcombine.low %v700_v40, %v702_v41  ;;  %v739_v40 = vld [vmem:[%s3457_s3 + $0x2f8] sm:$0xff] }
 0x1d3   :  { %v111_v54 = vpop.xlane.xlu1 %110 }
 0x1d4   :  { %v112_v55 = vmul.f32 0.00390625, %v111_v54  ;;  %v2173_v54 = vcombine.low %v720_v49, %v722_v50  ;;  %v698_v49 = vld [vmem:[%s3457_s3 + $0x70] sm:$0xff]  ;;  %v697_v50 = vld [vmem:[%s3457_s3 + $0x58] sm:$0xff] }
 0x1d5   :  { %v2149_v62 = vcombine.low %v696_v48, %v698_v49 }
 0x1d6   :  { %v2748_v56 = vsub.f32 %v2621_v31, %v112_v55  ;;  %v2751_v57 = vsub.f32 %v2623_v32, %v112_v55  ;;  %v2175_v55 = vcombine.low %v721_v51, %v723_v53 }
 0x1d8   :  { %v115_v58 = vmul.f32 %v2748_v56, %v2748_v56  ;;  %v116_v59 = vmul.f32 %v2751_v57, %v2751_v57 }
 0x1da   :  { %v117_v60 = vadd.f32 %v116_v59, %v115_v58  ;;  %v2176_v58 = vcombine.high %v721_v51, %v723_v53  ;;  %v699_v51 = vld [vmem:[%s3457_s3 + $0x78] sm:$0xff]  ;;  %v2155_v53 = vcombine.low %v701_v42, %v703_v43 }
 0x1dc   :  { %118 = vadd.xlane.f32.xlu1 %v117_v60  ;;  %1117 = vmatprep.subr.bf16.mxu1 %v2176_v58  ;;  %v692_v58 = vld [vmem:[%s3457_s3 + $0x10] sm:$0xff] }
 0x265   :  { %v119_v59 = vpop.xlane.xlu1 %118 }
 0x266   :  { %v120_v60 = vmul.f32 0.00390625, %v119_v59  ;;  %v694_v59 = vld [vmem:[%s3457_s3 + $0x30] sm:$0xff] }
 0x267   :  { %v2145_v6 = vcombine.low %v692_v58, %v694_v59 }
 0x268   :  { %v121_v61 = vadd.f32 1e-06, %v120_v60  ;;  %v693_v60 = vld [vmem:[%s3457_s3 + $0x18] sm:$0xff] }
 0x26a   :  { %2534 = vrsqrt.f32 %v121_v61  ;;  %v695_v61 = vld [vmem:[%s3457_s3 + $0x38] sm:$0xff] }
 0x26b   :  { %v2147_v7 = vcombine.low %v693_v60, %v695_v61 }
 0x277   :  { %v2535_v1 = vpop.eup %2534 }
 0x278   :  { %v124_v2 = vmul.f32 %v2535_v1, %v2751_v57  ;;  %v123_v3 = vmul.f32 %v2535_v1, %v2748_v56  ;;  %v719_v57 = vld [vmem:[%s3457_s3 + $0x1b8] sm:$0xff]  ;;  %v2148_v1 = vcombine.high %v693_v60, %v695_v61 }
 0x279   :  { %v2172_v12 = vcombine.high %v717_v8, %v719_v57  ;;  %v2171_v19 = vcombine.low %v717_v8, %v719_v57 }
 0x27a   :  { %v137_v4 = vmul.f32 %v133_v63, %v124_v2  ;;  %v136_v5 = vmul.f32 %v129_v0, %v123_v3  ;;  %v2151_v63 = vcombine.low %v697_v50, %v699_v51  ;;  %v2146_v0 = vcombine.high %v692_v58, %v694_v59  ;;  %v752_v2 = vld [vmem:[%s3457_s3 + $0x3d0] sm:$0xff]  ;;  %v731_v58 = vld [vmem:[%s3457_s3 + $0x278] sm:$0xff] }
 0x27b   :  { %v754_v3 = vld [vmem:[%s3457_s3 + $0x3f0] sm:$0xff] }
 0x27c   :  { %v139_v9 = vpack.c.bf16 %v137_v4, %v137_v4  ;;  %v2860_v56 = vpack.c.bf16 %v136_v5, %v136_v5  ;;  %v753_v4 = vld [vmem:[%s3457_s3 + $0x3d8] sm:$0xff]  ;;  %v2206_v8 = vcombine.high %v752_v2, %v754_v3  ;;  %v2205_v13 = vcombine.low %v752_v2, %v754_v3 }
 0x27d   :  { %v755_v5 = vld [vmem:[%s3457_s3 + $0x3f8] sm:$0xff] }
 0x27e   :  { %556 = vmatprep.mubr.bf16.mxu0 %v139_v9  ;;  %597 = vmatprep.mubr.bf16.mxu1 %v139_v9  ;;  %v2208_v57 = vcombine.high %v753_v4, %v755_v5  ;;  %v2207_v14 = vcombine.low %v753_v4, %v755_v5  ;;  %v727_v2 = vld [vmem:[%s3457_s3 + $0x238] sm:$0xff] }
 0x27f   :  { %557 = vmatmul.mubr.bf16.vlgmr.msra.gmra.mxu0 %v2860_v56  ;;  %598 = vmatmul.mubr.bf16.vlgmr.msra.gmra.mxu1 %v2860_v56 }
 0x280   :  { %1077 = vmatpush1.bf16.msra.mxu0 %v2173_v54  ;;  %1118 = vmatpush1.bf16.msra.mxu1 %v2175_v55  ;;  %v2150_v54 = vcombine.high %v696_v48, %v698_v49  ;;  %v2152_v55 = vcombine.high %v697_v50, %v699_v51  ;;  %v735_v48 = vld [vmem:[%s3457_s3 + $0x2b8] sm:$0xff] }
 0x281   :  { %1108 = vmatprep.mubr.bf16.mxu0 %v139_v9  ;;  %1149 = vmatprep.mubr.bf16.mxu1 %v139_v9  ;;  %v748_v9 = vld [vmem:[%s3457_s3 + $0x390] sm:$0xff] }
 0x282   :  { %1078 = vmatprep.subr.bf16.mxu0 %v2170_v11  ;;  %1119 = vmatprep.subr.bf16.mxu1 %v2172_v12  ;;  %v749_v11 = vld [vmem:[%s3457_s3 + $0x398] sm:$0xff]  ;;  %v2202_v15 = vcombine.high %v748_v9, %v750_v10  ;;  %v2201_v23 = vcombine.low %v748_v9, %v750_v10 }
 0x283   :  { %v751_v12 = vld [vmem:[%s3457_s3 + $0x3b8] sm:$0xff] }
 0x284   :  { %1079 = vmatpush1.bf16.msra.mxu0 %v2169_v18  ;;  %1120 = vmatpush1.bf16.msra.mxu1 %v2171_v19  ;;  %v2204_v18 = vcombine.high %v749_v11, %v751_v12  ;;  %v744_v19 = vld [vmem:[%s3457_s3 + $0x350] sm:$0xff]  ;;  %v2203_v24 = vcombine.low %v749_v11, %v751_v12  ;;  %v2351_v12 = vld [vmem:[%s3458_s4 + $0x364] ss:$8 sps:$4 sm:$0xff]  }
 0x285   :  { %1080 = vmatprep.subr.bf16.mxu0 %v2166_v20  ;;  %1121 = vmatprep.subr.bf16.mxu1 %v2168_v21  ;;  %v746_v20 = vld [vmem:[%s3457_s3 + $0x370] sm:$0xff]  ;;  %v745_v21 = vld [vmem:[%s3457_s3 + $0x358] sm:$0xff] }
 0x286   :  { %v2198_v25 = vcombine.high %v744_v19, %v746_v20  ;;  %v2197_v33 = vcombine.low %v744_v19, %v746_v20  ;;  %v2199_v34 = vcombine.low %v745_v21, %v747_v22  ;;  %v2342_v9 = vld [vmem:[%s3458_s4 + $0x274] ss:$8 sps:$4 sm:$0xff]   ;;  %v2343_v10 = vld [vmem:[%s3458_s4 + $0x370] ss:$8 sps:$4 sm:$0xff]  }
 0x287   :  { %v2345_v11 = vld [vmem:[%s3458_s4 + $0x374] ss:$8 sps:$4 sm:$0xff]   ;;  %v2352_v19 = vld [vmem:[%s3458_s4 + $0x250] ss:$8 sps:$4 sm:$0xff]  }
 0x288   :  { %1081 = vmatpush1.bf16.msra.mxu0 %v2165_v26  ;;  %1122 = vmatpush1.bf16.msra.mxu1 %v2167_v27  ;;  %v2200_v26 = vcombine.high %v745_v21, %v747_v22  ;;  %v740_v27 = vld [vmem:[%s3457_s3 + $0x310] sm:$0xff]  ;;  %v2360_v21 = vld [vmem:[%s3458_s4 + $0x244] ss:$8 sps:$4 sm:$0xff]  }
 0x289   :  { %1082 = vmatprep.subr.bf16.mxu0 %v2162_v28  ;;  %1123 = vmatprep.subr.bf16.mxu1 %v2164_v29  ;;  %v742_v28 = vld [vmem:[%s3457_s3 + $0x330] sm:$0xff]  ;;  %v741_v29 = vld [vmem:[%s3457_s3 + $0x318] sm:$0xff]  ;;  %v2363_v22 = vld [vmem:[%s3458_s4 + $0x344] ss:$8 sps:$4 sm:$0xff]  }
 0x28a   :  { %v2194_v35 = vcombine.high %v740_v27, %v742_v28  ;;  %v2193_v41 = vcombine.low %v740_v27, %v742_v28  ;;  %v2195_v42 = vcombine.low %v741_v29, %v743_v30  ;;  %v2355_v20 = vld [vmem:[%s3458_s4 + $0x350] ss:$8 sps:$4 sm:$0xff]  }
 0x28b   :  { %v2364_v27 = vld [vmem:[%s3458_s4 + $0x230] ss:$8 sps:$4 sm:$0xff]  }
 0x28c   :  { %1083 = vmatpush1.bf16.msra.mxu0 %v2161_v36  ;;  %1124 = vmatpush1.bf16.msra.mxu1 %v2163_v37  ;;  %v2196_v36 = vcombine.high %v741_v29, %v743_v30  ;;  %v736_v37 = vld [vmem:[%s3457_s3 + $0x2d0] sm:$0xff]  ;;  %v2372_v29 = vld [vmem:[%s3458_s4 + $0x224] ss:$8 sps:$4 sm:$0xff]  }
 0x28d   :  { %1084 = vmatprep.subr.bf16.mxu0 %v2158_v38  ;;  %1125 = vmatprep.subr.bf16.mxu1 %v2160_v39  ;;  %v738_v38 = vld [vmem:[%s3457_s3 + $0x2f0] sm:$0xff]  ;;  %v737_v39 = vld [vmem:[%s3457_s3 + $0x2d8] sm:$0xff]  ;;  %v2375_v30 = vld [vmem:[%s3458_s4 + $0x324] ss:$8 sps:$4 sm:$0xff]  }
 0x28e   :  { %v2190_v43 = vcombine.high %v736_v37, %v738_v38  ;;  %v2189_v49 = vcombine.low %v736_v37, %v738_v38  ;;  %v2191_v50 = vcombine.low %v737_v39, %v739_v40  ;;  %v2367_v28 = vld [vmem:[%s3458_s4 + $0x330] ss:$8 sps:$4 sm:$0xff]  }
 0x28f   :  { %v2376_v37 = vld [vmem:[%s3458_s4 + $0x210] ss:$8 sps:$4 sm:$0xff]  }
 0x290   :  { %1085 = vmatpush1.bf16.msra.mxu0 %v2157_v44  ;;  %1126 = vmatpush1.bf16.msra.mxu1 %v2159_v45  ;;  %v2192_v44 = vcombine.high %v737_v39, %v739_v40  ;;  %v732_v45 = vld [vmem:[%s3457_s3 + $0x290] sm:$0xff]  ;;  %v2384_v39 = vld [vmem:[%s3458_s4 + $0x204] ss:$8 sps:$4 sm:$0xff]  }
 0x291   :  { %1086 = vmatprep.subr.bf16.mxu0 %v2154_v46  ;;  %1127 = vmatprep.subr.bf16.mxu1 %v2156_v47  ;;  %v734_v46 = vld [vmem:[%s3457_s3 + $0x2b0] sm:$0xff]  ;;  %v733_v47 = vld [vmem:[%s3457_s3 + $0x298] sm:$0xff]  ;;  %v2387_v40 = vld [vmem:[%s3458_s4 + $0x304] ss:$8 sps:$4 sm:$0xff]  }
 0x292   :  { %v2186_v51 = vcombine.high %v732_v45, %v734_v46  ;;  %v2185_v59 = vcombine.low %v732_v45, %v734_v46  ;;  %v2187_v60 = vcombine.low %v733_v47, %v735_v48  ;;  %v2379_v38 = vld [vmem:[%s3458_s4 + $0x310] ss:$8 sps:$4 sm:$0xff]  }
 0x293   :  { %v2388_v45 = vld [vmem:[%s3458_s4 + $0x2f0] ss:$8 sps:$4 sm:$0xff]  }
 0x294   :  { %1087 = vmatpush1.bf16.msra.mxu0 %v2153_v52  ;;  %1128 = vmatpush1.bf16.msra.mxu1 %v2155_v53  ;;  %v2188_v52 = vcombine.high %v733_v47, %v735_v48  ;;  %v728_v53 = vld [vmem:[%s3457_s3 + $0x250] sm:$0xff]  ;;  %v2396_v47 = vld [vmem:[%s3458_s4 + $0x2e4] ss:$8 sps:$4 sm:$0xff]  }
 0x295   :  { %1088 = vmatprep.subr.bf16.mxu0 %v2150_v54  ;;  %1129 = vmatprep.subr.bf16.mxu1 %v2152_v55  ;;  %v730_v54 = vld [vmem:[%s3457_s3 + $0x270] sm:$0xff]  ;;  %v729_v55 = vld [vmem:[%s3457_s3 + $0x258] sm:$0xff]  ;;  %v2399_v48 = vld [vmem:[%s3458_s4 + $0x3e4] ss:$8 sps:$4 sm:$0xff]  }
 0x296   :  { %v2182_v61 = vcombine.high %v728_v53, %v730_v54  ;;  %v2181_v3 = vcombine.low %v728_v53, %v730_v54  ;;  %v2183_v4 = vcombine.low %v729_v55, %v731_v58  ;;  %v2391_v46 = vld [vmem:[%s3458_s4 + $0x3f0] ss:$8 sps:$4 sm:$0xff]  }
 0x297   :  { %v2400_v53 = vld [vmem:[%s3458_s4 + $0x2d0] ss:$8 sps:$4 sm:$0xff]  }
 0x298   :  { %1089 = vmatpush1.bf16.msra.mxu0 %v2149_v62  ;;  %1130 = vmatpush1.bf16.msra.mxu1 %v2151_v63  ;;  %v2184_v62 = vcombine.high %v729_v55, %v731_v58  ;;  %v724_v63 = vld [vmem:[%s3457_s3 + $0x210] sm:$0xff]  ;;  %v2408_v55 = vld [vmem:[%s3458_s4 + $0x2c4] ss:$8 sps:$4 sm:$0xff]  }
 0x299   :  { %1090 = vmatprep.subr.bf16.mxu0 %v2146_v0  ;;  %1131 = vmatprep.subr.bf16.mxu1 %v2148_v1  ;;  %v726_v0 = vld [vmem:[%s3457_s3 + $0x230] sm:$0xff]  ;;  %v725_v1 = vld [vmem:[%s3457_s3 + $0x218] sm:$0xff]  ;;  %v2411_v58 = vld [vmem:[%s3458_s4 + $0x3c4] ss:$8 sps:$4 sm:$0xff]  }
 0x29a   :  { %v2178_v5 = vcombine.high %v724_v63, %v726_v0  ;;  %v2403_v54 = vld [vmem:[%s3458_s4 + $0x3d0] ss:$8 sps:$4 sm:$0xff]  }
 0x29c   :  { %1091 = vmatpush1.bf16.msra.mxu0 %v2145_v6  ;;  %1132 = vmatpush1.bf16.msra.mxu1 %v2147_v7  ;;  %v2180_v6 = vcombine.high %v725_v1, %v727_v2  ;;  %v2177_v7 = vcombine.low %v724_v63, %v726_v0  ;;  %v2412_v63 = vld [vmem:[%s3458_s4 + $0x2b0] ss:$8 sps:$4 sm:$0xff]  }
 0x29d   :  { %1092 = vmatprep.subr.bf16.mxu0 %v2206_v8  ;;  %1133 = vmatprep.subr.bf16.mxu1 %v2208_v57  ;;  %v2179_v8 = vcombine.low %v725_v1, %v727_v2  ;;  %v2340_v57 = vld [vmem:[%s3458_s4 + $0x270] ss:$8 sps:$4 sm:$0xff]   ;;  %v2420_v1 = vld [vmem:[%s3458_s4 + $0x2a4] ss:$8 sps:$4 sm:$0xff]  }
 0x29e   :  { %v2415_v0 = vld [vmem:[%s3458_s4 + $0x3b0] ss:$8 sps:$4 sm:$0xff]   ;;  %v2423_v2 = vld [vmem:[%s3458_s4 + $0x3a4] ss:$8 sps:$4 sm:$0xff]  }
 0x2a0   :  { %1093 = vmatpush2.bf16.msra.mxu0 %v2205_v13  ;;  %1134 = vmatpush2.bf16.msra.mxu1 %v2207_v14  ;;  %v2346_v13 = vld [vmem:[%s3458_s4 + $0x260] ss:$8 sps:$4 sm:$0xff]  }
 0x2a1   :  { %1094 = vmatprep.subr.bf16.mxu0 %v2202_v15  ;;  %1135 = vmatprep.subr.bf16.mxu1 %v2204_v18  ;;  %v2349_v14 = vld [vmem:[%s3458_s4 + $0x360] ss:$8 sps:$4 sm:$0xff]   ;;  %v2354_v15 = vld [vmem:[%s3458_s4 + $0x254] ss:$8 sps:$4 sm:$0xff]  }
 0x2a2   :  { %v2357_v18 = vld [vmem:[%s3458_s4 + $0x354] ss:$8 sps:$4 sm:$0xff]  }
 0x2a4   :  { %1095 = vmatpush2.bf16.msra.mxu0 %v2201_v23  ;;  %1136 = vmatpush2.bf16.msra.mxu1 %v2203_v24  ;;  %v2358_v23 = vld [vmem:[%s3458_s4 + $0x240] ss:$8 sps:$4 sm:$0xff]  }
 0x2a5   :  { %1096 = vmatprep.subr.bf16.mxu0 %v2198_v25  ;;  %1137 = vmatprep.subr.bf16.mxu1 %v2200_v26  ;;  %v2361_v24 = vld [vmem:[%s3458_s4 + $0x340] ss:$8 sps:$4 sm:$0xff]   ;;  %v2366_v25 = vld [vmem:[%s3458_s4 + $0x234] ss:$8 sps:$4 sm:$0xff]  }
 0x2a6   :  { %v2369_v26 = vld [vmem:[%s3458_s4 + $0x334] ss:$8 sps:$4 sm:$0xff]  }
 0x2a8   :  { %1097 = vmatpush2.bf16.msra.mxu0 %v2197_v33  ;;  %1138 = vmatpush2.bf16.msra.mxu1 %v2199_v34  ;;  %v2370_v33 = vld [vmem:[%s3458_s4 + $0x220] ss:$8 sps:$4 sm:$0xff]  }
 0x2a9   :  { %1098 = vmatprep.subr.bf16.mxu0 %v2194_v35  ;;  %1139 = vmatprep.subr.bf16.mxu1 %v2196_v36  ;;  %v2373_v34 = vld [vmem:[%s3458_s4 + $0x320] ss:$8 sps:$4 sm:$0xff]   ;;  %v2378_v35 = vld [vmem:[%s3458_s4 + $0x214] ss:$8 sps:$4 sm:$0xff]  }
 0x2aa   :  { %v2381_v36 = vld [vmem:[%s3458_s4 + $0x314] ss:$8 sps:$4 sm:$0xff]  }
 0x2ac   :  { %1099 = vmatpush2.bf16.msra.mxu0 %v2193_v41  ;;  %1140 = vmatpush2.bf16.msra.mxu1 %v2195_v42  ;;  %v2382_v41 = vld [vmem:[%s3458_s4 + $0x200] ss:$8 sps:$4 sm:$0xff]  }
 0x2ad   :  { %1100 = vmatprep.subr.bf16.mxu0 %v2190_v43  ;;  %1141 = vmatprep.subr.bf16.mxu1 %v2192_v44  ;;  %v2385_v42 = vld [vmem:[%s3458_s4 + $0x300] ss:$8 sps:$4 sm:$0xff]   ;;  %v2390_v43 = vld [vmem:[%s3458_s4 + $0x2f4] ss:$8 sps:$4 sm:$0xff]  }
 0x2ae   :  { %v2393_v44 = vld [vmem:[%s3458_s4 + $0x3f4] ss:$8 sps:$4 sm:$0xff]  }
 0x2b0   :  { %1101 = vmatpush2.bf16.msra.mxu0 %v2189_v49  ;;  %1142 = vmatpush2.bf16.msra.mxu1 %v2191_v50  ;;  %v2394_v49 = vld [vmem:[%s3458_s4 + $0x2e0] ss:$8 sps:$4 sm:$0xff]  }
 0x2b1   :  { %1102 = vmatprep.subr.bf16.mxu0 %v2186_v51  ;;  %1143 = vmatprep.subr.bf16.mxu1 %v2188_v52  ;;  %v2397_v50 = vld [vmem:[%s3458_s4 + $0x3e0] ss:$8 sps:$4 sm:$0xff]   ;;  %v2402_v51 = vld [vmem:[%s3458_s4 + $0x2d4] ss:$8 sps:$4 sm:$0xff]  }
 0x2b2   :  { %v2405_v52 = vld [vmem:[%s3458_s4 + $0x3d4] ss:$8 sps:$4 sm:$0xff]  }
 0x2b4   :  { %1103 = vmatpush2.bf16.msra.mxu0 %v2185_v59  ;;  %1144 = vmatpush2.bf16.msra.mxu1 %v2187_v60  ;;  %v2406_v59 = vld [vmem:[%s3458_s4 + $0x2c0] ss:$8 sps:$4 sm:$0xff]  }
 0x2b5   :  { %1104 = vmatprep.subr.bf16.mxu0 %v2182_v61  ;;  %1145 = vmatprep.subr.bf16.mxu1 %v2184_v62  ;;  %v2409_v60 = vld [vmem:[%s3458_s4 + $0x3c0] ss:$8 sps:$4 sm:$0xff]   ;;  %v2414_v61 = vld [vmem:[%s3458_s4 + $0x2b4] ss:$8 sps:$4 sm:$0xff]  }
 0x2b6   :  { %v2417_v62 = vld [vmem:[%s3458_s4 + $0x3b4] ss:$8 sps:$4 sm:$0xff]  }
 0x2b8   :  { %1105 = vmatpush2.bf16.msra.mxu0 %v2181_v3  ;;  %1146 = vmatpush2.bf16.msra.mxu1 %v2183_v4  ;;  %v2418_v3 = vld [vmem:[%s3458_s4 + $0x2a0] ss:$8 sps:$4 sm:$0xff]  }
 0x2b9   :  { %1106 = vmatprep.subr.bf16.mxu0 %v2178_v5  ;;  %1147 = vmatprep.subr.bf16.mxu1 %v2180_v6  ;;  %v2421_v4 = vld [vmem:[%s3458_s4 + $0x3a0] ss:$8 sps:$4 sm:$0xff]   ;;  %v2426_v5 = vld [vmem:[%s3458_s4 + $0x294] ss:$8 sps:$4 sm:$0xff]  }
 0x2ba   :  { %v2429_v6 = vld [vmem:[%s3458_s4 + $0x394] ss:$8 sps:$4 sm:$0xff]  }
 0x2bc   :  { %1107 = vmatpush2.bf16.msra.mxu0 %v2177_v7  ;;  %1148 = vmatpush2.bf16.msra.mxu1 %v2179_v8  ;;  %v2424_v7 = vld [vmem:[%s3458_s4 + $0x290] ss:$8 sps:$4 sm:$0xff]  }
 0x2bd   :  { %1562 = vmatprep.subr.bf16.mxu0 %v2342_v9  ;;  %1603 = vmatprep.subr.bf16.mxu1 %v2345_v11  ;;  %v2427_v8 = vld [vmem:[%s3458_s4 + $0x390] ss:$8 sps:$4 sm:$0xff]   ;;  %v2435_v9 = vld [vmem:[%s3458_s4 + $0x384] ss:$8 sps:$4 sm:$0xff]   ;;  %v2433_v11 = vld [vmem:[%s3458_s4 + $0x380] ss:$8 sps:$4 sm:$0xff]  }
 0x2bf   :  { %1109 = vmatmul.mubr.bf16.vlgmr.msra.gmra.mxu0 %v2860_v56  ;;  %1150 = vmatmul.mubr.bf16.vlgmr.msra.gmra.mxu1 %v2860_v56  ;;  %v2348_v56 = vld [vmem:[%s3458_s4 + $0x264] ss:$8 sps:$4 sm:$0xff]  }
 0x2c0   :  { %1563 = vmatpush1.bf16.msra.mxu0 %v2340_v57  ;;  %1604 = vmatpush1.bf16.msra.mxu1 %v2343_v10  ;;  %v2432_v57 = vld [vmem:[%s3458_s4 + $0x284] ss:$8 sps:$4 sm:$0xff]   ;;  %v2430_v10 = vld [vmem:[%s3458_s4 + $0x280] ss:$8 sps:$4 sm:$0xff]  }
 0x2c1   :  { %1564 = vmatprep.subr.bf16.mxu0 %v2348_v56  ;;  %1605 = vmatprep.subr.bf16.mxu1 %v2351_v12  ;;  %v2438_v56 = vld [vmem:[%s3458_s4 + $0x74] ss:$8 sps:$4 sm:$0xff]  }
 0x2c2   :  { %v2441_v12 = vld [vmem:[%s3458_s4 + $0x174] ss:$8 sps:$4 sm:$0xff]  }
 0x2c4   :  { %1565 = vmatpush1.bf16.msra.mxu0 %v2346_v13  ;;  %1606 = vmatpush1.bf16.msra.mxu1 %v2349_v14 }
 0x2c5   :  { %1566 = vmatprep.subr.bf16.mxu0 %v2354_v15  ;;  %1607 = vmatprep.subr.bf16.mxu1 %v2357_v18 }
 0x2c8   :  { %1567 = vmatpush1.bf16.msra.mxu0 %v2352_v19  ;;  %1608 = vmatpush1.bf16.msra.mxu1 %v2355_v20 }
 0x2c9   :  { %1568 = vmatprep.subr.bf16.mxu0 %v2360_v21  ;;  %1609 = vmatprep.subr.bf16.mxu1 %v2363_v22 }
 0x2cc   :  { %1569 = vmatpush1.bf16.msra.mxu0 %v2358_v23  ;;  %1610 = vmatpush1.bf16.msra.mxu1 %v2361_v24 }
 0x2cd   :  { %1570 = vmatprep.subr.bf16.mxu0 %v2366_v25  ;;  %1611 = vmatprep.subr.bf16.mxu1 %v2369_v26 }
 0x2d0   :  { %1571 = vmatpush1.bf16.msra.mxu0 %v2364_v27  ;;  %1612 = vmatpush1.bf16.msra.mxu1 %v2367_v28 }
 0x2d1   :  { %1572 = vmatprep.subr.bf16.mxu0 %v2372_v29  ;;  %1613 = vmatprep.subr.bf16.mxu1 %v2375_v30 }
 0x2d4   :  { %1573 = vmatpush1.bf16.msra.mxu0 %v2370_v33  ;;  %1614 = vmatpush1.bf16.msra.mxu1 %v2373_v34 }
 0x2d5   :  { %1574 = vmatprep.subr.bf16.mxu0 %v2378_v35  ;;  %1615 = vmatprep.subr.bf16.mxu1 %v2381_v36 }
 0x2d8   :  { %1575 = vmatpush1.bf16.msra.mxu0 %v2376_v37  ;;  %1616 = vmatpush1.bf16.msra.mxu1 %v2379_v38 }
 0x2d9   :  { %1576 = vmatprep.subr.bf16.mxu0 %v2384_v39  ;;  %1617 = vmatprep.subr.bf16.mxu1 %v2387_v40  ;;  %v3236_v39 = vstv %s61_s2 }
 0x2dc   :  { %1577 = vmatpush1.bf16.msra.mxu0 %v2382_v41  ;;  %1618 = vmatpush1.bf16.msra.mxu1 %v2385_v42 }
 0x2dd   :  { %1578 = vmatprep.subr.bf16.mxu0 %v2390_v43  ;;  %1619 = vmatprep.subr.bf16.mxu1 %v2393_v44 }
 0x2e0   :  { %1579 = vmatpush2.bf16.msra.mxu0 %v2388_v45  ;;  %1620 = vmatpush2.bf16.msra.mxu1 %v2391_v46 }
 0x2e1   :  { %1580 = vmatprep.subr.bf16.mxu0 %v2396_v47  ;;  %1621 = vmatprep.subr.bf16.mxu1 %v2399_v48 }
 0x2e4   :  { %1581 = vmatpush2.bf16.msra.mxu0 %v2394_v49  ;;  %1622 = vmatpush2.bf16.msra.mxu1 %v2397_v50  ;;  %v3242_v50 = vstv %s2080_s27 }
 0x2e5   :  { %1582 = vmatprep.subr.bf16.mxu0 %v2402_v51  ;;  %1623 = vmatprep.subr.bf16.mxu1 %v2405_v52 }
 0x2e8   :  { %1583 = vmatpush2.bf16.msra.mxu0 %v2400_v53  ;;  %1624 = vmatpush2.bf16.msra.mxu1 %v2403_v54 }
 0x2e9   :  { %1584 = vmatprep.subr.bf16.mxu0 %v2408_v55  ;;  %1625 = vmatprep.subr.bf16.mxu1 %v2411_v58 }
 0x2ec   :  { %1585 = vmatpush2.bf16.msra.mxu0 %v2406_v59  ;;  %1626 = vmatpush2.bf16.msra.mxu1 %v2409_v60 }
 0x2ed   :  { %1586 = vmatprep.subr.bf16.mxu0 %v2414_v61  ;;  %1627 = vmatprep.subr.bf16.mxu1 %v2417_v62 }
 0x2f0   :  { %1587 = vmatpush2.bf16.msra.mxu0 %v2412_v63  ;;  %1628 = vmatpush2.bf16.msra.mxu1 %v2415_v0  ;;  %v2436_v63 = vld [vmem:[%s3458_s4 + $0x70] ss:$8 sps:$4 sm:$0xff]  }
 0x2f1   :  { %1588 = vmatprep.subr.bf16.mxu0 %v2420_v1  ;;  %1629 = vmatprep.subr.bf16.mxu1 %v2423_v2  ;;  %v2439_v0 = vld [vmem:[%s3458_s4 + $0x170] ss:$8 sps:$4 sm:$0xff]  }
 0x2f4   :  { %1589 = vmatpush2.bf16.msra.mxu0 %v2418_v3  ;;  %1630 = vmatpush2.bf16.msra.mxu1 %v2421_v4  ;;  %v2444_v3 = vld [vmem:[%s3458_s4 + $0x64] ss:$8 sps:$4 sm:$0xff]  }
 0x2f5   :  { %1590 = vmatprep.subr.bf16.mxu0 %v2426_v5  ;;  %1631 = vmatprep.subr.bf16.mxu1 %v2429_v6  ;;  %v2447_v4 = vld [vmem:[%s3458_s4 + $0x164] ss:$8 sps:$4 sm:$0xff]  }
 0x2f8   :  { %1591 = vmatpush2.bf16.msra.mxu0 %v2424_v7  ;;  %1632 = vmatpush2.bf16.msra.mxu1 %v2427_v8  ;;  %v2442_v7 = vld [vmem:[%s3458_s4 + $0x60] ss:$8 sps:$4 sm:$0xff]  }
 0x2f9   :  { %1592 = vmatprep.subr.bf16.mxu0 %v2432_v57  ;;  %1633 = vmatprep.subr.bf16.mxu1 %v2435_v9  ;;  %v2445_v8 = vld [vmem:[%s3458_s4 + $0x160] ss:$8 sps:$4 sm:$0xff]   ;;  %v2450_v57 = vld [vmem:[%s3458_s4 + $0x54] ss:$8 sps:$4 sm:$0xff]  }
 0x2fa   :  { %v2453_v9 = vld [vmem:[%s3458_s4 + $0x154] ss:$8 sps:$4 sm:$0xff]  }
 0x2fc   :  { %1593 = vmatpush2.bf16.msra.mxu0 %v2430_v10  ;;  %1634 = vmatpush2.bf16.msra.mxu1 %v2433_v11  ;;  %v2448_v10 = vld [vmem:[%s3458_s4 + $0x50] ss:$8 sps:$4 sm:$0xff]  }
 0x2fd   :  { %1964 = vmatprep.subr.bf16.mxu0 %v2438_v56  ;;  %2005 = vmatprep.subr.bf16.mxu1 %v2441_v12  ;;  %v2451_v11 = vld [vmem:[%s3458_s4 + $0x150] ss:$8 sps:$4 sm:$0xff]   ;;  %v2456_v56 = vld [vmem:[%s3458_s4 + $0x44] ss:$8 sps:$4 sm:$0xff]  }
 0x2fe   :  { %v2459_v12 = vld [vmem:[%s3458_s4 + $0x144] ss:$8 sps:$4 sm:$0xff]  }
 0x33f   :  { %v3232_v13 = vpop.f32.mrf.mxu0  ;;  %v3234_v14 = vpop.f32.mrf.mxu1 }
 0x341   :  { %v560_v15 = vpop.f32.mrf.mxu0  ;;  %v601_v18 = vpop.f32.mrf.mxu1 }
 0x342   :  { %v607_v23 = vmax.f32 %v560_v15, 0.0  ;;  %v609_v24 = vmax.f32 %v601_v18, 0.0  ;;  %v2454_v15 = vld [vmem:[%s3458_s4 + $0x40] ss:$8 sps:$4 sm:$0xff]  }
 0x343   :  { %v562_v19 = vpop.f32.mrf.mxu0  ;;  %v603_v20 = vpop.f32.mrf.mxu1  ;;  %v2457_v18 = vld [vmem:[%s3458_s4 + $0x140] ss:$8 sps:$4 sm:$0xff]  }
 0x344   :  { %v611_v29 = vmul.f32 %v607_v23, %v607_v23  ;;  %v613_v30 = vmul.f32 %v609_v24, %v609_v24  ;;  %v2462_v19 = vld [vmem:[%s3458_s4 + $0x34] ss:$8 sps:$4 sm:$0xff]   ;;  %v2468_v23 = vld [vmem:[%s3458_s4 + $0x24] ss:$8 sps:$4 sm:$0xff]  }
 0x345   :  { %v563_v21 = vpop.f32.mrf.mxu0  ;;  %v604_v22 = vpop.f32.mrf.mxu1  ;;  %v2465_v20 = vld [vmem:[%s3458_s4 + $0x134] ss:$8 sps:$4 sm:$0xff]   ;;  %v2471_v24 = vld [vmem:[%s3458_s4 + $0x124] ss:$8 sps:$4 sm:$0xff]  }
 0x346   :  { %v616_v46 = vmul.f32 %v3236_v39, %v611_v29  ;;  %v618_v47 = vmul.f32 %v3236_v39, %v613_v30  ;;  %v2460_v21 = vld [vmem:[%s3458_s4 + $0x30] ss:$8 sps:$4 sm:$0xff]  }
 0x347   :  { %v2463_v22 = vld [vmem:[%s3458_s4 + $0x130] ss:$8 sps:$4 sm:$0xff]  }
 0x348   :  { %v621_v59 = vadd.f32 %v3242_v50, %v616_v46  ;;  %v623_v60 = vadd.f32 %v3242_v50, %v618_v47  ;;  %v2472_v29 = vld [vmem:[%s3458_s4 + $0x10] ss:$8 sps:$4 sm:$0xff]   ;;  %v2498_v46 = vld [vmem:[%s3458_s4 + $0xd4] ss:$8 sps:$4 sm:$0xff]  }
 0x349   :  { %v2475_v30 = vld [vmem:[%s3458_s4 + $0x110] ss:$8 sps:$4 sm:$0xff]   ;;  %v2501_v47 = vld [vmem:[%s3458_s4 + $0x1d4] ss:$8 sps:$4 sm:$0xff]  }
 0x34a   :  { %v625_v5 = vpack.c.bf16 %v621_v59, %v621_v59  ;;  %v627_v6 = vpack.c.bf16 %v623_v60, %v623_v60  ;;  %v2508_v59 = vld [vmem:[%s3458_s4 + $0xb0] ss:$8 sps:$4 sm:$0xff]  }
 0x34b   :  { %v2511_v60 = vld [vmem:[%s3458_s4 + $0x1b0] ss:$8 sps:$4 sm:$0xff]  }
 0x37f   :  { %v1110_v25 = vpop.f32.mrf.mxu0  ;;  %v1151_v26 = vpop.f32.mrf.mxu1 }
 0x380   :  { %v1158_v27 = vmax.f32 %v1110_v25, 0.0  ;;  %v1160_v28 = vmax.f32 %v1151_v26, 0.0  ;;  %v2466_v25 = vld [vmem:[%s3458_s4 + $0x20] ss:$8 sps:$4 sm:$0xff]  }
 0x381   :  { %v1112_v33 = vpop.f32.mrf.mxu0  ;;  %v1153_v34 = vpop.f32.mrf.mxu1  ;;  %v2469_v26 = vld [vmem:[%s3458_s4 + $0x120] ss:$8 sps:$4 sm:$0xff]  }
 0x382   :  { %v1162_v35 = vmul.f32 %v1158_v27, %v1158_v27  ;;  %v1164_v36 = vmul.f32 %v1160_v28, %v1160_v28  ;;  %v1159_v37 = vmax.f32 %v1112_v33, 0.0  ;;  %v1161_v38 = vmax.f32 %v1153_v34, 0.0  ;;  %v2474_v27 = vld [vmem:[%s3458_s4 + $0x14] ss:$8 sps:$4 sm:$0xff]   ;;  %v2480_v33 = vld [vmem:[%s3458_s4 + $0x4] ss:$8 sps:$4 sm:$0xff]  }
 0x383   :  { %v1114_v40 = vpop.f32.mrf.mxu0  ;;  %v1155_v41 = vpop.f32.mrf.mxu1  ;;  %v2477_v28 = vld [vmem:[%s3458_s4 + $0x114] ss:$8 sps:$4 sm:$0xff]   ;;  %v2483_v34 = vld [vmem:[%s3458_s4 + $0x104] ss:$8 sps:$4 sm:$0xff]  }
 0x384   :  { %v1166_v42 = vmul.f32 %v1162_v35, %v3236_v39  ;;  %v1168_v43 = vmul.f32 %v1164_v36, %v3236_v39  ;;  %v1163_v44 = vmul.f32 %v1159_v37, %v1159_v37  ;;  %v1165_v45 = vmul.f32 %v1161_v38, %v1161_v38  ;;  %v2478_v35 = vld [vmem:[%s3458_s4] ss:$8 sps:$4 sm:$0xff]   ;;  %v2486_v37 = vld [vmem:[%s3458_s4 + $0xf4] ss:$8 sps:$4 sm:$0xff]   ;;  %v2484_v40 = vld [vmem:[%s3458_s4 + $0xf0] ss:$8 sps:$4 sm:$0xff]  }
 0x385   :  { %v1115_v48 = vpop.f32.mrf.mxu0  ;;  %v1156_v49 = vpop.f32.mrf.mxu1  ;;  %v2481_v36 = vld [vmem:[%s3458_s4 + $0x100] ss:$8 sps:$4 sm:$0xff]   ;;  %v2489_v38 = vld [vmem:[%s3458_s4 + $0x1f4] ss:$8 sps:$4 sm:$0xff]   ;;  %v2487_v41 = vld [vmem:[%s3458_s4 + $0x1f0] ss:$8 sps:$4 sm:$0xff]  }
 0x386   :  { %v1167_v51 = vmul.f32 %v1163_v44, %v3236_v39  ;;  %v1169_v52 = vmul.f32 %v1165_v45, %v3236_v39  ;;  %v1170_v53 = vadd.f32 %v1166_v42, %v3242_v50  ;;  %v1172_v54 = vadd.f32 %v1168_v43, %v3242_v50  ;;  %v2492_v42 = vld [vmem:[%s3458_s4 + $0xe4] ss:$8 sps:$4 sm:$0xff]   ;;  %v2490_v44 = vld [vmem:[%s3458_s4 + $0xe0] ss:$8 sps:$4 sm:$0xff]   ;;  %v2496_v48 = vld [vmem:[%s3458_s4 + $0xd0] ss:$8 sps:$4 sm:$0xff]  }
 0x387   :  { %v2495_v43 = vld [vmem:[%s3458_s4 + $0x1e4] ss:$8 sps:$4 sm:$0xff]   ;;  %v2493_v45 = vld [vmem:[%s3458_s4 + $0x1e0] ss:$8 sps:$4 sm:$0xff]   ;;  %v2499_v49 = vld [vmem:[%s3458_s4 + $0x1d0] ss:$8 sps:$4 sm:$0xff]  }
 0x388   :  { %v1171_v55 = vadd.f32 %v1167_v51, %v3242_v50  ;;  %v1173_v58 = vadd.f32 %v1169_v52, %v3242_v50  ;;  %v1174_v1 = vpack.c.bf16 %v1170_v53, %v1170_v53  ;;  %v1176_v2 = vpack.c.bf16 %v1172_v54, %v1172_v54  ;;  %v2504_v51 = vld [vmem:[%s3458_s4 + $0xc4] ss:$8 sps:$4 sm:$0xff]   ;;  %v2502_v53 = vld [vmem:[%s3458_s4 + $0xc0] ss:$8 sps:$4 sm:$0xff]  }
 0x389   :  { %v2507_v52 = vld [vmem:[%s3458_s4 + $0x1c4] ss:$8 sps:$4 sm:$0xff]   ;;  %v2505_v54 = vld [vmem:[%s3458_s4 + $0x1c0] ss:$8 sps:$4 sm:$0xff]  }
 0x38a   :  { %v1175_v61 = vpack.c.bf16 %v1171_v55, %v1171_v55  ;;  %v1177_v62 = vpack.c.bf16 %v1173_v58, %v1173_v58  ;;  %v2510_v55 = vld [vmem:[%s3458_s4 + $0xb4] ss:$8 sps:$4 sm:$0xff]  }
 0x38b   :  { %v2513_v58 = vld [vmem:[%s3458_s4 + $0x1b4] ss:$8 sps:$4 sm:$0xff]  }
 0x38c   :  { %1594 = vmatprep.mubr.bf16.mxu0 %v1175_v61  ;;  %1635 = vmatprep.mubr.bf16.mxu1 %v1177_v62  ;;  %v606_v61 = vmax.f32 %v3232_v13, 0.0  ;;  %v608_v62 = vmax.f32 %v3234_v14, 0.0  ;;  %v2517_v13 = vld [vmem:[%s3458_s4 + $0x1a0] ss:$8 sps:$4 sm:$0xff]  }
 0x38d   :  { %1595 = vmatmul.mubr.bf16.vlgmr.msra.gmra.mxu0 %v1174_v1  ;;  %1636 = vmatmul.mubr.bf16.vlgmr.msra.gmra.mxu1 %v1176_v2  ;;  %v2514_v1 = vld [vmem:[%s3458_s4 + $0xa0] ss:$8 sps:$4 sm:$0xff]  }
 0x38e   :  { %1965 = vmatpush1.bf16.msra.mxu0 %v2436_v63  ;;  %2006 = vmatpush1.bf16.msra.mxu1 %v2439_v0  ;;  %v2516_v63 = vld [vmem:[%s3458_s4 + $0xa4] ss:$8 sps:$4 sm:$0xff]   ;;  %v610_v14 = vmul.f32 %v606_v61, %v606_v61  ;;  %v612_v2 = vmul.f32 %v608_v62, %v608_v62 }
 0x38f   :  { %1996 = vmatprep.mubr.bf16.mxu0 %v625_v5  ;;  %2037 = vmatprep.mubr.bf16.mxu1 %v627_v6  ;;  %v2519_v0 = vld [vmem:[%s3458_s4 + $0x1a4] ss:$8 sps:$4 sm:$0xff]   ;;  %v2520_v5 = vld [vmem:[%s3458_s4 + $0x90] ss:$8 sps:$4 sm:$0xff]  }
 0x390   :  { %1966 = vmatprep.subr.bf16.mxu0 %v2444_v3  ;;  %2007 = vmatprep.subr.bf16.mxu1 %v2447_v4  ;;  %v2522_v3 = vld [vmem:[%s3458_s4 + $0x94] ss:$8 sps:$4 sm:$0xff]   ;;  %v2523_v6 = vld [vmem:[%s3458_s4 + $0x190] ss:$8 sps:$4 sm:$0xff]  }
 0x391   :  { %v2525_v4 = vld [vmem:[%s3458_s4 + $0x194] ss:$8 sps:$4 sm:$0xff]  }
 0x392   :  { %1967 = vmatpush1.bf16.msra.mxu0 %v2442_v7  ;;  %2008 = vmatpush1.bf16.msra.mxu1 %v2445_v8  ;;  %v615_v7 = vmul.f32 %v3236_v39, %v610_v14  ;;  %v617_v8 = vmul.f32 %v3236_v39, %v612_v2  ;;  %v2529_v39 = vld [vmem:[%s3458_s4 + $0x180] ss:$8 sps:$4 sm:$0xff]  }
 0x393   :  { %1968 = vmatprep.subr.bf16.mxu0 %v2450_v57  ;;  %2009 = vmatprep.subr.bf16.mxu1 %v2453_v9  ;;  %v2528_v57 = vld [vmem:[%s3458_s4 + $0x84] ss:$8 sps:$4 sm:$0xff]  }
 0x394   :  { %v2531_v9 = vld [vmem:[%s3458_s4 + $0x184] ss:$8 sps:$4 sm:$0xff]  }
 0x396   :  { %1969 = vmatpush1.bf16.msra.mxu0 %v2448_v10  ;;  %2010 = vmatpush1.bf16.msra.mxu1 %v2451_v11  ;;  %v2526_v10 = vld [vmem:[%s3458_s4 + $0x80] ss:$8 sps:$4 sm:$0xff]   ;;  %v620_v11 = vadd.f32 %v3242_v50, %v615_v7 }
 0x397   :  { %1970 = vmatprep.subr.bf16.mxu0 %v2456_v56  ;;  %2011 = vmatprep.subr.bf16.mxu1 %v2459_v12  ;;  %v622_v56 = vadd.f32 %v3242_v50, %v617_v8  ;;  %v59_v50 = vld [vmem:[%s3460_s6] sm:$0x3] }
 0x398   :  { %v624_v12 = vpack.c.bf16 %v620_v11, %v620_v11 }
 0x39a   :  { %1971 = vmatpush1.bf16.msra.mxu0 %v2454_v15  ;;  %2012 = vmatpush1.bf16.msra.mxu1 %v2457_v18  ;;  %v626_v15 = vpack.c.bf16 %v622_v56, %v622_v56 }
 0x39b   :  { %1972 = vmatprep.subr.bf16.mxu0 %v2462_v19  ;;  %2013 = vmatprep.subr.bf16.mxu1 %v2465_v20 }
 0x39e   :  { %1973 = vmatpush1.bf16.msra.mxu0 %v2460_v21  ;;  %2014 = vmatpush1.bf16.msra.mxu1 %v2463_v22 }
 0x39f   :  { %1974 = vmatprep.subr.bf16.mxu0 %v2468_v23  ;;  %2015 = vmatprep.subr.bf16.mxu1 %v2471_v24 }
 0x3a2   :  { %1975 = vmatpush1.bf16.msra.mxu0 %v2466_v25  ;;  %2016 = vmatpush1.bf16.msra.mxu1 %v2469_v26 }
 0x3a3   :  { %1976 = vmatprep.subr.bf16.mxu0 %v2474_v27  ;;  %2017 = vmatprep.subr.bf16.mxu1 %v2477_v28 }
 0x3a6   :  { %1977 = vmatpush1.bf16.msra.mxu0 %v2472_v29  ;;  %2018 = vmatpush1.bf16.msra.mxu1 %v2475_v30 }
 0x3a7   :  { %1978 = vmatprep.subr.bf16.mxu0 %v2480_v33  ;;  %2019 = vmatprep.subr.bf16.mxu1 %v2483_v34  ;;  %v2050_v33 = vrot.slane %v59_v50, %v2607_v16  ;;  %v2054_v34 = vrot.slane %v59_v50, %v2609_v17 }
 0x3aa   :  { %1979 = vmatpush1.bf16.msra.mxu0 %v2478_v35  ;;  %2020 = vmatpush1.bf16.msra.mxu1 %v2481_v36 }
 0x3ab   :  { %1980 = vmatprep.subr.bf16.mxu0 %v2486_v37  ;;  %2021 = vmatprep.subr.bf16.mxu1 %v2489_v38 }
 0x3ae   :  { %1981 = vmatpush2.bf16.msra.mxu0 %v2484_v40  ;;  %2022 = vmatpush2.bf16.msra.mxu1 %v2487_v41 }
 0x3af   :  { %1982 = vmatprep.subr.bf16.mxu0 %v2492_v42  ;;  %2023 = vmatprep.subr.bf16.mxu1 %v2495_v43  ;;  %v2057_v42 = vmul.f32 %v2050_v33, %v2621_v31 }
 0x3b2   :  { %1983 = vmatpush2.bf16.msra.mxu0 %v2490_v44  ;;  %2024 = vmatpush2.bf16.msra.mxu1 %v2493_v45  ;;  %v2058_v44 = vmul.f32 %v2054_v34, %v2623_v32 }
 0x3b3   :  { %1984 = vmatprep.subr.bf16.mxu0 %v2498_v46  ;;  %2025 = vmatprep.subr.bf16.mxu1 %v2501_v47 }
 0x3b6   :  { %1985 = vmatpush2.bf16.msra.mxu0 %v2496_v48  ;;  %2026 = vmatpush2.bf16.msra.mxu1 %v2499_v49 }
 0x3b7   :  { %1986 = vmatprep.subr.bf16.mxu0 %v2504_v51  ;;  %2027 = vmatprep.subr.bf16.mxu1 %v2507_v52 }
 0x3ba   :  { %1987 = vmatpush2.bf16.msra.mxu0 %v2502_v53  ;;  %2028 = vmatpush2.bf16.msra.mxu1 %v2505_v54 }
 0x3bb   :  { %1988 = vmatprep.subr.bf16.mxu0 %v2510_v55  ;;  %2029 = vmatprep.subr.bf16.mxu1 %v2513_v58 }
 0x3be   :  { %1989 = vmatpush2.bf16.msra.mxu0 %v2508_v59  ;;  %2030 = vmatpush2.bf16.msra.mxu1 %v2511_v60 }
 0x3bf   :  { %1990 = vmatprep.subr.bf16.mxu0 %v2516_v63  ;;  %2031 = vmatprep.subr.bf16.mxu1 %v2519_v0 }
 0x3c2   :  { %1991 = vmatpush2.bf16.msra.mxu0 %v2514_v1  ;;  %2032 = vmatpush2.bf16.msra.mxu1 %v2517_v13 }
 0x3c3   :  { %1992 = vmatprep.subr.bf16.mxu0 %v2522_v3  ;;  %2033 = vmatprep.subr.bf16.mxu1 %v2525_v4 }
 0x3c6   :  { %1993 = vmatpush2.bf16.msra.mxu0 %v2520_v5  ;;  %2034 = vmatpush2.bf16.msra.mxu1 %v2523_v6 }
 0x3c7   :  { %1994 = vmatprep.subr.bf16.mxu0 %v2528_v57  ;;  %2035 = vmatprep.subr.bf16.mxu1 %v2531_v9 }
 0x3ca   :  { %1995 = vmatpush2.bf16.msra.mxu0 %v2526_v10  ;;  %2036 = vmatpush2.bf16.msra.mxu1 %v2529_v39 }
 0x3cd   :  { %1997 = vmatmul.mubr.bf16.vlgmr.msra.gmra.mxu0 %v624_v12  ;;  %2038 = vmatmul.mubr.bf16.vlgmr.msra.gmra.mxu1 %v626_v15 }
 0x44d   :  { %v1596_v18 = vpop.f32.mrf.mxu0  ;;  %v1637_v19 = vpop.f32.mrf.mxu1 }
 0x44e   :  { %v1638_v20 = vadd.f32 %v1637_v19, %v1596_v18 }
 0x44f   :  { %v1598_v21 = vpop.f32.mrf.mxu0  ;;  %v1639_v22 = vpop.f32.mrf.mxu1 }
 0x450   :  { %v1640_v29 = vadd.f32 %v1639_v22, %v1598_v21 }
 0x451   :  { %v1600_v23 = vpop.f32.mrf.mxu0  ;;  %v1641_v24 = vpop.f32.mrf.mxu1 }
 0x453   :  { %v1601_v25 = vpop.f32.mrf.mxu0  ;;  %v1642_v26 = vpop.f32.mrf.mxu1 }
 0x48d   :  { %v1998_v27 = vpop.f32.mrf.mxu0  ;;  %v2039_v28 = vpop.f32.mrf.mxu1 }
 0x48e   :  { %v1999_v30 = vadd.f32 %v1998_v27, %v1638_v20 }
 0x48f   :  { %v2000_v35 = vpop.f32.mrf.mxu0  ;;  %v2041_v36 = vpop.f32.mrf.mxu1 }
 0x490   :  { %v2040_v37 = vadd.f32 %v2039_v28, %v1999_v30  ;;  %v2001_v38 = vadd.f32 %v2000_v35, %v1640_v29 }
 0x491   :  { %v2002_v40 = vpop.f32.mrf.mxu0  ;;  %v2043_v41 = vpop.f32.mrf.mxu1 }
 0x492   :  { %v2042_v43 = vadd.f32 %v2041_v36, %v2001_v38  ;;  %v2059_v47 = vadd.f32 %v2057_v42, %v2040_v37 }
 0x493   :  { %v2003_v45 = vpop.f32.mrf.mxu0  ;;  %v2044_v46 = vpop.f32.mrf.mxu1 }
 0x494   :  { %v2060_v48 = vadd.f32 %v2058_v44, %v2042_v43 }
 0x496   :  { %v2338_v49 = vpack.c.bf16 %v2060_v48, %v2059_v47 }
 0x498   :  { %2074 = vst [vmem:[%s3463_s9] sm:$0xff] %v2338_v49 }
 0x499   :  { %2079 = vsyncpa [#allocation4], 1 }

</bundles_post_ra>
